<compile_context>
chip_gen: v6e
topology: v6e:2x2x1
jax: 0.10.0
libtpu: 0.0.40
codegen_flags: <defaults>
</compile_context>

<pallas_src>
import math
import functools

import jax
import jax.numpy as jnp
from jax.experimental import pallas as pl
from jax.experimental.pallas import tpu as pltpu


def _mab_kernel(qx_ref, kx_ref, w_ref, b_ref, o_ref, *,
                num_heads, dim_V, block_b, n_q, n_k, rq, rk, dpad):
    """One grid step == `block_b` batch elements, rows flattened for the MXU."""
    f32, bf16 = jnp.float32, jnp.bfloat16

    Qx = qx_ref[...].astype(bf16)                      # (block_b*n_q, rq)
    Kx = kx_ref[...].astype(bf16)                      # (block_b*n_k, rk)

    # Static slab views (8-aligned offsets/lengths, free):
    wq = w_ref[pl.ds(0, rq), :]                        # fc_q
    wk = w_ref[pl.ds(rq, rk), :]                       # fc_k (pre-scaled by 1/sqrt(dim_V))
    wv = w_ref[pl.ds(rq + rk, rk), :]                  # fc_v
    wo = w_ref[pl.ds(rq + 2 * rk, dpad), :]            # fc_o
    bq = b_ref[pl.ds(0, 1), :]
    bk = b_ref[pl.ds(1, 1), :]                         # pre-scaled
    bv = b_ref[pl.ds(2, 1), :]
    bo = b_ref[pl.ds(3, 1), :]

    # Projections: bf16 MXU operands, f32 accumulation + f32 bias add.
    q = jnp.dot(Qx, wq, preferred_element_type=f32) + bq
    k = jnp.dot(Kx, wk, preferred_element_type=f32) + bk
    v = jnp.dot(Kx, wv, preferred_element_type=f32) + bv

    # Per-batch views: reshapes keep the minor (lane) dim untouched -> cheap.
    q3 = q.reshape(block_b, n_q, dpad)
    q3b = q3.astype(bf16)
    k3b = k.reshape(block_b, n_k, dpad).astype(bf16)
    v3b = v.reshape(block_b, n_k, dpad).astype(bf16)

    d_head = dim_V // num_heads
    lane = jax.lax.broadcasted_iota(jnp.int32, (1, 1, dpad), 2)

    def head_body(h, O):
        # Masked-q head trick (valid while dpad == 128): contracting the full
        # lane axis with q zeroed outside head h equals q_h . k_h^T exactly --
        # no lane slicing, no concatenation, same MXU pass count.
        head_mask = (lane >= h * d_head) & (lane < (h + 1) * d_head)
        qm = jnp.where(head_mask, q3b, 0.0).astype(bf16)
        s = jnp.einsum('bqd,bkd->bqk', qm, k3b,
                       preferred_element_type=f32)     # (bb, n_q, n_k)
        s_max = jnp.max(s, axis=-1, keepdims=True)
        p = jnp.exp(s - s_max)
        a = (p / jnp.sum(p, axis=-1, keepdims=True)).astype(bf16)  # exact softmax
        # Mask v (not av): av then lands only in head-h lanes; accumulate unmasked.
        vm = jnp.where(head_mask, v3b, 0.0).astype(bf16)
        av = jnp.einsum('bqk,bkd->bqd', a, vm,
                        preferred_element_type=f32)    # (bb, n_q, dpad)
        return O + av

    # +q residual: the concatenated per-head q equals q itself (heads are
    # contiguous lane blocks; padded lanes of q are exactly zero).  fori_loop
    # with unroll=True keeps the per-head temporaries' live ranges bounded.
    O = jax.lax.fori_loop(0, num_heads, head_body, q3, unroll=True)

    Of = O.reshape(block_b * n_q, dpad)
    ff = jnp.dot(Of.astype(bf16), wo, preferred_element_type=f32) + bo
    res = Of + jnp.maximum(ff, 0.0)                    # O = O + relu(fc_o(O))
    o_ref[...] = res[:, :o_ref.shape[-1]].astype(o_ref.dtype)


def _step_vmem_bytes(bb, n_q, n_k, rq, rk, dpad):
    """Per-grid-step VMEM estimate: double-buffered I/O blocks, resident weight
    and bias slabs, plus the in-kernel f32/bf16 intermediates (q,k,v,O,ff and
    per-head s/p/av), with a 1.5x safety margin."""
    f32, bf16 = 4, 2
    io = 2 * (bb * n_q * rq + bb * n_k * rk) * f32          # inputs, double-buffered
    io += 2 * bb * n_q * dpad * f32                          # output block (lane-padded layout)
    wts = 2 * ((rq + 2 * rk + dpad) * dpad * bf16 + 8 * dpad * f32)
    inter = bb * ((5 * n_q + 2 * n_k) * dpad + 3 * n_q * n_k) * f32
    inter += bb * ((n_q + 2 * n_k) * dpad + n_q * n_k) * bf16
    return int(1.5 * (io + wts + inter))


def _pick_block_b(B, n_q, n_k, rq, rk, dpad, *, target_rows=1024,
                  vmem_budget_bytes=24 << 20, prefer_even_grid=False):
    """Largest batch tile dividing B that (a) keeps block row counts 8-aligned,
    (b) fits a per-core VMEM budget sized for v7x (64 MiB/core, 2 cores/chip),
    and (c) lands block_b*n_q near the 512-1024 row sweet spot.  A single grid
    step (block_b == B) is allowed: on single-TensorCore chips (v5e/v6e) extra
    steps are pure per-step overhead.  prefer_even_grid biases toward an even
    number of steps for v7x CORE_PARALLEL sharding."""
    cands = []
    for bb in range(B, 0, -1):
        if B % bb:
            continue
        if bb != B and ((bb * n_q) % 8 or (bb * n_k) % 8):
            continue
        if bb != 1 and _step_vmem_bytes(bb, n_q, n_k, rq, rk, dpad) > vmem_budget_bytes:
            continue
        cands.append(bb)
    if not cands:
        return 1
    picked = None
    for bb in cands:                                   # descending
        if bb * n_q <= target_rows:
            picked = bb
            break
    if picked is None:
        picked = cands[-1]
    if prefer_even_grid:
        for bb in cands:
            if bb <= picked and (B // bb) % 2 == 0:
                return bb
    return picked


def mab_pallas(Q, K, params, *, num_heads, target_rows=1024, core_parallel=False):
    """Q: (B, Nq, dim_Q), K: (B, Nk, dim_K) -> (B, Nq, dim_V).
    Set core_parallel=True on v7x (2 TensorCores) to shard the batch grid axis."""
    B, n_q, dim_Q = Q.shape
    _, n_k, dim_K = K.shape
    wq, bq, wk, bk, wv, bv, wo, bo = params
    dim_V = wq.shape[1]
    assert dim_V % num_heads == 0

    # Internal lane width (heads selected via lane masks -> needs one 128 chunk).
    dpad = ((dim_V + 127) // 128) * 128
    # TODO(synk): for dim_V > 128 the masked-head contraction is no longer
    # MXU-pass-neutral; switch to a heads-into-batch (b*H, n, d_head) layout.
    assert dpad == 128, "masked-head path only implemented for dim_V <= 128"

    rq = ((dim_Q + 7) // 8) * 8                        # 8-aligned slab segments
    rk = ((dim_K + 7) // 8) * 8
    scale = 1.0 / math.sqrt(dim_V)                     # folded into fc_k only

    f32 = jnp.float32

    def pad2(a, rows, cols):                           # zero padding (contract!)
        return jnp.pad(a.astype(f32), ((0, rows - a.shape[0]), (0, cols - a.shape[1])))

    # One bf16 weight slab: [wq ; wk*scale ; wv ; wo], all dpad columns.
    w_slab = jnp.concatenate([
        pad2(wq, rq, dpad),
        pad2(wk * scale, rk, dpad),
        pad2(wv, rk, dpad),
        pad2(wo, dpad, dpad),
    ], axis=0).astype(jnp.bfloat16)

    # One f32 bias slab (added after f32 accumulation): rows = bq, bk*scale, bv, bo.
    b_slab = jnp.zeros((8, dpad), f32)
    b_slab = b_slab.at[0, :dim_V].set(bq[0])
    b_slab = b_slab.at[1, :dim_V].set(bk[0] * scale)
    b_slab = b_slab.at[2, :dim_V].set(bv[0])
    b_slab = b_slab.at[3, :dim_V].set(bo[0])

    block_b = _pick_block_b(B, n_q, n_k, rq, rk, dpad,
                            target_rows=target_rows,
                            prefer_even_grid=core_parallel)
    grid = (B // block_b,)

    # Flatten rows in HBM (free) and pad feature dims to the 8-aligned slab widths.
    Qf = jnp.pad(Q.reshape(B * n_q, dim_Q), ((0, 0), (0, rq - dim_Q)))
    Kf = jnp.pad(K.reshape(B * n_k, dim_K), ((0, 0), (0, rk - dim_K)))

    kernel = functools.partial(_mab_kernel, num_heads=num_heads, dim_V=dim_V,
                               block_b=block_b, n_q=n_q, n_k=n_k,
                               rq=rq, rk=rk, dpad=dpad)

    vmem_limit = int(min(max(_step_vmem_bytes(block_b, n_q, n_k, rq, rk, dpad),
                             32 * 1024 * 1024), 64 * 1024 * 1024))
    batch_sem = pltpu.CORE_PARALLEL if core_parallel else pltpu.PARALLEL

    out = pl.pallas_call(
        kernel,
        out_shape=jax.ShapeDtypeStruct((B * n_q, dim_V), Q.dtype),
        grid=grid,
        in_specs=[
            pl.BlockSpec((block_b * n_q, rq), lambda b: (b, 0)),   # Q rows
            pl.BlockSpec((block_b * n_k, rk), lambda b: (b, 0)),   # K rows
            pl.BlockSpec(w_slab.shape, lambda b: (0, 0)),          # weight slab (constant)
            pl.BlockSpec(b_slab.shape, lambda b: (0, 0)),          # bias slab (constant)
        ],
        # dim_V-lane output (masked vst): no dpad-wide HBM write + slice kernel.
        out_specs=pl.BlockSpec((block_b * n_q, dim_V), lambda b: (b, 0)),
        compiler_params=pltpu.CompilerParams(
            dimension_semantics=(batch_sem,),
            vmem_limit_bytes=vmem_limit),
    )(Qf, Kf, w_slab, b_slab)

    return out.reshape(B, n_q, dim_V)


def mab_reference(Q, K, params, *, num_heads):
    """Pure-JAX f32 reference mirroring the PyTorch MAB forward (ln=False)."""
    wq, bq, wk, bk, wv, bv, wo, bo = params
    dim_V = wq.shape[1]

    q = Q @ wq + bq[0]
    k = K @ wk + bk[0]
    v = K @ wv + bv[0]

    split = lambda x: jnp.concatenate(jnp.split(x, num_heads, axis=2), axis=0)
    q_, k_, v_ = split(q), split(k), split(v)

    A = jax.nn.softmax(jnp.einsum('bqd,bkd->bqk', q_, k_) / math.sqrt(dim_V), axis=2)
    O = q_ + jnp.einsum('bqk,bkd->bqd', A, v_)
    O = jnp.concatenate(jnp.split(O, num_heads, axis=0), axis=2)   # (B, Nq, dim_V)
    O = O + jax.nn.relu(O @ wo + bo[0])
    return O


def init_params(key, dim_Q, dim_K, dim_V):
    """Deterministic synthetic init (Linear-style uniform)."""
    ks = jax.random.split(key, 8)

    def lin(kw, kb, fan_in, fan_out):
        bound = 1.0 / math.sqrt(fan_in)
        w = jax.random.uniform(kw, (fan_in, fan_out), jnp.float32, -bound, bound)
        b = jax.random.uniform(kb, (1, fan_out), jnp.float32, -bound, bound)
        return w, b

    wq, bq = lin(ks[0], ks[1], dim_Q, dim_V)
    wk, bk = lin(ks[2], ks[3], dim_K, dim_V)
    wv, bv = lin(ks[4], ks[5], dim_K, dim_V)
    wo, bo = lin(ks[6], ks[7], dim_V, dim_V)
    return (wq, bq, wk, bk, wv, bv, wo, bo)


if __name__ == "__main__":
    # SAB(X) = MAB(X, X): the set layer used by DWSModel (set_layer='sab').
    # Small DWS-like shapes: batch of 16 sets, set size 16, 16 features ->
    # hidden_dim 32, num_heads=8 (DWSModel default).
    B, n_set = 16, 16
    d_in, d_hidden, num_heads = 16, 32, 8

    key = jax.random.PRNGKey(0)
    kx, kp = jax.random.split(key)
    X = jax.random.normal(kx, (B, n_set, d_in), jnp.float32)
    params = init_params(kp, d_in, d_in, d_hidden)

    out = mab_pallas(X, X, params, num_heads=num_heads)
    out = jax.block_until_ready(out)

    ref = mab_reference(X, X, params, num_heads=num_heads)
    assert out.shape == (B, n_set, d_hidden)
    # Softmax uses an exact divide; the remaining error comes solely from bf16
    # MXU operands (f32 accumulation), so 5e-2 abs/rel is comfortably loose.
    assert jnp.allclose(out, ref, atol=5e-2, rtol=5e-2), "mismatch vs reference"

    print("KERNEL_OK")
</pallas_src>

<mosaic_0001>
module attributes {stable_mosaic.version = 11 : i64} {
  func.func @_mab_kernel(%arg0: i32, %arg1: memref<256x16xf32, #tpu.memory_space<vmem>>, %arg2: memref<256x16xf32, #tpu.memory_space<vmem>>, %arg3: memref<176x128xbf16, #tpu.memory_space<vmem>>, %arg4: memref<8x128xf32, #tpu.memory_space<vmem>>, %arg5: memref<256x32xf32, #tpu.memory_space<vmem>>) attributes {dimension_semantics = [#tpu.dimension_semantics<parallel>], iteration_bounds = array<i64: 1>, scalar_prefetch = 0 : i64, scratch_operands = 0 : i64, tpu.core_type = #tpu.core_type<tc>, window_params = [{transform_indices = @transform_0, window_bounds = array<i64: 256, 16>}, {transform_indices = @transform_1, window_bounds = array<i64: 256, 16>}, {pipeline_mode = #tpu.pipeline_mode<synchronous>, transform_indices = @transform_2, window_bounds = array<i64: 176, 128>}, {pipeline_mode = #tpu.pipeline_mode<synchronous>, transform_indices = @transform_3, window_bounds = array<i64: 8, 128>}, {transform_indices = @transform_4, window_bounds = array<i64: 256, 32>}]} {
    %c0 = arith.constant 0 : index
    %c0_0 = arith.constant 0 : index
    %0 = vector.load %arg1[%c0, %c0_0] : memref<256x16xf32, #tpu.memory_space<vmem>>, vector<256x16xf32>
    %1 = arith.truncf %0 : vector<256x16xf32> to vector<256x16xbf16>
    %c0_1 = arith.constant 0 : index
    %c0_2 = arith.constant 0 : index
    %2 = vector.load %arg2[%c0_1, %c0_2] : memref<256x16xf32, #tpu.memory_space<vmem>>, vector<256x16xf32>
    %3 = arith.truncf %2 : vector<256x16xf32> to vector<256x16xbf16>
    %c0_3 = arith.constant 0 : index
    %c0_4 = arith.constant 0 : index
    %4 = vector.load %arg3[%c0_3, %c0_4] : memref<176x128xbf16, #tpu.memory_space<vmem>>, vector<16x128xbf16>
    %c16 = arith.constant 16 : index
    %c0_5 = arith.constant 0 : index
    %5 = vector.load %arg3[%c16, %c0_5] : memref<176x128xbf16, #tpu.memory_space<vmem>>, vector<16x128xbf16>
    %c32 = arith.constant 32 : index
    %c0_6 = arith.constant 0 : index
    %6 = vector.load %arg3[%c32, %c0_6] : memref<176x128xbf16, #tpu.memory_space<vmem>>, vector<16x128xbf16>
    %c48 = arith.constant 48 : index
    %c0_7 = arith.constant 0 : index
    %7 = vector.load %arg3[%c48, %c0_7] : memref<176x128xbf16, #tpu.memory_space<vmem>>, vector<128x128xbf16>
    %c0_8 = arith.constant 0 : index
    %c0_9 = arith.constant 0 : index
    %8 = vector.load %arg4[%c0_8, %c0_9] : memref<8x128xf32, #tpu.memory_space<vmem>>, vector<1x128xf32>
    %c1 = arith.constant 1 : index
    %c0_10 = arith.constant 0 : index
    %9 = vector.load %arg4[%c1, %c0_10] : memref<8x128xf32, #tpu.memory_space<vmem>>, vector<1x128xf32>
    %c2 = arith.constant 2 : index
    %c0_11 = arith.constant 0 : index
    %10 = vector.load %arg4[%c2, %c0_11] : memref<8x128xf32, #tpu.memory_space<vmem>>, vector<1x128xf32>
    %c3 = arith.constant 3 : index
    %c0_12 = arith.constant 0 : index
    %11 = vector.load %arg4[%c3, %c0_12] : memref<8x128xf32, #tpu.memory_space<vmem>>, vector<1x128xf32>
    %cst = arith.constant dense<0.000000e+00> : vector<256x128xf32>
    %12 = tpu.matmul %1, %4, %cst {dimension_numbers = #tpu.dot_dimension_numbers<[1], [0], [0], [1], [0, 0, 1, 1], [], []>} : vector<256x16xbf16>, vector<16x128xbf16>, vector<256x128xf32> -> vector<256x128xf32>
    %13 = vector.broadcast %8 : vector<1x128xf32> to vector<256x128xf32>
    %14 = arith.addf %12, %13 : vector<256x128xf32>
    %cst_13 = arith.constant dense<0.000000e+00> : vector<256x128xf32>
    %15 = tpu.matmul %3, %5, %cst_13 {dimension_numbers = #tpu.dot_dimension_numbers<[1], [0], [0], [1], [0, 0, 1, 1], [], []>} : vector<256x16xbf16>, vector<16x128xbf16>, vector<256x128xf32> -> vector<256x128xf32>
    %16 = vector.broadcast %9 : vector<1x128xf32> to vector<256x128xf32>
    %17 = arith.addf %15, %16 : vector<256x128xf32>
    %cst_14 = arith.constant dense<0.000000e+00> : vector<256x128xf32>
    %18 = tpu.matmul %3, %6, %cst_14 {dimension_numbers = #tpu.dot_dimension_numbers<[1], [0], [0], [1], [0, 0, 1, 1], [], []>} : vector<256x16xbf16>, vector<16x128xbf16>, vector<256x128xf32> -> vector<256x128xf32>
    %19 = vector.broadcast %10 : vector<1x128xf32> to vector<256x128xf32>
    %20 = arith.addf %18, %19 : vector<256x128xf32>
    %21 = vector.shape_cast %14 : vector<256x128xf32> to vector<16x16x128xf32>
    %22 = arith.truncf %21 : vector<16x16x128xf32> to vector<16x16x128xbf16>
    %23 = vector.shape_cast %17 : vector<256x128xf32> to vector<16x16x128xf32>
    %24 = arith.truncf %23 : vector<16x16x128xf32> to vector<16x16x128xbf16>
    %25 = vector.shape_cast %20 : vector<256x128xf32> to vector<16x16x128xf32>
    %26 = arith.truncf %25 : vector<16x16x128xf32> to vector<16x16x128xbf16>
    %27 = tpu.iota {dimensions = array<i32: 2>} : vector<1x1x128xi32>
    %c0_i32 = arith.constant 0 : i32
    %c4_i32 = arith.constant 4 : i32
    %28 = arith.muli %c0_i32, %c4_i32 : i32
    %29 = vector.broadcast %28 : i32 to vector<1x1x128xi32>
    %30 = arith.cmpi sge, %27, %29 : vector<1x1x128xi32>
    %c1_i32 = arith.constant 1 : i32
    %31 = arith.addi %c0_i32, %c1_i32 : i32
    %c4_i32_15 = arith.constant 4 : i32
    %32 = arith.muli %31, %c4_i32_15 : i32
    %33 = vector.broadcast %32 : i32 to vector<1x1x128xi32>
    %34 = arith.cmpi slt, %27, %33 : vector<1x1x128xi32>
    %35 = arith.andi %30, %34 : vector<1x1x128xi1>
    %cst_16 = arith.constant 0.000000e+00 : f32
    %36 = arith.truncf %cst_16 : f32 to bf16
    %37 = vector.shape_cast %35 : vector<1x1x128xi1> to vector<1x1x128xi1>
    %38 = vector.broadcast %37 : vector<1x1x128xi1> to vector<16x16x128xi1>
    %39 = vector.broadcast %36 : bf16 to vector<16x16x128xbf16>
    %40 = arith.select %38, %22, %39 : vector<16x16x128xi1>, vector<16x16x128xbf16>
    "tpu.trace_start"() <{level = 10 : i32, message = "bqd,bkd->bqk"}> : () -> ()
    %cst_17 = arith.constant dense<0.000000e+00> : vector<16x16x16xf32>
    %41 = tpu.matmul %40, %24, %cst_17 {dimension_numbers = #tpu.dot_dimension_numbers<[2], [2], [1], [1], [0, 0, 0, 1, 1, 1], [0], [0]>} : vector<16x16x128xbf16>, vector<16x16x128xbf16>, vector<16x16x16xf32> -> vector<16x16x16xf32>
    "tpu.trace_stop"() : () -> ()
    %cst_18 = arith.constant dense<0xFF800000> : vector<16x16xf32>
    %42 = vector.multi_reduction <maximumf>, %41, %cst_18 [2] : vector<16x16x16xf32> to vector<16x16xf32>
    %43 = vector.shape_cast %42 : vector<16x16xf32> to vector<16x16x1xf32>
    %44 = vector.broadcast %43 : vector<16x16x1xf32> to vector<16x16x16xf32>
    %45 = arith.subf %41, %44 : vector<16x16x16xf32>
    %46 = math.exp %45 : vector<16x16x16xf32>
    %cst_19 = arith.constant dense<0.000000e+00> : vector<16x16xf32>
    %47 = vector.multi_reduction <add>, %46, %cst_19 [2] : vector<16x16x16xf32> to vector<16x16xf32>
    %48 = vector.shape_cast %47 : vector<16x16xf32> to vector<16x16x1xf32>
    %49 = vector.broadcast %48 : vector<16x16x1xf32> to vector<16x16x16xf32>
    %50 = arith.divf %46, %49 : vector<16x16x16xf32>
    %51 = arith.truncf %50 : vector<16x16x16xf32> to vector<16x16x16xbf16>
    %cst_20 = arith.constant 0.000000e+00 : f32
    %52 = arith.truncf %cst_20 : f32 to bf16
    %53 = vector.shape_cast %35 : vector<1x1x128xi1> to vector<1x1x128xi1>
    %54 = vector.broadcast %53 : vector<1x1x128xi1> to vector<16x16x128xi1>
    %55 = vector.broadcast %52 : bf16 to vector<16x16x128xbf16>
    %56 = arith.select %54, %26, %55 : vector<16x16x128xi1>, vector<16x16x128xbf16>
    "tpu.trace_start"() <{level = 10 : i32, message = "bqk,bkd->bqd"}> : () -> ()
    %cst_21 = arith.constant dense<0.000000e+00> : vector<16x16x128xf32>
    %57 = tpu.matmul %51, %56, %cst_21 {dimension_numbers = #tpu.dot_dimension_numbers<[2], [1], [1], [2], [0, 0, 0, 1, 1, 2], [0], [0]>} : vector<16x16x16xbf16>, vector<16x16x128xbf16>, vector<16x16x128xf32> -> vector<16x16x128xf32>
    "tpu.trace_stop"() : () -> ()
    %58 = arith.addf %21, %57 : vector<16x16x128xf32>
    %c1_i32_22 = arith.constant 1 : i32
    %c4_i32_23 = arith.constant 4 : i32
    %59 = arith.muli %c1_i32_22, %c4_i32_23 : i32
    %60 = vector.broadcast %59 : i32 to vector<1x1x128xi32>
    %61 = arith.cmpi sge, %27, %60 : vector<1x1x128xi32>
    %c1_i32_24 = arith.constant 1 : i32
    %62 = arith.addi %c1_i32_22, %c1_i32_24 : i32
    %c4_i32_25 = arith.constant 4 : i32
    %63 = arith.muli %62, %c4_i32_25 : i32
    %64 = vector.broadcast %63 : i32 to vector<1x1x128xi32>
    %65 = arith.cmpi slt, %27, %64 : vector<1x1x128xi32>
    %66 = arith.andi %61, %65 : vector<1x1x128xi1>
    %cst_26 = arith.constant 0.000000e+00 : f32
    %67 = arith.truncf %cst_26 : f32 to bf16
    %68 = vector.shape_cast %66 : vector<1x1x128xi1> to vector<1x1x128xi1>
    %69 = vector.broadcast %68 : vector<1x1x128xi1> to vector<16x16x128xi1>
    %70 = vector.broadcast %67 : bf16 to vector<16x16x128xbf16>
    %71 = arith.select %69, %22, %70 : vector<16x16x128xi1>, vector<16x16x128xbf16>
    "tpu.trace_start"() <{level = 10 : i32, message = "bqd,bkd->bqk"}> : () -> ()
    %cst_27 = arith.constant dense<0.000000e+00> : vector<16x16x16xf32>
    %72 = tpu.matmul %71, %24, %cst_27 {dimension_numbers = #tpu.dot_dimension_numbers<[2], [2], [1], [1], [0, 0, 0, 1, 1, 1], [0], [0]>} : vector<16x16x128xbf16>, vector<16x16x128xbf16>, vector<16x16x16xf32> -> vector<16x16x16xf32>
    "tpu.trace_stop"() : () -> ()
    %cst_28 = arith.constant dense<0xFF800000> : vector<16x16xf32>
    %73 = vector.multi_reduction <maximumf>, %72, %cst_28 [2] : vector<16x16x16xf32> to vector<16x16xf32>
    %74 = vector.shape_cast %73 : vector<16x16xf32> to vector<16x16x1xf32>
    %75 = vector.broadcast %74 : vector<16x16x1xf32> to vector<16x16x16xf32>
    %76 = arith.subf %72, %75 : vector<16x16x16xf32>
    %77 = math.exp %76 : vector<16x16x16xf32>
    %cst_29 = arith.constant dense<0.000000e+00> : vector<16x16xf32>
    %78 = vector.multi_reduction <add>, %77, %cst_29 [2] : vector<16x16x16xf32> to vector<16x16xf32>
    %79 = vector.shape_cast %78 : vector<16x16xf32> to vector<16x16x1xf32>
    %80 = vector.broadcast %79 : vector<16x16x1xf32> to vector<16x16x16xf32>
    %81 = arith.divf %77, %80 : vector<16x16x16xf32>
    %82 = arith.truncf %81 : vector<16x16x16xf32> to vector<16x16x16xbf16>
    %cst_30 = arith.constant 0.000000e+00 : f32
    %83 = arith.truncf %cst_30 : f32 to bf16
    %84 = vector.shape_cast %66 : vector<1x1x128xi1> to vector<1x1x128xi1>
    %85 = vector.broadcast %84 : vector<1x1x128xi1> to vector<16x16x128xi1>
    %86 = vector.broadcast %83 : bf16 to vector<16x16x128xbf16>
    %87 = arith.select %85, %26, %86 : vector<16x16x128xi1>, vector<16x16x128xbf16>
    "tpu.trace_start"() <{level = 10 : i32, message = "bqk,bkd->bqd"}> : () -> ()
    %cst_31 = arith.constant dense<0.000000e+00> : vector<16x16x128xf32>
    %88 = tpu.matmul %82, %87, %cst_31 {dimension_numbers = #tpu.dot_dimension_numbers<[2], [1], [1], [2], [0, 0, 0, 1, 1, 2], [0], [0]>} : vector<16x16x16xbf16>, vector<16x16x128xbf16>, vector<16x16x128xf32> -> vector<16x16x128xf32>
    "tpu.trace_stop"() : () -> ()
    %89 = arith.addf %58, %88 : vector<16x16x128xf32>
    %c2_i32 = arith.constant 2 : i32
    %c4_i32_32 = arith.constant 4 : i32
    %90 = arith.muli %c2_i32, %c4_i32_32 : i32
    %91 = vector.broadcast %90 : i32 to vector<1x1x128xi32>
    %92 = arith.cmpi sge, %27, %91 : vector<1x1x128xi32>
    %c1_i32_33 = arith.constant 1 : i32
    %93 = arith.addi %c2_i32, %c1_i32_33 : i32
    %c4_i32_34 = arith.constant 4 : i32
    %94 = arith.muli %93, %c4_i32_34 : i32
    %95 = vector.broadcast %94 : i32 to vector<1x1x128xi32>
    %96 = arith.cmpi slt, %27, %95 : vector<1x1x128xi32>
    %97 = arith.andi %92, %96 : vector<1x1x128xi1>
    %cst_35 = arith.constant 0.000000e+00 : f32
    %98 = arith.truncf %cst_35 : f32 to bf16
    %99 = vector.shape_cast %97 : vector<1x1x128xi1> to vector<1x1x128xi1>
    %100 = vector.broadcast %99 : vector<1x1x128xi1> to vector<16x16x128xi1>
    %101 = vector.broadcast %98 : bf16 to vector<16x16x128xbf16>
    %102 = arith.select %100, %22, %101 : vector<16x16x128xi1>, vector<16x16x128xbf16>
    "tpu.trace_start"() <{level = 10 : i32, message = "bqd,bkd->bqk"}> : () -> ()
    %cst_36 = arith.constant dense<0.000000e+00> : vector<16x16x16xf32>
    %103 = tpu.matmul %102, %24, %cst_36 {dimension_numbers = #tpu.dot_dimension_numbers<[2], [2], [1], [1], [0, 0, 0, 1, 1, 1], [0], [0]>} : vector<16x16x128xbf16>, vector<16x16x128xbf16>, vector<16x16x16xf32> -> vector<16x16x16xf32>
    "tpu.trace_stop"() : () -> ()
    %cst_37 = arith.constant dense<0xFF800000> : vector<16x16xf32>
    %104 = vector.multi_reduction <maximumf>, %103, %cst_37 [2] : vector<16x16x16xf32> to vector<16x16xf32>
    %105 = vector.shape_cast %104 : vector<16x16xf32> to vector<16x16x1xf32>
    %106 = vector.broadcast %105 : vector<16x16x1xf32> to vector<16x16x16xf32>
    %107 = arith.subf %103, %106 : vector<16x16x16xf32>
    %108 = math.exp %107 : vector<16x16x16xf32>
    %cst_38 = arith.constant dense<0.000000e+00> : vector<16x16xf32>
    %109 = vector.multi_reduction <add>, %108, %cst_38 [2] : vector<16x16x16xf32> to vector<16x16xf32>
    %110 = vector.shape_cast %109 : vector<16x16xf32> to vector<16x16x1xf32>
    %111 = vector.broadcast %110 : vector<16x16x1xf32> to vector<16x16x16xf32>
    %112 = arith.divf %108, %111 : vector<16x16x16xf32>
    %113 = arith.truncf %112 : vector<16x16x16xf32> to vector<16x16x16xbf16>
    %cst_39 = arith.constant 0.000000e+00 : f32
    %114 = arith.truncf %cst_39 : f32 to bf16
    %115 = vector.shape_cast %97 : vector<1x1x128xi1> to vector<1x1x128xi1>
    %116 = vector.broadcast %115 : vector<1x1x128xi1> to vector<16x16x128xi1>
    %117 = vector.broadcast %114 : bf16 to vector<16x16x128xbf16>
    %118 = arith.select %116, %26, %117 : vector<16x16x128xi1>, vector<16x16x128xbf16>
    "tpu.trace_start"() <{level = 10 : i32, message = "bqk,bkd->bqd"}> : () -> ()
    %cst_40 = arith.constant dense<0.000000e+00> : vector<16x16x128xf32>
    %119 = tpu.matmul %113, %118, %cst_40 {dimension_numbers = #tpu.dot_dimension_numbers<[2], [1], [1], [2], [0, 0, 0, 1, 1, 2], [0], [0]>} : vector<16x16x16xbf16>, vector<16x16x128xbf16>, vector<16x16x128xf32> -> vector<16x16x128xf32>
    "tpu.trace_stop"() : () -> ()
    %120 = arith.addf %89, %119 : vector<16x16x128xf32>
    %c3_i32 = arith.constant 3 : i32
    %c4_i32_41 = arith.constant 4 : i32
    %121 = arith.muli %c3_i32, %c4_i32_41 : i32
    %122 = vector.broadcast %121 : i32 to vector<1x1x128xi32>
    %123 = arith.cmpi sge, %27, %122 : vector<1x1x128xi32>
    %c1_i32_42 = arith.constant 1 : i32
    %124 = arith.addi %c3_i32, %c1_i32_42 : i32
    %c4_i32_43 = arith.constant 4 : i32
    %125 = arith.muli %124, %c4_i32_43 : i32
    %126 = vector.broadcast %125 : i32 to vector<1x1x128xi32>
    %127 = arith.cmpi slt, %27, %126 : vector<1x1x128xi32>
    %128 = arith.andi %123, %127 : vector<1x1x128xi1>
    %cst_44 = arith.constant 0.000000e+00 : f32
    %129 = arith.truncf %cst_44 : f32 to bf16
    %130 = vector.shape_cast %128 : vector<1x1x128xi1> to vector<1x1x128xi1>
    %131 = vector.broadcast %130 : vector<1x1x128xi1> to vector<16x16x128xi1>
    %132 = vector.broadcast %129 : bf16 to vector<16x16x128xbf16>
    %133 = arith.select %131, %22, %132 : vector<16x16x128xi1>, vector<16x16x128xbf16>
    "tpu.trace_start"() <{level = 10 : i32, message = "bqd,bkd->bqk"}> : () -> ()
    %cst_45 = arith.constant dense<0.000000e+00> : vector<16x16x16xf32>
    %134 = tpu.matmul %133, %24, %cst_45 {dimension_numbers = #tpu.dot_dimension_numbers<[2], [2], [1], [1], [0, 0, 0, 1, 1, 1], [0], [0]>} : vector<16x16x128xbf16>, vector<16x16x128xbf16>, vector<16x16x16xf32> -> vector<16x16x16xf32>
    "tpu.trace_stop"() : () -> ()
    %cst_46 = arith.constant dense<0xFF800000> : vector<16x16xf32>
    %135 = vector.multi_reduction <maximumf>, %134, %cst_46 [2] : vector<16x16x16xf32> to vector<16x16xf32>
    %136 = vector.shape_cast %135 : vector<16x16xf32> to vector<16x16x1xf32>
    %137 = vector.broadcast %136 : vector<16x16x1xf32> to vector<16x16x16xf32>
    %138 = arith.subf %134, %137 : vector<16x16x16xf32>
    %139 = math.exp %138 : vector<16x16x16xf32>
    %cst_47 = arith.constant dense<0.000000e+00> : vector<16x16xf32>
    %140 = vector.multi_reduction <add>, %139, %cst_47 [2] : vector<16x16x16xf32> to vector<16x16xf32>
    %141 = vector.shape_cast %140 : vector<16x16xf32> to vector<16x16x1xf32>
    %142 = vector.broadcast %141 : vector<16x16x1xf32> to vector<16x16x16xf32>
    %143 = arith.divf %139, %142 : vector<16x16x16xf32>
    %144 = arith.truncf %143 : vector<16x16x16xf32> to vector<16x16x16xbf16>
    %cst_48 = arith.constant 0.000000e+00 : f32
    %145 = arith.truncf %cst_48 : f32 to bf16
    %146 = vector.shape_cast %128 : vector<1x1x128xi1> to vector<1x1x128xi1>
    %147 = vector.broadcast %146 : vector<1x1x128xi1> to vector<16x16x128xi1>
    %148 = vector.broadcast %145 : bf16 to vector<16x16x128xbf16>
    %149 = arith.select %147, %26, %148 : vector<16x16x128xi1>, vector<16x16x128xbf16>
    "tpu.trace_start"() <{level = 10 : i32, message = "bqk,bkd->bqd"}> : () -> ()
    %cst_49 = arith.constant dense<0.000000e+00> : vector<16x16x128xf32>
    %150 = tpu.matmul %144, %149, %cst_49 {dimension_numbers = #tpu.dot_dimension_numbers<[2], [1], [1], [2], [0, 0, 0, 1, 1, 2], [0], [0]>} : vector<16x16x16xbf16>, vector<16x16x128xbf16>, vector<16x16x128xf32> -> vector<16x16x128xf32>
    "tpu.trace_stop"() : () -> ()
    %151 = arith.addf %120, %150 : vector<16x16x128xf32>
    %c4_i32_50 = arith.constant 4 : i32
    %c4_i32_51 = arith.constant 4 : i32
    %152 = arith.muli %c4_i32_50, %c4_i32_51 : i32
    %153 = vector.broadcast %152 : i32 to vector<1x1x128xi32>
    %154 = arith.cmpi sge, %27, %153 : vector<1x1x128xi32>
    %c1_i32_52 = arith.constant 1 : i32
    %155 = arith.addi %c4_i32_50, %c1_i32_52 : i32
    %c4_i32_53 = arith.constant 4 : i32
    %156 = arith.muli %155, %c4_i32_53 : i32
    %157 = vector.broadcast %156 : i32 to vector<1x1x128xi32>
    %158 = arith.cmpi slt, %27, %157 : vector<1x1x128xi32>
    %159 = arith.andi %154, %158 : vector<1x1x128xi1>
    %cst_54 = arith.constant 0.000000e+00 : f32
    %160 = arith.truncf %cst_54 : f32 to bf16
    %161 = vector.shape_cast %159 : vector<1x1x128xi1> to vector<1x1x128xi1>
    %162 = vector.broadcast %161 : vector<1x1x128xi1> to vector<16x16x128xi1>
    %163 = vector.broadcast %160 : bf16 to vector<16x16x128xbf16>
    %164 = arith.select %162, %22, %163 : vector<16x16x128xi1>, vector<16x16x128xbf16>
    "tpu.trace_start"() <{level = 10 : i32, message = "bqd,bkd->bqk"}> : () -> ()
    %cst_55 = arith.constant dense<0.000000e+00> : vector<16x16x16xf32>
    %165 = tpu.matmul %164, %24, %cst_55 {dimension_numbers = #tpu.dot_dimension_numbers<[2], [2], [1], [1], [0, 0, 0, 1, 1, 1], [0], [0]>} : vector<16x16x128xbf16>, vector<16x16x128xbf16>, vector<16x16x16xf32> -> vector<16x16x16xf32>
    "tpu.trace_stop"() : () -> ()
    %cst_56 = arith.constant dense<0xFF800000> : vector<16x16xf32>
    %166 = vector.multi_reduction <maximumf>, %165, %cst_56 [2] : vector<16x16x16xf32> to vector<16x16xf32>
    %167 = vector.shape_cast %166 : vector<16x16xf32> to vector<16x16x1xf32>
    %168 = vector.broadcast %167 : vector<16x16x1xf32> to vector<16x16x16xf32>
    %169 = arith.subf %165, %168 : vector<16x16x16xf32>
    %170 = math.exp %169 : vector<16x16x16xf32>
    %cst_57 = arith.constant dense<0.000000e+00> : vector<16x16xf32>
    %171 = vector.multi_reduction <add>, %170, %cst_57 [2] : vector<16x16x16xf32> to vector<16x16xf32>
    %172 = vector.shape_cast %171 : vector<16x16xf32> to vector<16x16x1xf32>
    %173 = vector.broadcast %172 : vector<16x16x1xf32> to vector<16x16x16xf32>
    %174 = arith.divf %170, %173 : vector<16x16x16xf32>
    %175 = arith.truncf %174 : vector<16x16x16xf32> to vector<16x16x16xbf16>
    %cst_58 = arith.constant 0.000000e+00 : f32
    %176 = arith.truncf %cst_58 : f32 to bf16
    %177 = vector.shape_cast %159 : vector<1x1x128xi1> to vector<1x1x128xi1>
    %178 = vector.broadcast %177 : vector<1x1x128xi1> to vector<16x16x128xi1>
    %179 = vector.broadcast %176 : bf16 to vector<16x16x128xbf16>
    %180 = arith.select %178, %26, %179 : vector<16x16x128xi1>, vector<16x16x128xbf16>
    "tpu.trace_start"() <{level = 10 : i32, message = "bqk,bkd->bqd"}> : () -> ()
    %cst_59 = arith.constant dense<0.000000e+00> : vector<16x16x128xf32>
    %181 = tpu.matmul %175, %180, %cst_59 {dimension_numbers = #tpu.dot_dimension_numbers<[2], [1], [1], [2], [0, 0, 0, 1, 1, 2], [0], [0]>} : vector<16x16x16xbf16>, vector<16x16x128xbf16>, vector<16x16x128xf32> -> vector<16x16x128xf32>
    "tpu.trace_stop"() : () -> ()
    %182 = arith.addf %151, %181 : vector<16x16x128xf32>
    %c5_i32 = arith.constant 5 : i32
    %c4_i32_60 = arith.constant 4 : i32
    %183 = arith.muli %c5_i32, %c4_i32_60 : i32
    %184 = vector.broadcast %183 : i32 to vector<1x1x128xi32>
    %185 = arith.cmpi sge, %27, %184 : vector<1x1x128xi32>
    %c1_i32_61 = arith.constant 1 : i32
    %186 = arith.addi %c5_i32, %c1_i32_61 : i32
    %c4_i32_62 = arith.constant 4 : i32
    %187 = arith.muli %186, %c4_i32_62 : i32
    %188 = vector.broadcast %187 : i32 to vector<1x1x128xi32>
    %189 = arith.cmpi slt, %27, %188 : vector<1x1x128xi32>
    %190 = arith.andi %185, %189 : vector<1x1x128xi1>
    %cst_63 = arith.constant 0.000000e+00 : f32
    %191 = arith.truncf %cst_63 : f32 to bf16
    %192 = vector.shape_cast %190 : vector<1x1x128xi1> to vector<1x1x128xi1>
    %193 = vector.broadcast %192 : vector<1x1x128xi1> to vector<16x16x128xi1>
    %194 = vector.broadcast %191 : bf16 to vector<16x16x128xbf16>
    %195 = arith.select %193, %22, %194 : vector<16x16x128xi1>, vector<16x16x128xbf16>
    "tpu.trace_start"() <{level = 10 : i32, message = "bqd,bkd->bqk"}> : () -> ()
    %cst_64 = arith.constant dense<0.000000e+00> : vector<16x16x16xf32>
    %196 = tpu.matmul %195, %24, %cst_64 {dimension_numbers = #tpu.dot_dimension_numbers<[2], [2], [1], [1], [0, 0, 0, 1, 1, 1], [0], [0]>} : vector<16x16x128xbf16>, vector<16x16x128xbf16>, vector<16x16x16xf32> -> vector<16x16x16xf32>
    "tpu.trace_stop"() : () -> ()
    %cst_65 = arith.constant dense<0xFF800000> : vector<16x16xf32>
    %197 = vector.multi_reduction <maximumf>, %196, %cst_65 [2] : vector<16x16x16xf32> to vector<16x16xf32>
    %198 = vector.shape_cast %197 : vector<16x16xf32> to vector<16x16x1xf32>
    %199 = vector.broadcast %198 : vector<16x16x1xf32> to vector<16x16x16xf32>
    %200 = arith.subf %196, %199 : vector<16x16x16xf32>
    %201 = math.exp %200 : vector<16x16x16xf32>
    %cst_66 = arith.constant dense<0.000000e+00> : vector<16x16xf32>
    %202 = vector.multi_reduction <add>, %201, %cst_66 [2] : vector<16x16x16xf32> to vector<16x16xf32>
    %203 = vector.shape_cast %202 : vector<16x16xf32> to vector<16x16x1xf32>
    %204 = vector.broadcast %203 : vector<16x16x1xf32> to vector<16x16x16xf32>
    %205 = arith.divf %201, %204 : vector<16x16x16xf32>
    %206 = arith.truncf %205 : vector<16x16x16xf32> to vector<16x16x16xbf16>
    %cst_67 = arith.constant 0.000000e+00 : f32
    %207 = arith.truncf %cst_67 : f32 to bf16
    %208 = vector.shape_cast %190 : vector<1x1x128xi1> to vector<1x1x128xi1>
    %209 = vector.broadcast %208 : vector<1x1x128xi1> to vector<16x16x128xi1>
    %210 = vector.broadcast %207 : bf16 to vector<16x16x128xbf16>
    %211 = arith.select %209, %26, %210 : vector<16x16x128xi1>, vector<16x16x128xbf16>
    "tpu.trace_start"() <{level = 10 : i32, message = "bqk,bkd->bqd"}> : () -> ()
    %cst_68 = arith.constant dense<0.000000e+00> : vector<16x16x128xf32>
    %212 = tpu.matmul %206, %211, %cst_68 {dimension_numbers = #tpu.dot_dimension_numbers<[2], [1], [1], [2], [0, 0, 0, 1, 1, 2], [0], [0]>} : vector<16x16x16xbf16>, vector<16x16x128xbf16>, vector<16x16x128xf32> -> vector<16x16x128xf32>
    "tpu.trace_stop"() : () -> ()
    %213 = arith.addf %182, %212 : vector<16x16x128xf32>
    %c6_i32 = arith.constant 6 : i32
    %c4_i32_69 = arith.constant 4 : i32
    %214 = arith.muli %c6_i32, %c4_i32_69 : i32
    %215 = vector.broadcast %214 : i32 to vector<1x1x128xi32>
    %216 = arith.cmpi sge, %27, %215 : vector<1x1x128xi32>
    %c1_i32_70 = arith.constant 1 : i32
    %217 = arith.addi %c6_i32, %c1_i32_70 : i32
    %c4_i32_71 = arith.constant 4 : i32
    %218 = arith.muli %217, %c4_i32_71 : i32
    %219 = vector.broadcast %218 : i32 to vector<1x1x128xi32>
    %220 = arith.cmpi slt, %27, %219 : vector<1x1x128xi32>
    %221 = arith.andi %216, %220 : vector<1x1x128xi1>
    %cst_72 = arith.constant 0.000000e+00 : f32
    %222 = arith.truncf %cst_72 : f32 to bf16
    %223 = vector.shape_cast %221 : vector<1x1x128xi1> to vector<1x1x128xi1>
    %224 = vector.broadcast %223 : vector<1x1x128xi1> to vector<16x16x128xi1>
    %225 = vector.broadcast %222 : bf16 to vector<16x16x128xbf16>
    %226 = arith.select %224, %22, %225 : vector<16x16x128xi1>, vector<16x16x128xbf16>
    "tpu.trace_start"() <{level = 10 : i32, message = "bqd,bkd->bqk"}> : () -> ()
    %cst_73 = arith.constant dense<0.000000e+00> : vector<16x16x16xf32>
    %227 = tpu.matmul %226, %24, %cst_73 {dimension_numbers = #tpu.dot_dimension_numbers<[2], [2], [1], [1], [0, 0, 0, 1, 1, 1], [0], [0]>} : vector<16x16x128xbf16>, vector<16x16x128xbf16>, vector<16x16x16xf32> -> vector<16x16x16xf32>
    "tpu.trace_stop"() : () -> ()
    %cst_74 = arith.constant dense<0xFF800000> : vector<16x16xf32>
    %228 = vector.multi_reduction <maximumf>, %227, %cst_74 [2] : vector<16x16x16xf32> to vector<16x16xf32>
    %229 = vector.shape_cast %228 : vector<16x16xf32> to vector<16x16x1xf32>
    %230 = vector.broadcast %229 : vector<16x16x1xf32> to vector<16x16x16xf32>
    %231 = arith.subf %227, %230 : vector<16x16x16xf32>
    %232 = math.exp %231 : vector<16x16x16xf32>
    %cst_75 = arith.constant dense<0.000000e+00> : vector<16x16xf32>
    %233 = vector.multi_reduction <add>, %232, %cst_75 [2] : vector<16x16x16xf32> to vector<16x16xf32>
    %234 = vector.shape_cast %233 : vector<16x16xf32> to vector<16x16x1xf32>
    %235 = vector.broadcast %234 : vector<16x16x1xf32> to vector<16x16x16xf32>
    %236 = arith.divf %232, %235 : vector<16x16x16xf32>
    %237 = arith.truncf %236 : vector<16x16x16xf32> to vector<16x16x16xbf16>
    %cst_76 = arith.constant 0.000000e+00 : f32
    %238 = arith.truncf %cst_76 : f32 to bf16
    %239 = vector.shape_cast %221 : vector<1x1x128xi1> to vector<1x1x128xi1>
    %240 = vector.broadcast %239 : vector<1x1x128xi1> to vector<16x16x128xi1>
    %241 = vector.broadcast %238 : bf16 to vector<16x16x128xbf16>
    %242 = arith.select %240, %26, %241 : vector<16x16x128xi1>, vector<16x16x128xbf16>
    "tpu.trace_start"() <{level = 10 : i32, message = "bqk,bkd->bqd"}> : () -> ()
    %cst_77 = arith.constant dense<0.000000e+00> : vector<16x16x128xf32>
    %243 = tpu.matmul %237, %242, %cst_77 {dimension_numbers = #tpu.dot_dimension_numbers<[2], [1], [1], [2], [0, 0, 0, 1, 1, 2], [0], [0]>} : vector<16x16x16xbf16>, vector<16x16x128xbf16>, vector<16x16x128xf32> -> vector<16x16x128xf32>
    "tpu.trace_stop"() : () -> ()
    %244 = arith.addf %213, %243 : vector<16x16x128xf32>
    %c7_i32 = arith.constant 7 : i32
    %c4_i32_78 = arith.constant 4 : i32
    %245 = arith.muli %c7_i32, %c4_i32_78 : i32
    %246 = vector.broadcast %245 : i32 to vector<1x1x128xi32>
    %247 = arith.cmpi sge, %27, %246 : vector<1x1x128xi32>
    %c1_i32_79 = arith.constant 1 : i32
    %248 = arith.addi %c7_i32, %c1_i32_79 : i32
    %c4_i32_80 = arith.constant 4 : i32
    %249 = arith.muli %248, %c4_i32_80 : i32
    %250 = vector.broadcast %249 : i32 to vector<1x1x128xi32>
    %251 = arith.cmpi slt, %27, %250 : vector<1x1x128xi32>
    %252 = arith.andi %247, %251 : vector<1x1x128xi1>
    %cst_81 = arith.constant 0.000000e+00 : f32
    %253 = arith.truncf %cst_81 : f32 to bf16
    %254 = vector.shape_cast %252 : vector<1x1x128xi1> to vector<1x1x128xi1>
    %255 = vector.broadcast %254 : vector<1x1x128xi1> to vector<16x16x128xi1>
    %256 = vector.broadcast %253 : bf16 to vector<16x16x128xbf16>
    %257 = arith.select %255, %22, %256 : vector<16x16x128xi1>, vector<16x16x128xbf16>
    "tpu.trace_start"() <{level = 10 : i32, message = "bqd,bkd->bqk"}> : () -> ()
    %cst_82 = arith.constant dense<0.000000e+00> : vector<16x16x16xf32>
    %258 = tpu.matmul %257, %24, %cst_82 {dimension_numbers = #tpu.dot_dimension_numbers<[2], [2], [1], [1], [0, 0, 0, 1, 1, 1], [0], [0]>} : vector<16x16x128xbf16>, vector<16x16x128xbf16>, vector<16x16x16xf32> -> vector<16x16x16xf32>
    "tpu.trace_stop"() : () -> ()
    %cst_83 = arith.constant dense<0xFF800000> : vector<16x16xf32>
    %259 = vector.multi_reduction <maximumf>, %258, %cst_83 [2] : vector<16x16x16xf32> to vector<16x16xf32>
    %260 = vector.shape_cast %259 : vector<16x16xf32> to vector<16x16x1xf32>
    %261 = vector.broadcast %260 : vector<16x16x1xf32> to vector<16x16x16xf32>
    %262 = arith.subf %258, %261 : vector<16x16x16xf32>
    %263 = math.exp %262 : vector<16x16x16xf32>
    %cst_84 = arith.constant dense<0.000000e+00> : vector<16x16xf32>
    %264 = vector.multi_reduction <add>, %263, %cst_84 [2] : vector<16x16x16xf32> to vector<16x16xf32>
    %265 = vector.shape_cast %264 : vector<16x16xf32> to vector<16x16x1xf32>
    %266 = vector.broadcast %265 : vector<16x16x1xf32> to vector<16x16x16xf32>
    %267 = arith.divf %263, %266 : vector<16x16x16xf32>
    %268 = arith.truncf %267 : vector<16x16x16xf32> to vector<16x16x16xbf16>
    %cst_85 = arith.constant 0.000000e+00 : f32
    %269 = arith.truncf %cst_85 : f32 to bf16
    %270 = vector.shape_cast %252 : vector<1x1x128xi1> to vector<1x1x128xi1>
    %271 = vector.broadcast %270 : vector<1x1x128xi1> to vector<16x16x128xi1>
    %272 = vector.broadcast %269 : bf16 to vector<16x16x128xbf16>
    %273 = arith.select %271, %26, %272 : vector<16x16x128xi1>, vector<16x16x128xbf16>
    "tpu.trace_start"() <{level = 10 : i32, message = "bqk,bkd->bqd"}> : () -> ()
    %cst_86 = arith.constant dense<0.000000e+00> : vector<16x16x128xf32>
    %274 = tpu.matmul %268, %273, %cst_86 {dimension_numbers = #tpu.dot_dimension_numbers<[2], [1], [1], [2], [0, 0, 0, 1, 1, 2], [0], [0]>} : vector<16x16x16xbf16>, vector<16x16x128xbf16>, vector<16x16x128xf32> -> vector<16x16x128xf32>
    "tpu.trace_stop"() : () -> ()
    %275 = arith.addf %244, %274 : vector<16x16x128xf32>
    %c8_i32 = arith.constant 8 : i32
    %276 = vector.shape_cast %275 : vector<16x16x128xf32> to vector<256x128xf32>
    %277 = arith.truncf %276 : vector<256x128xf32> to vector<256x128xbf16>
    %cst_87 = arith.constant dense<0.000000e+00> : vector<256x128xf32>
    %278 = tpu.matmul %277, %7, %cst_87 {dimension_numbers = #tpu.dot_dimension_numbers<[1], [0], [0], [1], [0, 0, 1, 1], [], []>} : vector<256x128xbf16>, vector<128x128xbf16>, vector<256x128xf32> -> vector<256x128xf32>
    %279 = vector.broadcast %11 : vector<1x128xf32> to vector<256x128xf32>
    %280 = arith.addf %278, %279 : vector<256x128xf32>
    %cst_88 = arith.constant 0.000000e+00 : f32
    %281 = vector.broadcast %cst_88 : f32 to vector<256x128xf32>
    %282 = arith.maximumf %280, %281 : vector<256x128xf32>
    %283 = arith.addf %276, %282 : vector<256x128xf32>
    %284 = vector.extract_strided_slice %283 {offsets = [0, 0], sizes = [256, 32], strides = [1, 1]} : vector<256x128xf32> to vector<256x32xf32>
    %c0_89 = arith.constant 0 : index
    %c0_90 = arith.constant 0 : index
    %285 = vector.load %arg5[%c0_89, %c0_90] : memref<256x32xf32, #tpu.memory_space<vmem>>, vector<256x32xf32>
    tpu.vector_store %arg5[%c0_89, %c0_90], %284 {strides = array<i32>} : memref<256x32xf32, #tpu.memory_space<vmem>>, vector<256x32xf32>,
    return
  }
  func.func @transform_0(%arg0: i32) -> (i32, i32) {
    %c0_i32 = arith.constant 0 : i32
    %c0_i32_0 = arith.constant 0 : i32
    return %arg0, %c0_i32 : i32, i32
  }
  func.func @transform_1(%arg0: i32) -> (i32, i32) {
    %c0_i32 = arith.constant 0 : i32
    %c0_i32_0 = arith.constant 0 : i32
    return %arg0, %c0_i32 : i32, i32
  }
  func.func @transform_2(%arg0: i32) -> (i32, i32) {
    %c0_i32 = arith.constant 0 : i32
    %c0_i32_0 = arith.constant 0 : i32
    %c0_i32_1 = arith.constant 0 : i32
    return %c0_i32, %c0_i32_0 : i32, i32
  }
  func.func @transform_3(%arg0: i32) -> (i32, i32) {
    %c0_i32 = arith.constant 0 : i32
    %c0_i32_0 = arith.constant 0 : i32
    %c0_i32_1 = arith.constant 0 : i32
    return %c0_i32, %c0_i32_0 : i32, i32
  }
  func.func @transform_4(%arg0: i32) -> (i32, i32) {
    %c0_i32 = arith.constant 0 : i32
    %c0_i32_0 = arith.constant 0 : i32
    return %arg0, %c0_i32 : i32, i32
  }
}

</mosaic_0001>

<bundles_post_ra>
// kernel: tpu_custom_call.1
= control target key start
LH: loop header
LB: loop body
LE: loop exit
PB: predicated region body
PF: predicated region fallthrough
CT: control target
= control target key end

     0   :  { %vm152_vm0 = vcmask 130048   ;;  %vm19197_vm1 = vmmov 0   ;;  %s25349_s2 = inlined_call_operand.vmem [shape: bf16[176,128], index: 2, kind: input, shape index: {}]   ;;  %s25350_s0 = inlined_call_operand.vmem [shape: f32[256,16], index: 0, kind: input, shape index: {}]   ;;  %s25351_s1 = inlined_call_operand.vmem [shape: f32[256,16], index: 1, kind: input, shape index: {}]   ;;  %s25352_s3 = inlined_call_operand.vmem [shape: f32[8,128], index: 3, kind: input, shape index: {}]   ;;  %s25353_s4 = inlined_call_operand.vmem [shape: f32[256,32], index: 4, kind: output, shape index: {}]  }
   0x1   :  { %v18161_v0 = vld [vmem:[%s25349_s2] sm:$0xff]   ;;  %v33_v2 = vld [vmem:[%s25350_s0 + $0x68] sm:$0xff]  ;;  %v34_v3 = vld [vmem:[%s25350_s0 + $0x70] sm:$0xff] }
   0x2   :  { %v32_v1 = vld [vmem:[%s25350_s0 + $0x60] sm:$0xff]  ;;  %18156 = vmatprep.subr.bf16.mxu1 %v18161_v0  ;;  %v35_v5 = vld [vmem:[%s25350_s0 + $0x78] sm:$0xff]  ;;  %v37_v7 = vld [vmem:[%s25350_s0 + $0x88] sm:$0xff]  ;;  %16470 = vmatprep.subr.bf16.mxu0 %v18161_v0 }
   0x3   :  { %v58_v4 = vpack.c.bf16 %v33_v2, %v32_v1  ;;  %v36_v6 = vld [vmem:[%s25350_s0 + $0x80] sm:$0xff]  ;;  %18157 = vmatpush3.bf16.msra.mxu1 %v18161_v0  ;;  %v59_v8 = vpack.c.bf16 %v35_v5, %v34_v3  ;;  %16471 = vmatpush3.bf16.msra.mxu0 %v18161_v0  ;;  %v38_v10 = vld [vmem:[%s25350_s0 + $0x90] sm:$0xff]  ;;  %v39_v11 = vld [vmem:[%s25350_s0 + $0x98] sm:$0xff] }
   0x4   :  { %v60_v9 = vpack.c.bf16 %v37_v7, %v36_v6  ;;  %v40_v12 = vld [vmem:[%s25350_s0 + $0xa0] sm:$0xff]  ;;  %v41_v13 = vld [vmem:[%s25350_s0 + $0xa8] sm:$0xff]  ;;  %v61_v15 = vpack.c.bf16 %v39_v11, %v38_v10  ;;  %v22_v18 = vld [vmem:[%s25350_s0 + $0x10] sm:$0xff] }
   0x5   :  { %16484 = vmatprep.mubr.msk.bf16.mxu1 %vm152_vm0, %v58_v4  ;;  %v18162_v14 = vld [vmem:[%s25349_s2 + $0x8] sm:$0xff]   ;;  %v20_v16 = vld [vmem:[%s25350_s0] sm:$0xff]  ;;  %v62_v19 = vpack.c.bf16 %v41_v13, %v40_v12  ;;  %v23_v21 = vld [vmem:[%s25350_s0 + $0x18] sm:$0xff] }
   0x6   :  { %16485 = vmatmul.mubr.msk.bf16.vlgmr.msra.gmra.mxu1 %vm152_vm0, %v59_v8  ;;  %16504 = vmatprep.subr.bf16.mxu1 %v18162_v14  ;;  %v21_v17 = vld [vmem:[%s25350_s0 + $0x8] sm:$0xff]  ;;  %v53_v22 = vpack.c.bf16 %v23_v21, %v22_v18  ;;  %v42_v23 = vld [vmem:[%s25350_s0 + $0xb0] sm:$0xff]  ;;  %v24_v24 = vld [vmem:[%s25350_s0 + $0x20] sm:$0xff] }
   0x7   :  { %16488 = vmatprep.mubr.msk.bf16.mxu1 %vm152_vm0, %v60_v9  ;;  %16505 = vmatpush3.bf16.msra.mxu1 %v18162_v14  ;;  %v52_v20 = vpack.c.bf16 %v21_v17, %v20_v16  ;;  %v25_v25 = vld [vmem:[%s25350_s0 + $0x28] sm:$0xff]  ;;  %v43_v26 = vld [vmem:[%s25350_s0 + $0xb8] sm:$0xff]  ;;  %v26_v28 = vld [vmem:[%s25350_s0 + $0x30] sm:$0xff] }
   0x8   :  { %v54_v27 = vpack.c.bf16 %v25_v25, %v24_v24  ;;  %v27_v29 = vld [vmem:[%s25350_s0 + $0x38] sm:$0xff]  ;;  %v44_v30 = vld [vmem:[%s25350_s0 + $0xc0] sm:$0xff]  ;;  %v45_v31 = vld [vmem:[%s25350_s0 + $0xc8] sm:$0xff]  ;;  %v63_v32 = vpack.c.bf16 %v43_v26, %v42_v23 }
   0x9   :  { %16472 = vmatprep.mubr.msk.bf16.mxu0 %vm152_vm0, %v52_v20  ;;  %v55_v33 = vpack.c.bf16 %v27_v29, %v26_v28  ;;  %v28_v34 = vld [vmem:[%s25350_s0 + $0x40] sm:$0xff]  ;;  %v29_v35 = vld [vmem:[%s25350_s0 + $0x48] sm:$0xff]  ;;  %v64_v36 = vpack.c.bf16 %v45_v31, %v44_v30  ;;  %v46_v38 = vld [vmem:[%s25350_s0 + $0xd0] sm:$0xff] }
   0xa   :  { %16473 = vmatmul.mubr.msk.bf16.vlgmr.msra.gmra.mxu0 %vm152_vm0, %v53_v22  ;;  %v56_v37 = vpack.c.bf16 %v29_v35, %v28_v34  ;;  %v47_v39 = vld [vmem:[%s25350_s0 + $0xd8] sm:$0xff]  ;;  %v48_v40 = vld [vmem:[%s25350_s0 + $0xe0] sm:$0xff]  ;;  %v49_v41 = vld [vmem:[%s25350_s0 + $0xe8] sm:$0xff]  ;;  %v25356_v35 = vmov 0.0  }
   0xb   :  { %16476 = vmatprep.mubr.msk.bf16.mxu0 %vm152_vm0, %v54_v27  ;;  %v30_v42 = vld [vmem:[%s25350_s0 + $0x50] sm:$0xff]  ;;  %v31_v43 = vld [vmem:[%s25350_s0 + $0x58] sm:$0xff]  ;;  %v68_v44 = vld [vmem:[%s25351_s1] sm:$0xff]  ;;  %v65_v46 = vpack.c.bf16 %v47_v39, %v46_v38  ;;  %v66_v48 = vpack.c.bf16 %v49_v41, %v48_v40  ;;  %16572 = vmatprep.subr.bf16.mxu1 %v25356_v35 }
   0xc   :  { %v69_v45 = vld [vmem:[%s25351_s1 + $0x8] sm:$0xff]  ;;  %v57_v47 = vpack.c.bf16 %v31_v43, %v30_v42  ;;  %v50_v50 = vld [vmem:[%s25350_s0 + $0xf0] sm:$0xff]  ;;  %v51_v51 = vld [vmem:[%s25350_s0 + $0xf8] sm:$0xff] }
   0xd   :  { %v100_v49 = vpack.c.bf16 %v69_v45, %v68_v44  ;;  %v67_v52 = vpack.c.bf16 %v51_v51, %v50_v50  ;;  %v70_v53 = vld [vmem:[%s25351_s1 + $0x10] sm:$0xff]  ;;  %v71_v54 = vld [vmem:[%s25351_s1 + $0x18] sm:$0xff]  ;;  %v72_v55 = vld [vmem:[%s25351_s1 + $0x20] sm:$0xff] }
   0xe   :  { %16489 = vmatmul.mubr.msk.bf16.gmra.mxu1 %vm152_vm0, %v61_v15  ;;  %v73_v56 = vld [vmem:[%s25351_s1 + $0x28] sm:$0xff]  ;;  %v101_v57 = vpack.c.bf16 %v71_v54, %v70_v53  ;;  %v74_v59 = vld [vmem:[%s25351_s1 + $0x30] sm:$0xff]  ;;  %v75_v60 = vld [vmem:[%s25351_s1 + $0x38] sm:$0xff] }
   0xf   :  { %16492 = vmatprep.mubr.msk.bf16.mxu1 %vm152_vm0, %v62_v19  ;;  %v102_v58 = vpack.c.bf16 %v73_v56, %v72_v55  ;;  %v76_v61 = vld [vmem:[%s25351_s1 + $0x40] sm:$0xff]  ;;  %v77_v62 = vld [vmem:[%s25351_s1 + $0x48] sm:$0xff]  ;;  %v103_v63 = vpack.c.bf16 %v75_v60, %v74_v59  ;;  %v78_v1 = vld [vmem:[%s25351_s1 + $0x50] sm:$0xff] }
  0x10   :  { %v104_v0 = vpack.c.bf16 %v77_v62, %v76_v61  ;;  %v79_v2 = vld [vmem:[%s25351_s1 + $0x58] sm:$0xff]  ;;  %v80_v3 = vld [vmem:[%s25351_s1 + $0x60] sm:$0xff]  ;;  %v81_v4 = vld [vmem:[%s25351_s1 + $0x68] sm:$0xff]  ;;  %v800_v62 = vlaneseq }
  0x11   :  { %v105_v5 = vpack.c.bf16 %v79_v2, %v78_v1  ;;  %v106_v6 = vpack.c.bf16 %v81_v4, %v80_v3  ;;  %v82_v7 = vld [vmem:[%s25351_s1 + $0x70] sm:$0xff]  ;;  %v83_v8 = vld [vmem:[%s25351_s1 + $0x78] sm:$0xff]  ;;  %v84_v9 = vld [vmem:[%s25351_s1 + $0x80] sm:$0xff] }
  0x12   :  { %16477 = vmatmul.mubr.msk.bf16.gmra.mxu0 %vm152_vm0, %v55_v33  ;;  %v85_v10 = vld [vmem:[%s25351_s1 + $0x88] sm:$0xff]  ;;  %v107_v11 = vpack.c.bf16 %v83_v8, %v82_v7  ;;  %v86_v13 = vld [vmem:[%s25351_s1 + $0x90] sm:$0xff]  ;;  %v87_v14 = vld [vmem:[%s25351_s1 + $0x98] sm:$0xff]  ;;  %v19532_v3 = vand.u32 127, %v800_v62  ;;  %v810_v7 = vshrl.u32 %v800_v62, 7 }
  0x13   :  { %16480 = vmatprep.mubr.msk.bf16.mxu0 %vm152_vm0, %v56_v37  ;;  %v108_v12 = vpack.c.bf16 %v85_v10, %v84_v9  ;;  %v88_v15 = vld [vmem:[%s25351_s1 + $0xa0] sm:$0xff]  ;;  %v89_v16 = vld [vmem:[%s25351_s1 + $0xa8] sm:$0xff]  ;;  %v109_v17 = vpack.c.bf16 %v87_v14, %v86_v13  ;;  %v90_v19 = vld [vmem:[%s25351_s1 + $0xb0] sm:$0xff] }
  0x14   :  { %v110_v18 = vpack.c.bf16 %v89_v16, %v88_v15  ;;  %v91_v20 = vld [vmem:[%s25351_s1 + $0xb8] sm:$0xff]  ;;  %v92_v21 = vld [vmem:[%s25351_s1 + $0xc0] sm:$0xff]  ;;  %v93_v22 = vld [vmem:[%s25351_s1 + $0xc8] sm:$0xff]  ;;  %vm803_vm2 = vcmp.lt.s32.totalorder %v19532_v3, 4  ;;  %v19542_v14 = vsub.s32 0, %v810_v7  ;;  %v25354_v16 = vmov 0  }
  0x15   :  { %v111_v23 = vpack.c.bf16 %v91_v20, %v90_v19  ;;  %v112_v24 = vpack.c.bf16 %v93_v22, %v92_v21  ;;  %v94_v25 = vld [vmem:[%s25351_s1 + $0xd0] sm:$0xff]  ;;  %v95_v26 = vld [vmem:[%s25351_s1 + $0xd8] sm:$0xff]  ;;  %v96_v27 = vld [vmem:[%s25351_s1 + $0xe0] sm:$0xff]  ;;  %vm2606_vm5 = vcmp.ge.s32.totalorder %v19532_v3, 4  ;;  %vm2607_vm6 = vcmp.lt.s32.totalorder %v19532_v3, 8 }
  0x16   :  { %16493 = vmatmul.mubr.msk.bf16.gmra.mxu1 %vm152_vm0, %v63_v32  ;;  %v97_v28 = vld [vmem:[%s25351_s1 + $0xe8] sm:$0xff]  ;;  %v113_v29 = vpack.c.bf16 %v95_v26, %v94_v25  ;;  %v18163_v30 = vld [vmem:[%s25349_s2 + $0x10] sm:$0xff]   ;;  %v99_v33 = vld [vmem:[%s25351_s1 + $0xf8] sm:$0xff]  ;;  %25468 = vst [vmem:[#allocation10_spill] sm:$0xff] %v19542_v14  ;;  %vm4410_vm10 = vcmp.ge.s32.totalorder %v19532_v3, 8  ;;  %vm4411_vm11 = vcmp.lt.s32.totalorder %v19532_v3, 12 }
  0x17   :  { %16496 = vmatprep.mubr.msk.bf16.mxu1 %vm152_vm0, %v64_v36  ;;  %v114_v31 = vpack.c.bf16 %v97_v28, %v96_v27  ;;  %16538 = vmatprep.subr.bf16.mxu0 %v18163_v30  ;;  %v98_v32 = vld [vmem:[%s25351_s1 + $0xf0] sm:$0xff]  ;;  %v19490_v40 = vld [vmem:[%s25352_s3] ss:$0 sm:$0xff]  ;;  %vm807_vm3 = vmpackc.low %vm803_vm2, %vm803_vm2  ;;  %vm6214_vm15 = vcmp.ge.s32.totalorder %v19532_v3, 12  ;;  %vm6215_vm2 = vcmp.lt.s32.totalorder %v19532_v3, 16 }
  0x18   :  { %16539 = vmatpush3.bf16.msra.mxu0 %v18163_v30  ;;  %v115_v34 = vpack.c.bf16 %v99_v33, %v98_v32  ;;  %v19538_v10 = vld [vmem:[%s25352_s3 + $0x1] ss:$0 sm:$0xff]  ;;  %vm20406_vm7 = vmand %vm2606_vm5, %vm2607_vm6  ;;  %vm8018_vm6 = vcmp.ge.s32.totalorder %v19532_v3, 16 }
  0x19   :  { %16620 = vmatprep.subr.bf16.mxu0 %v25356_v35  ;;  %vm2611_vm8 = vmpackc.low %vm20406_vm7, %vm20406_vm7  ;;  %vm8019_vm7 = vcmp.lt.s32.totalorder %v19532_v3, 20 }
  0x1a   :  { %16481 = vmatmul.mubr.msk.bf16.gmra.mxu0 %vm152_vm0, %v57_v47  ;;  %vm21029_vm12 = vmand %vm4410_vm10, %vm4411_vm11  ;;  %vm9822_vm11 = vcmp.ge.s32.totalorder %v19532_v3, 20 }
  0x1b   :  { %16540 = vmatprep.mubr.msk.bf16.mxu0 %vm152_vm0, %v100_v49  ;;  %vm4415_vm13 = vmpackc.low %vm21029_vm12, %vm21029_vm12  ;;  %vm9823_vm12 = vcmp.lt.s32.totalorder %v19532_v3, 24 }
  0x1e   :  { %16497 = vmatmul.mubr.msk.bf16.gmra.mxu1 %vm152_vm0, %v65_v46 }
  0x1f   :  { %16500 = vmatprep.mubr.msk.bf16.mxu1 %vm152_vm0, %v66_v48 }
  0x22   :  { %16541 = vmatmul.mubr.msk.bf16.vlgmr.msra.gmra.mxu0 %vm152_vm0, %v101_v57 }
  0x23   :  { %16544 = vmatprep.mubr.msk.bf16.mxu0 %vm152_vm0, %v102_v58 }
  0x26   :  { %16501 = vmatmul.mubr.msk.bf16.gmra.mxu1 %vm152_vm0, %v67_v52 }
  0x27   :  { %16506 = vmatprep.mubr.msk.bf16.mxu1 %vm152_vm0, %v100_v49 }
  0x2a   :  { %16545 = vmatmul.mubr.msk.bf16.gmra.mxu0 %vm152_vm0, %v103_v63 }
  0x2b   :  { %16548 = vmatprep.mubr.msk.bf16.mxu0 %vm152_vm0, %v104_v0 }
  0x2e   :  { %16507 = vmatmul.mubr.msk.bf16.vlgmr.msra.gmra.mxu1 %vm152_vm0, %v101_v57 }
  0x2f   :  { %16510 = vmatprep.mubr.msk.bf16.mxu1 %vm152_vm0, %v102_v58 }
  0x32   :  { %16549 = vmatmul.mubr.msk.bf16.gmra.mxu0 %vm152_vm0, %v105_v5 }
  0x33   :  { %16552 = vmatprep.mubr.msk.bf16.mxu0 %vm152_vm0, %v106_v6 }
  0x36   :  { %16511 = vmatmul.mubr.msk.bf16.gmra.mxu1 %vm152_vm0, %v103_v63 }
  0x37   :  { %16514 = vmatprep.mubr.msk.bf16.mxu1 %vm152_vm0, %v104_v0 }
  0x3a   :  { %16553 = vmatmul.mubr.msk.bf16.gmra.mxu0 %vm152_vm0, %v107_v11 }
  0x3b   :  { %16556 = vmatprep.mubr.msk.bf16.mxu0 %vm152_vm0, %v108_v12 }
  0x3e   :  { %16515 = vmatmul.mubr.msk.bf16.gmra.mxu1 %vm152_vm0, %v105_v5 }
  0x3f   :  { %16518 = vmatprep.mubr.msk.bf16.mxu1 %vm152_vm0, %v106_v6 }
  0x42   :  { %16557 = vmatmul.mubr.msk.bf16.gmra.mxu0 %vm152_vm0, %v109_v17 }
  0x43   :  { %16560 = vmatprep.mubr.msk.bf16.mxu0 %vm152_vm0, %v110_v18 }
  0x46   :  { %16519 = vmatmul.mubr.msk.bf16.gmra.mxu1 %vm152_vm0, %v107_v11 }
  0x47   :  { %16522 = vmatprep.mubr.msk.bf16.mxu1 %vm152_vm0, %v108_v12 }
  0x4a   :  { %16561 = vmatmul.mubr.msk.bf16.gmra.mxu0 %vm152_vm0, %v111_v23 }
  0x4b   :  { %16564 = vmatprep.mubr.msk.bf16.mxu0 %vm152_vm0, %v112_v24 }
  0x4e   :  { %16523 = vmatmul.mubr.msk.bf16.gmra.mxu1 %vm152_vm0, %v109_v17  ;;  %v808_v17 = vsel %vm807_vm3, 65537, %v25354_v16  ;;  %vm21716_vm3 = vmand %vm6214_vm15, %vm6215_vm2  ;;  %vm11626_vm2 = vcmp.ge.s32.totalorder %v19532_v3, 24 }
  0x4f   :  { %16526 = vmatprep.mubr.msk.bf16.mxu1 %vm152_vm0, %v110_v18  ;;  %v812_v21 = vrot.slane %v808_v17, %v19542_v14 }
  0x51   :  { %vm19558_vm4 = vcmp.ne.s16.totalorder %v812_v21, 0 }
  0x52   :  { %16565 = vmatmul.mubr.msk.bf16.gmra.mxu0 %vm152_vm0, %v113_v29 }
  0x53   :  { %16568 = vmatprep.mubr.msk.bf16.mxu0 %vm152_vm0, %v114_v31 }
  0x56   :  { %16527 = vmatmul.mubr.msk.bf16.gmra.mxu1 %vm152_vm0, %v111_v23 }
  0x57   :  { %16530 = vmatprep.mubr.msk.bf16.mxu1 %vm152_vm0, %v112_v24 }
  0x5a   :  { %16569 = vmatmul.mubr.msk.bf16.gmra.mxu0 %vm152_vm0, %v115_v34 }
  0x5b   :  { %16622 = vmatprep.mubr.msk.bf16.mxu0 %vm19197_vm1, %v25356_v35 }
  0x5e   :  { %16531 = vmatmul.mubr.msk.bf16.gmra.mxu1 %vm152_vm0, %v113_v29 }
  0x5f   :  { %16534 = vmatprep.mubr.msk.bf16.mxu1 %vm152_vm0, %v114_v31 }
  0x66   :  { %16535 = vmatmul.mubr.msk.bf16.gmra.mxu1 %vm152_vm0, %v115_v34 }
  0x67   :  { %16574 = vmatprep.mubr.msk.bf16.mxu1 %vm19197_vm1, %v25356_v35 }
  0xc6   :  { %v19479_v36 = vpop.f32.mrf.mxu1 }
  0xc8   :  { %v19481_v37 = vpop.f32.mrf.mxu1 }
  0xca   :  { %v19483_v38 = vpop.f32.mrf.mxu1  ;;  %v16474_v1 = vpop.f32.mrf.mxu0 }
  0xcc   :  { %v19485_v39 = vpop.f32.mrf.mxu1  ;;  %v235_v5 = vpop.f32.mrf.mxu0 }
  0xcd   :  { %v19550_v22 = vadd.f32 %v19490_v40, %v235_v5 }
  0xce   :  { %v16490_v41 = vpop.f32.mrf.mxu1  ;;  %v16475_v9 = vpop.f32.mrf.mxu0 }
  0xcf   :  { %v19493_v42 = vadd.f32 %v16490_v41, %v19490_v40  ;;  %25470 = vst [vmem:[#allocation12_spill] sm:$0xff] %v19550_v22  ;;  %v19577_v41 = vadd.f32 %v16474_v1, %v19490_v40 }
  0xd0   :  { %v19495_v43 = vpop.f32.mrf.mxu1  ;;  %v238_v19 = vpop.f32.mrf.mxu0 }
  0xd1   :  { %25460 = vst [vmem:[#allocation2_spill] sm:$0xff] %v19493_v42  ;;  %v19553_v24 = vadd.f32 %v19490_v40, %v238_v19  ;;  %25476 = vst [vmem:[#allocation16_spill] sm:$0xff] %v19577_v41 }
  0xd2   :  { %v16491_v44 = vpop.f32.mrf.mxu1  ;;  %v16478_v26 = vpop.f32.mrf.mxu0 }
  0xd3   :  { %v19498_v45 = vadd.f32 %v16491_v44, %v19490_v40  ;;  %25471 = vst [vmem:[#allocation13_spill] sm:$0xff] %v19553_v24  ;;  %v19564_v30 = vpack.c.bf16 %v19553_v24, %v19550_v22  ;;  %v19580_v44 = vadd.f32 %v16475_v9, %v19490_v40 }
  0xd4   :  { %v19500_v46 = vpop.f32.mrf.mxu1  ;;  %v251_v33 = vpop.f32.mrf.mxu0 }
  0xd5   :  { %25461 = vst [vmem:[#allocation3_spill] sm:$0xff] %v19498_v45  ;;  %25474 = vst [vmem:[#allocation14_spill] sm:$0xff] %v19564_v30  ;;  %v19587_v62 = vpack.c.bf16 %v19580_v44, %v19577_v41 }
  0xd6   :  { %v16494_v47 = vpop.f32.mrf.mxu1  ;;  %25477 = vst [vmem:[#allocation17_spill] sm:$0xff] %v19580_v44 }
  0xd7   :  { %v19503_v48 = vadd.f32 %v16494_v47, %v19490_v40  ;;  %25478 = vst [vmem:[#allocation18_spill] sm:$0xff] %v19587_v62 }
  0xd8   :  { %v19505_v49 = vpop.f32.mrf.mxu1 }
  0xd9   :  { %25462 = vst [vmem:[#allocation4_spill] sm:$0xff] %v19503_v48 }
  0xda   :  { %v16495_v50 = vpop.f32.mrf.mxu1 }
  0xdb   :  { %v19508_v51 = vadd.f32 %v16495_v50, %v19490_v40 }
  0xdc   :  { %v19510_v52 = vpop.f32.mrf.mxu1 }
  0xdd   :  { %25463 = vst [vmem:[#allocation5_spill] sm:$0xff] %v19508_v51 }
  0xde   :  { %v16498_v53 = vpop.f32.mrf.mxu1 }
  0xdf   :  { %v19513_v54 = vadd.f32 %v16498_v53, %v19490_v40 }
  0xe0   :  { %v19515_v55 = vpop.f32.mrf.mxu1 }
  0xe1   :  { %25464 = vst [vmem:[#allocation6_spill] sm:$0xff] %v19513_v54 }
  0xe2   :  { %v16499_v56 = vpop.f32.mrf.mxu1 }
  0xe3   :  { %v19518_v57 = vadd.f32 %v16499_v56, %v19490_v40  ;;  %v16479_v56 = vpop.f32.mrf.mxu0 }
  0xe4   :  { %v19520_v58 = vpop.f32.mrf.mxu1 }
  0xe5   :  { %25465 = vst [vmem:[#allocation7_spill] sm:$0xff] %v19518_v57 }
  0xe6   :  { %v16502_v59 = vpop.f32.mrf.mxu1 }
  0xe7   :  { %v19523_v60 = vadd.f32 %v16502_v59, %v19490_v40 }
  0xe8   :  { %v19525_v61 = vpop.f32.mrf.mxu1 }
  0xe9   :  { %25466 = vst [vmem:[#allocation8_spill] sm:$0xff] %v19523_v60 }
  0xea   :  { %v16503_v63 = vpop.f32.mrf.mxu1 }
  0xeb   :  { %v19528_v0 = vadd.f32 %v16503_v63, %v19490_v40 }
  0xec   :  { %v19530_v2 = vpop.f32.mrf.mxu1 }
  0xed   :  { %25467 = vst [vmem:[#allocation9_spill] sm:$0xff] %v19528_v0 }
  0xee   :  { %v16508_v4 = vpop.f32.mrf.mxu1 }
  0xef   :  { %v463_v28 = vadd.f32 %v16508_v4, %v19538_v10  ;;  %v254_v4 = vpop.f32.mrf.mxu0 }
  0xf0   :  { %v454_v6 = vpop.f32.mrf.mxu1 }
  0xf1   :  { %v455_v12 = vadd.f32 %v19538_v10, %v454_v6  ;;  %v19602_v6 = vadd.f32 %v19490_v40, %v251_v33 }
  0xf2   :  { %v16509_v8 = vpop.f32.mrf.mxu1 }
  0xf3   :  { %v466_v25 = vadd.f32 %v16509_v8, %v19538_v10  ;;  %25480 = vst [vmem:[#allocation20_spill] sm:$0xff] %v19602_v6  ;;  %v19607_v8 = vadd.f32 %v19490_v40, %v254_v4 }
  0xf4   :  { %v457_v11 = vpop.f32.mrf.mxu1 }
  0xf5   :  { %v458_v13 = vadd.f32 %v19538_v10, %v457_v11  ;;  %v19568_v32 = vpack.c.bf16 %v466_v25, %v463_v28  ;;  %25481 = vst [vmem:[#allocation21_spill] sm:$0xff] %v19607_v8  ;;  %v19614_v17 = vpack.c.bf16 %v19607_v8, %v19602_v6 }
  0xf6   :  { %v16512_v15 = vpop.f32.mrf.mxu1 }
  0xf7   :  { %v19545_v18 = vpack.c.bf16 %v458_v13, %v455_v12  ;;  %25475 = vst [vmem:[#allocation15_spill] sm:$0xff] %v19568_v32  ;;  %v479_v9 = vadd.f32 %v16512_v15, %v19538_v10  ;;  %v16482_v12 = vpop.f32.mrf.mxu0  ;;  %25482 = vst [vmem:[#allocation22_spill] sm:$0xff] %v19614_v17  ;;  %v19627_v15 = vadd.f32 %v16478_v26, %v19490_v40 }
  0xf8   :  { %v470_v20 = vpop.f32.mrf.mxu1 }
  0xf9   :  { %25469 = vst [vmem:[#allocation11_spill] sm:$0xff] %v19545_v18  ;;  %16573 = vmatpush3.bf16.xpose.msra.mxu1 %v19545_v18  ;;  %v471_v50 = vadd.f32 %v19538_v10, %v470_v20  ;;  %v267_v21 = vpop.f32.mrf.mxu0  ;;  %25484 = vst [vmem:[#allocation24_spill] sm:$0xff] %v19627_v15 }
  0xfa   :  { %v16513_v23 = vpop.f32.mrf.mxu1  ;;  %16578 = vmatprep.subr.bf16.mxu1 %v25356_v35 }
  0xfb   :  { %v482_v11 = vadd.f32 %v16513_v23, %v19538_v10  ;;  %v19630_v23 = vadd.f32 %v16479_v56, %v19490_v40 }
  0xfc   :  { %v473_v27 = vpop.f32.mrf.mxu1 }
  0xfd   :  { %v474_v53 = vadd.f32 %v19538_v10, %v473_v27  ;;  %v19618_v20 = vpack.c.bf16 %v482_v11, %v479_v9  ;;  %25485 = vst [vmem:[#allocation25_spill] sm:$0xff] %v19630_v23  ;;  %v19641_v26 = vpack.c.bf16 %v19630_v23, %v19627_v15 }
  0xfe   :  { %v19566_v31 = vpop.f32.mrf.mxu1 }
  0xff   :  { %v19591_v1 = vpack.c.bf16 %v474_v53, %v471_v50  ;;  %25483 = vst [vmem:[#allocation23_spill] sm:$0xff] %v19618_v20  ;;  %v16483_v53 = vpop.f32.mrf.mxu0  ;;  %25486 = vst [vmem:[#allocation26_spill] sm:$0xff] %v19641_v26 }
 0x100   :  { %v486_v34 = vpop.f32.mrf.mxu1  ;;  %16575 = vmatmul.mubr.msk.bf16.vlgmr.msra.gmra.mxu1 %vm19558_vm4, %v19564_v30 }
 0x101   :  { %16579 = vmatpush3.bf16.xpose.msra.mxu1 %v19568_v32  ;;  %16580 = vmatprep.mubr.msk.bf16.mxu1 %vm19197_vm1, %v25356_v35  ;;  %25479 = vst [vmem:[#allocation19_spill] sm:$0xff] %v19591_v1  ;;  %v487_v28 = vadd.f32 %v19538_v10, %v486_v34 }
 0x102   :  { %v16517_v47 = vpop.f32.mrf.mxu1  ;;  %16584 = vmatprep.subr.bf16.mxu1 %v25356_v35 }
 0x104   :  { %v489_v59 = vpop.f32.mrf.mxu1 }
 0x105   :  { %v490_v33 = vadd.f32 %v19538_v10, %v489_v59  ;;  %v19656_v59 = vadd.f32 %v19490_v40, %v19500_v46 }
 0x106   :  { %v19589_v63 = vpop.f32.mrf.mxu1 }
 0x107   :  { %v19645_v11 = vpack.c.bf16 %v490_v33, %v487_v28  ;;  %25489 = vst [vmem:[#allocation29_spill] sm:$0xff] %v19656_v59 }
 0x108   :  { %v19593_v5 = vpop.f32.mrf.mxu1  ;;  %16581 = vmatmul.mubr.msk.bf16.vlgmr.msra.gmra.mxu1 %vm19558_vm4, %v19587_v62 }
 0x109   :  { %16585 = vmatpush3.bf16.xpose.msra.mxu1 %v19591_v1  ;;  %16586 = vmatprep.mubr.msk.bf16.mxu1 %vm19197_vm1, %v25356_v35  ;;  %25487 = vst [vmem:[#allocation27_spill] sm:$0xff] %v19645_v11 }
 0x10a   :  { %v19604_v7 = vpop.f32.mrf.mxu1  ;;  %16590 = vmatprep.subr.bf16.mxu1 %v25356_v35 }
 0x10c   :  { %v505_v13 = vpop.f32.mrf.mxu1 }
 0x10e   :  { %v19616_v19 = vpop.f32.mrf.mxu1 }
 0x110   :  { %v518_v25 = vpop.f32.mrf.mxu1  ;;  %16587 = vmatmul.mubr.msk.bf16.vlgmr.msra.gmra.mxu1 %vm19558_vm4, %v19614_v17 }
 0x111   :  { %16591 = vmatpush3.bf16.xpose.msra.mxu1 %v19618_v20  ;;  %16592 = vmatprep.mubr.msk.bf16.mxu1 %vm19197_vm1, %v25356_v35  ;;  %v519_v50 = vadd.f32 %v19538_v10, %v518_v25  ;;  %v19659_v25 = vadd.f32 %v19490_v40, %v267_v21  ;;  %v19676_v21 = vadd.f32 %v19490_v40, %v19495_v43 }
 0x112   :  { %v19632_v27 = vpop.f32.mrf.mxu1  ;;  %16596 = vmatprep.subr.bf16.mxu1 %v25356_v35  ;;  %v270_v35 = vpop.f32.mrf.mxu0 }
 0x113   :  { %25490 = vst [vmem:[#allocation30_spill] sm:$0xff] %v19659_v25  ;;  %v19664_v33 = vadd.f32 %v19490_v40, %v270_v35  ;;  %25493 = vst [vmem:[#allocation32_spill] sm:$0xff] %v19676_v21  ;;  %v19681_v15 = vpack.c.bf16 %v19656_v59, %v19676_v21  ;;  %v506_v59 = vadd.f32 %v19538_v10, %v505_v13 }
 0x114   :  { %v521_v4 = vpop.f32.mrf.mxu1  ;;  %v19699_v43 = vpop.f32.mrf.mxu0 }
 0x115   :  { %v522_v9 = vadd.f32 %v19538_v10, %v521_v4  ;;  %25491 = vst [vmem:[#allocation31_spill] sm:$0xff] %v19664_v33  ;;  %v495_v4 = vadd.f32 %v19566_v31, %v19538_v10  ;;  %25494 = vst [vmem:[#allocation33_spill] sm:$0xff] %v19681_v15  ;;  %v19685_v31 = vpack.c.bf16 %v19664_v33, %v19659_v25 }
 0x116   :  { %v19643_v56 = vpop.f32.mrf.mxu1 }
 0x117   :  { %v19647_v16 = vpack.c.bf16 %v522_v9, %v519_v50  ;;  %v25492_v50 = vmov 0.0   ;;  %v498_v9 = vadd.f32 %v16517_v47, %v19538_v10  ;;  %25495 = vst [vmem:[#allocation34_spill] sm:$0xff] %v19685_v31 }
 0x118   :  { %v534_v34 = vpop.f32.mrf.mxu1  ;;  %16593 = vmatmul.mubr.msk.bf16.vlgmr.msra.gmra.mxu1 %vm19558_vm4, %v19641_v26 }
 0x119   :  { %25488 = vst [vmem:[#allocation28_spill] sm:$0xff] %v19647_v16  ;;  %16597 = vmatpush3.bf16.xpose.msra.mxu1 %v19645_v11  ;;  %16621 = vmatpush3.bf16.xpose.msra.mxu0 %v19647_v16  ;;  %v535_v46 = vadd.f32 %v19538_v10, %v534_v34  ;;  %v19689_v34 = vpack.c.bf16 %v498_v9, %v495_v4 }
 0x11a   :  { %v19661_v28 = vpop.f32.mrf.mxu1  ;;  %16598 = vmatprep.mubr.msk.bf16.mxu1 %vm19197_vm1, %v25492_v50  ;;  %16602 = vmatprep.subr.bf16.mxu1 %v25492_v50  ;;  %v19705_v4 = vadd.f32 %v19490_v40, %v19510_v52  ;;  %v19711_v9 = vadd.f32 %v16483_v53, %v19490_v40  ;;  %v503_v52 = vadd.f32 %v19538_v10, %v19593_v5 }
 0x11b   :  { %16632 = vmatprep.subr.bf16.mxu0 %v25492_v50  ;;  %25496 = vst [vmem:[#allocation35_spill] sm:$0xff] %v19689_v34  ;;  %v19729_v53 = vadd.f32 %v19490_v40, %v19505_v49 }
 0x11c   :  { %v537_v35 = vpop.f32.mrf.mxu1  ;;  %25498 = vst [vmem:[#allocation37_spill] sm:$0xff] %v19705_v4  ;;  %25500 = vst [vmem:[#allocation39_spill] sm:$0xff] %v19711_v9  ;;  %v19746_v41 = vpack.c.bf16 %v506_v59, %v503_v52  ;;  %v19770_v52 = vadd.f32 %v19490_v40, %v19520_v58 }
 0x11d   :  { %v538_v23 = vadd.f32 %v19538_v10, %v537_v35  ;;  %v19719_v35 = vpop.f32.mrf.mxu0  ;;  %25501 = vst [vmem:[#allocation40_spill] sm:$0xff] %v19729_v53  ;;  %v19736_v5 = vpack.c.bf16 %v19705_v4, %v19729_v53 }
 0x11e   :  { %v19687_v47 = vpop.f32.mrf.mxu1  ;;  %25504 = vst [vmem:[#allocation43_spill] sm:$0xff] %v19746_v41  ;;  %25507 = vst [vmem:[#allocation46_spill] sm:$0xff] %v19770_v52 }
 0x11f   :  { %v19691_v8 = vpack.c.bf16 %v538_v23, %v535_v46  ;;  %v19708_v23 = vadd.f32 %v16482_v12, %v19490_v40  ;;  %v19731_v33 = vpop.f32.mrf.mxu0  ;;  %25502 = vst [vmem:[#allocation41_spill] sm:$0xff] %v19736_v5 }
 0x120   :  { %v550_v6 = vpop.f32.mrf.mxu1  ;;  %16599 = vmatmul.mubr.msk.bf16.vlgmr.msra.gmra.mxu1 %vm19558_vm4, %v19685_v31  ;;  %16623 = vmatmul.mubr.msk.bf16.vlgmr.msra.gmra.mxu0 %vm19558_vm4, %v19681_v15 }
 0x121   :  { %25497 = vst [vmem:[#allocation36_spill] sm:$0xff] %v19691_v8  ;;  %16603 = vmatpush3.bf16.xpose.msra.mxu1 %v19689_v34  ;;  %16633 = vmatpush3.bf16.xpose.msra.mxu0 %v19691_v8  ;;  %25499 = vst [vmem:[#allocation38_spill] sm:$0xff] %v19708_v23  ;;  %v551_v12 = vadd.f32 %v19538_v10, %v550_v6  ;;  %v19740_v6 = vpack.c.bf16 %v19711_v9, %v19708_v23  ;;  %v19744_v44 = vpop.f32.mrf.mxu0 }
 0x122   :  { %v19713_v46 = vpop.f32.mrf.mxu1  ;;  %16604 = vmatprep.mubr.msk.bf16.mxu1 %vm19197_vm1, %v25492_v50  ;;  %16634 = vmatprep.mubr.msk.bf16.mxu0 %vm19197_vm1, %v25492_v50  ;;  %v19792_v23 = vadd.f32 %v19490_v40, %v19515_v55 }
 0x123   :  { %16608 = vmatprep.subr.bf16.mxu1 %v25492_v50  ;;  %16644 = vmatprep.subr.bf16.mxu0 %v25492_v50  ;;  %25503 = vst [vmem:[#allocation42_spill] sm:$0xff] %v19740_v6  ;;  %v16546_v4 = vpop.f32.mrf.mxu0 }
 0x124   :  { %v553_v21 = vpop.f32.mrf.mxu1  ;;  %25509 = vst [vmem:[#allocation48_spill] sm:$0xff] %v19792_v23 }
 0x125   :  { %v554_v25 = vadd.f32 %v19538_v10, %v553_v21  ;;  %v19759_v21 = vld [vmem:[%s25352_s3 + $0x2] ss:$0 sm:$0xff] }
 0x126   :  { %v19742_v13 = vpop.f32.mrf.mxu1  ;;  %v650_v59 = vadd.f32 %v16546_v4, %v19759_v21  ;;  %v641_v4 = vpop.f32.mrf.mxu0 }
 0x127   :  { %v19748_v49 = vpack.c.bf16 %v554_v25, %v551_v12  ;;  %v19766_v25 = vadd.f32 %v19490_v40, %v19485_v39  ;;  %v511_v12 = vadd.f32 %v19589_v63, %v19538_v10  ;;  %v514_v39 = vadd.f32 %v19604_v7, %v19538_v10 }
 0x128   :  { %v566_v24 = vpop.f32.mrf.mxu1  ;;  %16605 = vmatmul.mubr.msk.bf16.vlgmr.msra.gmra.mxu1 %vm19558_vm4, %v19740_v6  ;;  %16635 = vmatmul.mubr.msk.bf16.vlgmr.msra.gmra.mxu0 %vm19558_vm4, %v19736_v5  ;;  %v642_v58 = vadd.f32 %v19759_v21, %v641_v4  ;;  %v19788_v63 = vadd.f32 %v19490_v40, %v19481_v37  ;;  %v19802_v4 = vpack.c.bf16 %v19770_v52, %v19792_v23 }
 0x129   :  { %25505 = vst [vmem:[#allocation44_spill] sm:$0xff] %v19748_v49  ;;  %16609 = vmatpush3.bf16.xpose.msra.mxu1 %v19746_v41  ;;  %16645 = vmatpush3.bf16.xpose.msra.mxu0 %v19748_v49  ;;  %25506 = vst [vmem:[#allocation45_spill] sm:$0xff] %v19766_v25  ;;  %v567_v9 = vadd.f32 %v19538_v10, %v566_v24  ;;  %v16547_v49 = vpop.f32.mrf.mxu0  ;;  %v19804_v8 = vpack.c.bf16 %v514_v39, %v511_v12 }
 0x12a   :  { %v19774_v53 = vpop.f32.mrf.mxu1  ;;  %16610 = vmatprep.mubr.msk.bf16.mxu1 %vm19197_vm1, %v25492_v50  ;;  %16646 = vmatprep.mubr.msk.bf16.mxu0 %vm19197_vm1, %v25492_v50  ;;  %25508 = vst [vmem:[#allocation47_spill] sm:$0xff] %v19788_v63  ;;  %v653_v24 = vadd.f32 %v16547_v49, %v19759_v21  ;;  %v19798_v5 = vpack.c.bf16 %v19766_v25, %v19788_v63  ;;  %25511 = vst [vmem:[#allocation50_spill] sm:$0xff] %v19802_v4 }
 0x12b   :  { %16614 = vmatprep.subr.bf16.mxu1 %v25492_v50  ;;  %16656 = vmatprep.subr.bf16.mxu0 %v25492_v50  ;;  %v644_v37 = vpop.f32.mrf.mxu0  ;;  %25512 = vst [vmem:[#allocation51_spill] sm:$0xff] %v19804_v8  ;;  %v19828_v12 = vadd.f32 %v19490_v40, %v19530_v2  ;;  %v19843_v2 = vadd.f32 %v19479_v36, %v19490_v40 }
 0x12c   :  { %v569_v22 = vpop.f32.mrf.mxu1  ;;  %25510 = vst [vmem:[#allocation49_spill] sm:$0xff] %v19798_v5  ;;  %v19808_v55 = vpack.c.bf16 %v653_v24, %v650_v59  ;;  %v645_v16 = vadd.f32 %v19759_v21, %v644_v37  ;;  %v19824_v59 = vadd.f32 %v19483_v38, %v19490_v40 }
 0x12d   :  { %v570_v7 = vadd.f32 %v19538_v10, %v569_v22  ;;  %v16550_v22 = vpop.f32.mrf.mxu0  ;;  %25515 = vst [vmem:[#allocation54_spill] sm:$0xff] %v19828_v12  ;;  %25516 = vst [vmem:[#allocation55_spill] sm:$0xff] %v19843_v2 }
 0x12e   :  { %v19819_v49 = vpack.c.bf16 %v645_v16, %v642_v58  ;;  %25514 = vst [vmem:[#allocation53_spill] sm:$0xff] %v19824_v59  ;;  %v527_v16 = vadd.f32 %v19616_v19, %v19538_v10  ;;  %v530_v58 = vadd.f32 %v19632_v27, %v19538_v10  ;;  %v19852_v27 = vpack.c.bf16 %v19824_v59, %v19843_v2 }
 0x12f   :  { %v19806_v15 = vpack.c.bf16 %v570_v7, %v567_v9  ;;  %v666_v9 = vadd.f32 %v16550_v22, %v19759_v21  ;;  %v657_v39 = vpop.f32.mrf.mxu0  ;;  %v19847_v7 = vadd.f32 %v19490_v40, %v19525_v61  ;;  %v626_v40 = vadd.f32 %v19759_v21, %v19719_v35 }
 0x130   :  { %16611 = vmatmul.mubr.msk.bf16.vlgmr.msra.gmra.mxu1 %vm19558_vm4, %v19798_v5  ;;  %16647 = vmatmul.mubr.msk.bf16.vlgmr.msra.gmra.mxu0 %vm19558_vm4, %v19802_v4  ;;  %v658_v38 = vadd.f32 %v19759_v21, %v657_v39  ;;  %25518 = vst [vmem:[#allocation57_spill] sm:$0xff] %v19852_v27  ;;  %v19858_v39 = vpack.c.bf16 %v530_v58, %v527_v16 }
 0x131   :  { %25513 = vst [vmem:[#allocation52_spill] sm:$0xff] %v19806_v15  ;;  %16615 = vmatpush3.bf16.xpose.msra.mxu1 %v19804_v8  ;;  %16657 = vmatpush3.bf16.xpose.msra.mxu0 %v19806_v15  ;;  %25517 = vst [vmem:[#allocation56_spill] sm:$0xff] %v19847_v7  ;;  %v16551_v24 = vpop.f32.mrf.mxu0  ;;  %v19856_v37 = vpack.c.bf16 %v19828_v12, %v19847_v7  ;;  %v543_v35 = vadd.f32 %v19643_v56, %v19538_v10 }
 0x132   :  { %16616 = vmatprep.mubr.msk.bf16.mxu1 %vm19197_vm1, %v25492_v50  ;;  %16658 = vmatprep.mubr.msk.bf16.mxu0 %vm19197_vm1, %v25492_v50  ;;  %v669_v19 = vadd.f32 %v16551_v24, %v19759_v21  ;;  %25520 = vst [vmem:[#allocation59_spill] sm:$0xff] %v19858_v39 }
 0x133   :  { %16626 = vmatprep.subr.bf16.mxu1 %v25492_v50  ;;  %16668 = vmatprep.subr.bf16.mxu0 %v25492_v50  ;;  %25519 = vst [vmem:[#allocation58_spill] sm:$0xff] %v19856_v37  ;;  %v660_v22 = vpop.f32.mrf.mxu0 }
 0x134   :  { %v19860_v36 = vpack.c.bf16 %v669_v19, %v666_v9  ;;  %v661_v52 = vadd.f32 %v19759_v21, %v660_v22  ;;  %v629_v9 = vadd.f32 %v19759_v21, %v19744_v44  ;;  %v546_v19 = vadd.f32 %v19661_v28, %v19538_v10 }
 0x135   :  { %v16554_v61 = vpop.f32.mrf.mxu0 }
 0x136   :  { %v19876_v16 = vpack.c.bf16 %v661_v52, %v658_v38  ;;  %v682_v58 = vadd.f32 %v16554_v61, %v19759_v21  ;;  %v19887_v44 = vpack.c.bf16 %v629_v9, %v626_v40  ;;  %v19892_v38 = vpack.c.bf16 %v19498_v45, %v19493_v42 }
 0x137   :  { %v673_v24 = vpop.f32.mrf.mxu0  ;;  %v19894_v7 = vpack.c.bf16 %v546_v19, %v543_v35  ;;  %v562_v35 = vadd.f32 %v19713_v46, %v19538_v10 }
 0x138   :  { %16617 = vmatmul.mubr.msk.bf16.vlgmr.msra.gmra.mxu1 %vm19558_vm4, %v19852_v27  ;;  %16659 = vmatmul.mubr.msk.bf16.vlgmr.msra.gmra.mxu0 %vm19558_vm4, %v19856_v37  ;;  %v674_v22 = vadd.f32 %v19759_v21, %v673_v24  ;;  %25521 = vst [vmem:[#allocation60_spill] sm:$0xff] %v19887_v44  ;;  %25522 = vst [vmem:[#allocation61_spill] sm:$0xff] %v19892_v38  ;;  %v1854_v9 = vsel %vm19558_vm4, %v19887_v44, 0  ;;  %v559_v24 = vadd.f32 %v19687_v47, %v19538_v10 }
 0x139   :  { %16627 = vmatpush3.bf16.xpose.msra.mxu1 %v19858_v39  ;;  %16628 = vmatprep.mubr.msk.bf16.mxu1 %vm19197_vm1, %v25492_v50  ;;  %v16555_v12 = vpop.f32.mrf.mxu0  ;;  %25523 = vst [vmem:[#allocation62_spill] sm:$0xff] %v19894_v7 }
 0x13a   :  { %16638 = vmatprep.subr.bf16.mxu1 %v25492_v50  ;;  %16670 = vmatprep.mubr.msk.bf16.mxu0 %vm19197_vm1, %v25492_v50  ;;  %v685_v52 = vadd.f32 %v16555_v12, %v19759_v21 }
 0x13b   :  { %v676_v61 = vpop.f32.mrf.mxu0  ;;  %16669 = vmatpush3.bf16.msra.mxu0 %v1854_v9 }
 0x13c   :  { %v19896_v23 = vpack.c.bf16 %v685_v52, %v682_v58  ;;  %v677_v56 = vadd.f32 %v19759_v21, %v676_v61  ;;  %16680 = vmatprep.subr.bf16.mxu0 %v25492_v50  ;;  %v19921_v61 = vpack.c.bf16 %v19508_v51, %v19503_v48 }
 0x13d   :  { %v16558_v28 = vpop.f32.mrf.mxu0 }
 0x13e   :  { %v19905_v12 = vpack.c.bf16 %v677_v56, %v674_v22  ;;  %v698_v40 = vadd.f32 %v16558_v28, %v19759_v21  ;;  %25524 = vst [vmem:[#allocation63_spill] sm:$0xff] %v19921_v61  ;;  %v19923_v28 = vpack.c.bf16 %v562_v35, %v559_v24  ;;  %v575_v24 = vadd.f32 %v19742_v13, %v19538_v10 }
 0x13f   :  { %v689_v58 = vpop.f32.mrf.mxu0  ;;  %v578_v35 = vadd.f32 %v19774_v53, %v19538_v10 }
 0x140   :  { %16629 = vmatmul.mubr.msk.bf16.vlgmr.msra.gmra.mxu1 %vm19558_vm4, %v19892_v38  ;;  %v690_v19 = vadd.f32 %v19759_v21, %v689_v58  ;;  %25525 = vst [vmem:[#allocation64_spill] sm:$0xff] %v19923_v28 }
 0x141   :  { %16639 = vmatpush3.bf16.xpose.msra.mxu1 %v19894_v7  ;;  %16640 = vmatprep.mubr.msk.bf16.mxu1 %vm19197_vm1, %v25492_v50  ;;  %v16559_v22 = vpop.f32.mrf.mxu0  ;;  %v19952_v13 = vpack.c.bf16 %v578_v35, %v575_v24  ;;  %v19973_v35 = vpack.c.bf16 %v19528_v0, %v19523_v60 }
 0x142   :  { %16650 = vmatprep.subr.bf16.mxu1 %v25492_v50  ;;  %v701_v52 = vadd.f32 %v16559_v22, %v19759_v21 }
 0x143   :  { %v692_v56 = vpop.f32.mrf.mxu0  ;;  %25527 = vst [vmem:[#allocation66_spill] sm:$0xff] %v19952_v13  ;;  %25529 = vst [vmem:[#allocation68_spill] sm:$0xff] %v19973_v35 }
 0x144   :  { %v19925_v9 = vpack.c.bf16 %v701_v52, %v698_v40  ;;  %v693_v47 = vadd.f32 %v19759_v21, %v692_v56 }
 0x145   :  { %v16562_v46 = vpop.f32.mrf.mxu0 }
 0x146   :  { %v19934_v58 = vpack.c.bf16 %v693_v47, %v690_v19  ;;  %v714_v22 = vadd.f32 %v16562_v46, %v19759_v21  ;;  %v19946_v19 = vpack.c.bf16 %v19518_v57, %v19513_v54  ;;  %v634_v47 = vadd.f32 %v19699_v43, %v19759_v21 }
 0x147   :  { %v705_v40 = vpop.f32.mrf.mxu0  ;;  %v637_v46 = vadd.f32 %v19731_v33, %v19759_v21 }
 0x148   :  { %16641 = vmatmul.mubr.msk.bf16.vlgmr.msra.gmra.mxu1 %vm19558_vm4, %v19921_v61  ;;  %v706_v52 = vadd.f32 %v19759_v21, %v705_v40  ;;  %25526 = vst [vmem:[#allocation65_spill] sm:$0xff] %v19946_v19 }
 0x149   :  { %16651 = vmatpush3.bf16.xpose.msra.mxu1 %v19923_v28  ;;  %16652 = vmatprep.mubr.msk.bf16.mxu1 %vm19197_vm1, %v25492_v50  ;;  %v16563_v56 = vpop.f32.mrf.mxu0  ;;  %v19966_v40 = vpack.c.bf16 %v637_v46, %v634_v47 }
 0x14a   :  { %16662 = vmatprep.subr.bf16.mxu1 %v25492_v50  ;;  %v717_v51 = vadd.f32 %v16563_v56, %v19759_v21 }
 0x14b   :  { %v708_v48 = vpop.f32.mrf.mxu0  ;;  %25528 = vst [vmem:[#allocation67_spill] sm:$0xff] %v19966_v40 }
 0x14c   :  { %v19954_v45 = vpack.c.bf16 %v717_v51, %v714_v22  ;;  %v709_v10 = vadd.f32 %v19759_v21, %v708_v48 }
 0x14d   :  { %v16566_v53 = vpop.f32.mrf.mxu0 }
 0x14e   :  { %v19963_v43 = vpack.c.bf16 %v709_v10, %v706_v52  ;;  %v730_v33 = vadd.f32 %v16566_v53, %v19759_v21  ;;  %v1855_v52 = vsel %vm19558_vm4, %v19966_v40, 0 }
 0x14f   :  { %v721_v51 = vpop.f32.mrf.mxu0 }
 0x150   :  { %16653 = vmatmul.mubr.msk.bf16.vlgmr.msra.gmra.mxu1 %vm19558_vm4, %v19946_v19  ;;  %v722_v48 = vadd.f32 %v19759_v21, %v721_v51 }
 0x151   :  { %16663 = vmatpush3.bf16.xpose.msra.mxu1 %v19952_v13  ;;  %16664 = vmatprep.mubr.msk.bf16.mxu1 %vm19197_vm1, %v25492_v50  ;;  %v16567_v22 = vpop.f32.mrf.mxu0 }
 0x152   :  { %16674 = vmatprep.subr.bf16.mxu1 %v25492_v50  ;;  %v733_v24 = vadd.f32 %v16567_v22, %v19759_v21 }
 0x153   :  { %v724_v56 = vpop.f32.mrf.mxu0 }
 0x154   :  { %v19978_v10 = vpack.c.bf16 %v733_v24, %v730_v33  ;;  %v725_v47 = vadd.f32 %v19759_v21, %v724_v56 }
 0x155   :  { %v16570_v46 = vpop.f32.mrf.mxu0 }
 0x156   :  { %v19984_v53 = vpack.c.bf16 %v725_v47, %v722_v48  ;;  %v746_v51 = vadd.f32 %v16570_v46, %v19759_v21 }
 0x157   :  { %v737_v22 = vpop.f32.mrf.mxu0 }
 0x158   :  { %16665 = vmatmul.mubr.msk.bf16.vlgmr.msra.gmra.mxu1 %vm19558_vm4, %v19973_v35  ;;  %v738_v33 = vadd.f32 %v19759_v21, %v737_v22 }
 0x159   :  { %16675 = vmatpush3.bf16.msra.mxu1 %v1855_v52  ;;  %16676 = vmatprep.mubr.msk.bf16.mxu1 %vm19197_vm1, %v25492_v50  ;;  %v16571_v24 = vpop.f32.mrf.mxu0 }
 0x15a   :  { %16686 = vmatprep.subr.bf16.mxu1 %v25492_v50  ;;  %v749_v56 = vadd.f32 %v16571_v24, %v19759_v21 }
 0x15b   :  { %v740_v0 = vpop.f32.mrf.mxu0 }
 0x15c   :  { %v19992_v60 = vpack.c.bf16 %v749_v56, %v746_v51  ;;  %v741_v48 = vadd.f32 %v19759_v21, %v740_v0 }
 0x15e   :  { %v19995_v47 = vpack.c.bf16 %v741_v48, %v738_v33 }
 0x1c0   :  { %v19997_v46 = vpop.f32.mrf.mxu1 }
 0x1c1   :  { %v1486_v52 = vsel %vm152_vm0, %v19997_v46, -inf }
 0x1c2   :  { %1487 = vmax.xlane.f32.xlu0 %v1486_v52  ;;  %v16576_v57 = vpop.f32.mrf.mxu1 }
 0x1c4   :  { %v20001_v54 = vpop.f32.mrf.mxu1 }
 0x1c5   :  { %v1489_v22 = vsel %vm152_vm0, %v20001_v54, -inf }
 0x1c6   :  { %1490 = vmax.xlane.f32.xlu0 %v1489_v22  ;;  %v16577_v24 = vpop.f32.mrf.mxu1 }
 0x1c8   :  { %v20005_v51 = vpop.f32.mrf.mxu1 }
 0x1c9   :  { %v1492_v0 = vsel %vm152_vm0, %v20005_v51, -inf }
 0x1ca   :  { %1493 = vmax.xlane.f32.xlu1 %v1492_v0  ;;  %v16582_v21 = vpop.f32.mrf.mxu1 }
 0x1cc   :  { %v20009_v33 = vpop.f32.mrf.mxu1 }
 0x1cd   :  { %v1495_v56 = vsel %vm152_vm0, %v20009_v33, -inf }
 0x1ce   :  { %1496 = vmax.xlane.f32.xlu1 %v1495_v56  ;;  %v16583_v57 = vpop.f32.mrf.mxu1 }
 0x1d0   :  { %v20013_v48 = vpop.f32.mrf.mxu1 }
 0x1d1   :  { %v1498_v52 = vsel %vm152_vm0, %v20013_v48, -inf }
 0x1d2   :  { %1499 = vmax.xlane.f32.xlu0 %v1498_v52  ;;  %v16588_v22 = vpop.f32.mrf.mxu1 }
 0x1d4   :  { %v20017_v24 = vpop.f32.mrf.mxu1 }
 0x1d5   :  { %v1501_v0 = vsel %vm152_vm0, %v20017_v24, -inf }
 0x1d6   :  { %1502 = vmax.xlane.f32.xlu1 %v1501_v0  ;;  %v16589_v21 = vpop.f32.mrf.mxu1 }
 0x1d8   :  { %v20021_v42 = vpop.f32.mrf.mxu1 }
 0x1d9   :  { %v1504_v56 = vsel %vm152_vm0, %v20021_v42, -inf }
 0x1da   :  { %1505 = vmax.xlane.f32.xlu0 %v1504_v56  ;;  %v16594_v57 = vpop.f32.mrf.mxu1 }
 0x1dc   :  { %v20025_v59 = vpop.f32.mrf.mxu1 }
 0x1dd   :  { %v1507_v52 = vsel %vm152_vm0, %v20025_v59, -inf }
 0x1de   :  { %1508 = vmax.xlane.f32.xlu1 %v1507_v52  ;;  %v16595_v22 = vpop.f32.mrf.mxu1 }
 0x1e0   :  { %v20029_v2 = vpop.f32.mrf.mxu1  ;;  %v20031_v25 = vpop.f32.mrf.mxu0 }
 0x1e1   :  { %v1510_v0 = vsel %vm152_vm0, %v20029_v2, -inf  ;;  %v1534_v27 = vsel %vm152_vm0, %v20031_v25, -inf }
 0x1e2   :  { %v16624_v21 = vpop.f32.mrf.mxu0  ;;  %1511 = vmax.xlane.f32.xlu0 %v1510_v0  ;;  %v16600_v63 = vpop.f32.mrf.mxu1 }
 0x1e4   :  { %v20035_v40 = vpop.f32.mrf.mxu1  ;;  %v20037_v56 = vpop.f32.mrf.mxu0 }
 0x1e5   :  { %v1513_v57 = vsel %vm152_vm0, %v20035_v40, -inf }
 0x1e6   :  { %v16625_v35 = vpop.f32.mrf.mxu0  ;;  %1514 = vmax.xlane.f32.xlu1 %v1513_v57  ;;  %v16601_v52 = vpop.f32.mrf.mxu1 }
 0x1e8   :  { %v20041_v22 = vpop.f32.mrf.mxu1  ;;  %v20043_v44 = vpop.f32.mrf.mxu0 }
 0x1e9   :  { %v1516_v37 = vsel %vm152_vm0, %v20041_v22, -inf  ;;  %v1546_v6 = vsel %vm152_vm0, %v20043_v44, -inf }
 0x1ea   :  { %v16636_v21 = vpop.f32.mrf.mxu0  ;;  %1517 = vmax.xlane.f32.xlu0 %v1516_v37  ;;  %v16606_v63 = vpop.f32.mrf.mxu1 }
 0x1ec   :  { %v20047_v0 = vpop.f32.mrf.mxu1  ;;  %v20049_v13 = vpop.f32.mrf.mxu0 }
 0x1ed   :  { %v1519_v19 = vsel %vm152_vm0, %v20047_v0, -inf }
 0x1ee   :  { %v16637_v35 = vpop.f32.mrf.mxu0  ;;  %1520 = vmax.xlane.f32.xlu1 %v1519_v19  ;;  %v16607_v57 = vpop.f32.mrf.mxu1 }
 0x1f0   :  { %v20053_v52 = vpop.f32.mrf.mxu1  ;;  %v20055_v15 = vpop.f32.mrf.mxu0 }
 0x1f1   :  { %v1522_v4 = vsel %vm152_vm0, %v20053_v52, -inf  ;;  %v1558_v41 = vsel %vm152_vm0, %v20055_v15, -inf }
 0x1f2   :  { %v16648_v21 = vpop.f32.mrf.mxu0  ;;  %1523 = vmax.xlane.f32.xlu0 %v1522_v4  ;;  %v16612_v37 = vpop.f32.mrf.mxu1 }
 0x1f4   :  { %v20059_v63 = vpop.f32.mrf.mxu1  ;;  %v20061_v28 = vpop.f32.mrf.mxu0 }
 0x1f5   :  { %v1525_v61 = vsel %vm152_vm0, %v20059_v63, -inf  ;;  %v1561_v31 = vsel %vm152_vm0, %v20061_v28, -inf }
 0x1f6   :  { %v16649_v35 = vpop.f32.mrf.mxu0  ;;  %1526 = vmax.xlane.f32.xlu1 %v1525_v61  ;;  %v16613_v19 = vpop.f32.mrf.mxu1 }
 0x1f8   :  { %v20065_v57 = vpop.f32.mrf.mxu1  ;;  %v20067_v7 = vpop.f32.mrf.mxu0 }
 0x1f9   :  { %v1528_v38 = vsel %vm152_vm0, %v20065_v57, -inf  ;;  %v1570_v34 = vsel %vm152_vm0, %v20067_v7, -inf }
 0x1fa   :  { %v16660_v21 = vpop.f32.mrf.mxu0  ;;  %1529 = vmax.xlane.f32.xlu0 %v1528_v38  ;;  %v16618_v4 = vpop.f32.mrf.mxu1  ;;  %v1537_v38 = vsel %vm152_vm0, %v20037_v56, -inf }
 0x1fc   :  { %v20071_v37 = vpop.f32.mrf.mxu1  ;;  %v20073_v39 = vpop.f32.mrf.mxu0 }
 0x1fd   :  { %v1531_v61 = vsel %vm152_vm0, %v20071_v37, -inf  ;;  %v1573_v26 = vsel %vm152_vm0, %v20073_v39, -inf }
 0x1fe   :  { %v16661_v35 = vpop.f32.mrf.mxu0  ;;  %1535 = vmax.xlane.f32.xlu0 %v1534_v27  ;;  %1532 = vmax.xlane.f32.xlu1 %v1531_v61  ;;  %v16619_v19 = vpop.f32.mrf.mxu1 }
 0x1ff   :  { %v1549_v19 = vsel %vm152_vm0, %v20049_v13, -inf }
 0x200   :  { %v20079_v5 = vpop.f32.mrf.mxu1 }
 0x201   :  { %v1540_v21 = vsel %vm152_vm0, %v20079_v5, -inf }
 0x202   :  { %1538 = vmax.xlane.f32.xlu1 %v1537_v38  ;;  %1541 = vmax.xlane.f32.xlu0 %v1540_v21  ;;  %v16630_v4 = vpop.f32.mrf.mxu1 }
 0x204   :  { %v20085_v8 = vpop.f32.mrf.mxu1 }
 0x205   :  { %v1543_v27 = vsel %vm152_vm0, %v20085_v8, -inf }
 0x206   :  { %1547 = vmax.xlane.f32.xlu0 %v1546_v6  ;;  %1544 = vmax.xlane.f32.xlu1 %v1543_v27  ;;  %v16631_v61 = vpop.f32.mrf.mxu1 }
 0x208   :  { %v20091_v35 = vpop.f32.mrf.mxu1 }
 0x209   :  { %v1552_v38 = vsel %vm152_vm0, %v20091_v35, -inf }
 0x20a   :  { %1550 = vmax.xlane.f32.xlu1 %v1549_v19  ;;  %1553 = vmax.xlane.f32.xlu0 %v1552_v38  ;;  %v16642_v21 = vpop.f32.mrf.mxu1 }
 0x20c   :  { %v20097_v4 = vpop.f32.mrf.mxu1 }
 0x20d   :  { %v1555_v6 = vsel %vm152_vm0, %v20097_v4, -inf }
 0x20e   :  { %1559 = vmax.xlane.f32.xlu0 %v1558_v41  ;;  %1556 = vmax.xlane.f32.xlu1 %v1555_v6  ;;  %v16643_v27 = vpop.f32.mrf.mxu1 }
 0x210   :  { %v20103_v61 = vpop.f32.mrf.mxu1 }
 0x211   :  { %v1564_v19 = vsel %vm152_vm0, %v20103_v61, -inf }
 0x212   :  { %1562 = vmax.xlane.f32.xlu1 %v1561_v31  ;;  %1565 = vmax.xlane.f32.xlu0 %v1564_v19  ;;  %v16654_v38 = vpop.f32.mrf.mxu1 }
 0x214   :  { %v20109_v21 = vpop.f32.mrf.mxu1 }
 0x215   :  { %v1567_v41 = vsel %vm152_vm0, %v20109_v21, -inf }
 0x216   :  { %1571 = vmax.xlane.f32.xlu0 %v1570_v34  ;;  %1568 = vmax.xlane.f32.xlu1 %v1567_v41  ;;  %v16655_v6 = vpop.f32.mrf.mxu1 }
 0x218   :  { %v20115_v27 = vpop.f32.mrf.mxu1 }
 0x219   :  { %v1576_v31 = vsel %vm152_vm0, %v20115_v27, -inf }
 0x21a   :  { %1574 = vmax.xlane.f32.xlu1 %v1573_v26  ;;  %1577 = vmax.xlane.f32.xlu0 %v1576_v31  ;;  %v16666_v19 = vpop.f32.mrf.mxu1 }
 0x21c   :  { %v20121_v38 = vpop.f32.mrf.mxu1 }
 0x21d   :  { %v1579_v11 = vsel %vm152_vm0, %v20121_v38, -inf }
 0x21e   :  { %1580 = vmax.xlane.f32.xlu1 %v1579_v11  ;;  %v16667_v34 = vpop.f32.mrf.mxu1 }
 0x24b   :  { %v1488_v41 = vpop.xlane.xlu0 %1487 }
 0x24c   :  { %v1582_v6 = vsub.f32 %v19997_v46, %v1488_v41 }
 0x24e   :  { %v1614_v17 = vmul.f32 1.442695, %v1582_v6 }
 0x24f   :  { %v1491_v20 = vpop.xlane.xlu0 %1490 }
 0x250   :  { %18172 = vpow2.f32 %v1614_v17  ;;  %v1583_v62 = vsub.f32 %v20001_v54, %v1491_v20 }
 0x252   :  { %v1616_v1 = vmul.f32 1.442695, %v1583_v62 }
 0x253   :  { %v1494_v30 = vpop.xlane.xlu1 %1493 }
 0x254   :  { %18174 = vpow2.f32 %v1616_v1  ;;  %v1584_v26 = vsub.f32 %v20005_v51, %v1494_v30 }
 0x256   :  { %v1618_v31 = vmul.f32 1.442695, %v1584_v26 }
 0x257   :  { %v1497_v19 = vpop.xlane.xlu1 %1496 }
 0x258   :  { %18176 = vpow2.f32 %v1618_v31  ;;  %v1585_v32 = vsub.f32 %v20009_v33, %v1497_v19 }
 0x25a   :  { %v1620_v11 = vmul.f32 1.442695, %v1585_v32 }
 0x25b   :  { %v1500_v34 = vpop.xlane.xlu0 %1499 }
 0x25c   :  { %18178 = vpow2.f32 %v1620_v11  ;;  %v1586_v46 = vsub.f32 %v20013_v48, %v1500_v34 }
 0x25d   :  { %v20130_v41 = vpop.eup %18172 }
 0x25e   :  { %v1622_v17 = vmul.f32 1.442695, %v1586_v46  ;;  %v1678_v54 = vsel %vm152_vm0, %v20130_v41, 0.0 }
 0x25f   :  { %v1503_v62 = vpop.xlane.xlu1 %1502  ;;  %1679 = vadd.xlane.f32.xlu0 %v1678_v54 }
 0x260   :  { %18180 = vpow2.f32 %v1622_v17  ;;  %v1587_v30 = vsub.f32 %v20017_v24, %v1503_v62 }
 0x261   :  { %v20135_v1 = vpop.eup %18174 }
 0x262   :  { %v1624_v20 = vmul.f32 1.442695, %v1587_v30  ;;  %v1681_v32 = vsel %vm152_vm0, %v20135_v1, 0.0 }
 0x263   :  { %v1506_v51 = vpop.xlane.xlu0 %1505  ;;  %1682 = vadd.xlane.f32.xlu1 %v1681_v32 }
 0x264   :  { %18182 = vpow2.f32 %v1624_v20  ;;  %v1588_v33 = vsub.f32 %v20021_v42, %v1506_v51 }
 0x265   :  { %v20140_v48 = vpop.eup %18176 }
 0x266   :  { %v1626_v6 = vmul.f32 1.442695, %v1588_v33  ;;  %v1684_v26 = vsel %vm152_vm0, %v20140_v48, 0.0 }
 0x267   :  { %v1509_v31 = vpop.xlane.xlu1 %1508  ;;  %1685 = vadd.xlane.f32.xlu0 %v1684_v26 }
 0x268   :  { %18184 = vpow2.f32 %v1626_v6  ;;  %v1589_v24 = vsub.f32 %v20025_v59, %v1509_v31 }
 0x269   :  { %v20145_v19 = vpop.eup %18178 }
 0x26a   :  { %v1628_v11 = vmul.f32 1.442695, %v1589_v24  ;;  %v1687_v34 = vsel %vm152_vm0, %v20145_v19, 0.0 }
 0x26b   :  { %v1512_v46 = vpop.xlane.xlu0 %1511  ;;  %1688 = vadd.xlane.f32.xlu1 %v1687_v34 }
 0x26c   :  { %18186 = vpow2.f32 %v1628_v11  ;;  %v1590_v42 = vsub.f32 %v20029_v2, %v1512_v46 }
 0x26d   :  { %v20150_v17 = vpop.eup %18180 }
 0x26e   :  { %v1630_v54 = vmul.f32 1.442695, %v1590_v42  ;;  %v1690_v62 = vsel %vm152_vm0, %v20150_v17, 0.0 }
 0x26f   :  { %v1515_v30 = vpop.xlane.xlu1 %1514  ;;  %1691 = vadd.xlane.f32.xlu0 %v1690_v62 }
 0x270   :  { %18188 = vpow2.f32 %v1630_v54  ;;  %v1591_v59 = vsub.f32 %v20035_v40, %v1515_v30 }
 0x271   :  { %v20155_v20 = vpop.eup %18182 }
 0x272   :  { %v1632_v32 = vmul.f32 1.442695, %v1591_v59  ;;  %v1693_v51 = vsel %vm152_vm0, %v20155_v20, 0.0 }
 0x273   :  { %v1518_v33 = vpop.xlane.xlu0 %1517  ;;  %1694 = vadd.xlane.f32.xlu1 %v1693_v51 }
 0x274   :  { %18190 = vpow2.f32 %v1632_v32  ;;  %v1592_v2 = vsub.f32 %v20041_v22, %v1518_v33 }
 0x275   :  { %v20160_v6 = vpop.eup %18184 }
 0x276   :  { %v1634_v26 = vmul.f32 1.442695, %v1592_v2  ;;  %v1696_v31 = vsel %vm152_vm0, %v20160_v6, 0.0 }
 0x277   :  { %v1521_v24 = vpop.xlane.xlu1 %1520  ;;  %1697 = vadd.xlane.f32.xlu0 %v1696_v31 }
 0x278   :  { %18192 = vpow2.f32 %v1634_v26  ;;  %v1593_v40 = vsub.f32 %v20047_v0, %v1521_v24 }
 0x279   :  { %v20165_v11 = vpop.eup %18186 }
 0x27a   :  { %v1636_v34 = vmul.f32 1.442695, %v1593_v40  ;;  %v1699_v46 = vsel %vm152_vm0, %v20165_v11, 0.0 }
 0x27b   :  { %v1524_v42 = vpop.xlane.xlu0 %1523  ;;  %1700 = vadd.xlane.f32.xlu1 %v1699_v46 }
 0x27c   :  { %18194 = vpow2.f32 %v1636_v34  ;;  %v1594_v22 = vsub.f32 %v20053_v52, %v1524_v42 }
 0x27d   :  { %v20170_v54 = vpop.eup %18188 }
 0x27e   :  { %v1638_v62 = vmul.f32 1.442695, %v1594_v22  ;;  %v1702_v30 = vsel %vm152_vm0, %v20170_v54, 0.0 }
 0x27f   :  { %v1527_v59 = vpop.xlane.xlu1 %1526  ;;  %1703 = vadd.xlane.f32.xlu0 %v1702_v30 }
 0x280   :  { %18196 = vpow2.f32 %v1638_v62  ;;  %v1595_v0 = vsub.f32 %v20059_v63, %v1527_v59 }
 0x281   :  { %v20175_v32 = vpop.eup %18190 }
 0x282   :  { %v1640_v51 = vmul.f32 1.442695, %v1595_v0  ;;  %v1705_v33 = vsel %vm152_vm0, %v20175_v32, 0.0 }
 0x283   :  { %v1530_v2 = vpop.xlane.xlu0 %1529  ;;  %1706 = vadd.xlane.f32.xlu1 %v1705_v33 }
 0x284   :  { %18198 = vpow2.f32 %v1640_v51  ;;  %v1596_v52 = vsub.f32 %v20065_v57, %v1530_v2 }
 0x285   :  { %v20180_v26 = vpop.eup %18192 }
 0x286   :  { %v1642_v31 = vmul.f32 1.442695, %v1596_v52  ;;  %v1708_v24 = vsel %vm152_vm0, %v20180_v26, 0.0 }
 0x287   :  { %v1536_v40 = vpop.xlane.xlu0 %1535  ;;  %v1533_v34 = vpop.xlane.xlu1 %1532  ;;  %1709 = vadd.xlane.f32.xlu0 %v1708_v24 }
 0x288   :  { %18200 = vpow2.f32 %v1642_v31  ;;  %v1598_v63 = vsub.f32 %v20031_v25, %v1536_v40  ;;  %v1597_v46 = vsub.f32 %v20071_v37, %v1533_v34 }
 0x289   :  { %v20186_v42 = vpop.eup %18194 }
 0x28a   :  { %v1646_v22 = vmul.f32 1.442695, %v1598_v63  ;;  %v1644_v62 = vmul.f32 1.442695, %v1597_v46  ;;  %v1711_v57 = vsel %vm152_vm0, %v20186_v42, 0.0 }
 0x28b   :  { %v1539_v30 = vpop.xlane.xlu1 %1538  ;;  %v1542_v59 = vpop.xlane.xlu0 %1541  ;;  %1712 = vadd.xlane.f32.xlu1 %v1711_v57 }
 0x28c   :  { %18202 = vpow2.f32 %v1646_v22  ;;  %v1599_v0 = vsub.f32 %v20037_v56, %v1539_v30  ;;  %v1600_v51 = vsub.f32 %v20079_v5, %v1542_v59 }
 0x28d   :  { %v20192_v33 = vpop.eup %18196  ;;  %18204 = vpow2.f32 %v1644_v62 }
 0x28e   :  { %v1648_v25 = vmul.f32 1.442695, %v1599_v0  ;;  %v1650_v37 = vmul.f32 1.442695, %v1600_v51  ;;  %v1714_v2 = vsel %vm152_vm0, %v20192_v33, 0.0 }
 0x28f   :  { %v1548_v52 = vpop.xlane.xlu0 %1547  ;;  %v1545_v31 = vpop.xlane.xlu1 %1544  ;;  %1715 = vadd.xlane.f32.xlu0 %v1714_v2 }
 0x290   :  { %18206 = vpow2.f32 %v1648_v25  ;;  %v1602_v24 = vsub.f32 %v20043_v44, %v1548_v52  ;;  %v1601_v40 = vsub.f32 %v20085_v8, %v1545_v31 }
 0x291   :  { %v20198_v34 = vpop.eup %18198  ;;  %18208 = vpow2.f32 %v1650_v37 }
 0x292   :  { %v1654_v5 = vmul.f32 1.442695, %v1602_v24  ;;  %v1652_v56 = vmul.f32 1.442695, %v1601_v40  ;;  %v1717_v63 = vsel %vm152_vm0, %v20198_v34, 0.0 }
 0x293   :  { %v1551_v46 = vpop.xlane.xlu1 %1550  ;;  %v1554_v22 = vpop.xlane.xlu0 %1553  ;;  %1718 = vadd.xlane.f32.xlu1 %v1717_v63 }
 0x294   :  { %18210 = vpow2.f32 %v1654_v5  ;;  %v1603_v62 = vsub.f32 %v20049_v13, %v1551_v46  ;;  %v1604_v57 = vsub.f32 %v20091_v35, %v1554_v22 }
 0x295   :  { %v20204_v30 = vpop.eup %18200  ;;  %18212 = vpow2.f32 %v1652_v56 }
 0x296   :  { %v1656_v8 = vmul.f32 1.442695, %v1603_v62  ;;  %v1658_v44 = vmul.f32 1.442695, %v1604_v57  ;;  %v1720_v59 = vsel %vm152_vm0, %v20204_v30, 0.0 }
 0x297   :  { %v1560_v0 = vpop.xlane.xlu0 %1559  ;;  %v1557_v51 = vpop.xlane.xlu1 %1556  ;;  %1721 = vadd.xlane.f32.xlu0 %v1720_v59 }
 0x298   :  { %18214 = vpow2.f32 %v1656_v8  ;;  %v1606_v25 = vsub.f32 %v20055_v15, %v1560_v0  ;;  %v1605_v37 = vsub.f32 %v20097_v4, %v1557_v51 }
 0x299   :  { %v20210_v2 = vpop.eup %18202  ;;  %18216 = vpow2.f32 %v1658_v44 }
 0x29a   :  { %v20212_v13 = vpop.eup %18204  ;;  %v1662_v35 = vmul.f32 1.442695, %v1606_v25  ;;  %v1660_v52 = vmul.f32 1.442695, %v1605_v37  ;;  %v1726_v31 = vsel %vm152_vm0, %v20210_v2, 0.0 }
 0x29b   :  { %v1563_v24 = vpop.xlane.xlu1 %1562  ;;  %v1566_v40 = vpop.xlane.xlu0 %1565  ;;  %1727 = vadd.xlane.f32.xlu0 %v1726_v31  ;;  %v1723_v5 = vsel %vm152_vm0, %v20212_v13, 0.0 }
 0x29c   :  { %18218 = vpow2.f32 %v1662_v35  ;;  %v1607_v15 = vsub.f32 %v20061_v28, %v1563_v24  ;;  %v1608_v4 = vsub.f32 %v20103_v61, %v1566_v40  ;;  %1724 = vadd.xlane.f32.xlu1 %v1723_v5 }
 0x29d   :  { %v20220_v56 = vpop.eup %18206  ;;  %18220 = vpow2.f32 %v1660_v52 }
 0x29e   :  { %v20222_v63 = vpop.eup %18208  ;;  %v1664_v46 = vmul.f32 1.442695, %v1607_v15  ;;  %v1666_v22 = vmul.f32 1.442695, %v1608_v4  ;;  %v1729_v62 = vsel %vm152_vm0, %v20220_v56, 0.0 }
 0x29f   :  { %v1572_v57 = vpop.xlane.xlu0 %1571  ;;  %v1569_v8 = vpop.xlane.xlu1 %1568  ;;  %v1732_v44 = vsel %vm152_vm0, %v20222_v63, 0.0 }
 0x2a0   :  { %18222 = vpow2.f32 %v1664_v46  ;;  %v1610_v28 = vsub.f32 %v20067_v7, %v1572_v57  ;;  %v1609_v61 = vsub.f32 %v20109_v21, %v1569_v8  ;;  %1733 = vadd.xlane.f32.xlu0 %v1732_v44  ;;  %1730 = vadd.xlane.f32.xlu1 %v1729_v62 }
 0x2a1   :  { %v20230_v59 = vpop.eup %18210  ;;  %18224 = vpow2.f32 %v1666_v22 }
 0x2a2   :  { %v20232_v0 = vpop.eup %18212  ;;  %v1670_v51 = vmul.f32 1.442695, %v1610_v28  ;;  %v1668_v25 = vmul.f32 1.442695, %v1609_v61  ;;  %v1738_v37 = vsel %vm152_vm0, %v20230_v59, 0.0 }
 0x2a3   :  { %v1575_v35 = vpop.xlane.xlu1 %1574  ;;  %v1578_v52 = vpop.xlane.xlu0 %1577  ;;  %v1735_v31 = vsel %vm152_vm0, %v20232_v0, 0.0 }
 0x2a4   :  { %18226 = vpow2.f32 %v1670_v51  ;;  %v1611_v7 = vsub.f32 %v20073_v39, %v1575_v35  ;;  %1739 = vadd.xlane.f32.xlu0 %v1738_v37  ;;  %v1612_v21 = vsub.f32 %v20115_v27, %v1578_v52  ;;  %1736 = vadd.xlane.f32.xlu1 %v1735_v31 }
 0x2a5   :  { %v20240_v24 = vpop.eup %18214  ;;  %18228 = vpow2.f32 %v1668_v25 }
 0x2a6   :  { %v20242_v40 = vpop.eup %18216  ;;  %v1672_v5 = vmul.f32 1.442695, %v1611_v7  ;;  %v1674_v15 = vmul.f32 1.442695, %v1612_v21  ;;  %v1741_v4 = vsel %vm152_vm0, %v20240_v24, 0.0 }
 0x2a7   :  { %v1744_v46 = vsel %vm152_vm0, %v20242_v40, 0.0  ;;  %v1581_v22 = vpop.xlane.xlu1 %1580 }
 0x2a8   :  { %18230 = vpow2.f32 %v1672_v5  ;;  %1745 = vadd.xlane.f32.xlu0 %v1744_v46  ;;  %1742 = vadd.xlane.f32.xlu1 %v1741_v4  ;;  %v1613_v39 = vsub.f32 %v20121_v38, %v1581_v22 }
 0x2a9   :  { %v20249_v27 = vpop.eup %18218  ;;  %18232 = vpow2.f32 %v1674_v15 }
 0x2aa   :  { %v20251_v62 = vpop.eup %18220  ;;  %v1676_v57 = vmul.f32 1.442695, %v1613_v39  ;;  %v1750_v8 = vsel %vm152_vm0, %v20249_v27, 0.0 }
 0x2ab   :  { %v1747_v44 = vsel %vm152_vm0, %v20251_v62, 0.0 }
 0x2ac   :  { %18234 = vpow2.f32 %v1676_v57  ;;  %1751 = vadd.xlane.f32.xlu0 %v1750_v8  ;;  %1748 = vadd.xlane.f32.xlu1 %v1747_v44 }
 0x2ad   :  { %v20257_v28 = vpop.eup %18222 }
 0x2ae   :  { %v20259_v61 = vpop.eup %18224  ;;  %v1753_v38 = vsel %vm152_vm0, %v20257_v28, 0.0 }
 0x2af   :  { %v1756_v51 = vsel %vm152_vm0, %v20259_v61, 0.0 }
 0x2b0   :  { %1757 = vadd.xlane.f32.xlu0 %v1756_v51  ;;  %1754 = vadd.xlane.f32.xlu1 %v1753_v38 }
 0x2b1   :  { %v20265_v25 = vpop.eup %18226 }
 0x2b2   :  { %v20267_v37 = vpop.eup %18228  ;;  %v1762_v35 = vsel %vm152_vm0, %v20265_v25, 0.0 }
 0x2b3   :  { %v1759_v52 = vsel %vm152_vm0, %v20267_v37, 0.0 }
 0x2b4   :  { %1763 = vadd.xlane.f32.xlu0 %v1762_v35  ;;  %1760 = vadd.xlane.f32.xlu1 %v1759_v52 }
 0x2b5   :  { %v20273_v31 = vpop.eup %18230 }
 0x2b6   :  { %v20275_v7 = vpop.eup %18232  ;;  %v1765_v21 = vsel %vm152_vm0, %v20273_v31, 0.0 }
 0x2b7   :  { %v1768_v5 = vsel %vm152_vm0, %v20275_v7, 0.0 }
 0x2b8   :  { %1769 = vadd.xlane.f32.xlu0 %v1768_v5  ;;  %1766 = vadd.xlane.f32.xlu1 %v1765_v21  ;;  %v1856_v5 = vsel %vm19558_vm4, %v19819_v49, 0 }
 0x2b9   :  { %v20281_v15 = vpop.eup %18234 }
 0x2ba   :  { %v1771_v4 = vsel %vm152_vm0, %v20281_v15, 0.0 }
 0x2bc   :  { %1772 = vadd.xlane.f32.xlu1 %v1771_v4 }
 0x2e8   :  { %v1680_v46 = vpop.xlane.xlu0 %1679 }
 0x2e9   :  { %18236 = vrcp.f32 %v1680_v46 }
 0x2ec   :  { %v1683_v22 = vpop.xlane.xlu1 %1682 }
 0x2ed   :  { %18238 = vrcp.f32 %v1683_v22 }
 0x2f0   :  { %v1686_v39 = vpop.xlane.xlu0 %1685 }
 0x2f1   :  { %18240 = vrcp.f32 %v1686_v39 }
 0x2f4   :  { %v1689_v57 = vpop.xlane.xlu1 %1688 }
 0x2f5   :  { %18242 = vrcp.f32 %v1689_v57 }
 0x2f6   :  { %v18237_v8 = vpop.eup %18236 }
 0x2f7   :  { %v1775_v51 = vmul.f32 %v18237_v8, %v20130_v41  ;;  %v1857_v8 = vsel %vm19558_vm4, %v19808_v55, 0 }
 0x2f8   :  { %v1692_v44 = vpop.xlane.xlu0 %1691 }
 0x2f9   :  { %18244 = vrcp.f32 %v1692_v44 }
 0x2fa   :  { %v18239_v38 = vpop.eup %18238 }
 0x2fb   :  { %v1777_v35 = vmul.f32 %v18239_v38, %v20135_v1 }
 0x2fc   :  { %v1695_v52 = vpop.xlane.xlu1 %1694 }
 0x2fd   :  { %18246 = vrcp.f32 %v1695_v52  ;;  %v1838_v21 = vpack.c.bf16 %v1777_v35, %v1775_v51 }
 0x2fe   :  { %v18241_v4 = vpop.eup %18240 }
 0x2ff   :  { %16671 = vmatmul.mubr.msk.bf16.vlgmr.msra.gmra.mxu0 %vm152_vm0, %v1838_v21  ;;  %v1779_v1 = vmul.f32 %v18241_v4, %v20140_v48  ;;  %v1858_v21 = vsel %vm19558_vm4, %v19876_v16, 0 }
 0x300   :  { %16681 = vmatpush3.bf16.msra.mxu0 %v1856_v5  ;;  %v1698_v46 = vpop.xlane.xlu0 %1697  ;;  %16682 = vmatprep.mubr.msk.bf16.mxu0 %vm19197_vm1, %v25492_v50 }
 0x301   :  { %16692 = vmatprep.subr.bf16.mxu0 %v25492_v50  ;;  %18248 = vrcp.f32 %v1698_v46 }
 0x302   :  { %v18243_v41 = vpop.eup %18242 }
 0x303   :  { %v1781_v22 = vmul.f32 %v18243_v41, %v20145_v19 }
 0x304   :  { %v1701_v39 = vpop.xlane.xlu1 %1700 }
 0x305   :  { %18250 = vrcp.f32 %v1701_v39  ;;  %v1839_v57 = vpack.c.bf16 %v1781_v22, %v1779_v1  ;;  %v1859_v22 = vsel %vm19558_vm4, %v19860_v36, 0 }
 0x306   :  { %v18245_v44 = vpop.eup %18244 }
 0x307   :  { %16677 = vmatmul.mubr.msk.bf16.vlgmr.msra.gmra.mxu1 %vm152_vm0, %v1839_v57  ;;  %v1783_v19 = vmul.f32 %v18245_v44, %v20150_v17 }
 0x308   :  { %16687 = vmatpush3.bf16.msra.mxu1 %v1857_v8  ;;  %v1704_v38 = vpop.xlane.xlu0 %1703  ;;  %16688 = vmatprep.mubr.msk.bf16.mxu1 %vm19197_vm1, %v25492_v50 }
 0x309   :  { %16698 = vmatprep.subr.bf16.mxu1 %v25492_v50  ;;  %18252 = vrcp.f32 %v1704_v38 }
 0x30a   :  { %v18247_v48 = vpop.eup %18246 }
 0x30b   :  { %v1785_v51 = vmul.f32 %v18247_v48, %v20155_v20  ;;  %v1860_v48 = vsel %vm19558_vm4, %v19905_v12, 0 }
 0x30c   :  { %v1707_v35 = vpop.xlane.xlu1 %1706 }
 0x30d   :  { %18254 = vrcp.f32 %v1707_v35  ;;  %v1840_v52 = vpack.c.bf16 %v1785_v51, %v1783_v19 }
 0x30e   :  { %v18249_v5 = vpop.eup %18248 }
 0x30f   :  { %16683 = vmatmul.mubr.msk.bf16.vlgmr.msra.gmra.mxu0 %vm152_vm0, %v1840_v52  ;;  %v1787_v20 = vmul.f32 %v18249_v5, %v20160_v6 }
 0x310   :  { %16693 = vmatpush3.bf16.msra.mxu0 %v1858_v21  ;;  %v1710_v4 = vpop.xlane.xlu0 %1709  ;;  %16694 = vmatprep.mubr.msk.bf16.mxu0 %vm19197_vm1, %v25492_v50 }
 0x311   :  { %16704 = vmatprep.subr.bf16.mxu0 %v25492_v50  ;;  %18256 = vrcp.f32 %v1710_v4  ;;  %v1861_v4 = vsel %vm19558_vm4, %v19896_v23, 0 }
 0x312   :  { %v18251_v17 = vpop.eup %18250 }
 0x313   :  { %v1789_v46 = vmul.f32 %v18251_v17, %v20165_v11 }
 0x314   :  { %v1713_v41 = vpop.xlane.xlu1 %1712 }
 0x315   :  { %18258 = vrcp.f32 %v1713_v41  ;;  %v1841_v1 = vpack.c.bf16 %v1789_v46, %v1787_v20 }
 0x316   :  { %v18253_v39 = vpop.eup %18252 }
 0x317   :  { %16689 = vmatmul.mubr.msk.bf16.vlgmr.msra.gmra.mxu1 %vm152_vm0, %v1841_v1  ;;  %v1791_v11 = vmul.f32 %v18253_v39, %v20170_v54 }
 0x318   :  { %16699 = vmatpush3.bf16.msra.mxu1 %v1859_v22  ;;  %v1716_v57 = vpop.xlane.xlu0 %1715  ;;  %16700 = vmatprep.mubr.msk.bf16.mxu1 %vm19197_vm1, %v25492_v50 }
 0x319   :  { %16710 = vmatprep.subr.bf16.mxu1 %v25492_v50  ;;  %18260 = vrcp.f32 %v1716_v57  ;;  %v1862_v57 = vsel %vm19558_vm4, %v19934_v58, 0 }
 0x31a   :  { %v18255_v6 = vpop.eup %18254 }
 0x31b   :  { %v1793_v8 = vmul.f32 %v18255_v6, %v20175_v32 }
 0x31c   :  { %v1719_v44 = vpop.xlane.xlu1 %1718 }
 0x31d   :  { %18262 = vrcp.f32 %v1719_v44  ;;  %v1842_v38 = vpack.c.bf16 %v1793_v8, %v1791_v11 }
 0x31e   :  { %v18257_v19 = vpop.eup %18256 }
 0x31f   :  { %16695 = vmatmul.mubr.msk.bf16.vlgmr.msra.gmra.mxu0 %vm152_vm0, %v1842_v38  ;;  %v1795_v32 = vmul.f32 %v18257_v19, %v20180_v26 }
 0x320   :  { %16705 = vmatpush3.bf16.msra.mxu0 %v1860_v48  ;;  %v1722_v51 = vpop.xlane.xlu0 %1721  ;;  %16706 = vmatprep.mubr.msk.bf16.mxu0 %vm19197_vm1, %v25492_v50 }
 0x321   :  { %16716 = vmatprep.subr.bf16.mxu0 %v25492_v50  ;;  %18264 = vrcp.f32 %v1722_v51 }
 0x322   :  { %v18259_v54 = vpop.eup %18258 }
 0x323   :  { %v1797_v35 = vmul.f32 %v18259_v54, %v20186_v42 }
 0x324   :  { %v1728_v52 = vpop.xlane.xlu0 %1727 }
 0x325   :  { %v1725_v21 = vpop.xlane.xlu1 %1724  ;;  %v1843_v5 = vpack.c.bf16 %v1797_v35, %v1795_v32  ;;  %v1863_v32 = vsel %vm19558_vm4, %v19925_v9, 0 }
 0x326   :  { %18266 = vrcp.f32 %v1725_v21  ;;  %v18261_v17 = vpop.eup %18260 }
 0x327   :  { %16701 = vmatmul.mubr.msk.bf16.vlgmr.msra.gmra.mxu1 %vm152_vm0, %v1843_v5  ;;  %18268 = vrcp.f32 %v1728_v52  ;;  %v1799_v46 = vmul.f32 %v18261_v17, %v20192_v33 }
 0x328   :  { %16711 = vmatpush3.bf16.msra.mxu1 %v1861_v4  ;;  %16712 = vmatprep.mubr.msk.bf16.mxu1 %vm19197_vm1, %v25492_v50 }
 0x329   :  { %v1734_v26 = vpop.xlane.xlu0 %1733  ;;  %v1731_v20 = vpop.xlane.xlu1 %1730  ;;  %16722 = vmatprep.subr.bf16.mxu1 %v25492_v50 }
 0x32a   :  { %v18263_v42 = vpop.eup %18262  ;;  %18270 = vrcp.f32 %v1731_v20 }
 0x32b   :  { %v1801_v41 = vmul.f32 %v18263_v42, %v20198_v34  ;;  %18272 = vrcp.f32 %v1734_v26 }
 0x32d   :  { %v1740_v1 = vpop.xlane.xlu0 %1739  ;;  %v1737_v22 = vpop.xlane.xlu1 %1736  ;;  %v1844_v39 = vpack.c.bf16 %v1801_v41, %v1799_v46 }
 0x32e   :  { %18274 = vrcp.f32 %v1737_v22  ;;  %v18265_v6 = vpop.eup %18264 }
 0x32f   :  { %16707 = vmatmul.mubr.msk.bf16.vlgmr.msra.gmra.mxu0 %vm152_vm0, %v1844_v39  ;;  %18276 = vrcp.f32 %v1740_v1  ;;  %v1803_v8 = vmul.f32 %v18265_v6, %v20204_v30 }
 0x330   :  { %16717 = vmatpush3.bf16.msra.mxu0 %v1862_v57  ;;  %16718 = vmatprep.mubr.msk.bf16.mxu0 %vm19197_vm1, %v25492_v50 }
 0x331   :  { %v1746_v33 = vpop.xlane.xlu0 %1745  ;;  %v1743_v11 = vpop.xlane.xlu1 %1742  ;;  %16728 = vmatprep.subr.bf16.mxu0 %v25492_v50 }
 0x332   :  { %18278 = vrcp.f32 %v1743_v11 }
 0x333   :  { %v18267_v34 = vpop.eup %18266  ;;  %18280 = vrcp.f32 %v1746_v33 }
 0x334   :  { %v1805_v44 = vmul.f32 %v18267_v34, %v20212_v13  ;;  %v18269_v19 = vpop.eup %18268 }
 0x335   :  { %v1752_v38 = vpop.xlane.xlu0 %1751  ;;  %v1749_v48 = vpop.xlane.xlu1 %1748  ;;  %v1807_v30 = vmul.f32 %v18269_v19, %v20210_v2  ;;  %v1864_v2 = vsel %vm19558_vm4, %v19963_v43, 0 }
 0x336   :  { %v1845_v51 = vpack.c.bf16 %v1805_v44, %v1803_v8  ;;  %18282 = vrcp.f32 %v1749_v48 }
 0x337   :  { %v18271_v54 = vpop.eup %18270  ;;  %18284 = vrcp.f32 %v1752_v38 }
 0x338   :  { %16713 = vmatmul.mubr.msk.bf16.vlgmr.msra.gmra.mxu1 %vm152_vm0, %v1845_v51  ;;  %v1809_v13 = vmul.f32 %v18271_v54, %v20220_v56  ;;  %v18273_v21 = vpop.eup %18272 }
 0x339   :  { %16723 = vmatpush3.bf16.msra.mxu1 %v1863_v32  ;;  %v1758_v35 = vpop.xlane.xlu0 %1757  ;;  %v1755_v52 = vpop.xlane.xlu1 %1754  ;;  %16724 = vmatprep.mubr.msk.bf16.mxu1 %vm19197_vm1, %v25492_v50  ;;  %v1811_v17 = vmul.f32 %v18273_v21, %v20222_v63 }
 0x33a   :  { %16734 = vmatprep.subr.bf16.mxu1 %v25492_v50  ;;  %18286 = vrcp.f32 %v1755_v52  ;;  %v1846_v5 = vpack.c.bf16 %v1809_v13, %v1807_v30  ;;  %v1869_v13 = vsel %vm19558_vm4, %v19992_v60, 0 }
 0x33b   :  { %v18275_v4 = vpop.eup %18274  ;;  %18288 = vrcp.f32 %v1758_v35 }
 0x33c   :  { %v1813_v26 = vmul.f32 %v18275_v4, %v20232_v0  ;;  %16719 = vmatmul.mubr.msk.bf16.vlgmr.msra.gmra.mxu0 %vm152_vm0, %v1846_v5  ;;  %v18277_v42 = vpop.eup %18276  ;;  %v1865_v0 = vsel %vm19558_vm4, %v19954_v45, 0 }
 0x33d   :  { %v1764_v56 = vpop.xlane.xlu0 %1763  ;;  %v1761_v20 = vpop.xlane.xlu1 %1760  ;;  %16729 = vmatpush3.bf16.msra.mxu0 %v1864_v2  ;;  %16730 = vmatprep.mubr.msk.bf16.mxu0 %vm19197_vm1, %v25492_v50  ;;  %v1815_v22 = vmul.f32 %v18277_v42, %v20230_v59  ;;  %v1866_v59 = vsel %vm19558_vm4, %v19984_v53, 0  ;;  %v25537_v42 = vld [vmem:[#allocation19_spill] sm:$0xff] }
 0x33e   :  { %18290 = vrcp.f32 %v1761_v20  ;;  %v1847_v46 = vpack.c.bf16 %v1813_v26, %v1811_v17  ;;  %16740 = vmatprep.subr.bf16.mxu0 %v25492_v50  ;;  %v25533_v20 = vld [vmem:[#allocation15_spill] sm:$0xff] }
 0x33f   :  { %v18279_v63 = vpop.eup %18278  ;;  %18292 = vrcp.f32 %v1764_v56 }
 0x340   :  { %16725 = vmatmul.mubr.msk.bf16.vlgmr.msra.gmra.mxu1 %vm152_vm0, %v1847_v46  ;;  %v1817_v39 = vmul.f32 %v18279_v63, %v20240_v24  ;;  %v18281_v57 = vpop.eup %18280  ;;  %v25538_v46 = vld [vmem:[#allocation18_spill] sm:$0xff]  ;;  %v25539_v63 = vld [vmem:[#allocation23_spill] sm:$0xff] }
 0x341   :  { %v1770_v41 = vpop.xlane.xlu0 %1769  ;;  %v1767_v1 = vpop.xlane.xlu1 %1766  ;;  %16735 = vmatpush3.bf16.msra.mxu1 %v1865_v0  ;;  %16736 = vmatprep.mubr.msk.bf16.mxu1 %vm19197_vm1, %v25492_v50  ;;  %v1819_v11 = vmul.f32 %v18281_v57, %v20242_v40  ;;  %v1867_v40 = vsel %vm19558_vm4, %v19978_v10, 0  ;;  %v25540_v0 = vld [vmem:[#allocation22_spill] sm:$0xff]  ;;  %v25545_v57 = vld [vmem:[#allocation43_spill] sm:$0xff] }
 0x342   :  { %18294 = vrcp.f32 %v1767_v1  ;;  %v1848_v6 = vpack.c.bf16 %v1817_v39, %v1815_v22  ;;  %16746 = vmatprep.subr.bf16.mxu1 %v25492_v50  ;;  %v25542_v1 = vld [vmem:[#allocation26_spill] sm:$0xff]  ;;  %v25543_v22 = vld [vmem:[#allocation35_spill] sm:$0xff] }
 0x343   :  { %v18283_v33 = vpop.eup %18282  ;;  %18296 = vrcp.f32 %v1770_v41  ;;  %v25541_v41 = vld [vmem:[#allocation27_spill] sm:$0xff]  ;;  %v25544_v39 = vld [vmem:[#allocation34_spill] sm:$0xff] }
 0x344   :  { %v1821_v34 = vmul.f32 %v18283_v33, %v20251_v62  ;;  %16731 = vmatmul.mubr.msk.bf16.vlgmr.msra.gmra.mxu0 %vm152_vm0, %v1848_v6  ;;  %v18285_v8 = vpop.eup %18284  ;;  %v25546_v6 = vld [vmem:[#allocation42_spill] sm:$0xff]  ;;  %v25547_v33 = vld [vmem:[#allocation51_spill] sm:$0xff] }
 0x345   :  { %v1773_v24 = vpop.xlane.xlu1 %1772  ;;  %16741 = vmatpush3.bf16.msra.mxu0 %v1866_v59  ;;  %16742 = vmatprep.mubr.msk.bf16.mxu0 %vm19197_vm1, %v25492_v50  ;;  %v1823_v62 = vmul.f32 %v18285_v8, %v20249_v27  ;;  %v1868_v27 = vsel %vm19558_vm4, %v19995_v47, 0  ;;  %v25550_v59 = vld [vmem:[#allocation57_spill] sm:$0xff]  ;;  %vm6219_vm4 = vmpackc.low %vm21716_vm3, %vm21716_vm3  ;;  %vm11627_vm3 = vcmp.lt.s32.totalorder %v19532_v3, 28 }
 0x346   :  { %18298 = vrcp.f32 %v1773_v24  ;;  %v1849_v44 = vpack.c.bf16 %v1821_v34, %v1819_v11  ;;  %16752 = vmatprep.subr.bf16.mxu0 %v25492_v50  ;;  %v25548_v11 = vld [vmem:[#allocation49_spill] sm:$0xff]  ;;  %v25549_v34 = vld [vmem:[#allocation28_spill] sm:$0xff]  ;;  %v25551_v24 = vld [vmem:[#allocation59_spill] sm:$0xff] }
 0x347   :  { %v18287_v38 = vpop.eup %18286  ;;  %v25552_v8 = vld [vmem:[#allocation33_spill] sm:$0xff] }
 0x348   :  { %16737 = vmatmul.mubr.msk.bf16.vlgmr.msra.gmra.mxu1 %vm152_vm0, %v1849_v44  ;;  %v1825_v48 = vmul.f32 %v18287_v38, %v20257_v28  ;;  %v18289_v19 = vpop.eup %18288  ;;  %v25553_v44 = vld [vmem:[#allocation36_spill] sm:$0xff]  ;;  %v25554_v38 = vld [vmem:[#allocation61_spill] sm:$0xff] }
 0x349   :  { %16747 = vmatpush3.bf16.msra.mxu1 %v1867_v40  ;;  %16748 = vmatprep.mubr.msk.bf16.mxu1 %vm19197_vm1, %v25492_v50  ;;  %v1827_v32 = vmul.f32 %v18289_v19, %v20259_v61  ;;  %v25555_v40 = vld [vmem:[#allocation62_spill] sm:$0xff]  ;;  %v25558_v19 = vld [vmem:[#allocation63_spill] sm:$0xff] }
 0x34a   :  { %v1850_v51 = vpack.c.bf16 %v1825_v48, %v1823_v62  ;;  %16758 = vmatprep.subr.bf16.mxu1 %v25492_v50  ;;  %v25556_v62 = vld [vmem:[#allocation41_spill] sm:$0xff]  ;;  %v25557_v48 = vld [vmem:[#allocation44_spill] sm:$0xff] }
 0x34b   :  { %v18291_v54 = vpop.eup %18290 }
 0x34c   :  { %v1829_v35 = vmul.f32 %v18291_v54, %v20267_v37  ;;  %16743 = vmatmul.mubr.msk.bf16.vlgmr.msra.gmra.mxu0 %vm152_vm0, %v1850_v51  ;;  %v18293_v28 = vpop.eup %18292  ;;  %v25559_v51 = vld [vmem:[#allocation64_spill] sm:$0xff]  ;;  %v25560_v54 = vld [vmem:[#allocation50_spill] sm:$0xff] }
 0x34d   :  { %16753 = vmatpush3.bf16.msra.mxu0 %v1868_v27  ;;  %16754 = vmatprep.mubr.msk.bf16.mxu0 %vm19197_vm1, %v25492_v50  ;;  %v1831_v21 = vmul.f32 %v18293_v28, %v20265_v25  ;;  %v25532_v25 = vmov 0   ;;  %v25563_v27 = vld [vmem:[#allocation66_spill] sm:$0xff] }
 0x34e   :  { %v1851_v52 = vpack.c.bf16 %v1829_v35, %v1827_v32  ;;  %16764 = vmatprep.subr.bf16.mxu0 %v25492_v50  ;;  %v25561_v32 = vld [vmem:[#allocation52_spill] sm:$0xff]  ;;  %v25562_v35 = vld [vmem:[#allocation65_spill] sm:$0xff]  ;;  %v25564_v28 = vld [vmem:[#allocation58_spill] sm:$0xff] }
 0x34f   :  { %v18295_v61 = vpop.eup %18294 }
 0x350   :  { %v18297_v37 = vpop.eup %18296  ;;  %16749 = vmatmul.mubr.msk.bf16.vlgmr.msra.gmra.mxu1 %vm152_vm0, %v1851_v52  ;;  %v1833_v5 = vmul.f32 %v18295_v61, %v20273_v31  ;;  %v2612_v31 = vsel %vm2611_vm8, 65537, %v25532_v25  ;;  %v25565_v52 = vld [vmem:[#allocation60_spill] sm:$0xff]  ;;  %vm22371_vm8 = vmand %vm8018_vm6, %vm8019_vm7  ;;  %vm13430_vm7 = vcmp.ge.s32.totalorder %v19532_v3, 28 }
 0x351   :  { %16759 = vmatpush3.bf16.msra.mxu1 %v1869_v13  ;;  %16760 = vmatprep.mubr.msk.bf16.mxu1 %vm19197_vm1, %v25492_v50  ;;  %v1835_v26 = vmul.f32 %v18297_v37, %v20275_v7  ;;  %v2616_v56 = vrot.slane %v2612_v31, %v19542_v14  ;;  %v25566_v61 = vld [vmem:[#allocation68_spill] sm:$0xff]  ;;  %v25567_v37 = vld [vmem:[#allocation67_spill] sm:$0xff]  ;;  %v4416_v7 = vsel %vm4415_vm13, 65537, %v25532_v25  ;;  %vm23026_vm13 = vmand %vm9822_vm11, %vm9823_vm12 }
 0x352   :  { %v1852_v17 = vpack.c.bf16 %v1833_v5, %v1831_v21  ;;  %16770 = vmatprep.subr.bf16.mxu1 %v25492_v50 }
 0x353   :  { %v18299_v4 = vpop.eup %18298  ;;  %vm20436_vm9 = vcmp.ne.s16.totalorder %v2616_v56, 0 }
 0x354   :  { %v1837_v29 = vmul.f32 %v18299_v4, %v20281_v15  ;;  %16755 = vmatmul.mubr.msk.bf16.vlgmr.msra.gmra.mxu0 %vm152_vm0, %v1852_v17  ;;  %v25536_v15 = vld [vmem:[#allocation14_spill] sm:$0xff]  ;;  %v3658_v30 = vsel %vm20436_vm9, %v25565_v52, 0  ;;  %v3659_v13 = vsel %vm20436_vm9, %v25567_v37, 0 }
 0x355   :  { %16765 = vmatpush3.bf16.xpose.msra.mxu0 %v19545_v18  ;;  %16766 = vmatprep.mubr.msk.bf16.mxu0 %vm19197_vm1, %v25492_v50 }
 0x356   :  { %v1853_v2 = vpack.c.bf16 %v1837_v29, %v1835_v26  ;;  %16776 = vmatprep.subr.bf16.mxu0 %v25492_v50 }
 0x358   :  { %16761 = vmatmul.mubr.msk.bf16.vlgmr.msra.gmra.mxu1 %vm152_vm0, %v1853_v2 }
 0x359   :  { %16771 = vmatpush3.bf16.xpose.msra.mxu1 %v25533_v20  ;;  %16772 = vmatprep.mubr.msk.bf16.mxu1 %vm19197_vm1, %v25492_v50 }
 0x35a   :  { %16782 = vmatprep.subr.bf16.mxu1 %v25492_v50 }
 0x35c   :  { %16767 = vmatmul.mubr.msk.bf16.vlgmr.msra.gmra.mxu0 %vm20436_vm9, %v25536_v15 }
 0x35d   :  { %16777 = vmatpush3.bf16.xpose.msra.mxu0 %v25537_v42  ;;  %16778 = vmatprep.mubr.msk.bf16.mxu0 %vm19197_vm1, %v25492_v50 }
 0x35e   :  { %16788 = vmatprep.subr.bf16.mxu0 %v25492_v50 }
 0x360   :  { %16773 = vmatmul.mubr.msk.bf16.vlgmr.msra.gmra.mxu1 %vm20436_vm9, %v25538_v46 }
 0x361   :  { %16783 = vmatpush3.bf16.xpose.msra.mxu1 %v25539_v63  ;;  %16784 = vmatprep.mubr.msk.bf16.mxu1 %vm19197_vm1, %v25492_v50 }
 0x362   :  { %16794 = vmatprep.subr.bf16.mxu1 %v25492_v50 }
 0x364   :  { %16779 = vmatmul.mubr.msk.bf16.vlgmr.msra.gmra.mxu0 %vm20436_vm9, %v25540_v0 }
 0x365   :  { %16789 = vmatpush3.bf16.xpose.msra.mxu0 %v25541_v41  ;;  %16790 = vmatprep.mubr.msk.bf16.mxu0 %vm19197_vm1, %v25492_v50 }
 0x366   :  { %16800 = vmatprep.subr.bf16.mxu0 %v25492_v50 }
 0x368   :  { %16785 = vmatmul.mubr.msk.bf16.vlgmr.msra.gmra.mxu1 %vm20436_vm9, %v25542_v1 }
 0x369   :  { %16795 = vmatpush3.bf16.xpose.msra.mxu1 %v25543_v22  ;;  %16796 = vmatprep.mubr.msk.bf16.mxu1 %vm19197_vm1, %v25492_v50 }
 0x36a   :  { %16806 = vmatprep.subr.bf16.mxu1 %v25492_v50 }
 0x36c   :  { %16791 = vmatmul.mubr.msk.bf16.vlgmr.msra.gmra.mxu0 %vm20436_vm9, %v25544_v39 }
 0x36d   :  { %16801 = vmatpush3.bf16.xpose.msra.mxu0 %v25545_v57  ;;  %16802 = vmatprep.mubr.msk.bf16.mxu0 %vm19197_vm1, %v25492_v50 }
 0x36e   :  { %16812 = vmatprep.subr.bf16.mxu0 %v25492_v50 }
 0x370   :  { %16797 = vmatmul.mubr.msk.bf16.vlgmr.msra.gmra.mxu1 %vm20436_vm9, %v25546_v6 }
 0x371   :  { %16807 = vmatpush3.bf16.xpose.msra.mxu1 %v25547_v33  ;;  %16808 = vmatprep.mubr.msk.bf16.mxu1 %vm19197_vm1, %v25492_v50 }
 0x372   :  { %16818 = vmatprep.subr.bf16.mxu1 %v25492_v50 }
 0x374   :  { %16803 = vmatmul.mubr.msk.bf16.vlgmr.msra.gmra.mxu0 %vm20436_vm9, %v25548_v11 }
 0x375   :  { %16813 = vmatpush3.bf16.xpose.msra.mxu0 %v25549_v34  ;;  %16814 = vmatprep.mubr.msk.bf16.mxu0 %vm19197_vm1, %v25492_v50 }
 0x376   :  { %16824 = vmatprep.subr.bf16.mxu0 %v25492_v50 }
 0x378   :  { %16809 = vmatmul.mubr.msk.bf16.vlgmr.msra.gmra.mxu1 %vm20436_vm9, %v25550_v59 }
 0x379   :  { %16819 = vmatpush3.bf16.xpose.msra.mxu1 %v25551_v24  ;;  %16820 = vmatprep.mubr.msk.bf16.mxu1 %vm19197_vm1, %v25492_v50 }
 0x37a   :  { %16830 = vmatprep.subr.bf16.mxu1 %v25492_v50 }
 0x37c   :  { %16815 = vmatmul.mubr.msk.bf16.vlgmr.msra.gmra.mxu0 %vm20436_vm9, %v25552_v8 }
 0x37d   :  { %16825 = vmatpush3.bf16.xpose.msra.mxu0 %v25553_v44  ;;  %16826 = vmatprep.mubr.msk.bf16.mxu0 %vm19197_vm1, %v25492_v50 }
 0x37e   :  { %16836 = vmatprep.subr.bf16.mxu0 %v25492_v50 }
 0x380   :  { %16821 = vmatmul.mubr.msk.bf16.vlgmr.msra.gmra.mxu1 %vm20436_vm9, %v25554_v38 }
 0x381   :  { %16831 = vmatpush3.bf16.xpose.msra.mxu1 %v25555_v40  ;;  %16832 = vmatprep.mubr.msk.bf16.mxu1 %vm19197_vm1, %v25492_v50 }
 0x382   :  { %16842 = vmatprep.subr.bf16.mxu1 %v25492_v50 }
 0x384   :  { %16827 = vmatmul.mubr.msk.bf16.vlgmr.msra.gmra.mxu0 %vm20436_vm9, %v25556_v62 }
 0x385   :  { %16837 = vmatpush3.bf16.xpose.msra.mxu0 %v25557_v48  ;;  %16838 = vmatprep.mubr.msk.bf16.mxu0 %vm19197_vm1, %v25492_v50 }
 0x386   :  { %16848 = vmatprep.subr.bf16.mxu0 %v25492_v50 }
 0x388   :  { %16833 = vmatmul.mubr.msk.bf16.vlgmr.msra.gmra.mxu1 %vm20436_vm9, %v25558_v19 }
 0x389   :  { %16843 = vmatpush3.bf16.xpose.msra.mxu1 %v25559_v51  ;;  %16844 = vmatprep.mubr.msk.bf16.mxu1 %vm19197_vm1, %v25492_v50 }
 0x38a   :  { %16854 = vmatprep.subr.bf16.mxu1 %v25492_v50 }
 0x38c   :  { %16839 = vmatmul.mubr.msk.bf16.vlgmr.msra.gmra.mxu0 %vm20436_vm9, %v25560_v54 }
 0x38d   :  { %16849 = vmatpush3.bf16.xpose.msra.mxu0 %v25561_v32  ;;  %16850 = vmatprep.mubr.msk.bf16.mxu0 %vm19197_vm1, %v25492_v50 }
 0x38e   :  { %16860 = vmatprep.subr.bf16.mxu0 %v25492_v50 }
 0x390   :  { %16845 = vmatmul.mubr.msk.bf16.vlgmr.msra.gmra.mxu1 %vm20436_vm9, %v25562_v35 }
 0x391   :  { %16855 = vmatpush3.bf16.xpose.msra.mxu1 %v25563_v27  ;;  %16856 = vmatprep.mubr.msk.bf16.mxu1 %vm19197_vm1, %v25492_v50 }
 0x392   :  { %16866 = vmatprep.subr.bf16.mxu1 %v25492_v50 }
 0x394   :  { %16851 = vmatmul.mubr.msk.bf16.vlgmr.msra.gmra.mxu0 %vm20436_vm9, %v25564_v28 }
 0x395   :  { %16861 = vmatpush3.bf16.msra.mxu0 %v3658_v30  ;;  %16862 = vmatprep.mubr.msk.bf16.mxu0 %vm19197_vm1, %v25492_v50 }
 0x396   :  { %16872 = vmatprep.subr.bf16.mxu0 %v25492_v50 }
 0x398   :  { %16857 = vmatmul.mubr.msk.bf16.vlgmr.msra.gmra.mxu1 %vm20436_vm9, %v25566_v61 }
 0x399   :  { %16867 = vmatpush3.bf16.msra.mxu1 %v3659_v13  ;;  %16868 = vmatprep.mubr.msk.bf16.mxu1 %vm19197_vm1, %v25492_v50 }
 0x39a   :  { %16878 = vmatprep.subr.bf16.mxu1 %v25492_v50 }
 0x3bf   :  { %v20556_v21 = vpop.f32.mrf.mxu0 }
 0x3c0   :  { %25568 = vst [vmem:[#allocation69_spill] sm:$0xff] %v20556_v21 }
 0x3c1   :  { %v16672_v5 = vpop.f32.mrf.mxu0 }
 0x3c3   :  { %v20558_v4 = vpop.f32.mrf.mxu0 }
 0x3c4   :  { %25569 = vst [vmem:[#allocation70_spill] sm:$0xff] %v20558_v4 }
 0x3c5   :  { %v16673_v17 = vpop.f32.mrf.mxu0 }
 0x3c7   :  { %v20560_v26 = vpop.f32.mrf.mxu1 }
 0x3c8   :  { %25570 = vst [vmem:[#allocation71_spill] sm:$0xff] %v20560_v26 }
 0x3c9   :  { %v16678_v29 = vpop.f32.mrf.mxu1 }
 0x3cb   :  { %v20562_v31 = vpop.f32.mrf.mxu1 }
 0x3cc   :  { %25571 = vst [vmem:[#allocation72_spill] sm:$0xff] %v20562_v31 }
 0x3cd   :  { %v16679_v2 = vpop.f32.mrf.mxu1 }
 0x3cf   :  { %v20564_v56 = vpop.f32.mrf.mxu0 }
 0x3d0   :  { %25572 = vst [vmem:[#allocation73_spill] sm:$0xff] %v20564_v56 }
 0x3d1   :  { %v16684_v30 = vpop.f32.mrf.mxu0 }
 0x3d3   :  { %v20566_v13 = vpop.f32.mrf.mxu0 }
 0x3d4   :  { %25573 = vst [vmem:[#allocation74_spill] sm:$0xff] %v20566_v13 }
 0x3d5   :  { %v16685_v37 = vpop.f32.mrf.mxu0 }
 0x3d7   :  { %v20568_v61 = vpop.f32.mrf.mxu1 }
 0x3d8   :  { %25574 = vst [vmem:[#allocation75_spill] sm:$0xff] %v20568_v61 }
 0x3d9   :  { %v16690_v52 = vpop.f32.mrf.mxu1 }
 0x3db   :  { %v20570_v21 = vpop.f32.mrf.mxu1 }
 0x3dc   :  { %25575 = vst [vmem:[#allocation76_spill] sm:$0xff] %v20570_v21 }
 0x3dd   :  { %v16691_v5 = vpop.f32.mrf.mxu1 }
 0x3df   :  { %v20572_v4 = vpop.f32.mrf.mxu0 }
 0x3e0   :  { %25576 = vst [vmem:[#allocation77_spill] sm:$0xff] %v20572_v4 }
 0x3e1   :  { %v16696_v17 = vpop.f32.mrf.mxu0 }
 0x3e3   :  { %v20574_v26 = vpop.f32.mrf.mxu0 }
 0x3e4   :  { %25577 = vst [vmem:[#allocation78_spill] sm:$0xff] %v20574_v26 }
 0x3e5   :  { %v16697_v29 = vpop.f32.mrf.mxu0 }
 0x3e7   :  { %v20576_v31 = vpop.f32.mrf.mxu1 }
 0x3e8   :  { %25578 = vst [vmem:[#allocation79_spill] sm:$0xff] %v20576_v31 }
 0x3e9   :  { %v16702_v2 = vpop.f32.mrf.mxu1 }
 0x3eb   :  { %v20578_v56 = vpop.f32.mrf.mxu1 }
 0x3ec   :  { %25579 = vst [vmem:[#allocation80_spill] sm:$0xff] %v20578_v56 }
 0x3ed   :  { %v16703_v30 = vpop.f32.mrf.mxu1 }
 0x3ef   :  { %v20580_v13 = vpop.f32.mrf.mxu0 }
 0x3f0   :  { %25580 = vst [vmem:[#allocation81_spill] sm:$0xff] %v20580_v13 }
 0x3f1   :  { %v16708_v37 = vpop.f32.mrf.mxu0 }
 0x3f3   :  { %v20582_v61 = vpop.f32.mrf.mxu0 }
 0x3f4   :  { %25581 = vst [vmem:[#allocation82_spill] sm:$0xff] %v20582_v61 }
 0x3f5   :  { %v16709_v52 = vpop.f32.mrf.mxu0 }
 0x3f8   :  { %v20584_v21 = vpop.f32.mrf.mxu1 }
 0x3f9   :  { %25582 = vst [vmem:[#allocation83_spill] sm:$0xff] %v20584_v21 }
 0x3fa   :  { %v16714_v5 = vpop.f32.mrf.mxu1 }
 0x3fc   :  { %v20586_v4 = vpop.f32.mrf.mxu1  ;;  %v20588_v17 = vpop.f32.mrf.mxu0 }
 0x3fd   :  { %25583 = vst [vmem:[#allocation84_spill] sm:$0xff] %v20586_v4  ;;  %25584 = vst [vmem:[#allocation85_spill] sm:$0xff] %v20588_v17 }
 0x3fe   :  { %v16715_v29 = vpop.f32.mrf.mxu1  ;;  %v16720_v26 = vpop.f32.mrf.mxu0 }
 0x400   :  { %v20590_v31 = vpop.f32.mrf.mxu0  ;;  %v20592_v2 = vpop.f32.mrf.mxu1 }
 0x401   :  { %25585 = vst [vmem:[#allocation86_spill] sm:$0xff] %v20590_v31  ;;  %25586 = vst [vmem:[#allocation87_spill] sm:$0xff] %v20592_v2 }
 0x402   :  { %v16721_v30 = vpop.f32.mrf.mxu0  ;;  %v16726_v56 = vpop.f32.mrf.mxu1 }
 0x404   :  { %v20594_v13 = vpop.f32.mrf.mxu1  ;;  %v20596_v37 = vpop.f32.mrf.mxu0 }
 0x405   :  { %25587 = vst [vmem:[#allocation88_spill] sm:$0xff] %v20594_v13  ;;  %25588 = vst [vmem:[#allocation89_spill] sm:$0xff] %v20596_v37 }
 0x406   :  { %v16727_v52 = vpop.f32.mrf.mxu1  ;;  %v16732_v61 = vpop.f32.mrf.mxu0 }
 0x408   :  { %v20598_v21 = vpop.f32.mrf.mxu0  ;;  %v20600_v5 = vpop.f32.mrf.mxu1 }
 0x409   :  { %25589 = vst [vmem:[#allocation90_spill] sm:$0xff] %v20598_v21  ;;  %25590 = vst [vmem:[#allocation91_spill] sm:$0xff] %v20600_v5 }
 0x40a   :  { %v16733_v4 = vpop.f32.mrf.mxu0  ;;  %v16738_v17 = vpop.f32.mrf.mxu1 }
 0x40c   :  { %v20602_v29 = vpop.f32.mrf.mxu1  ;;  %v20604_v26 = vpop.f32.mrf.mxu0 }
 0x40d   :  { %25591 = vst [vmem:[#allocation92_spill] sm:$0xff] %v20602_v29  ;;  %25592 = vst [vmem:[#allocation93_spill] sm:$0xff] %v20604_v26 }
 0x40e   :  { %v16739_v31 = vpop.f32.mrf.mxu1  ;;  %v16744_v2 = vpop.f32.mrf.mxu0 }
 0x410   :  { %v20606_v30 = vpop.f32.mrf.mxu0  ;;  %v20608_v56 = vpop.f32.mrf.mxu1 }
 0x411   :  { %25593 = vst [vmem:[#allocation94_spill] sm:$0xff] %v20606_v30  ;;  %25594 = vst [vmem:[#allocation95_spill] sm:$0xff] %v20608_v56 }
 0x412   :  { %v16745_v13 = vpop.f32.mrf.mxu0  ;;  %v16750_v37 = vpop.f32.mrf.mxu1 }
 0x414   :  { %v20610_v52 = vpop.f32.mrf.mxu1  ;;  %v20612_v61 = vpop.f32.mrf.mxu0 }
 0x415   :  { %25595 = vst [vmem:[#allocation96_spill] sm:$0xff] %v20610_v52  ;;  %25596 = vst [vmem:[#allocation97_spill] sm:$0xff] %v20612_v61 }
 0x416   :  { %v16751_v21 = vpop.f32.mrf.mxu1  ;;  %v16756_v5 = vpop.f32.mrf.mxu0 }
 0x418   :  { %v20614_v4 = vpop.f32.mrf.mxu0  ;;  %v20616_v17 = vpop.f32.mrf.mxu1 }
 0x419   :  { %25597 = vst [vmem:[#allocation98_spill] sm:$0xff] %v20614_v4  ;;  %25598 = vst [vmem:[#allocation99_spill] sm:$0xff] %v20616_v17 }
 0x41a   :  { %v16757_v29 = vpop.f32.mrf.mxu0  ;;  %v16762_v26 = vpop.f32.mrf.mxu1 }
 0x41c   :  { %v20618_v31 = vpop.f32.mrf.mxu1  ;;  %v20620_v2 = vpop.f32.mrf.mxu0 }
 0x41d   :  { %25599 = vst [vmem:[#allocation100_spill] sm:$0xff] %v20618_v31  ;;  %v3290_v13 = vsel %vm152_vm0, %v20620_v2, -inf }
 0x41e   :  { %3291 = vmax.xlane.f32.xlu0 %v3290_v13  ;;  %v16763_v37 = vpop.f32.mrf.mxu1  ;;  %v16768_v52 = vpop.f32.mrf.mxu0 }
 0x420   :  { %v20624_v56 = vpop.f32.mrf.mxu0  ;;  %v20626_v21 = vpop.f32.mrf.mxu1 }
 0x421   :  { %v3293_v5 = vsel %vm152_vm0, %v20624_v56, -inf  ;;  %v3296_v29 = vsel %vm152_vm0, %v20626_v21, -inf }
 0x422   :  { %3294 = vmax.xlane.f32.xlu1 %v3293_v5  ;;  %v16769_v26 = vpop.f32.mrf.mxu0  ;;  %3297 = vmax.xlane.f32.xlu0 %v3296_v29  ;;  %v16774_v31 = vpop.f32.mrf.mxu1 }
 0x424   :  { %v20632_v17 = vpop.f32.mrf.mxu1  ;;  %v20634_v4 = vpop.f32.mrf.mxu0 }
 0x425   :  { %v3302_v52 = vsel %vm152_vm0, %v20634_v4, -inf  ;;  %v3299_v13 = vsel %vm152_vm0, %v20632_v17, -inf }
 0x426   :  { %v16780_v37 = vpop.f32.mrf.mxu0  ;;  %3303 = vmax.xlane.f32.xlu0 %v3302_v52  ;;  %3300 = vmax.xlane.f32.xlu1 %v3299_v13  ;;  %v16775_v61 = vpop.f32.mrf.mxu1 }
 0x428   :  { %v20640_v30 = vpop.f32.mrf.mxu0  ;;  %v20642_v5 = vpop.f32.mrf.mxu1 }
 0x429   :  { %v3305_v31 = vsel %vm152_vm0, %v20640_v30, -inf  ;;  %v3308_v29 = vsel %vm152_vm0, %v20642_v5, -inf }
 0x42a   :  { %v16781_v26 = vpop.f32.mrf.mxu0  ;;  %3306 = vmax.xlane.f32.xlu1 %v3305_v31  ;;  %3309 = vmax.xlane.f32.xlu0 %v3308_v29  ;;  %v16786_v28 = vpop.f32.mrf.mxu1 }
 0x42c   :  { %v20648_v27 = vpop.f32.mrf.mxu1  ;;  %v20650_v37 = vpop.f32.mrf.mxu0 }
 0x42d   :  { %v3314_v61 = vsel %vm152_vm0, %v20650_v37, -inf  ;;  %v3311_v52 = vsel %vm152_vm0, %v20648_v27, -inf }
 0x42e   :  { %v16792_v13 = vpop.f32.mrf.mxu0  ;;  %3315 = vmax.xlane.f32.xlu0 %v3314_v61  ;;  %3312 = vmax.xlane.f32.xlu1 %v3311_v52  ;;  %v16787_v35 = vpop.f32.mrf.mxu1 }
 0x430   :  { %v20656_v32 = vpop.f32.mrf.mxu0  ;;  %v20658_v26 = vpop.f32.mrf.mxu1 }
 0x431   :  { %v3317_v28 = vsel %vm152_vm0, %v20656_v32, -inf  ;;  %v3320_v31 = vsel %vm152_vm0, %v20658_v26, -inf }
 0x432   :  { %v16793_v29 = vpop.f32.mrf.mxu0  ;;  %3318 = vmax.xlane.f32.xlu1 %v3317_v28  ;;  %3321 = vmax.xlane.f32.xlu0 %v3320_v31  ;;  %v16798_v54 = vpop.f32.mrf.mxu1 }
 0x434   :  { %v20664_v51 = vpop.f32.mrf.mxu1  ;;  %v20666_v13 = vpop.f32.mrf.mxu0 }
 0x435   :  { %v3326_v35 = vsel %vm152_vm0, %v20666_v13, -inf  ;;  %v3323_v61 = vsel %vm152_vm0, %v20664_v51, -inf }
 0x436   :  { %v16804_v52 = vpop.f32.mrf.mxu0  ;;  %3327 = vmax.xlane.f32.xlu0 %v3326_v35  ;;  %3324 = vmax.xlane.f32.xlu1 %v3323_v61  ;;  %v16799_v19 = vpop.f32.mrf.mxu1 }
 0x438   :  { %v20672_v48 = vpop.f32.mrf.mxu0  ;;  %v20674_v29 = vpop.f32.mrf.mxu1 }
 0x439   :  { %v3329_v54 = vsel %vm152_vm0, %v20672_v48, -inf  ;;  %v3332_v28 = vsel %vm152_vm0, %v20674_v29, -inf }
 0x43a   :  { %v16805_v31 = vpop.f32.mrf.mxu0  ;;  %3330 = vmax.xlane.f32.xlu1 %v3329_v54  ;;  %3333 = vmax.xlane.f32.xlu0 %v3332_v28  ;;  %v16810_v62 = vpop.f32.mrf.mxu1 }
 0x43c   :  { %v20680_v40 = vpop.f32.mrf.mxu1  ;;  %v20682_v52 = vpop.f32.mrf.mxu0 }
 0x43d   :  { %v3338_v19 = vsel %vm152_vm0, %v20682_v52, -inf  ;;  %v3335_v35 = vsel %vm152_vm0, %v20680_v40, -inf }
 0x43e   :  { %v16816_v61 = vpop.f32.mrf.mxu0  ;;  %3339 = vmax.xlane.f32.xlu0 %v3338_v19  ;;  %3336 = vmax.xlane.f32.xlu1 %v3335_v35  ;;  %v16811_v38 = vpop.f32.mrf.mxu1 }
 0x440   :  { %v20688_v44 = vpop.f32.mrf.mxu0  ;;  %v20690_v31 = vpop.f32.mrf.mxu1 }
 0x441   :  { %v3341_v62 = vsel %vm152_vm0, %v20688_v44, -inf  ;;  %v3344_v54 = vsel %vm152_vm0, %v20690_v31, -inf }
 0x442   :  { %v16817_v28 = vpop.f32.mrf.mxu0  ;;  %3342 = vmax.xlane.f32.xlu1 %v3341_v62  ;;  %3345 = vmax.xlane.f32.xlu0 %v3344_v54  ;;  %v16822_v8 = vpop.f32.mrf.mxu1 }
 0x444   :  { %v20696_v24 = vpop.f32.mrf.mxu1  ;;  %v20698_v61 = vpop.f32.mrf.mxu0 }
 0x445   :  { %v3350_v38 = vsel %vm152_vm0, %v20698_v61, -inf  ;;  %v3347_v19 = vsel %vm152_vm0, %v20696_v24, -inf }
 0x446   :  { %v16828_v35 = vpop.f32.mrf.mxu0  ;;  %3351 = vmax.xlane.f32.xlu0 %v3350_v38  ;;  %3348 = vmax.xlane.f32.xlu1 %v3347_v19  ;;  %v16823_v59 = vpop.f32.mrf.mxu1 }
 0x448   :  { %v20704_v34 = vpop.f32.mrf.mxu0  ;;  %v20706_v28 = vpop.f32.mrf.mxu1 }
 0x449   :  { %v3353_v8 = vsel %vm152_vm0, %v20704_v34, -inf  ;;  %v3356_v62 = vsel %vm152_vm0, %v20706_v28, -inf }
 0x44a   :  { %v16829_v54 = vpop.f32.mrf.mxu0  ;;  %3354 = vmax.xlane.f32.xlu1 %v3353_v8  ;;  %3357 = vmax.xlane.f32.xlu0 %v3356_v62  ;;  %v16834_v11 = vpop.f32.mrf.mxu1 }
 0x44c   :  { %v20712_v33 = vpop.f32.mrf.mxu1  ;;  %v20714_v35 = vpop.f32.mrf.mxu0 }
 0x44d   :  { %v3362_v59 = vsel %vm152_vm0, %v20714_v35, -inf  ;;  %v3359_v38 = vsel %vm152_vm0, %v20712_v33, -inf }
 0x44e   :  { %v16840_v19 = vpop.f32.mrf.mxu0  ;;  %3363 = vmax.xlane.f32.xlu0 %v3362_v59  ;;  %3360 = vmax.xlane.f32.xlu1 %v3359_v38  ;;  %v16835_v6 = vpop.f32.mrf.mxu1 }
 0x450   :  { %v20720_v57 = vpop.f32.mrf.mxu0  ;;  %v20722_v54 = vpop.f32.mrf.mxu1 }
 0x451   :  { %v3365_v11 = vsel %vm152_vm0, %v20720_v57, -inf  ;;  %v3368_v8 = vsel %vm152_vm0, %v20722_v54, -inf }
 0x452   :  { %v16841_v62 = vpop.f32.mrf.mxu0  ;;  %3366 = vmax.xlane.f32.xlu1 %v3365_v11  ;;  %3369 = vmax.xlane.f32.xlu0 %v3368_v8  ;;  %v16846_v39 = vpop.f32.mrf.mxu1 }
 0x454   :  { %v20728_v22 = vpop.f32.mrf.mxu1  ;;  %v20730_v19 = vpop.f32.mrf.mxu0 }
 0x455   :  { %v3374_v6 = vsel %vm152_vm0, %v20730_v19, -inf  ;;  %v3371_v59 = vsel %vm152_vm0, %v20728_v22, -inf }
 0x456   :  { %v16852_v38 = vpop.f32.mrf.mxu0  ;;  %3375 = vmax.xlane.f32.xlu0 %v3374_v6  ;;  %3372 = vmax.xlane.f32.xlu1 %v3371_v59  ;;  %v16847_v1 = vpop.f32.mrf.mxu1 }
 0x458   :  { %v20736_v41 = vpop.f32.mrf.mxu0  ;;  %v20738_v62 = vpop.f32.mrf.mxu1 }
 0x459   :  { %v3377_v39 = vsel %vm152_vm0, %v20736_v41, -inf  ;;  %v3380_v11 = vsel %vm152_vm0, %v20738_v62, -inf }
 0x45a   :  { %v16853_v8 = vpop.f32.mrf.mxu0  ;;  %3378 = vmax.xlane.f32.xlu1 %v3377_v39  ;;  %3381 = vmax.xlane.f32.xlu0 %v3380_v11  ;;  %v16858_v0 = vpop.f32.mrf.mxu1 }
 0x45c   :  { %v20744_v63 = vpop.f32.mrf.mxu1 }
 0x45d   :  { %v3383_v6 = vsel %vm152_vm0, %v20744_v63, -inf }
 0x45e   :  { %3384 = vmax.xlane.f32.xlu1 %v3383_v6  ;;  %v16859_v1 = vpop.f32.mrf.mxu1 }
 0x4a7   :  { %v3292_v59 = vpop.xlane.xlu0 %3291 }
 0x4a8   :  { %v3386_v38 = vsub.f32 %v20620_v2, %v3292_v59 }
 0x4aa   :  { %v3418_v46 = vmul.f32 1.442695, %v3386_v38 }
 0x4ab   :  { %v3295_v42 = vpop.xlane.xlu1 %3294  ;;  %v3298_v15 = vpop.xlane.xlu0 %3297 }
 0x4ac   :  { %18300 = vpow2.f32 %v3418_v46  ;;  %v3387_v20 = vsub.f32 %v20624_v56, %v3295_v42  ;;  %v3388_v39 = vsub.f32 %v20626_v21, %v3298_v15 }
 0x4ae   :  { %v3420_v11 = vmul.f32 1.442695, %v3387_v20  ;;  %v3422_v0 = vmul.f32 1.442695, %v3388_v39 }
 0x4af   :  { %v3304_v8 = vpop.xlane.xlu0 %3303  ;;  %v3301_v14 = vpop.xlane.xlu1 %3300 }
 0x4b0   :  { %18302 = vpow2.f32 %v3420_v11  ;;  %v3390_v18 = vsub.f32 %v20634_v4, %v3304_v8  ;;  %v3389_v6 = vsub.f32 %v20632_v17, %v3301_v14 }
 0x4b1   :  { %18304 = vpow2.f32 %v3422_v0 }
 0x4b2   :  { %v3426_v1 = vmul.f32 1.442695, %v3390_v18  ;;  %v3424_v2 = vmul.f32 1.442695, %v3389_v6 }
 0x4b3   :  { %v3307_v59 = vpop.xlane.xlu1 %3306  ;;  %v3310_v38 = vpop.xlane.xlu0 %3309 }
 0x4b4   :  { %18306 = vpow2.f32 %v3426_v1  ;;  %v3391_v46 = vsub.f32 %v20640_v30, %v3307_v59  ;;  %v3392_v42 = vsub.f32 %v20642_v5, %v3310_v38 }
 0x4b5   :  { %18308 = vpow2.f32 %v3424_v2 }
 0x4b6   :  { %v3428_v20 = vmul.f32 1.442695, %v3391_v46  ;;  %v3430_v15 = vmul.f32 1.442695, %v3392_v42 }
 0x4b7   :  { %v3316_v56 = vpop.xlane.xlu0 %3315  ;;  %v3313_v21 = vpop.xlane.xlu1 %3312 }
 0x4b8   :  { %18310 = vpow2.f32 %v3428_v20  ;;  %v3394_v4 = vsub.f32 %v20650_v37, %v3316_v56  ;;  %v3393_v14 = vsub.f32 %v20648_v27, %v3313_v21 }
 0x4b9   :  { %v20757_v17 = vpop.eup %18300  ;;  %18312 = vpow2.f32 %v3430_v15 }
 0x4ba   :  { %v3434_v18 = vmul.f32 1.442695, %v3394_v4  ;;  %v3432_v39 = vmul.f32 1.442695, %v3393_v14  ;;  %v3482_v30 = vsel %vm152_vm0, %v20757_v17, 0.0 }
 0x4bb   :  { %v3319_v11 = vpop.xlane.xlu1 %3318  ;;  %v3322_v5 = vpop.xlane.xlu0 %3321  ;;  %3483 = vadd.xlane.f32.xlu0 %v3482_v30 }
 0x4bc   :  { %18314 = vpow2.f32 %v3434_v18  ;;  %v3395_v0 = vsub.f32 %v20656_v32, %v3319_v11  ;;  %v3396_v8 = vsub.f32 %v20658_v26, %v3322_v5 }
 0x4bd   :  { %v20763_v6 = vpop.eup %18302  ;;  %18316 = vpow2.f32 %v3432_v39 }
 0x4be   :  { %v20765_v27 = vpop.eup %18304  ;;  %v3436_v37 = vmul.f32 1.442695, %v3395_v0  ;;  %v3438_v1 = vmul.f32 1.442695, %v3396_v8  ;;  %v3485_v2 = vsel %vm152_vm0, %v20763_v6, 0.0 }
 0x4bf   :  { %v3328_v59 = vpop.xlane.xlu0 %3327  ;;  %v3325_v38 = vpop.xlane.xlu1 %3324  ;;  %v3488_v46 = vsel %vm152_vm0, %v20765_v27, 0.0  ;;  %3486 = vadd.xlane.f32.xlu1 %v3485_v2 }
 0x4c0   :  { %18318 = vpow2.f32 %v3436_v37  ;;  %v3398_v32 = vsub.f32 %v20666_v13, %v3328_v59  ;;  %v3397_v26 = vsub.f32 %v20664_v51, %v3325_v38  ;;  %3489 = vadd.xlane.f32.xlu0 %v3488_v46 }
 0x4c1   :  { %v20773_v42 = vpop.eup %18306  ;;  %18320 = vpow2.f32 %v3438_v1 }
 0x4c2   :  { %v20775_v20 = vpop.eup %18308  ;;  %v3442_v15 = vmul.f32 1.442695, %v3398_v32  ;;  %v3440_v56 = vmul.f32 1.442695, %v3397_v26  ;;  %v3494_v21 = vsel %vm152_vm0, %v20773_v42, 0.0 }
 0x4c3   :  { %v3331_v4 = vpop.xlane.xlu1 %3330  ;;  %v3334_v14 = vpop.xlane.xlu0 %3333  ;;  %v3491_v18 = vsel %vm152_vm0, %v20775_v20, 0.0 }
 0x4c4   :  { %18322 = vpow2.f32 %v3442_v15  ;;  %v3399_v13 = vsub.f32 %v20672_v48, %v3331_v4  ;;  %v3400_v51 = vsub.f32 %v20674_v29, %v3334_v14  ;;  %3495 = vadd.xlane.f32.xlu0 %v3494_v21  ;;  %3492 = vadd.xlane.f32.xlu1 %v3491_v18 }
 0x4c5   :  { %v20783_v39 = vpop.eup %18310  ;;  %18324 = vpow2.f32 %v3440_v56 }
 0x4c6   :  { %v20785_v30 = vpop.eup %18312  ;;  %v3444_v11 = vmul.f32 1.442695, %v3399_v13  ;;  %v3446_v5 = vmul.f32 1.442695, %v3400_v51  ;;  %v3497_v0 = vsel %vm152_vm0, %v20783_v39, 0.0 }
 0x4c7   :  { %v3340_v8 = vpop.xlane.xlu0 %3339  ;;  %v3337_v37 = vpop.xlane.xlu1 %3336  ;;  %v3500_v1 = vsel %vm152_vm0, %v20785_v30, 0.0 }
 0x4c8   :  { %18326 = vpow2.f32 %v3444_v11  ;;  %v3402_v48 = vsub.f32 %v20682_v52, %v3340_v8  ;;  %v3401_v29 = vsub.f32 %v20680_v40, %v3337_v37  ;;  %3501 = vadd.xlane.f32.xlu0 %v3500_v1  ;;  %3498 = vadd.xlane.f32.xlu1 %v3497_v0 }
 0x4c9   :  { %v20793_v2 = vpop.eup %18314  ;;  %18328 = vpow2.f32 %v3446_v5 }
 0x4ca   :  { %v20795_v59 = vpop.eup %18316  ;;  %v3450_v38 = vmul.f32 1.442695, %v3402_v48  ;;  %v3448_v46 = vmul.f32 1.442695, %v3401_v29  ;;  %v3506_v32 = vsel %vm152_vm0, %v20793_v2, 0.0 }
 0x4cb   :  { %v3343_v26 = vpop.xlane.xlu1 %3342  ;;  %v3346_v15 = vpop.xlane.xlu0 %3345  ;;  %v3503_v56 = vsel %vm152_vm0, %v20795_v59, 0.0 }
 0x4cc   :  { %18330 = vpow2.f32 %v3450_v38  ;;  %v3403_v40 = vsub.f32 %v20688_v44, %v3343_v26  ;;  %v3404_v52 = vsub.f32 %v20690_v31, %v3346_v15  ;;  %3507 = vadd.xlane.f32.xlu0 %v3506_v32  ;;  %3504 = vadd.xlane.f32.xlu1 %v3503_v56 }
 0x4cd   :  { %v20803_v21 = vpop.eup %18318  ;;  %18332 = vpow2.f32 %v3448_v46 }
 0x4ce   :  { %v20805_v4 = vpop.eup %18320  ;;  %v3452_v14 = vmul.f32 1.442695, %v3403_v40  ;;  %v3454_v18 = vmul.f32 1.442695, %v3404_v52  ;;  %v3509_v13 = vsel %vm152_vm0, %v20803_v21, 0.0 }
 0x4cf   :  { %v3352_v51 = vpop.xlane.xlu0 %3351  ;;  %v3349_v11 = vpop.xlane.xlu1 %3348  ;;  %v3512_v5 = vsel %vm152_vm0, %v20805_v4, 0.0 }
 0x4d0   :  { %18334 = vpow2.f32 %v3452_v14  ;;  %v3406_v44 = vsub.f32 %v20698_v61, %v3352_v51  ;;  %v3405_v31 = vsub.f32 %v20696_v24, %v3349_v11  ;;  %3513 = vadd.xlane.f32.xlu0 %v3512_v5  ;;  %3510 = vadd.xlane.f32.xlu1 %v3509_v13 }
 0x4d1   :  { %v20813_v0 = vpop.eup %18322  ;;  %18336 = vpow2.f32 %v3454_v18 }
 0x4d2   :  { %v20815_v8 = vpop.eup %18324  ;;  %v3458_v37 = vmul.f32 1.442695, %v3406_v44  ;;  %v3456_v1 = vmul.f32 1.442695, %v3405_v31  ;;  %v3518_v48 = vsel %vm152_vm0, %v20813_v0, 0.0 }
 0x4d3   :  { %v3355_v29 = vpop.xlane.xlu1 %3354  ;;  %v3358_v38 = vpop.xlane.xlu0 %3357  ;;  %v3515_v46 = vsel %vm152_vm0, %v20815_v8, 0.0 }
 0x4d4   :  { %18338 = vpow2.f32 %v3458_v37  ;;  %v3407_v24 = vsub.f32 %v20704_v34, %v3355_v29  ;;  %v3408_v61 = vsub.f32 %v20706_v28, %v3358_v38  ;;  %3519 = vadd.xlane.f32.xlu0 %v3518_v48  ;;  %3516 = vadd.xlane.f32.xlu1 %v3515_v46 }
 0x4d5   :  { %v20823_v32 = vpop.eup %18326  ;;  %18340 = vpow2.f32 %v3456_v1 }
 0x4d6   :  { %v20825_v26 = vpop.eup %18328  ;;  %v3460_v15 = vmul.f32 1.442695, %v3407_v24  ;;  %v3462_v56 = vmul.f32 1.442695, %v3408_v61  ;;  %v3521_v40 = vsel %vm152_vm0, %v20823_v32, 0.0 }
 0x4d7   :  { %v3364_v52 = vpop.xlane.xlu0 %3363  ;;  %v3361_v14 = vpop.xlane.xlu1 %3360  ;;  %v3524_v18 = vsel %vm152_vm0, %v20825_v26, 0.0 }
 0x4d8   :  { %18342 = vpow2.f32 %v3460_v15  ;;  %v3410_v34 = vsub.f32 %v20714_v35, %v3364_v52  ;;  %v3409_v28 = vsub.f32 %v20712_v33, %v3361_v14  ;;  %3525 = vadd.xlane.f32.xlu0 %v3524_v18  ;;  %3522 = vadd.xlane.f32.xlu1 %v3521_v40 }
 0x4d9   :  { %v20833_v13 = vpop.eup %18330  ;;  %18344 = vpow2.f32 %v3462_v56 }
 0x4da   :  { %v20835_v51 = vpop.eup %18332  ;;  %v3466_v11 = vmul.f32 1.442695, %v3410_v34  ;;  %v3464_v5 = vmul.f32 1.442695, %v3409_v28  ;;  %v3530_v44 = vsel %vm152_vm0, %v20833_v13, 0.0 }
 0x4db   :  { %v3367_v31 = vpop.xlane.xlu1 %3366  ;;  %v3370_v37 = vpop.xlane.xlu0 %3369  ;;  %v3527_v1 = vsel %vm152_vm0, %v20835_v51, 0.0 }
 0x4dc   :  { %18346 = vpow2.f32 %v3466_v11  ;;  %v3411_v33 = vsub.f32 %v20720_v57, %v3367_v31  ;;  %v3412_v35 = vsub.f32 %v20722_v54, %v3370_v37  ;;  %3531 = vadd.xlane.f32.xlu0 %v3530_v44  ;;  %3528 = vadd.xlane.f32.xlu1 %v3527_v1 }
 0x4dd   :  { %v20843_v48 = vpop.eup %18334  ;;  %18348 = vpow2.f32 %v3464_v5 }
 0x4de   :  { %v20845_v29 = vpop.eup %18336  ;;  %v3468_v38 = vmul.f32 1.442695, %v3411_v33  ;;  %v3470_v46 = vmul.f32 1.442695, %v3412_v35  ;;  %v3533_v24 = vsel %vm152_vm0, %v20843_v48, 0.0 }
 0x4df   :  { %v3376_v61 = vpop.xlane.xlu0 %3375  ;;  %v3373_v15 = vpop.xlane.xlu1 %3372  ;;  %v3536_v56 = vsel %vm152_vm0, %v20845_v29, 0.0 }
 0x4e0   :  { %18350 = vpow2.f32 %v3468_v38  ;;  %v3414_v57 = vsub.f32 %v20730_v19, %v3376_v61  ;;  %v3413_v54 = vsub.f32 %v20728_v22, %v3373_v15  ;;  %3537 = vadd.xlane.f32.xlu0 %v3536_v56  ;;  %3534 = vadd.xlane.f32.xlu1 %v3533_v24 }
 0x4e1   :  { %v20853_v40 = vpop.eup %18338  ;;  %18352 = vpow2.f32 %v3470_v46 }
 0x4e2   :  { %v20855_v52 = vpop.eup %18340  ;;  %v3474_v14 = vmul.f32 1.442695, %v3414_v57  ;;  %v3472_v18 = vmul.f32 1.442695, %v3413_v54  ;;  %v3542_v34 = vsel %vm152_vm0, %v20853_v40, 0.0 }
 0x4e3   :  { %v3379_v28 = vpop.xlane.xlu1 %3378  ;;  %v3382_v11 = vpop.xlane.xlu0 %3381  ;;  %v3539_v5 = vsel %vm152_vm0, %v20855_v52, 0.0 }
 0x4e4   :  { %18354 = vpow2.f32 %v3474_v14  ;;  %v3415_v22 = vsub.f32 %v20736_v41, %v3379_v28  ;;  %3543 = vadd.xlane.f32.xlu0 %v3542_v34  ;;  %v3416_v19 = vsub.f32 %v20738_v62, %v3382_v11  ;;  %3540 = vadd.xlane.f32.xlu1 %v3539_v5 }
 0x4e5   :  { %v20863_v44 = vpop.eup %18342  ;;  %18356 = vpow2.f32 %v3472_v18 }
 0x4e6   :  { %v20865_v31 = vpop.eup %18344  ;;  %v3476_v37 = vmul.f32 1.442695, %v3415_v22  ;;  %v3478_v1 = vmul.f32 1.442695, %v3416_v19  ;;  %v3545_v33 = vsel %vm152_vm0, %v20863_v44, 0.0 }
 0x4e7   :  { %v3548_v35 = vsel %vm152_vm0, %v20865_v31, 0.0  ;;  %v3385_v38 = vpop.xlane.xlu1 %3384 }
 0x4e8   :  { %18358 = vpow2.f32 %v3476_v37  ;;  %3549 = vadd.xlane.f32.xlu0 %v3548_v35  ;;  %3546 = vadd.xlane.f32.xlu1 %v3545_v33  ;;  %v3417_v41 = vsub.f32 %v20744_v63, %v3385_v38 }
 0x4e9   :  { %v20872_v62 = vpop.eup %18346  ;;  %18360 = vpow2.f32 %v3478_v1 }
 0x4ea   :  { %v20874_v46 = vpop.eup %18348  ;;  %v3480_v24 = vmul.f32 1.442695, %v3417_v41  ;;  %v3554_v61 = vsel %vm152_vm0, %v20872_v62, 0.0 }
 0x4eb   :  { %v3551_v15 = vsel %vm152_vm0, %v20874_v46, 0.0 }
 0x4ec   :  { %18362 = vpow2.f32 %v3480_v24  ;;  %3555 = vadd.xlane.f32.xlu0 %v3554_v61  ;;  %3552 = vadd.xlane.f32.xlu1 %v3551_v15 }
 0x4ed   :  { %v20880_v56 = vpop.eup %18350 }
 0x4ee   :  { %v20882_v57 = vpop.eup %18352  ;;  %v3557_v63 = vsel %vm152_vm0, %v20880_v56, 0.0 }
 0x4ef   :  { %v3560_v54 = vsel %vm152_vm0, %v20882_v57, 0.0 }
 0x4f0   :  { %3561 = vadd.xlane.f32.xlu0 %v3560_v54  ;;  %3558 = vadd.xlane.f32.xlu1 %v3557_v63 }
 0x4f1   :  { %v20888_v14 = vpop.eup %18354 }
 0x4f2   :  { %v20890_v18 = vpop.eup %18356  ;;  %v3566_v34 = vsel %vm152_vm0, %v20888_v14, 0.0 }
 0x4f3   :  { %v3563_v28 = vsel %vm152_vm0, %v20890_v18, 0.0 }
 0x4f4   :  { %3567 = vadd.xlane.f32.xlu0 %v3566_v34  ;;  %3564 = vadd.xlane.f32.xlu1 %v3563_v28 }
 0x4f5   :  { %v20896_v11 = vpop.eup %18358 }
 0x4f6   :  { %v20898_v5 = vpop.eup %18360  ;;  %v3569_v22 = vsel %vm152_vm0, %v20896_v11, 0.0 }
 0x4f7   :  { %v3572_v19 = vsel %vm152_vm0, %v20898_v5, 0.0 }
 0x4f8   :  { %3573 = vadd.xlane.f32.xlu0 %v3572_v19  ;;  %3570 = vadd.xlane.f32.xlu1 %v3569_v22 }
 0x4f9   :  { %v20904_v37 = vpop.eup %18362 }
 0x4fa   :  { %v3575_v1 = vsel %vm152_vm0, %v20904_v37, 0.0 }
 0x4fc   :  { %3576 = vadd.xlane.f32.xlu1 %v3575_v1 }
 0x544   :  { %v3484_v33 = vpop.xlane.xlu0 %3483 }
 0x545   :  { %18364 = vrcp.f32 %v3484_v33 }
 0x548   :  { %v3487_v35 = vpop.xlane.xlu1 %3486 }
 0x549   :  { %v3490_v38 = vpop.xlane.xlu0 %3489  ;;  %18366 = vrcp.f32 %v3487_v35 }
 0x54a   :  { %18368 = vrcp.f32 %v3490_v38 }
 0x54d   :  { %v3496_v41 = vpop.xlane.xlu0 %3495  ;;  %v3493_v24 = vpop.xlane.xlu1 %3492 }
 0x54e   :  { %18370 = vrcp.f32 %v3493_v24 }
 0x54f   :  { %18372 = vrcp.f32 %v3496_v41  ;;  %v3660_v41 = vsel %vm20436_vm9, %v19819_v49, 0 }
 0x551   :  { %v3502_v61 = vpop.xlane.xlu0 %3501  ;;  %v3499_v15 = vpop.xlane.xlu1 %3498 }
 0x552   :  { %18374 = vrcp.f32 %v3499_v15  ;;  %v18365_v63 = vpop.eup %18364 }
 0x553   :  { %18376 = vrcp.f32 %v3502_v61  ;;  %v3579_v22 = vmul.f32 %v18365_v63, %v20757_v17 }
 0x555   :  { %v3508_v54 = vpop.xlane.xlu0 %3507  ;;  %v3505_v34 = vpop.xlane.xlu1 %3504 }
 0x556   :  { %v18367_v28 = vpop.eup %18366  ;;  %18378 = vrcp.f32 %v3505_v34 }
 0x557   :  { %v3581_v19 = vmul.f32 %v18367_v28, %v20763_v6  ;;  %18380 = vrcp.f32 %v3508_v54  ;;  %v18369_v38 = vpop.eup %18368 }
 0x558   :  { %v3583_v17 = vmul.f32 %v18369_v38, %v20765_v27  ;;  %v3661_v27 = vsel %vm20436_vm9, %v19808_v55, 0  ;;  %v3662_v38 = vsel %vm20436_vm9, %v19876_v16, 0 }
 0x559   :  { %v3514_v1 = vpop.xlane.xlu0 %3513  ;;  %v3511_v33 = vpop.xlane.xlu1 %3510  ;;  %v3642_v35 = vpack.c.bf16 %v3581_v19, %v3579_v22 }
 0x55a   :  { %18382 = vrcp.f32 %v3511_v33 }
 0x55b   :  { %16863 = vmatmul.mubr.msk.bf16.vlgmr.msra.gmra.mxu0 %vm152_vm0, %v3642_v35  ;;  %v18371_v24 = vpop.eup %18370  ;;  %18384 = vrcp.f32 %v3514_v1 }
 0x55c   :  { %16873 = vmatpush3.bf16.msra.mxu0 %v3660_v41  ;;  %16874 = vmatprep.mubr.msk.bf16.mxu0 %vm19197_vm1, %v25492_v50  ;;  %v3585_v6 = vmul.f32 %v18371_v24, %v20775_v20  ;;  %v18373_v63 = vpop.eup %18372 }
 0x55d   :  { %v3520_v61 = vpop.xlane.xlu0 %3519  ;;  %v3517_v15 = vpop.xlane.xlu1 %3516  ;;  %16884 = vmatprep.subr.bf16.mxu0 %v25492_v50  ;;  %v3587_v28 = vmul.f32 %v18373_v63, %v20773_v42 }
 0x55e   :  { %18386 = vrcp.f32 %v3517_v15  ;;  %v3643_v54 = vpack.c.bf16 %v3585_v6, %v3583_v17  ;;  %v3663_v15 = vsel %vm20436_vm9, %v19860_v36, 0 }
 0x55f   :  { %v18375_v34 = vpop.eup %18374  ;;  %18388 = vrcp.f32 %v3520_v61 }
 0x560   :  { %v3589_v22 = vmul.f32 %v18375_v34, %v20783_v39  ;;  %16869 = vmatmul.mubr.msk.bf16.vlgmr.msra.gmra.mxu1 %vm152_vm0, %v3643_v54  ;;  %v18377_v1 = vpop.eup %18376 }
 0x561   :  { %v3526_v20 = vpop.xlane.xlu0 %3525  ;;  %v3523_v19 = vpop.xlane.xlu1 %3522  ;;  %16879 = vmatpush3.bf16.msra.mxu1 %v3661_v27  ;;  %16880 = vmatprep.mubr.msk.bf16.mxu1 %vm19197_vm1, %v25492_v50  ;;  %v3591_v39 = vmul.f32 %v18377_v1, %v20785_v30  ;;  %v3664_v27 = vsel %vm20436_vm9, %v19905_v12, 0 }
 0x562   :  { %18390 = vrcp.f32 %v3523_v19  ;;  %v3644_v33 = vpack.c.bf16 %v3589_v22, %v3587_v28  ;;  %16890 = vmatprep.subr.bf16.mxu1 %v25492_v50 }
 0x563   :  { %v18379_v42 = vpop.eup %18378  ;;  %18392 = vrcp.f32 %v3526_v20 }
 0x564   :  { %v3593_v35 = vmul.f32 %v18379_v42, %v20795_v59  ;;  %16875 = vmatmul.mubr.msk.bf16.vlgmr.msra.gmra.mxu0 %vm152_vm0, %v3644_v33  ;;  %v18381_v17 = vpop.eup %18380 }
 0x565   :  { %v3532_v41 = vpop.xlane.xlu0 %3531  ;;  %v3529_v24 = vpop.xlane.xlu1 %3528  ;;  %16885 = vmatpush3.bf16.msra.mxu0 %v3662_v38  ;;  %16886 = vmatprep.mubr.msk.bf16.mxu0 %vm19197_vm1, %v25492_v50  ;;  %v3595_v59 = vmul.f32 %v18381_v17, %v20793_v2 }
 0x566   :  { %18394 = vrcp.f32 %v3529_v24  ;;  %v3645_v6 = vpack.c.bf16 %v3593_v35, %v3591_v39  ;;  %16896 = vmatprep.subr.bf16.mxu0 %v25492_v50  ;;  %v3665_v39 = vsel %vm20436_vm9, %v19896_v23, 0 }
 0x567   :  { %v18383_v30 = vpop.eup %18382  ;;  %18396 = vrcp.f32 %v3532_v41 }
 0x568   :  { %v3597_v61 = vmul.f32 %v18383_v30, %v20803_v21  ;;  %16881 = vmatmul.mubr.msk.bf16.vlgmr.msra.gmra.mxu1 %vm152_vm0, %v3645_v6  ;;  %v18385_v34 = vpop.eup %18384  ;;  %v3666_v6 = vsel %vm20436_vm9, %v19934_v58, 0 }
 0x569   :  { %v3538_v63 = vpop.xlane.xlu0 %3537  ;;  %v3535_v54 = vpop.xlane.xlu1 %3534  ;;  %16891 = vmatpush3.bf16.msra.mxu1 %v3663_v15  ;;  %16892 = vmatprep.mubr.msk.bf16.mxu1 %vm19197_vm1, %v25492_v50  ;;  %v3599_v21 = vmul.f32 %v18385_v34, %v20805_v4 }
 0x56a   :  { %18398 = vrcp.f32 %v3535_v54  ;;  %v3646_v28 = vpack.c.bf16 %v3597_v61, %v3595_v59  ;;  %16902 = vmatprep.subr.bf16.mxu1 %v25492_v50  ;;  %v3667_v54 = vsel %vm20436_vm9, %v19925_v9, 0 }
 0x56b   :  { %v18387_v2 = vpop.eup %18386  ;;  %18400 = vrcp.f32 %v3538_v63 }
 0x56c   :  { %v3601_v22 = vmul.f32 %v18387_v2, %v20815_v8  ;;  %16887 = vmatmul.mubr.msk.bf16.vlgmr.msra.gmra.mxu0 %vm152_vm0, %v3646_v28  ;;  %v18389_v1 = vpop.eup %18388 }
 0x56d   :  { %v3544_v20 = vpop.xlane.xlu0 %3543  ;;  %v3541_v19 = vpop.xlane.xlu1 %3540  ;;  %16897 = vmatpush3.bf16.msra.mxu0 %v3664_v27  ;;  %16898 = vmatprep.mubr.msk.bf16.mxu0 %vm19197_vm1, %v25492_v50  ;;  %v3603_v8 = vmul.f32 %v18389_v1, %v20813_v0  ;;  %v3668_v27 = vsel %vm20436_vm9, %v19963_v43, 0 }
 0x56e   :  { %18402 = vrcp.f32 %v3541_v19  ;;  %v3647_v33 = vpack.c.bf16 %v3601_v22, %v3599_v21  ;;  %16908 = vmatprep.subr.bf16.mxu0 %v25492_v50 }
 0x56f   :  { %v18391_v4 = vpop.eup %18390  ;;  %18404 = vrcp.f32 %v3544_v20 }
 0x570   :  { %v3605_v42 = vmul.f32 %v18391_v4, %v20823_v32  ;;  %16893 = vmatmul.mubr.msk.bf16.vlgmr.msra.gmra.mxu1 %vm152_vm0, %v3647_v33  ;;  %v18393_v41 = vpop.eup %18392 }
 0x571   :  { %v3550_v35 = vpop.xlane.xlu0 %3549  ;;  %v3547_v38 = vpop.xlane.xlu1 %3546  ;;  %16903 = vmatpush3.bf16.msra.mxu1 %v3665_v39  ;;  %16904 = vmatprep.mubr.msk.bf16.mxu1 %vm19197_vm1, %v25492_v50  ;;  %v3607_v32 = vmul.f32 %v18393_v41, %v20825_v26 }
 0x572   :  { %18406 = vrcp.f32 %v3547_v38  ;;  %v3648_v24 = vpack.c.bf16 %v3605_v42, %v3603_v8  ;;  %16914 = vmatprep.subr.bf16.mxu1 %v25492_v50  ;;  %v3669_v8 = vsel %vm20436_vm9, %v19954_v45, 0 }
 0x573   :  { %v18395_v0 = vpop.eup %18394  ;;  %18408 = vrcp.f32 %v3550_v35 }
 0x574   :  { %v3609_v17 = vmul.f32 %v18395_v0, %v20835_v51  ;;  %16899 = vmatmul.mubr.msk.bf16.vlgmr.msra.gmra.mxu0 %vm152_vm0, %v3648_v24  ;;  %v18397_v61 = vpop.eup %18396  ;;  %v3670_v24 = vsel %vm20436_vm9, %v19984_v53, 0 }
 0x575   :  { %v3556_v30 = vpop.xlane.xlu0 %3555  ;;  %v3553_v59 = vpop.xlane.xlu1 %3552  ;;  %16909 = vmatpush3.bf16.msra.mxu0 %v3666_v6  ;;  %16910 = vmatprep.mubr.msk.bf16.mxu0 %vm19197_vm1, %v25492_v50  ;;  %v3611_v51 = vmul.f32 %v18397_v61, %v20833_v13 }
 0x576   :  { %18410 = vrcp.f32 %v3553_v59  ;;  %v3649_v15 = vpack.c.bf16 %v3609_v17, %v3607_v32  ;;  %16920 = vmatprep.subr.bf16.mxu0 %v25492_v50 }
 0x577   :  { %v18399_v26 = vpop.eup %18398  ;;  %18412 = vrcp.f32 %v3556_v30  ;;  %v3671_v30 = vsel %vm20436_vm9, %v19978_v10, 0 }
 0x578   :  { %v3613_v63 = vmul.f32 %v18399_v26, %v20843_v48  ;;  %16905 = vmatmul.mubr.msk.bf16.vlgmr.msra.gmra.mxu1 %vm152_vm0, %v3649_v15  ;;  %v18401_v2 = vpop.eup %18400  ;;  %v3672_v26 = vsel %vm20436_vm9, %v19995_v47, 0 }
 0x579   :  { %v3562_v34 = vpop.xlane.xlu0 %3561  ;;  %v3559_v28 = vpop.xlane.xlu1 %3558  ;;  %16915 = vmatpush3.bf16.msra.mxu1 %v3667_v54  ;;  %16916 = vmatprep.mubr.msk.bf16.mxu1 %vm19197_vm1, %v25492_v50  ;;  %v3615_v48 = vmul.f32 %v18401_v2, %v20845_v29  ;;  %v3673_v2 = vsel %vm20436_vm9, %v19992_v60, 0  ;;  %vm8023_vm9 = vmpackc.low %vm22371_vm8, %vm22371_vm8  ;;  %vm13431_vm8 = vcmp.lt.s32.totalorder %v19532_v3, 32  ;;  %v26185_v3 = vld [vmem:[#allocation67_spill] sm:$0xff] }
 0x57a   :  { %18414 = vrcp.f32 %v3559_v28  ;;  %v3650_v21 = vpack.c.bf16 %v3613_v63, %v3611_v51  ;;  %16926 = vmatprep.subr.bf16.mxu1 %v25492_v50 }
 0x57b   :  { %v18403_v13 = vpop.eup %18402  ;;  %18416 = vrcp.f32 %v3562_v34 }
 0x57c   :  { %v3617_v22 = vmul.f32 %v18403_v13, %v20855_v52  ;;  %16911 = vmatmul.mubr.msk.bf16.vlgmr.msra.gmra.mxu0 %vm152_vm0, %v3650_v21  ;;  %v18405_v1 = vpop.eup %18404 }
 0x57d   :  { %v3568_v20 = vpop.xlane.xlu0 %3567  ;;  %v3565_v19 = vpop.xlane.xlu1 %3564  ;;  %16921 = vmatpush3.bf16.msra.mxu0 %v3668_v27  ;;  %16922 = vmatprep.mubr.msk.bf16.mxu0 %vm19197_vm1, %v25492_v50  ;;  %v3619_v52 = vmul.f32 %v18405_v1, %v20853_v40  ;;  %v25603_v27 = vld [vmem:[#allocation10_spill] sm:$0xff]  ;;  %v25608_v1 = vld [vmem:[#allocation19_spill] sm:$0xff] }
 0x57e   :  { %18418 = vrcp.f32 %v3565_v19  ;;  %v3651_v33 = vpack.c.bf16 %v3617_v22, %v3615_v48  ;;  %16932 = vmatprep.subr.bf16.mxu0 %v25492_v50  ;;  %v25602_v48 = vld [vmem:[#allocation11_spill] sm:$0xff] }
 0x57f   :  { %v18407_v29 = vpop.eup %18406  ;;  %18420 = vrcp.f32 %v3568_v20  ;;  %v4420_v20 = vrot.slane %v4416_v7, %v25603_v27  ;;  %v25604_v19 = vld [vmem:[#allocation15_spill] sm:$0xff]  ;;  %v25642_v7 = vld [vmem:[#allocation13_spill] sm:$0xff] }
 0x580   :  { %v3621_v4 = vmul.f32 %v18407_v29, %v20863_v44  ;;  %16917 = vmatmul.mubr.msk.bf16.vlgmr.msra.gmra.mxu1 %vm152_vm0, %v3651_v33  ;;  %v18409_v35 = vpop.eup %18408  ;;  %v25609_v33 = vld [vmem:[#allocation18_spill] sm:$0xff]  ;;  %v25610_v29 = vld [vmem:[#allocation23_spill] sm:$0xff] }
 0x581   :  { %v3574_v42 = vpop.xlane.xlu0 %3573  ;;  %v3571_v39 = vpop.xlane.xlu1 %3570  ;;  %16927 = vmatpush3.bf16.msra.mxu1 %v3669_v8  ;;  %16928 = vmatprep.mubr.msk.bf16.mxu1 %vm19197_vm1, %v25492_v50  ;;  %v3623_v44 = vmul.f32 %v18409_v35, %v20865_v31  ;;  %vm21059_vm14 = vcmp.ne.s16.totalorder %v4420_v20, 0  ;;  %v25613_v8 = vld [vmem:[#allocation26_spill] sm:$0xff]  ;;  %v25616_v35 = vld [vmem:[#allocation43_spill] sm:$0xff] }
 0x582   :  { %18422 = vrcp.f32 %v3571_v39  ;;  %v3652_v38 = vpack.c.bf16 %v3621_v4, %v3619_v52  ;;  %16938 = vmatprep.subr.bf16.mxu1 %v25492_v50  ;;  %v25611_v52 = vld [vmem:[#allocation22_spill] sm:$0xff]  ;;  %v25612_v4 = vld [vmem:[#allocation27_spill] sm:$0xff] }
 0x583   :  { %v18411_v40 = vpop.eup %18410  ;;  %18424 = vrcp.f32 %v3574_v42  ;;  %v25614_v42 = vld [vmem:[#allocation35_spill] sm:$0xff]  ;;  %v25615_v39 = vld [vmem:[#allocation34_spill] sm:$0xff] }
 0x584   :  { %v3625_v41 = vmul.f32 %v18411_v40, %v20874_v46  ;;  %16923 = vmatmul.mubr.msk.bf16.vlgmr.msra.gmra.mxu0 %vm152_vm0, %v3652_v38  ;;  %v18413_v32 = vpop.eup %18412  ;;  %v25617_v38 = vld [vmem:[#allocation42_spill] sm:$0xff]  ;;  %v25618_v40 = vld [vmem:[#allocation51_spill] sm:$0xff] }
 0x585   :  { %v3577_v0 = vpop.xlane.xlu1 %3576  ;;  %16933 = vmatpush3.bf16.msra.mxu0 %v3670_v24  ;;  %16934 = vmatprep.mubr.msk.bf16.mxu0 %vm19197_vm1, %v25492_v50  ;;  %v3627_v31 = vmul.f32 %v18413_v32, %v20872_v62  ;;  %v25621_v24 = vld [vmem:[#allocation57_spill] sm:$0xff] }
 0x586   :  { %18426 = vrcp.f32 %v3577_v0  ;;  %v3653_v17 = vpack.c.bf16 %v3625_v41, %v3623_v44  ;;  %16944 = vmatprep.subr.bf16.mxu0 %v25492_v50  ;;  %v25619_v44 = vld [vmem:[#allocation49_spill] sm:$0xff]  ;;  %v25620_v41 = vld [vmem:[#allocation28_spill] sm:$0xff]  ;;  %v25622_v0 = vld [vmem:[#allocation59_spill] sm:$0xff] }
 0x587   :  { %v18415_v6 = vpop.eup %18414  ;;  %v25623_v32 = vld [vmem:[#allocation33_spill] sm:$0xff] }
 0x588   :  { %v3629_v46 = vmul.f32 %v18415_v6, %v20880_v56  ;;  %16929 = vmatmul.mubr.msk.bf16.vlgmr.msra.gmra.mxu1 %vm152_vm0, %v3653_v17  ;;  %v18417_v59 = vpop.eup %18416  ;;  %v25624_v17 = vld [vmem:[#allocation36_spill] sm:$0xff]  ;;  %v25625_v6 = vld [vmem:[#allocation61_spill] sm:$0xff] }
 0x589   :  { %16939 = vmatpush3.bf16.msra.mxu1 %v3671_v30  ;;  %16940 = vmatprep.mubr.msk.bf16.mxu1 %vm19197_vm1, %v25492_v50  ;;  %v3631_v62 = vmul.f32 %v18417_v59, %v20882_v57  ;;  %v25628_v30 = vld [vmem:[#allocation44_spill] sm:$0xff]  ;;  %v25629_v59 = vld [vmem:[#allocation63_spill] sm:$0xff] }
 0x58a   :  { %v3654_v61 = vpack.c.bf16 %v3629_v46, %v3627_v31  ;;  %16950 = vmatprep.subr.bf16.mxu1 %v25492_v50  ;;  %v25626_v31 = vld [vmem:[#allocation62_spill] sm:$0xff]  ;;  %v25627_v46 = vld [vmem:[#allocation41_spill] sm:$0xff] }
 0x58b   :  { %v18419_v15 = vpop.eup %18418 }
 0x58c   :  { %v3633_v56 = vmul.f32 %v18419_v15, %v20890_v18  ;;  %16935 = vmatmul.mubr.msk.bf16.vlgmr.msra.gmra.mxu0 %vm152_vm0, %v3654_v61  ;;  %v18421_v51 = vpop.eup %18420  ;;  %v25630_v61 = vld [vmem:[#allocation64_spill] sm:$0xff]  ;;  %v25631_v15 = vld [vmem:[#allocation50_spill] sm:$0xff] }
 0x58d   :  { %16945 = vmatpush3.bf16.msra.mxu0 %v3672_v26  ;;  %16946 = vmatprep.mubr.msk.bf16.mxu0 %vm19197_vm1, %v25492_v50  ;;  %v3635_v34 = vmul.f32 %v18421_v51, %v20888_v14  ;;  %v25634_v26 = vld [vmem:[#allocation66_spill] sm:$0xff] }
 0x58e   :  { %v3655_v63 = vpack.c.bf16 %v3633_v56, %v3631_v62  ;;  %16956 = vmatprep.subr.bf16.mxu0 %v25492_v50  ;;  %v25632_v62 = vld [vmem:[#allocation52_spill] sm:$0xff]  ;;  %v25633_v56 = vld [vmem:[#allocation65_spill] sm:$0xff]  ;;  %v25635_v51 = vld [vmem:[#allocation58_spill] sm:$0xff] }
 0x58f   :  { %v18423_v57 = vpop.eup %18422 }
 0x590   :  { %v18425_v18 = vpop.eup %18424  ;;  %v3637_v28 = vmul.f32 %v18423_v57, %v20896_v11  ;;  %16941 = vmatmul.mubr.msk.bf16.vlgmr.msra.gmra.mxu1 %vm152_vm0, %v3655_v63  ;;  %v25636_v63 = vld [vmem:[#allocation60_spill] sm:$0xff] }
 0x591   :  { %16951 = vmatpush3.bf16.msra.mxu1 %v3673_v2  ;;  %16952 = vmatprep.mubr.msk.bf16.mxu1 %vm19197_vm1, %v25492_v50  ;;  %v3639_v14 = vmul.f32 %v18425_v18, %v20898_v5  ;;  %v5462_v54 = vsel %vm21059_vm14, %v25636_v63, 0  ;;  %v25637_v57 = vld [vmem:[#allocation68_spill] sm:$0xff]  ;;  %v25638_v18 = vld [vmem:[#allocation67_spill] sm:$0xff]  ;;  %v25640_v2 = vld [vmem:[#allocation69_spill] sm:$0xff]  ;;  %v6220_v5 = vsel %vm6219_vm4, 65537, %v25532_v25 }
 0x592   :  { %v3656_v13 = vpack.c.bf16 %v3637_v28, %v3635_v34  ;;  %16962 = vmatprep.subr.bf16.mxu1 %v25492_v50  ;;  %v5463_v34 = vsel %vm21059_vm14, %v25638_v18, 0  ;;  %v25639_v28 = vld [vmem:[#allocation12_spill] sm:$0xff]  ;;  %v25645_v63 = vld [vmem:[#allocation71_spill] sm:$0xff]  ;;  %vm23681_vm4 = vmand %vm11626_vm2, %vm11627_vm3 }
 0x593   :  { %v18427_v21 = vpop.eup %18426 }
 0x594   :  { %v3641_v11 = vmul.f32 %v18427_v21, %v20904_v37  ;;  %16947 = vmatmul.mubr.msk.bf16.vlgmr.msra.gmra.mxu0 %vm152_vm0, %v3656_v13  ;;  %v25607_v37 = vld [vmem:[#allocation14_spill] sm:$0xff]  ;;  %v2574_v21 = vadd.f32 %v25640_v2, %v25639_v28  ;;  %v25649_v28 = vld [vmem:[#allocation72_spill] sm:$0xff] }
 0x595   :  { %16957 = vmatpush3.bf16.xpose.msra.mxu0 %v25602_v48  ;;  %16958 = vmatprep.mubr.msk.bf16.mxu0 %vm19197_vm1, %v25492_v50 }
 0x596   :  { %v3657_v22 = vpack.c.bf16 %v3641_v11, %v3639_v14  ;;  %16968 = vmatprep.subr.bf16.mxu0 %v25492_v50 }
 0x598   :  { %16953 = vmatmul.mubr.msk.bf16.vlgmr.msra.gmra.mxu1 %vm152_vm0, %v3657_v22  ;;  %v25643_v22 = vld [vmem:[#allocation70_spill] sm:$0xff] }
 0x599   :  { %16963 = vmatpush3.bf16.xpose.msra.mxu1 %v25604_v19  ;;  %16964 = vmatprep.mubr.msk.bf16.mxu1 %vm19197_vm1, %v25492_v50  ;;  %v2575_v20 = vadd.f32 %v25643_v22, %v25642_v7 }
 0x59a   :  { %16974 = vmatprep.subr.bf16.mxu1 %v25492_v50 }
 0x59c   :  { %16959 = vmatmul.mubr.msk.bf16.vlgmr.msra.gmra.mxu0 %vm21059_vm14, %v25607_v37 }
 0x59d   :  { %16969 = vmatpush3.bf16.xpose.msra.mxu0 %v25608_v1  ;;  %16970 = vmatprep.mubr.msk.bf16.mxu0 %vm19197_vm1, %v25492_v50 }
 0x59e   :  { %16980 = vmatprep.subr.bf16.mxu0 %v25492_v50 }
 0x5a0   :  { %16965 = vmatmul.mubr.msk.bf16.vlgmr.msra.gmra.mxu1 %vm21059_vm14, %v25609_v33 }
 0x5a1   :  { %16975 = vmatpush3.bf16.xpose.msra.mxu1 %v25610_v29  ;;  %16976 = vmatprep.mubr.msk.bf16.mxu1 %vm19197_vm1, %v25492_v50 }
 0x5a2   :  { %16986 = vmatprep.subr.bf16.mxu1 %v25492_v50 }
 0x5a4   :  { %16971 = vmatmul.mubr.msk.bf16.vlgmr.msra.gmra.mxu0 %vm21059_vm14, %v25611_v52 }
 0x5a5   :  { %16981 = vmatpush3.bf16.xpose.msra.mxu0 %v25612_v4  ;;  %16982 = vmatprep.mubr.msk.bf16.mxu0 %vm19197_vm1, %v25492_v50 }
 0x5a6   :  { %16992 = vmatprep.subr.bf16.mxu0 %v25492_v50 }
 0x5a8   :  { %16977 = vmatmul.mubr.msk.bf16.vlgmr.msra.gmra.mxu1 %vm21059_vm14, %v25613_v8 }
 0x5a9   :  { %16987 = vmatpush3.bf16.xpose.msra.mxu1 %v25614_v42  ;;  %16988 = vmatprep.mubr.msk.bf16.mxu1 %vm19197_vm1, %v25492_v50 }
 0x5aa   :  { %16998 = vmatprep.subr.bf16.mxu1 %v25492_v50 }
 0x5ac   :  { %16983 = vmatmul.mubr.msk.bf16.vlgmr.msra.gmra.mxu0 %vm21059_vm14, %v25615_v39 }
 0x5ad   :  { %16993 = vmatpush3.bf16.xpose.msra.mxu0 %v25616_v35  ;;  %16994 = vmatprep.mubr.msk.bf16.mxu0 %vm19197_vm1, %v25492_v50 }
 0x5ae   :  { %17004 = vmatprep.subr.bf16.mxu0 %v25492_v50 }
 0x5b0   :  { %16989 = vmatmul.mubr.msk.bf16.vlgmr.msra.gmra.mxu1 %vm21059_vm14, %v25617_v38 }
 0x5b1   :  { %16999 = vmatpush3.bf16.xpose.msra.mxu1 %v25618_v40  ;;  %17000 = vmatprep.mubr.msk.bf16.mxu1 %vm19197_vm1, %v25492_v50 }
 0x5b2   :  { %17010 = vmatprep.subr.bf16.mxu1 %v25492_v50 }
 0x5b4   :  { %16995 = vmatmul.mubr.msk.bf16.vlgmr.msra.gmra.mxu0 %vm21059_vm14, %v25619_v44 }
 0x5b5   :  { %17005 = vmatpush3.bf16.xpose.msra.mxu0 %v25620_v41  ;;  %17006 = vmatprep.mubr.msk.bf16.mxu0 %vm19197_vm1, %v25492_v50 }
 0x5b6   :  { %17016 = vmatprep.subr.bf16.mxu0 %v25492_v50 }
 0x5b8   :  { %17001 = vmatmul.mubr.msk.bf16.vlgmr.msra.gmra.mxu1 %vm21059_vm14, %v25621_v24 }
 0x5b9   :  { %17011 = vmatpush3.bf16.xpose.msra.mxu1 %v25622_v0  ;;  %17012 = vmatprep.mubr.msk.bf16.mxu1 %vm19197_vm1, %v25492_v50 }
 0x5ba   :  { %17022 = vmatprep.subr.bf16.mxu1 %v25492_v50 }
 0x5bc   :  { %17007 = vmatmul.mubr.msk.bf16.vlgmr.msra.gmra.mxu0 %vm21059_vm14, %v25623_v32 }
 0x5bd   :  { %17017 = vmatpush3.bf16.xpose.msra.mxu0 %v25624_v17  ;;  %17018 = vmatprep.mubr.msk.bf16.mxu0 %vm19197_vm1, %v25492_v50 }
 0x5be   :  { %17028 = vmatprep.subr.bf16.mxu0 %v25492_v50 }
 0x5c0   :  { %17013 = vmatmul.mubr.msk.bf16.vlgmr.msra.gmra.mxu1 %vm21059_vm14, %v25625_v6 }
 0x5c1   :  { %17023 = vmatpush3.bf16.xpose.msra.mxu1 %v25626_v31  ;;  %17024 = vmatprep.mubr.msk.bf16.mxu1 %vm19197_vm1, %v25492_v50 }
 0x5c2   :  { %17034 = vmatprep.subr.bf16.mxu1 %v25492_v50 }
 0x5c4   :  { %17019 = vmatmul.mubr.msk.bf16.vlgmr.msra.gmra.mxu0 %vm21059_vm14, %v25627_v46 }
 0x5c5   :  { %17029 = vmatpush3.bf16.xpose.msra.mxu0 %v25628_v30  ;;  %17030 = vmatprep.mubr.msk.bf16.mxu0 %vm19197_vm1, %v25492_v50 }
 0x5c6   :  { %17040 = vmatprep.subr.bf16.mxu0 %v25492_v50 }
 0x5c8   :  { %17025 = vmatmul.mubr.msk.bf16.vlgmr.msra.gmra.mxu1 %vm21059_vm14, %v25629_v59 }
 0x5c9   :  { %17035 = vmatpush3.bf16.xpose.msra.mxu1 %v25630_v61  ;;  %17036 = vmatprep.mubr.msk.bf16.mxu1 %vm19197_vm1, %v25492_v50 }
 0x5ca   :  { %17046 = vmatprep.subr.bf16.mxu1 %v25492_v50 }
 0x5cc   :  { %17031 = vmatmul.mubr.msk.bf16.vlgmr.msra.gmra.mxu0 %vm21059_vm14, %v25631_v15  ;;  %v25648_v15 = vld [vmem:[#allocation17_spill] sm:$0xff] }
 0x5cd   :  { %17041 = vmatpush3.bf16.xpose.msra.mxu0 %v25632_v62  ;;  %17042 = vmatprep.mubr.msk.bf16.mxu0 %vm19197_vm1, %v25492_v50  ;;  %v2577_v2 = vadd.f32 %v25649_v28, %v25648_v15 }
 0x5ce   :  { %17052 = vmatprep.subr.bf16.mxu0 %v25492_v50 }
 0x5d0   :  { %17037 = vmatmul.mubr.msk.bf16.vlgmr.msra.gmra.mxu1 %vm21059_vm14, %v25633_v56 }
 0x5d1   :  { %17047 = vmatpush3.bf16.xpose.msra.mxu1 %v25634_v26  ;;  %17048 = vmatprep.mubr.msk.bf16.mxu1 %vm19197_vm1, %v25492_v50 }
 0x5d2   :  { %17058 = vmatprep.subr.bf16.mxu1 %v25492_v50 }
 0x5d4   :  { %17043 = vmatmul.mubr.msk.bf16.vlgmr.msra.gmra.mxu0 %vm21059_vm14, %v25635_v51 }
 0x5d5   :  { %17053 = vmatpush3.bf16.msra.mxu0 %v5462_v54  ;;  %17054 = vmatprep.mubr.msk.bf16.mxu0 %vm19197_vm1, %v25492_v50 }
 0x5d6   :  { %17064 = vmatprep.subr.bf16.mxu0 %v25492_v50 }
 0x5d8   :  { %17049 = vmatmul.mubr.msk.bf16.vlgmr.msra.gmra.mxu1 %vm21059_vm14, %v25637_v57  ;;  %v25644_v57 = vld [vmem:[#allocation16_spill] sm:$0xff] }
 0x5d9   :  { %17059 = vmatpush3.bf16.msra.mxu1 %v5463_v34  ;;  %17060 = vmatprep.mubr.msk.bf16.mxu1 %vm19197_vm1, %v25492_v50  ;;  %v2576_v18 = vadd.f32 %v25645_v63, %v25644_v57 }
 0x5da   :  { %17070 = vmatprep.subr.bf16.mxu1 %v25492_v50 }
 0x61b   :  { %v3711_v13 = vpop.f32.mrf.mxu0 }
 0x61c   :  { %v21181_v14 = vadd.f32 %v3711_v13, %v2574_v21  ;;  %v25650_v21 = vld [vmem:[#allocation20_spill] sm:$0xff]  ;;  %v25651_v13 = vld [vmem:[#allocation73_spill] sm:$0xff] }
 0x61d   :  { %v16864_v11 = vpop.f32.mrf.mxu0 }
 0x61e   :  { %25641 = vst [vmem:[#allocation12_spill] sm:$0xff] %v21181_v14  ;;  %v2578_v11 = vadd.f32 %v25651_v13, %v25650_v21 }
 0x61f   :  { %v3714_v54 = vpop.f32.mrf.mxu0 }
 0x620   :  { %v21187_v34 = vadd.f32 %v3714_v54, %v2575_v20  ;;  %v3755_v51 = vpop.f32.mrf.mxu1  ;;  %v25654_v20 = vld [vmem:[#allocation21_spill] sm:$0xff]  ;;  %v25655_v54 = vld [vmem:[#allocation74_spill] sm:$0xff] }
 0x621   :  { %v16865_v26 = vpop.f32.mrf.mxu0  ;;  %v21189_v56 = vadd.f32 %v3755_v51, %v2576_v18  ;;  %v25656_v51 = vld [vmem:[#allocation24_spill] sm:$0xff]  ;;  %v25657_v18 = vld [vmem:[#allocation75_spill] sm:$0xff] }
 0x622   :  { %25646 = vst [vmem:[#allocation69_spill] sm:$0xff] %v21187_v34  ;;  %v16870_v62 = vpop.f32.mrf.mxu1  ;;  %v2579_v26 = vadd.f32 %v25655_v54, %v25654_v20 }
 0x623   :  { %25647 = vst [vmem:[#allocation13_spill] sm:$0xff] %v21189_v56  ;;  %v2580_v62 = vadd.f32 %v25657_v18, %v25656_v51 }
 0x624   :  { %v3758_v14 = vpop.f32.mrf.mxu1  ;;  %v3799_v61 = vpop.f32.mrf.mxu0 }
 0x625   :  { %v21195_v7 = vadd.f32 %v3758_v14, %v2577_v2  ;;  %v21197_v22 = vadd.f32 %v3799_v61, %v2578_v11  ;;  %v25660_v14 = vld [vmem:[#allocation25_spill] sm:$0xff]  ;;  %v25661_v2 = vld [vmem:[#allocation76_spill] sm:$0xff]  ;;  %v25662_v11 = vld [vmem:[#allocation30_spill] sm:$0xff] }
 0x626   :  { %v16871_v63 = vpop.f32.mrf.mxu1  ;;  %v16876_v57 = vpop.f32.mrf.mxu0  ;;  %v2581_v61 = vadd.f32 %v25661_v2, %v25660_v14 }
 0x627   :  { %25652 = vst [vmem:[#allocation70_spill] sm:$0xff] %v21195_v7  ;;  %25653 = vst [vmem:[#allocation16_spill] sm:$0xff] %v21197_v22  ;;  %v25663_v63 = vld [vmem:[#allocation77_spill] sm:$0xff] }
 0x628   :  { %v3802_v56 = vpop.f32.mrf.mxu0  ;;  %v3843_v34 = vpop.f32.mrf.mxu1  ;;  %v2582_v57 = vadd.f32 %v25663_v63, %v25662_v11 }
 0x629   :  { %v21203_v15 = vadd.f32 %v3802_v56, %v2579_v26  ;;  %v21205_v28 = vadd.f32 %v3843_v34, %v2580_v62  ;;  %v25666_v56 = vld [vmem:[#allocation31_spill] sm:$0xff]  ;;  %v25667_v26 = vld [vmem:[#allocation78_spill] sm:$0xff] }
 0x62a   :  { %v16877_v21 = vpop.f32.mrf.mxu0  ;;  %v16882_v13 = vpop.f32.mrf.mxu1  ;;  %v2583_v34 = vadd.f32 %v25667_v26, %v25666_v56  ;;  %v25668_v62 = vld [vmem:[#allocation38_spill] sm:$0xff] }
 0x62b   :  { %25658 = vst [vmem:[#allocation71_spill] sm:$0xff] %v21203_v15  ;;  %25659 = vst [vmem:[#allocation17_spill] sm:$0xff] %v21205_v28  ;;  %v25669_v21 = vld [vmem:[#allocation79_spill] sm:$0xff] }
 0x62c   :  { %v3846_v22 = vpop.f32.mrf.mxu1  ;;  %v3887_v7 = vpop.f32.mrf.mxu0  ;;  %v2584_v13 = vadd.f32 %v25669_v21, %v25668_v62 }
 0x62d   :  { %v21211_v20 = vadd.f32 %v3846_v22, %v2581_v61  ;;  %v21213_v54 = vadd.f32 %v3887_v7, %v2582_v57  ;;  %v25672_v22 = vld [vmem:[#allocation39_spill] sm:$0xff]  ;;  %v25673_v61 = vld [vmem:[#allocation80_spill] sm:$0xff] }
 0x62e   :  { %v16883_v51 = vpop.f32.mrf.mxu1  ;;  %v16888_v18 = vpop.f32.mrf.mxu0  ;;  %v2585_v7 = vadd.f32 %v25673_v61, %v25672_v22  ;;  %v25674_v57 = vld [vmem:[#allocation47_spill] sm:$0xff] }
 0x62f   :  { %25664 = vst [vmem:[#allocation72_spill] sm:$0xff] %v21211_v20  ;;  %25665 = vst [vmem:[#allocation20_spill] sm:$0xff] %v21213_v54  ;;  %v25675_v51 = vld [vmem:[#allocation81_spill] sm:$0xff] }
 0x630   :  { %v3890_v28 = vpop.f32.mrf.mxu0  ;;  %v3931_v15 = vpop.f32.mrf.mxu1  ;;  %v2586_v18 = vadd.f32 %v25675_v51, %v25674_v57 }
 0x631   :  { %v21219_v14 = vadd.f32 %v3890_v28, %v2583_v34  ;;  %v21221_v2 = vadd.f32 %v3931_v15, %v2584_v13  ;;  %v25678_v28 = vld [vmem:[#allocation45_spill] sm:$0xff]  ;;  %v25679_v34 = vld [vmem:[#allocation82_spill] sm:$0xff]  ;;  %v25680_v13 = vld [vmem:[#allocation55_spill] sm:$0xff] }
 0x632   :  { %v16889_v11 = vpop.f32.mrf.mxu0  ;;  %v16894_v63 = vpop.f32.mrf.mxu1  ;;  %v2587_v15 = vadd.f32 %v25679_v34, %v25678_v28 }
 0x633   :  { %25670 = vst [vmem:[#allocation73_spill] sm:$0xff] %v21219_v14  ;;  %25671 = vst [vmem:[#allocation21_spill] sm:$0xff] %v21221_v2  ;;  %v25681_v11 = vld [vmem:[#allocation83_spill] sm:$0xff] }
 0x634   :  { %v3934_v54 = vpop.f32.mrf.mxu1  ;;  %v3975_v20 = vpop.f32.mrf.mxu0  ;;  %v2588_v63 = vadd.f32 %v25681_v11, %v25680_v13 }
 0x635   :  { %v21227_v56 = vadd.f32 %v3934_v54, %v2585_v7  ;;  %v21229_v26 = vadd.f32 %v3975_v20, %v2586_v18  ;;  %v25684_v54 = vld [vmem:[#allocation53_spill] sm:$0xff]  ;;  %v25685_v7 = vld [vmem:[#allocation84_spill] sm:$0xff] }
 0x636   :  { %v16895_v62 = vpop.f32.mrf.mxu1  ;;  %v16900_v21 = vpop.f32.mrf.mxu0  ;;  %v2589_v20 = vadd.f32 %v25685_v7, %v25684_v54  ;;  %v25686_v18 = vld [vmem:[#allocation32_spill] sm:$0xff] }
 0x637   :  { %25676 = vst [vmem:[#allocation74_spill] sm:$0xff] %v21227_v56  ;;  %25677 = vst [vmem:[#allocation24_spill] sm:$0xff] %v21229_v26  ;;  %v25687_v62 = vld [vmem:[#allocation85_spill] sm:$0xff] }
 0x638   :  { %v3978_v2 = vpop.f32.mrf.mxu0  ;;  %v4019_v14 = vpop.f32.mrf.mxu1  ;;  %v2590_v21 = vadd.f32 %v25687_v62, %v25686_v18 }
 0x639   :  { %v21235_v22 = vadd.f32 %v3978_v2, %v2587_v15  ;;  %v21237_v61 = vadd.f32 %v4019_v14, %v2588_v63  ;;  %v25690_v2 = vld [vmem:[#allocation29_spill] sm:$0xff]  ;;  %v25691_v15 = vld [vmem:[#allocation86_spill] sm:$0xff] }
 0x63a   :  { %v16901_v57 = vpop.f32.mrf.mxu0  ;;  %v16906_v51 = vpop.f32.mrf.mxu1  ;;  %v2591_v14 = vadd.f32 %v25691_v15, %v25690_v2  ;;  %v25692_v63 = vld [vmem:[#allocation2_spill] sm:$0xff] }
 0x63b   :  { %25682 = vst [vmem:[#allocation75_spill] sm:$0xff] %v21235_v22  ;;  %25683 = vst [vmem:[#allocation25_spill] sm:$0xff] %v21237_v61  ;;  %v25693_v57 = vld [vmem:[#allocation87_spill] sm:$0xff] }
 0x63c   :  { %v4022_v26 = vpop.f32.mrf.mxu1  ;;  %v4063_v56 = vpop.f32.mrf.mxu0  ;;  %v2592_v51 = vadd.f32 %v25693_v57, %v25692_v63 }
 0x63d   :  { %v21243_v28 = vadd.f32 %v4022_v26, %v2589_v20  ;;  %v21245_v34 = vadd.f32 %v4063_v56, %v2590_v21  ;;  %v25696_v26 = vld [vmem:[#allocation3_spill] sm:$0xff]  ;;  %v25697_v20 = vld [vmem:[#allocation88_spill] sm:$0xff] }
 0x63e   :  { %v16907_v13 = vpop.f32.mrf.mxu1  ;;  %v16912_v11 = vpop.f32.mrf.mxu0  ;;  %v2593_v56 = vadd.f32 %v25697_v20, %v25696_v26  ;;  %v25698_v21 = vld [vmem:[#allocation40_spill] sm:$0xff] }
 0x63f   :  { %25688 = vst [vmem:[#allocation76_spill] sm:$0xff] %v21243_v28  ;;  %25689 = vst [vmem:[#allocation30_spill] sm:$0xff] %v21245_v34  ;;  %v25699_v13 = vld [vmem:[#allocation89_spill] sm:$0xff] }
 0x640   :  { %v4066_v61 = vpop.f32.mrf.mxu0  ;;  %v4107_v22 = vpop.f32.mrf.mxu1  ;;  %v2594_v11 = vadd.f32 %v25699_v13, %v25698_v21 }
 0x641   :  { %v21251_v54 = vadd.f32 %v4066_v61, %v2591_v14  ;;  %v21253_v7 = vadd.f32 %v4107_v22, %v2592_v51  ;;  %v25702_v61 = vld [vmem:[#allocation37_spill] sm:$0xff]  ;;  %v25703_v14 = vld [vmem:[#allocation90_spill] sm:$0xff]  ;;  %v25704_v51 = vld [vmem:[#allocation4_spill] sm:$0xff] }
 0x642   :  { %v16913_v18 = vpop.f32.mrf.mxu0  ;;  %v16918_v62 = vpop.f32.mrf.mxu1  ;;  %v2595_v22 = vadd.f32 %v25703_v14, %v25702_v61 }
 0x643   :  { %25694 = vst [vmem:[#allocation77_spill] sm:$0xff] %v21251_v54  ;;  %25695 = vst [vmem:[#allocation31_spill] sm:$0xff] %v21253_v7  ;;  %v25705_v18 = vld [vmem:[#allocation91_spill] sm:$0xff] }
 0x644   :  { %v4110_v34 = vpop.f32.mrf.mxu1  ;;  %v4151_v28 = vpop.f32.mrf.mxu0  ;;  %v2596_v62 = vadd.f32 %v25705_v18, %v25704_v51 }
 0x645   :  { %v21259_v2 = vadd.f32 %v4110_v34, %v2593_v56  ;;  %v21261_v15 = vadd.f32 %v4151_v28, %v2594_v11  ;;  %v25708_v34 = vld [vmem:[#allocation5_spill] sm:$0xff]  ;;  %v25709_v56 = vld [vmem:[#allocation92_spill] sm:$0xff] }
 0x646   :  { %v16919_v63 = vpop.f32.mrf.mxu1  ;;  %v16924_v57 = vpop.f32.mrf.mxu0  ;;  %v2597_v28 = vadd.f32 %v25709_v56, %v25708_v34  ;;  %v25710_v11 = vld [vmem:[#allocation48_spill] sm:$0xff] }
 0x647   :  { %25700 = vst [vmem:[#allocation78_spill] sm:$0xff] %v21259_v2  ;;  %25701 = vst [vmem:[#allocation38_spill] sm:$0xff] %v21261_v15  ;;  %v25711_v63 = vld [vmem:[#allocation93_spill] sm:$0xff] }
 0x648   :  { %v4154_v7 = vpop.f32.mrf.mxu0  ;;  %v4195_v54 = vpop.f32.mrf.mxu1  ;;  %v2598_v57 = vadd.f32 %v25711_v63, %v25710_v11 }
 0x649   :  { %v21267_v26 = vadd.f32 %v4154_v7, %v2595_v22  ;;  %v21269_v20 = vadd.f32 %v4195_v54, %v2596_v62  ;;  %v25714_v7 = vld [vmem:[#allocation46_spill] sm:$0xff] }
 0x64a   :  { %v16925_v21 = vpop.f32.mrf.mxu0  ;;  %v16930_v13 = vpop.f32.mrf.mxu1  ;;  %v25715_v22 = vld [vmem:[#allocation94_spill] sm:$0xff] }
 0x64b   :  { %25706 = vst [vmem:[#allocation79_spill] sm:$0xff] %v21267_v26  ;;  %25707 = vst [vmem:[#allocation39_spill] sm:$0xff] %v21269_v20  ;;  %v2599_v54 = vadd.f32 %v25715_v22, %v25714_v7  ;;  %v25716_v62 = vld [vmem:[#allocation6_spill] sm:$0xff]  ;;  %v25717_v21 = vld [vmem:[#allocation95_spill] sm:$0xff] }
 0x64c   :  { %v4198_v15 = vpop.f32.mrf.mxu1  ;;  %v4239_v2 = vpop.f32.mrf.mxu0  ;;  %v2600_v13 = vadd.f32 %v25717_v21, %v25716_v62 }
 0x64d   :  { %v21275_v61 = vadd.f32 %v4198_v15, %v2597_v28  ;;  %v21277_v14 = vadd.f32 %v4239_v2, %v2598_v57  ;;  %v25720_v15 = vld [vmem:[#allocation7_spill] sm:$0xff]  ;;  %v25721_v28 = vld [vmem:[#allocation96_spill] sm:$0xff] }
 0x64e   :  { %v16931_v51 = vpop.f32.mrf.mxu1  ;;  %v16936_v18 = vpop.f32.mrf.mxu0  ;;  %v2601_v2 = vadd.f32 %v25721_v28, %v25720_v15  ;;  %v25722_v57 = vld [vmem:[#allocation56_spill] sm:$0xff] }
 0x64f   :  { %25712 = vst [vmem:[#allocation80_spill] sm:$0xff] %v21275_v61  ;;  %25713 = vst [vmem:[#allocation47_spill] sm:$0xff] %v21277_v14  ;;  %v25723_v51 = vld [vmem:[#allocation97_spill] sm:$0xff] }
 0x650   :  { %v4242_v20 = vpop.f32.mrf.mxu0  ;;  %v4283_v26 = vpop.f32.mrf.mxu1  ;;  %v2602_v18 = vadd.f32 %v25723_v51, %v25722_v57 }
 0x651   :  { %v21283_v34 = vadd.f32 %v4242_v20, %v2599_v54  ;;  %v21285_v56 = vadd.f32 %v4283_v26, %v2600_v13  ;;  %v25726_v20 = vld [vmem:[#allocation54_spill] sm:$0xff]  ;;  %v25728_v13 = vld [vmem:[#allocation8_spill] sm:$0xff] }
 0x652   :  { %v16937_v11 = vpop.f32.mrf.mxu0  ;;  %v16942_v63 = vpop.f32.mrf.mxu1  ;;  %v25727_v54 = vld [vmem:[#allocation98_spill] sm:$0xff] }
 0x653   :  { %25718 = vst [vmem:[#allocation81_spill] sm:$0xff] %v21283_v34  ;;  %25719 = vst [vmem:[#allocation45_spill] sm:$0xff] %v21285_v56  ;;  %v2603_v26 = vadd.f32 %v25727_v54, %v25726_v20  ;;  %v25729_v11 = vld [vmem:[#allocation99_spill] sm:$0xff] }
 0x654   :  { %v4286_v14 = vpop.f32.mrf.mxu1  ;;  %v4327_v61 = vpop.f32.mrf.mxu0  ;;  %v2604_v63 = vadd.f32 %v25729_v11, %v25728_v13 }
 0x655   :  { %v21291_v7 = vadd.f32 %v4286_v14, %v2601_v2  ;;  %v21293_v22 = vadd.f32 %v4327_v61, %v2602_v18  ;;  %v25732_v14 = vld [vmem:[#allocation9_spill] sm:$0xff]  ;;  %v25733_v2 = vld [vmem:[#allocation100_spill] sm:$0xff] }
 0x656   :  { %v16943_v62 = vpop.f32.mrf.mxu1  ;;  %v16948_v21 = vpop.f32.mrf.mxu0  ;;  %v2605_v61 = vadd.f32 %v25733_v2, %v25732_v14 }
 0x657   :  { %25724 = vst [vmem:[#allocation82_spill] sm:$0xff] %v21291_v7  ;;  %25725 = vst [vmem:[#allocation55_spill] sm:$0xff] %v21293_v22 }
 0x658   :  { %v4330_v56 = vpop.f32.mrf.mxu0  ;;  %v4371_v34 = vpop.f32.mrf.mxu1 }
 0x659   :  { %v21299_v15 = vadd.f32 %v4330_v56, %v2603_v26  ;;  %v21301_v28 = vadd.f32 %v4371_v34, %v2604_v63 }
 0x65a   :  { %v16949_v57 = vpop.f32.mrf.mxu0  ;;  %v16954_v51 = vpop.f32.mrf.mxu1 }
 0x65b   :  { %25730 = vst [vmem:[#allocation83_spill] sm:$0xff] %v21299_v15  ;;  %25731 = vst [vmem:[#allocation53_spill] sm:$0xff] %v21301_v28 }
 0x65c   :  { %v4374_v18 = vpop.f32.mrf.mxu1  ;;  %v21305_v62 = vpop.f32.mrf.mxu0 }
 0x65d   :  { %v21307_v21 = vadd.f32 %v4374_v18, %v2605_v61  ;;  %v5094_v20 = vsel %vm152_vm0, %v21305_v62, -inf }
 0x65e   :  { %5095 = vmax.xlane.f32.xlu0 %v5094_v20  ;;  %v16955_v54 = vpop.f32.mrf.mxu1  ;;  %v16960_v13 = vpop.f32.mrf.mxu0 }
 0x65f   :  { %25734 = vst [vmem:[#allocation84_spill] sm:$0xff] %v21307_v21 }
 0x660   :  { %v21311_v56 = vpop.f32.mrf.mxu0  ;;  %v21313_v34 = vpop.f32.mrf.mxu1 }
 0x661   :  { %v5097_v26 = vsel %vm152_vm0, %v21311_v56, -inf  ;;  %v5100_v11 = vsel %vm152_vm0, %v21313_v34, -inf }
 0x662   :  { %5098 = vmax.xlane.f32.xlu1 %v5097_v26  ;;  %v16961_v63 = vpop.f32.mrf.mxu0  ;;  %5101 = vmax.xlane.f32.xlu0 %v5100_v11  ;;  %v16966_v57 = vpop.f32.mrf.mxu1 }
 0x664   :  { %v21319_v51 = vpop.f32.mrf.mxu1  ;;  %v21321_v14 = vpop.f32.mrf.mxu0 }
 0x665   :  { %v5106_v2 = vsel %vm152_vm0, %v21321_v14, -inf  ;;  %v5103_v61 = vsel %vm152_vm0, %v21319_v51, -inf }
 0x666   :  { %v16972_v18 = vpop.f32.mrf.mxu0  ;;  %5107 = vmax.xlane.f32.xlu0 %v5106_v2  ;;  %5104 = vmax.xlane.f32.xlu1 %v5103_v61  ;;  %v16967_v20 = vpop.f32.mrf.mxu1 }
 0x668   :  { %v21327_v54 = vpop.f32.mrf.mxu0  ;;  %v21329_v13 = vpop.f32.mrf.mxu1 }
 0x669   :  { %v5109_v26 = vsel %vm152_vm0, %v21327_v54, -inf  ;;  %v5112_v11 = vsel %vm152_vm0, %v21329_v13, -inf }
 0x66a   :  { %v16973_v63 = vpop.f32.mrf.mxu0  ;;  %5110 = vmax.xlane.f32.xlu1 %v5109_v26  ;;  %5113 = vmax.xlane.f32.xlu0 %v5112_v11  ;;  %v16978_v57 = vpop.f32.mrf.mxu1 }
 0x66c   :  { %v21335_v21 = vpop.f32.mrf.mxu1  ;;  %v21337_v18 = vpop.f32.mrf.mxu0 }
 0x66d   :  { %v5118_v2 = vsel %vm152_vm0, %v21337_v18, -inf  ;;  %v5115_v61 = vsel %vm152_vm0, %v21335_v21, -inf }
 0x66e   :  { %v16984_v20 = vpop.f32.mrf.mxu0  ;;  %5119 = vmax.xlane.f32.xlu0 %v5118_v2  ;;  %5116 = vmax.xlane.f32.xlu1 %v5115_v61  ;;  %v16979_v28 = vpop.f32.mrf.mxu1 }
 0x670   :  { %v21343_v15 = vpop.f32.mrf.mxu0  ;;  %v21345_v63 = vpop.f32.mrf.mxu1 }
 0x671   :  { %v5121_v26 = vsel %vm152_vm0, %v21343_v15, -inf  ;;  %v5124_v11 = vsel %vm152_vm0, %v21345_v63, -inf }
 0x672   :  { %v16985_v57 = vpop.f32.mrf.mxu0  ;;  %5122 = vmax.xlane.f32.xlu1 %v5121_v26  ;;  %5125 = vmax.xlane.f32.xlu0 %v5124_v11  ;;  %v16990_v22 = vpop.f32.mrf.mxu1 }
 0x674   :  { %v21351_v7 = vpop.f32.mrf.mxu1  ;;  %v21353_v20 = vpop.f32.mrf.mxu0 }
 0x675   :  { %v5130_v28 = vsel %vm152_vm0, %v21353_v20, -inf  ;;  %v5127_v2 = vsel %vm152_vm0, %v21351_v7, -inf }
 0x676   :  { %v16996_v61 = vpop.f32.mrf.mxu0  ;;  %5131 = vmax.xlane.f32.xlu0 %v5130_v28  ;;  %5128 = vmax.xlane.f32.xlu1 %v5127_v2  ;;  %v16991_v59 = vpop.f32.mrf.mxu1 }
 0x678   :  { %v21359_v30 = vpop.f32.mrf.mxu0  ;;  %v21361_v57 = vpop.f32.mrf.mxu1 }
 0x679   :  { %v5133_v22 = vsel %vm152_vm0, %v21359_v30, -inf  ;;  %v5136_v26 = vsel %vm152_vm0, %v21361_v57, -inf }
 0x67a   :  { %v16997_v11 = vpop.f32.mrf.mxu0  ;;  %5134 = vmax.xlane.f32.xlu1 %v5133_v22  ;;  %5137 = vmax.xlane.f32.xlu0 %v5136_v26  ;;  %v17002_v46 = vpop.f32.mrf.mxu1 }
 0x67c   :  { %v21367_v31 = vpop.f32.mrf.mxu1  ;;  %v21369_v61 = vpop.f32.mrf.mxu0 }
 0x67d   :  { %v5142_v59 = vsel %vm152_vm0, %v21369_v61, -inf  ;;  %v5139_v28 = vsel %vm152_vm0, %v21367_v31, -inf }
 0x67e   :  { %v17008_v2 = vpop.f32.mrf.mxu0  ;;  %5143 = vmax.xlane.f32.xlu0 %v5142_v59  ;;  %5140 = vmax.xlane.f32.xlu1 %v5139_v28  ;;  %v17003_v6 = vpop.f32.mrf.mxu1 }
 0x680   :  { %v21375_v17 = vpop.f32.mrf.mxu0  ;;  %v21377_v11 = vpop.f32.mrf.mxu1 }
 0x681   :  { %v5145_v46 = vsel %vm152_vm0, %v21375_v17, -inf  ;;  %v5148_v22 = vsel %vm152_vm0, %v21377_v11, -inf }
 0x682   :  { %v17009_v26 = vpop.f32.mrf.mxu0  ;;  %5146 = vmax.xlane.f32.xlu1 %v5145_v46  ;;  %5149 = vmax.xlane.f32.xlu0 %v5148_v22  ;;  %v17014_v32 = vpop.f32.mrf.mxu1 }
 0x684   :  { %v21383_v0 = vpop.f32.mrf.mxu1  ;;  %v21385_v2 = vpop.f32.mrf.mxu0 }
 0x685   :  { %v5154_v6 = vsel %vm152_vm0, %v21385_v2, -inf  ;;  %v5151_v59 = vsel %vm152_vm0, %v21383_v0, -inf }
 0x686   :  { %v17020_v28 = vpop.f32.mrf.mxu0  ;;  %5155 = vmax.xlane.f32.xlu0 %v5154_v6  ;;  %5152 = vmax.xlane.f32.xlu1 %v5151_v59  ;;  %v17015_v24 = vpop.f32.mrf.mxu1 }
 0x688   :  { %v21391_v41 = vpop.f32.mrf.mxu0  ;;  %v21393_v26 = vpop.f32.mrf.mxu1 }
 0x689   :  { %v5157_v32 = vsel %vm152_vm0, %v21391_v41, -inf  ;;  %v5160_v46 = vsel %vm152_vm0, %v21393_v26, -inf }
 0x68a   :  { %v17021_v22 = vpop.f32.mrf.mxu0  ;;  %5158 = vmax.xlane.f32.xlu1 %v5157_v32  ;;  %5161 = vmax.xlane.f32.xlu0 %v5160_v46  ;;  %v17026_v44 = vpop.f32.mrf.mxu1 }
 0x68c   :  { %v21399_v40 = vpop.f32.mrf.mxu1  ;;  %v21401_v28 = vpop.f32.mrf.mxu0 }
 0x68d   :  { %v5166_v24 = vsel %vm152_vm0, %v21401_v28, -inf  ;;  %v5163_v6 = vsel %vm152_vm0, %v21399_v40, -inf }
 0x68e   :  { %v17032_v59 = vpop.f32.mrf.mxu0  ;;  %5167 = vmax.xlane.f32.xlu0 %v5166_v24  ;;  %5164 = vmax.xlane.f32.xlu1 %v5163_v6  ;;  %v17027_v38 = vpop.f32.mrf.mxu1 }
 0x690   :  { %v21407_v35 = vpop.f32.mrf.mxu0  ;;  %v21409_v22 = vpop.f32.mrf.mxu1 }
 0x691   :  { %v5169_v44 = vsel %vm152_vm0, %v21407_v35, -inf  ;;  %v5172_v32 = vsel %vm152_vm0, %v21409_v22, -inf }
 0x692   :  { %v17033_v46 = vpop.f32.mrf.mxu0  ;;  %5170 = vmax.xlane.f32.xlu1 %v5169_v44  ;;  %5173 = vmax.xlane.f32.xlu0 %v5172_v32  ;;  %v17038_v39 = vpop.f32.mrf.mxu1 }
 0x694   :  { %v21415_v42 = vpop.f32.mrf.mxu1  ;;  %v21417_v59 = vpop.f32.mrf.mxu0 }
 0x695   :  { %v5178_v38 = vsel %vm152_vm0, %v21417_v59, -inf  ;;  %v5175_v24 = vsel %vm152_vm0, %v21415_v42, -inf }
 0x696   :  { %v17044_v6 = vpop.f32.mrf.mxu0  ;;  %5179 = vmax.xlane.f32.xlu0 %v5178_v38  ;;  %5176 = vmax.xlane.f32.xlu1 %v5175_v24  ;;  %v17039_v8 = vpop.f32.mrf.mxu1 }
 0x698   :  { %v21423_v4 = vpop.f32.mrf.mxu0  ;;  %v21425_v46 = vpop.f32.mrf.mxu1 }
 0x699   :  { %v5181_v39 = vsel %vm152_vm0, %v21423_v4, -inf  ;;  %v5184_v44 = vsel %vm152_vm0, %v21425_v46, -inf }
 0x69a   :  { %v17045_v32 = vpop.f32.mrf.mxu0  ;;  %5182 = vmax.xlane.f32.xlu1 %v5181_v39  ;;  %5185 = vmax.xlane.f32.xlu0 %v5184_v44  ;;  %v17050_v52 = vpop.f32.mrf.mxu1 }
 0x69c   :  { %v21431_v29 = vpop.f32.mrf.mxu1 }
 0x69d   :  { %v5187_v38 = vsel %vm152_vm0, %v21431_v29, -inf }
 0x69e   :  { %5188 = vmax.xlane.f32.xlu1 %v5187_v38  ;;  %v17051_v8 = vpop.f32.mrf.mxu1 }
 0x6e7   :  { %v5096_v24 = vpop.xlane.xlu0 %5095 }
 0x6e8   :  { %v5190_v6 = vsub.f32 %v21305_v62, %v5096_v24 }
 0x6ea   :  { %v5222_v33 = vmul.f32 1.442695, %v5190_v6 }
 0x6eb   :  { %v5099_v1 = vpop.xlane.xlu1 %5098  ;;  %v5102_v37 = vpop.xlane.xlu0 %5101 }
 0x6ec   :  { %18428 = vpow2.f32 %v5222_v33  ;;  %v5191_v19 = vsub.f32 %v21311_v56, %v5099_v1  ;;  %v5192_v39 = vsub.f32 %v21313_v34, %v5102_v37 }
 0x6ee   :  { %v5224_v44 = vmul.f32 1.442695, %v5191_v19  ;;  %v5226_v52 = vmul.f32 1.442695, %v5192_v39 }
 0x6ef   :  { %v5108_v32 = vpop.xlane.xlu0 %5107  ;;  %v5105_v27 = vpop.xlane.xlu1 %5104 }
 0x6f0   :  { %18430 = vpow2.f32 %v5224_v44  ;;  %v5194_v48 = vsub.f32 %v21321_v14, %v5108_v32  ;;  %v5193_v38 = vsub.f32 %v21319_v51, %v5105_v27 }
 0x6f1   :  { %18432 = vpow2.f32 %v5226_v52 }
 0x6f2   :  { %v5230_v8 = vmul.f32 1.442695, %v5194_v48  ;;  %v5228_v62 = vmul.f32 1.442695, %v5193_v38 }
 0x6f3   :  { %v5111_v24 = vpop.xlane.xlu1 %5110  ;;  %v5114_v6 = vpop.xlane.xlu0 %5113 }
 0x6f4   :  { %18434 = vpow2.f32 %v5230_v8  ;;  %v5195_v33 = vsub.f32 %v21327_v54, %v5111_v24  ;;  %v5196_v1 = vsub.f32 %v21329_v13, %v5114_v6 }
 0x6f5   :  { %18436 = vpow2.f32 %v5228_v62 }
 0x6f6   :  { %v5232_v19 = vmul.f32 1.442695, %v5195_v33  ;;  %v5234_v37 = vmul.f32 1.442695, %v5196_v1 }
 0x6f7   :  { %v5120_v56 = vpop.xlane.xlu0 %5119  ;;  %v5117_v34 = vpop.xlane.xlu1 %5116 }
 0x6f8   :  { %18438 = vpow2.f32 %v5232_v19  ;;  %v5198_v14 = vsub.f32 %v21337_v18, %v5120_v56  ;;  %v5197_v27 = vsub.f32 %v21335_v21, %v5117_v34 }
 0x6f9   :  { %v21444_v51 = vpop.eup %18428  ;;  %18440 = vpow2.f32 %v5234_v37 }
 0x6fa   :  { %v5238_v48 = vmul.f32 1.442695, %v5198_v14  ;;  %v5236_v39 = vmul.f32 1.442695, %v5197_v27  ;;  %v5286_v54 = vsel %vm152_vm0, %v21444_v51, 0.0 }
 0x6fb   :  { %v5123_v44 = vpop.xlane.xlu1 %5122  ;;  %v5126_v13 = vpop.xlane.xlu0 %5125  ;;  %5287 = vadd.xlane.f32.xlu0 %v5286_v54 }
 0x6fc   :  { %18442 = vpow2.f32 %v5238_v48  ;;  %v5199_v52 = vsub.f32 %v21343_v15, %v5123_v44  ;;  %v5200_v32 = vsub.f32 %v21345_v63, %v5126_v13 }
 0x6fd   :  { %v21450_v38 = vpop.eup %18430  ;;  %18444 = vpow2.f32 %v5236_v39 }
 0x6fe   :  { %v21452_v21 = vpop.eup %18432  ;;  %v5240_v18 = vmul.f32 1.442695, %v5199_v52  ;;  %v5242_v8 = vmul.f32 1.442695, %v5200_v32  ;;  %v5289_v62 = vsel %vm152_vm0, %v21450_v38, 0.0 }
 0x6ff   :  { %v5132_v24 = vpop.xlane.xlu0 %5131  ;;  %v5129_v6 = vpop.xlane.xlu1 %5128  ;;  %v5292_v33 = vsel %vm152_vm0, %v21452_v21, 0.0  ;;  %5290 = vadd.xlane.f32.xlu1 %v5289_v62 }
 0x700   :  { %18446 = vpow2.f32 %v5240_v18  ;;  %v5202_v15 = vsub.f32 %v21353_v20, %v5132_v24  ;;  %v5201_v63 = vsub.f32 %v21351_v7, %v5129_v6  ;;  %5293 = vadd.xlane.f32.xlu0 %v5292_v33 }
 0x701   :  { %v21460_v1 = vpop.eup %18434  ;;  %18448 = vpow2.f32 %v5242_v8 }
 0x702   :  { %v21462_v19 = vpop.eup %18436  ;;  %v5246_v37 = vmul.f32 1.442695, %v5202_v15  ;;  %v5244_v56 = vmul.f32 1.442695, %v5201_v63  ;;  %v5298_v34 = vsel %vm152_vm0, %v21460_v1, 0.0 }
 0x703   :  { %v5135_v14 = vpop.xlane.xlu1 %5134  ;;  %v5138_v27 = vpop.xlane.xlu0 %5137  ;;  %v5295_v48 = vsel %vm152_vm0, %v21462_v19, 0.0 }
 0x704   :  { %18450 = vpow2.f32 %v5246_v37  ;;  %v5203_v20 = vsub.f32 %v21359_v30, %v5135_v14  ;;  %v5204_v7 = vsub.f32 %v21361_v57, %v5138_v27  ;;  %5299 = vadd.xlane.f32.xlu0 %v5298_v34  ;;  %5296 = vadd.xlane.f32.xlu1 %v5295_v48 }
 0x705   :  { %v21470_v39 = vpop.eup %18438  ;;  %18452 = vpow2.f32 %v5244_v56 }
 0x706   :  { %v21472_v54 = vpop.eup %18440  ;;  %v5248_v44 = vmul.f32 1.442695, %v5203_v20  ;;  %v5250_v13 = vmul.f32 1.442695, %v5204_v7  ;;  %v5301_v52 = vsel %vm152_vm0, %v21470_v39, 0.0 }
 0x707   :  { %v5144_v32 = vpop.xlane.xlu0 %5143  ;;  %v5141_v18 = vpop.xlane.xlu1 %5140  ;;  %v5304_v8 = vsel %vm152_vm0, %v21472_v54, 0.0 }
 0x708   :  { %18454 = vpow2.f32 %v5248_v44  ;;  %v5206_v30 = vsub.f32 %v21369_v61, %v5144_v32  ;;  %v5205_v57 = vsub.f32 %v21367_v31, %v5141_v18  ;;  %5305 = vadd.xlane.f32.xlu0 %v5304_v8  ;;  %5302 = vadd.xlane.f32.xlu1 %v5301_v52 }
 0x709   :  { %v21480_v62 = vpop.eup %18442  ;;  %18456 = vpow2.f32 %v5250_v13 }
 0x70a   :  { %v21482_v24 = vpop.eup %18444  ;;  %v5254_v6 = vmul.f32 1.442695, %v5206_v30  ;;  %v5252_v33 = vmul.f32 1.442695, %v5205_v57  ;;  %v5310_v15 = vsel %vm152_vm0, %v21480_v62, 0.0 }
 0x70b   :  { %v5147_v63 = vpop.xlane.xlu1 %5146  ;;  %v5150_v37 = vpop.xlane.xlu0 %5149  ;;  %v5307_v56 = vsel %vm152_vm0, %v21482_v24, 0.0 }
 0x70c   :  { %18458 = vpow2.f32 %v5254_v6  ;;  %v5207_v31 = vsub.f32 %v21375_v17, %v5147_v63  ;;  %v5208_v61 = vsub.f32 %v21377_v11, %v5150_v37  ;;  %5311 = vadd.xlane.f32.xlu0 %v5310_v15  ;;  %5308 = vadd.xlane.f32.xlu1 %v5307_v56 }
 0x70d   :  { %v21490_v34 = vpop.eup %18446  ;;  %18460 = vpow2.f32 %v5252_v33 }
 0x70e   :  { %v21492_v14 = vpop.eup %18448  ;;  %v5256_v27 = vmul.f32 1.442695, %v5207_v31  ;;  %v5258_v48 = vmul.f32 1.442695, %v5208_v61  ;;  %v5313_v20 = vsel %vm152_vm0, %v21490_v34, 0.0 }
 0x70f   :  { %v5156_v7 = vpop.xlane.xlu0 %5155  ;;  %v5153_v44 = vpop.xlane.xlu1 %5152  ;;  %v5316_v13 = vsel %vm152_vm0, %v21492_v14, 0.0 }
 0x710   :  { %18462 = vpow2.f32 %v5256_v27  ;;  %v5210_v17 = vsub.f32 %v21385_v2, %v5156_v7  ;;  %v5209_v11 = vsub.f32 %v21383_v0, %v5153_v44  ;;  %5317 = vadd.xlane.f32.xlu0 %v5316_v13  ;;  %5314 = vadd.xlane.f32.xlu1 %v5313_v20 }
 0x711   :  { %v21500_v52 = vpop.eup %18450  ;;  %18464 = vpow2.f32 %v5258_v48 }
 0x712   :  { %v21502_v32 = vpop.eup %18452  ;;  %v5262_v18 = vmul.f32 1.442695, %v5210_v17  ;;  %v5260_v8 = vmul.f32 1.442695, %v5209_v11  ;;  %v5322_v30 = vsel %vm152_vm0, %v21500_v52, 0.0 }
 0x713   :  { %v5159_v57 = vpop.xlane.xlu1 %5158  ;;  %v5162_v6 = vpop.xlane.xlu0 %5161  ;;  %v5319_v33 = vsel %vm152_vm0, %v21502_v32, 0.0 }
 0x714   :  { %18466 = vpow2.f32 %v5262_v18  ;;  %v5211_v0 = vsub.f32 %v21391_v41, %v5159_v57  ;;  %v5212_v2 = vsub.f32 %v21393_v26, %v5162_v6  ;;  %5323 = vadd.xlane.f32.xlu0 %v5322_v30  ;;  %5320 = vadd.xlane.f32.xlu1 %v5319_v33 }
 0x715   :  { %v21510_v15 = vpop.eup %18454  ;;  %18468 = vpow2.f32 %v5260_v8 }
 0x716   :  { %v21512_v63 = vpop.eup %18456  ;;  %v5264_v37 = vmul.f32 1.442695, %v5211_v0  ;;  %v5266_v56 = vmul.f32 1.442695, %v5212_v2  ;;  %v5325_v31 = vsel %vm152_vm0, %v21510_v15, 0.0 }
 0x717   :  { %v5168_v61 = vpop.xlane.xlu0 %5167  ;;  %v5165_v27 = vpop.xlane.xlu1 %5164  ;;  %v5328_v48 = vsel %vm152_vm0, %v21512_v63, 0.0 }
 0x718   :  { %18470 = vpow2.f32 %v5264_v37  ;;  %v5214_v41 = vsub.f32 %v21401_v28, %v5168_v61  ;;  %v5213_v26 = vsub.f32 %v21399_v40, %v5165_v27  ;;  %5329 = vadd.xlane.f32.xlu0 %v5328_v48  ;;  %5326 = vadd.xlane.f32.xlu1 %v5325_v31 }
 0x719   :  { %v21520_v20 = vpop.eup %18458  ;;  %18472 = vpow2.f32 %v5266_v56 }
 0x71a   :  { %v21522_v7 = vpop.eup %18460  ;;  %v5270_v44 = vmul.f32 1.442695, %v5214_v41  ;;  %v5268_v13 = vmul.f32 1.442695, %v5213_v26  ;;  %v5334_v17 = vsel %vm152_vm0, %v21520_v20, 0.0 }
 0x71b   :  { %v5171_v11 = vpop.xlane.xlu1 %5170  ;;  %v5174_v18 = vpop.xlane.xlu0 %5173  ;;  %v5331_v8 = vsel %vm152_vm0, %v21522_v7, 0.0 }
 0x71c   :  { %18474 = vpow2.f32 %v5270_v44  ;;  %v5215_v40 = vsub.f32 %v21407_v35, %v5171_v11  ;;  %v5216_v28 = vsub.f32 %v21409_v22, %v5174_v18  ;;  %5335 = vadd.xlane.f32.xlu0 %v5334_v17  ;;  %5332 = vadd.xlane.f32.xlu1 %v5331_v8 }
 0x71d   :  { %v21530_v30 = vpop.eup %18462  ;;  %18476 = vpow2.f32 %v5268_v13 }
 0x71e   :  { %v21532_v57 = vpop.eup %18464  ;;  %v5272_v6 = vmul.f32 1.442695, %v5215_v40  ;;  %v5274_v33 = vmul.f32 1.442695, %v5216_v28  ;;  %v5337_v0 = vsel %vm152_vm0, %v21530_v30, 0.0 }
 0x71f   :  { %v5180_v2 = vpop.xlane.xlu0 %5179  ;;  %v5177_v37 = vpop.xlane.xlu1 %5176  ;;  %v5340_v56 = vsel %vm152_vm0, %v21532_v57, 0.0 }
 0x720   :  { %18478 = vpow2.f32 %v5272_v6  ;;  %v5218_v35 = vsub.f32 %v21417_v59, %v5180_v2  ;;  %v5217_v22 = vsub.f32 %v21415_v42, %v5177_v37  ;;  %5341 = vadd.xlane.f32.xlu0 %v5340_v56  ;;  %5338 = vadd.xlane.f32.xlu1 %v5337_v0 }
 0x721   :  { %v21540_v31 = vpop.eup %18466  ;;  %18480 = vpow2.f32 %v5274_v33 }
 0x722   :  { %v21542_v61 = vpop.eup %18468  ;;  %v5278_v27 = vmul.f32 1.442695, %v5218_v35  ;;  %v5276_v48 = vmul.f32 1.442695, %v5217_v22  ;;  %v5346_v41 = vsel %vm152_vm0, %v21540_v31, 0.0 }
 0x723   :  { %v5183_v26 = vpop.xlane.xlu1 %5182  ;;  %v5186_v44 = vpop.xlane.xlu0 %5185  ;;  %v5343_v13 = vsel %vm152_vm0, %v21542_v61, 0.0 }
 0x724   :  { %18482 = vpow2.f32 %v5278_v27  ;;  %v5219_v42 = vsub.f32 %v21423_v4, %v5183_v26  ;;  %5347 = vadd.xlane.f32.xlu0 %v5346_v41  ;;  %v5220_v59 = vsub.f32 %v21425_v46, %v5186_v44  ;;  %5344 = vadd.xlane.f32.xlu1 %v5343_v13 }
 0x725   :  { %v21550_v17 = vpop.eup %18470  ;;  %18484 = vpow2.f32 %v5276_v48 }
 0x726   :  { %v21552_v11 = vpop.eup %18472  ;;  %v5280_v18 = vmul.f32 1.442695, %v5219_v42  ;;  %v5282_v8 = vmul.f32 1.442695, %v5220_v59  ;;  %v5349_v40 = vsel %vm152_vm0, %v21550_v17, 0.0 }
 0x727   :  { %v5352_v28 = vsel %vm152_vm0, %v21552_v11, 0.0  ;;  %v5189_v6 = vpop.xlane.xlu1 %5188 }
 0x728   :  { %18486 = vpow2.f32 %v5280_v18  ;;  %5353 = vadd.xlane.f32.xlu0 %v5352_v28  ;;  %5350 = vadd.xlane.f32.xlu1 %v5349_v40  ;;  %v5221_v4 = vsub.f32 %v21431_v29, %v5189_v6 }
 0x729   :  { %v21559_v46 = vpop.eup %18474  ;;  %18488 = vpow2.f32 %v5282_v8 }
 0x72a   :  { %v21561_v33 = vpop.eup %18476  ;;  %v5284_v0 = vmul.f32 1.442695, %v5221_v4  ;;  %v5358_v2 = vsel %vm152_vm0, %v21559_v46, 0.0 }
 0x72b   :  { %v5355_v37 = vsel %vm152_vm0, %v21561_v33, 0.0 }
 0x72c   :  { %18490 = vpow2.f32 %v5284_v0  ;;  %5359 = vadd.xlane.f32.xlu0 %v5358_v2  ;;  %5356 = vadd.xlane.f32.xlu1 %v5355_v37 }
 0x72d   :  { %v21567_v56 = vpop.eup %18478 }
 0x72e   :  { %v21569_v35 = vpop.eup %18480  ;;  %v5361_v29 = vsel %vm152_vm0, %v21567_v56, 0.0 }
 0x72f   :  { %v5364_v22 = vsel %vm152_vm0, %v21569_v35, 0.0 }
 0x730   :  { %5365 = vadd.xlane.f32.xlu0 %v5364_v22  ;;  %5362 = vadd.xlane.f32.xlu1 %v5361_v29 }
 0x731   :  { %v21575_v27 = vpop.eup %18482 }
 0x732   :  { %v21577_v48 = vpop.eup %18484  ;;  %v5370_v41 = vsel %vm152_vm0, %v21575_v27, 0.0 }
 0x733   :  { %v5367_v26 = vsel %vm152_vm0, %v21577_v48, 0.0 }
 0x734   :  { %5371 = vadd.xlane.f32.xlu0 %v5370_v41  ;;  %5368 = vadd.xlane.f32.xlu1 %v5367_v26 }
 0x735   :  { %v21583_v44 = vpop.eup %18486 }
 0x736   :  { %v21585_v13 = vpop.eup %18488  ;;  %v5373_v42 = vsel %vm152_vm0, %v21583_v44, 0.0 }
 0x737   :  { %v5376_v59 = vsel %vm152_vm0, %v21585_v13, 0.0 }
 0x738   :  { %5377 = vadd.xlane.f32.xlu0 %v5376_v59  ;;  %5374 = vadd.xlane.f32.xlu1 %v5373_v42 }
 0x739   :  { %v21591_v18 = vpop.eup %18490 }
 0x73a   :  { %v5379_v8 = vsel %vm152_vm0, %v21591_v18, 0.0 }
 0x73c   :  { %5380 = vadd.xlane.f32.xlu1 %v5379_v8 }
 0x784   :  { %v5288_v40 = vpop.xlane.xlu0 %5287 }
 0x785   :  { %18492 = vrcp.f32 %v5288_v40 }
 0x788   :  { %v5291_v28 = vpop.xlane.xlu1 %5290 }
 0x789   :  { %v5294_v6 = vpop.xlane.xlu0 %5293  ;;  %18494 = vrcp.f32 %v5291_v28 }
 0x78a   :  { %18496 = vrcp.f32 %v5294_v6 }
 0x78d   :  { %v5300_v4 = vpop.xlane.xlu0 %5299  ;;  %v5297_v0 = vpop.xlane.xlu1 %5296 }
 0x78e   :  { %18498 = vrcp.f32 %v5297_v0 }
 0x78f   :  { %18500 = vrcp.f32 %v5300_v4  ;;  %v5464_v4 = vsel %vm21059_vm14, %v19819_v49, 0 }
 0x791   :  { %v5306_v2 = vpop.xlane.xlu0 %5305  ;;  %v5303_v37 = vpop.xlane.xlu1 %5302 }
 0x792   :  { %18502 = vrcp.f32 %v5303_v37  ;;  %v18493_v29 = vpop.eup %18492 }
 0x793   :  { %18504 = vrcp.f32 %v5306_v2  ;;  %v5383_v42 = vmul.f32 %v18493_v29, %v21444_v51 }
 0x795   :  { %v5312_v22 = vpop.xlane.xlu0 %5311  ;;  %v5309_v41 = vpop.xlane.xlu1 %5308 }
 0x796   :  { %v18495_v26 = vpop.eup %18494  ;;  %18506 = vrcp.f32 %v5309_v41 }
 0x797   :  { %v5385_v59 = vmul.f32 %v18495_v26, %v21450_v38  ;;  %18508 = vrcp.f32 %v5312_v22  ;;  %v18497_v6 = vpop.eup %18496 }
 0x798   :  { %v5387_v51 = vmul.f32 %v18497_v6, %v21452_v21  ;;  %v5465_v21 = vsel %vm21059_vm14, %v19808_v55, 0  ;;  %v5466_v6 = vsel %vm21059_vm14, %v19876_v16, 0 }
 0x799   :  { %v5318_v8 = vpop.xlane.xlu0 %5317  ;;  %v5315_v40 = vpop.xlane.xlu1 %5314  ;;  %v5446_v28 = vpack.c.bf16 %v5385_v59, %v5383_v42 }
 0x79a   :  { %18510 = vrcp.f32 %v5315_v40 }
 0x79b   :  { %17055 = vmatmul.mubr.msk.bf16.vlgmr.msra.gmra.mxu0 %vm152_vm0, %v5446_v28  ;;  %v18499_v0 = vpop.eup %18498  ;;  %18512 = vrcp.f32 %v5318_v8 }
 0x79c   :  { %17065 = vmatpush3.bf16.msra.mxu0 %v5464_v4  ;;  %17066 = vmatprep.mubr.msk.bf16.mxu0 %vm19197_vm1, %v25492_v50  ;;  %v5389_v38 = vmul.f32 %v18499_v0, %v21462_v19  ;;  %v18501_v29 = vpop.eup %18500 }
 0x79d   :  { %v5324_v2 = vpop.xlane.xlu0 %5323  ;;  %v5321_v37 = vpop.xlane.xlu1 %5320  ;;  %17076 = vmatprep.subr.bf16.mxu0 %v25492_v50  ;;  %v5391_v26 = vmul.f32 %v18501_v29, %v21460_v1 }
 0x79e   :  { %18514 = vrcp.f32 %v5321_v37  ;;  %v5447_v22 = vpack.c.bf16 %v5389_v38, %v5387_v51  ;;  %v5467_v37 = vsel %vm21059_vm14, %v19860_v36, 0 }
 0x79f   :  { %v18503_v41 = vpop.eup %18502  ;;  %18516 = vrcp.f32 %v5324_v2 }
 0x7a0   :  { %v5393_v42 = vmul.f32 %v18503_v41, %v21470_v39  ;;  %17061 = vmatmul.mubr.msk.bf16.vlgmr.msra.gmra.mxu1 %vm152_vm0, %v5447_v22  ;;  %v18505_v8 = vpop.eup %18504 }
 0x7a1   :  { %v5330_v19 = vpop.xlane.xlu0 %5329  ;;  %v5327_v59 = vpop.xlane.xlu1 %5326  ;;  %17071 = vmatpush3.bf16.msra.mxu1 %v5465_v21  ;;  %17072 = vmatprep.mubr.msk.bf16.mxu1 %vm19197_vm1, %v25492_v50  ;;  %v5395_v39 = vmul.f32 %v18505_v8, %v21472_v54  ;;  %v5468_v21 = vsel %vm21059_vm14, %v19905_v12, 0 }
 0x7a2   :  { %18518 = vrcp.f32 %v5327_v59  ;;  %v5448_v40 = vpack.c.bf16 %v5393_v42, %v5391_v26  ;;  %17082 = vmatprep.subr.bf16.mxu1 %v25492_v50 }
 0x7a3   :  { %v18507_v1 = vpop.eup %18506  ;;  %18520 = vrcp.f32 %v5330_v19 }
 0x7a4   :  { %v5397_v28 = vmul.f32 %v18507_v1, %v21482_v24  ;;  %17067 = vmatmul.mubr.msk.bf16.vlgmr.msra.gmra.mxu0 %vm152_vm0, %v5448_v40  ;;  %v18509_v51 = vpop.eup %18508 }
 0x7a5   :  { %v5336_v4 = vpop.xlane.xlu0 %5335  ;;  %v5333_v0 = vpop.xlane.xlu1 %5332  ;;  %17077 = vmatpush3.bf16.msra.mxu0 %v5466_v6  ;;  %17078 = vmatprep.mubr.msk.bf16.mxu0 %vm19197_vm1, %v25492_v50  ;;  %v5399_v24 = vmul.f32 %v18509_v51, %v21480_v62 }
 0x7a6   :  { %18522 = vrcp.f32 %v5333_v0  ;;  %v5449_v38 = vpack.c.bf16 %v5397_v28, %v5395_v39  ;;  %17088 = vmatprep.subr.bf16.mxu0 %v25492_v50  ;;  %v5469_v39 = vsel %vm21059_vm14, %v19896_v23, 0 }
 0x7a7   :  { %v18511_v54 = vpop.eup %18510  ;;  %18524 = vrcp.f32 %v5336_v4 }
 0x7a8   :  { %v5401_v2 = vmul.f32 %v18511_v54, %v21490_v34  ;;  %17073 = vmatmul.mubr.msk.bf16.vlgmr.msra.gmra.mxu1 %vm152_vm0, %v5449_v38  ;;  %v18513_v41 = vpop.eup %18512  ;;  %v5470_v38 = vsel %vm21059_vm14, %v19934_v58, 0 }
 0x7a9   :  { %v5342_v29 = vpop.xlane.xlu0 %5341  ;;  %v5339_v22 = vpop.xlane.xlu1 %5338  ;;  %17083 = vmatpush3.bf16.msra.mxu1 %v5467_v37  ;;  %17084 = vmatprep.mubr.msk.bf16.mxu1 %vm19197_vm1, %v25492_v50  ;;  %v5403_v34 = vmul.f32 %v18513_v41, %v21492_v14 }
 0x7aa   :  { %18526 = vrcp.f32 %v5339_v22  ;;  %v5450_v26 = vpack.c.bf16 %v5401_v2, %v5399_v24  ;;  %17094 = vmatprep.subr.bf16.mxu1 %v25492_v50  ;;  %v5471_v22 = vsel %vm21059_vm14, %v19925_v9, 0 }
 0x7ab   :  { %v18515_v62 = vpop.eup %18514  ;;  %18528 = vrcp.f32 %v5342_v29 }
 0x7ac   :  { %v5405_v42 = vmul.f32 %v18515_v62, %v21502_v32  ;;  %17079 = vmatmul.mubr.msk.bf16.vlgmr.msra.gmra.mxu0 %vm152_vm0, %v5450_v26  ;;  %v18517_v8 = vpop.eup %18516 }
 0x7ad   :  { %v5348_v19 = vpop.xlane.xlu0 %5347  ;;  %v5345_v59 = vpop.xlane.xlu1 %5344  ;;  %17089 = vmatpush3.bf16.msra.mxu0 %v5468_v21  ;;  %17090 = vmatprep.mubr.msk.bf16.mxu0 %vm19197_vm1, %v25492_v50  ;;  %v5407_v32 = vmul.f32 %v18517_v8, %v21500_v52  ;;  %v5472_v21 = vsel %vm21059_vm14, %v19963_v43, 0 }
 0x7ae   :  { %18530 = vrcp.f32 %v5345_v59  ;;  %v5451_v40 = vpack.c.bf16 %v5405_v42, %v5403_v34  ;;  %17100 = vmatprep.subr.bf16.mxu0 %v25492_v50 }
 0x7af   :  { %v18519_v14 = vpop.eup %18518  ;;  %18532 = vrcp.f32 %v5348_v19 }
 0x7b0   :  { %v5409_v1 = vmul.f32 %v18519_v14, %v21510_v15  ;;  %17085 = vmatmul.mubr.msk.bf16.vlgmr.msra.gmra.mxu1 %vm152_vm0, %v5451_v40  ;;  %v18521_v4 = vpop.eup %18520 }
 0x7b1   :  { %v5354_v28 = vpop.xlane.xlu0 %5353  ;;  %v5351_v6 = vpop.xlane.xlu1 %5350  ;;  %17095 = vmatpush3.bf16.msra.mxu1 %v5469_v39  ;;  %17096 = vmatprep.mubr.msk.bf16.mxu1 %vm19197_vm1, %v25492_v50  ;;  %v5411_v15 = vmul.f32 %v18521_v4, %v21512_v63 }
 0x7b2   :  { %18534 = vrcp.f32 %v5351_v6  ;;  %v5452_v0 = vpack.c.bf16 %v5409_v1, %v5407_v32  ;;  %17106 = vmatprep.subr.bf16.mxu1 %v25492_v50  ;;  %v5473_v32 = vsel %vm21059_vm14, %v19954_v45, 0 }
 0x7b3   :  { %v18523_v52 = vpop.eup %18522  ;;  %18536 = vrcp.f32 %v5354_v28 }
 0x7b4   :  { %v5413_v51 = vmul.f32 %v18523_v52, %v21522_v7  ;;  %17091 = vmatmul.mubr.msk.bf16.vlgmr.msra.gmra.mxu0 %vm152_vm0, %v5452_v0  ;;  %v18525_v2 = vpop.eup %18524  ;;  %v5474_v0 = vsel %vm21059_vm14, %v19984_v53, 0 }
 0x7b5   :  { %v5360_v54 = vpop.xlane.xlu0 %5359  ;;  %v5357_v24 = vpop.xlane.xlu1 %5356  ;;  %17101 = vmatpush3.bf16.msra.mxu0 %v5470_v38  ;;  %17102 = vmatprep.mubr.msk.bf16.mxu0 %vm19197_vm1, %v25492_v50  ;;  %v5415_v7 = vmul.f32 %v18525_v2, %v21520_v20 }
 0x7b6   :  { %18538 = vrcp.f32 %v5357_v24  ;;  %v5453_v37 = vpack.c.bf16 %v5413_v51, %v5411_v15  ;;  %17112 = vmatprep.subr.bf16.mxu0 %v25492_v50 }
 0x7b7   :  { %v18527_v63 = vpop.eup %18526  ;;  %18540 = vrcp.f32 %v5360_v54  ;;  %v5475_v54 = vsel %vm21059_vm14, %v19978_v10, 0 }
 0x7b8   :  { %v5417_v29 = vmul.f32 %v18527_v63, %v21530_v30  ;;  %17097 = vmatmul.mubr.msk.bf16.vlgmr.msra.gmra.mxu1 %vm152_vm0, %v5453_v37  ;;  %v18529_v62 = vpop.eup %18528  ;;  %v5476_v63 = vsel %vm21059_vm14, %v19995_v47, 0 }
 0x7b9   :  { %v5366_v41 = vpop.xlane.xlu0 %5365  ;;  %v5363_v26 = vpop.xlane.xlu1 %5362  ;;  %17107 = vmatpush3.bf16.msra.mxu1 %v5471_v22  ;;  %17108 = vmatprep.mubr.msk.bf16.mxu1 %vm19197_vm1, %v25492_v50  ;;  %v5419_v30 = vmul.f32 %v18529_v62, %v21532_v57  ;;  %v5477_v62 = vsel %vm21059_vm14, %v19992_v60, 0  ;;  %vm9827_vm14 = vmpackc.low %vm23026_vm13, %vm23026_vm13 }
 0x7ba   :  { %18542 = vrcp.f32 %v5363_v26  ;;  %v5454_v34 = vpack.c.bf16 %v5417_v29, %v5415_v7  ;;  %17118 = vmatprep.subr.bf16.mxu1 %v25492_v50 }
 0x7bb   :  { %v18531_v20 = vpop.eup %18530  ;;  %18544 = vrcp.f32 %v5366_v41 }
 0x7bc   :  { %v5421_v42 = vmul.f32 %v18531_v20, %v21542_v61  ;;  %17103 = vmatmul.mubr.msk.bf16.vlgmr.msra.gmra.mxu0 %vm152_vm0, %v5454_v34  ;;  %v18533_v8 = vpop.eup %18532 }
 0x7bd   :  { %v5372_v19 = vpop.xlane.xlu0 %5371  ;;  %v5369_v59 = vpop.xlane.xlu1 %5368  ;;  %17113 = vmatpush3.bf16.msra.mxu0 %v5472_v21  ;;  %17114 = vmatprep.mubr.msk.bf16.mxu0 %vm19197_vm1, %v25492_v50  ;;  %v5423_v61 = vmul.f32 %v18533_v8, %v21540_v31  ;;  %v25738_v21 = vld [vmem:[#allocation10_spill] sm:$0xff]  ;;  %v25743_v8 = vld [vmem:[#allocation19_spill] sm:$0xff] }
 0x7be   :  { %18546 = vrcp.f32 %v5369_v59  ;;  %v5455_v40 = vpack.c.bf16 %v5421_v42, %v5419_v30  ;;  %17124 = vmatprep.subr.bf16.mxu0 %v25492_v50  ;;  %v25737_v30 = vld [vmem:[#allocation11_spill] sm:$0xff] }
 0x7bf   :  { %v18535_v57 = vpop.eup %18534  ;;  %18548 = vrcp.f32 %v5372_v19  ;;  %v6224_v19 = vrot.slane %v6220_v5, %v25738_v21  ;;  %v25739_v59 = vld [vmem:[#allocation15_spill] sm:$0xff] }
 0x7c0   :  { %v5425_v14 = vmul.f32 %v18535_v57, %v21550_v17  ;;  %17109 = vmatmul.mubr.msk.bf16.vlgmr.msra.gmra.mxu1 %vm152_vm0, %v5455_v40  ;;  %v18537_v28 = vpop.eup %18536  ;;  %v25744_v40 = vld [vmem:[#allocation18_spill] sm:$0xff]  ;;  %v25745_v57 = vld [vmem:[#allocation23_spill] sm:$0xff] }
 0x7c1   :  { %v5378_v1 = vpop.xlane.xlu0 %5377  ;;  %v5375_v39 = vpop.xlane.xlu1 %5374  ;;  %17119 = vmatpush3.bf16.msra.mxu1 %v5473_v32  ;;  %17120 = vmatprep.mubr.msk.bf16.mxu1 %vm19197_vm1, %v25492_v50  ;;  %v5427_v17 = vmul.f32 %v18537_v28, %v21552_v11  ;;  %vm21746_vm5 = vcmp.ne.s16.totalorder %v6224_v19, 0  ;;  %v25748_v32 = vld [vmem:[#allocation26_spill] sm:$0xff]  ;;  %v25751_v28 = vld [vmem:[#allocation43_spill] sm:$0xff] }
 0x7c2   :  { %18550 = vrcp.f32 %v5375_v39  ;;  %v5456_v6 = vpack.c.bf16 %v5425_v14, %v5423_v61  ;;  %17130 = vmatprep.subr.bf16.mxu1 %v25492_v50  ;;  %v25746_v61 = vld [vmem:[#allocation22_spill] sm:$0xff]  ;;  %v25747_v14 = vld [vmem:[#allocation27_spill] sm:$0xff] }
 0x7c3   :  { %v18539_v31 = vpop.eup %18538  ;;  %18552 = vrcp.f32 %v5378_v1  ;;  %v25749_v1 = vld [vmem:[#allocation35_spill] sm:$0xff]  ;;  %v25750_v39 = vld [vmem:[#allocation34_spill] sm:$0xff] }
 0x7c4   :  { %v5429_v4 = vmul.f32 %v18539_v31, %v21561_v33  ;;  %17115 = vmatmul.mubr.msk.bf16.vlgmr.msra.gmra.mxu0 %vm152_vm0, %v5456_v6  ;;  %v18541_v15 = vpop.eup %18540  ;;  %v25752_v6 = vld [vmem:[#allocation42_spill] sm:$0xff]  ;;  %v25753_v31 = vld [vmem:[#allocation51_spill] sm:$0xff] }
 0x7c5   :  { %v5381_v52 = vpop.xlane.xlu1 %5380  ;;  %17125 = vmatpush3.bf16.msra.mxu0 %v5474_v0  ;;  %17126 = vmatprep.mubr.msk.bf16.mxu0 %vm19197_vm1, %v25492_v50  ;;  %v5431_v11 = vmul.f32 %v18541_v15, %v21559_v46  ;;  %v25756_v0 = vld [vmem:[#allocation57_spill] sm:$0xff] }
 0x7c6   :  { %18554 = vrcp.f32 %v5381_v52  ;;  %v5457_v51 = vpack.c.bf16 %v5429_v4, %v5427_v17  ;;  %17136 = vmatprep.subr.bf16.mxu0 %v25492_v50  ;;  %v25754_v17 = vld [vmem:[#allocation49_spill] sm:$0xff]  ;;  %v25755_v4 = vld [vmem:[#allocation28_spill] sm:$0xff]  ;;  %v25757_v52 = vld [vmem:[#allocation59_spill] sm:$0xff] }
 0x7c7   :  { %v18543_v38 = vpop.eup %18542  ;;  %v25758_v15 = vld [vmem:[#allocation33_spill] sm:$0xff] }
 0x7c8   :  { %v5433_v33 = vmul.f32 %v18543_v38, %v21567_v56  ;;  %17121 = vmatmul.mubr.msk.bf16.vlgmr.msra.gmra.mxu1 %vm152_vm0, %v5457_v51  ;;  %v18545_v24 = vpop.eup %18544  ;;  %v25759_v51 = vld [vmem:[#allocation36_spill] sm:$0xff]  ;;  %v25760_v38 = vld [vmem:[#allocation61_spill] sm:$0xff] }
 0x7c9   :  { %17131 = vmatpush3.bf16.msra.mxu1 %v5475_v54  ;;  %17132 = vmatprep.mubr.msk.bf16.mxu1 %vm19197_vm1, %v25492_v50  ;;  %v5435_v46 = vmul.f32 %v18545_v24, %v21569_v35  ;;  %v25763_v54 = vld [vmem:[#allocation44_spill] sm:$0xff]  ;;  %v25764_v24 = vld [vmem:[#allocation63_spill] sm:$0xff] }
 0x7ca   :  { %v5458_v2 = vpack.c.bf16 %v5433_v33, %v5431_v11  ;;  %17142 = vmatprep.subr.bf16.mxu1 %v25492_v50  ;;  %v25761_v11 = vld [vmem:[#allocation62_spill] sm:$0xff]  ;;  %v25762_v33 = vld [vmem:[#allocation41_spill] sm:$0xff] }
 0x7cb   :  { %v18547_v37 = vpop.eup %18546 }
 0x7cc   :  { %v5437_v56 = vmul.f32 %v18547_v37, %v21577_v48  ;;  %17127 = vmatmul.mubr.msk.bf16.vlgmr.msra.gmra.mxu0 %vm152_vm0, %v5458_v2  ;;  %v18549_v7 = vpop.eup %18548  ;;  %v25765_v2 = vld [vmem:[#allocation64_spill] sm:$0xff]  ;;  %v25766_v37 = vld [vmem:[#allocation50_spill] sm:$0xff] }
 0x7cd   :  { %17137 = vmatpush3.bf16.msra.mxu0 %v5476_v63  ;;  %17138 = vmatprep.mubr.msk.bf16.mxu0 %vm19197_vm1, %v25492_v50  ;;  %v5439_v41 = vmul.f32 %v18549_v7, %v21575_v27  ;;  %v25769_v63 = vld [vmem:[#allocation66_spill] sm:$0xff] }
 0x7ce   :  { %v5459_v29 = vpack.c.bf16 %v5437_v56, %v5435_v46  ;;  %17148 = vmatprep.subr.bf16.mxu0 %v25492_v50  ;;  %v25767_v46 = vld [vmem:[#allocation52_spill] sm:$0xff]  ;;  %v25768_v56 = vld [vmem:[#allocation65_spill] sm:$0xff]  ;;  %v25770_v7 = vld [vmem:[#allocation58_spill] sm:$0xff] }
 0x7cf   :  { %v18551_v35 = vpop.eup %18550 }
 0x7d0   :  { %v18553_v48 = vpop.eup %18552  ;;  %v5441_v26 = vmul.f32 %v18551_v35, %v21583_v44  ;;  %17133 = vmatmul.mubr.msk.bf16.vlgmr.msra.gmra.mxu1 %vm152_vm0, %v5459_v29  ;;  %v25771_v29 = vld [vmem:[#allocation60_spill] sm:$0xff] }
 0x7d1   :  { %17143 = vmatpush3.bf16.msra.mxu1 %v5477_v62  ;;  %17144 = vmatprep.mubr.msk.bf16.mxu1 %vm19197_vm1, %v25492_v50  ;;  %v5443_v27 = vmul.f32 %v18553_v48, %v21585_v13  ;;  %v7266_v22 = vsel %vm21746_vm5, %v25771_v29, 0  ;;  %v25772_v35 = vld [vmem:[#allocation68_spill] sm:$0xff]  ;;  %v25773_v48 = vld [vmem:[#allocation67_spill] sm:$0xff]  ;;  %v8024_v13 = vsel %vm8023_vm9, 65537, %v25532_v25  ;;  %vm24336_vm9 = vmand %vm13430_vm7, %vm13431_vm8 }
 0x7d2   :  { %v5460_v20 = vpack.c.bf16 %v5441_v26, %v5439_v41  ;;  %17154 = vmatprep.subr.bf16.mxu1 %v25492_v50  ;;  %v7267_v41 = vsel %vm21746_vm5, %v25773_v48, 0  ;;  %v25774_v62 = vld [vmem:[#allocation12_spill] sm:$0xff] }
 0x7d3   :  { %v18555_v34 = vpop.eup %18554 }
 0x7d4   :  { %v5445_v44 = vmul.f32 %v18555_v34, %v21591_v18  ;;  %17139 = vmatmul.mubr.msk.bf16.vlgmr.msra.gmra.mxu0 %vm152_vm0, %v5460_v20  ;;  %v25742_v18 = vld [vmem:[#allocation14_spill] sm:$0xff] }
 0x7d5   :  { %17149 = vmatpush3.bf16.xpose.msra.mxu0 %v25737_v30  ;;  %17150 = vmatprep.mubr.msk.bf16.mxu0 %vm19197_vm1, %v25492_v50 }
 0x7d6   :  { %v5461_v42 = vpack.c.bf16 %v5445_v44, %v5443_v27  ;;  %17160 = vmatprep.subr.bf16.mxu0 %v25492_v50  ;;  %v25776_v44 = vld [vmem:[#allocation69_spill] sm:$0xff] }
 0x7d8   :  { %17145 = vmatmul.mubr.msk.bf16.vlgmr.msra.gmra.mxu1 %vm152_vm0, %v5461_v42 }
 0x7d9   :  { %17155 = vmatpush3.bf16.xpose.msra.mxu1 %v25739_v59  ;;  %17156 = vmatprep.mubr.msk.bf16.mxu1 %vm19197_vm1, %v25492_v50 }
 0x7da   :  { %17166 = vmatprep.subr.bf16.mxu1 %v25492_v50 }
 0x7dc   :  { %17151 = vmatmul.mubr.msk.bf16.vlgmr.msra.gmra.mxu0 %vm21746_vm5, %v25742_v18 }
 0x7dd   :  { %17161 = vmatpush3.bf16.xpose.msra.mxu0 %v25743_v8  ;;  %17162 = vmatprep.mubr.msk.bf16.mxu0 %vm19197_vm1, %v25492_v50 }
 0x7de   :  { %17172 = vmatprep.subr.bf16.mxu0 %v25492_v50 }
 0x7e0   :  { %17157 = vmatmul.mubr.msk.bf16.vlgmr.msra.gmra.mxu1 %vm21746_vm5, %v25744_v40 }
 0x7e1   :  { %17167 = vmatpush3.bf16.xpose.msra.mxu1 %v25745_v57  ;;  %17168 = vmatprep.mubr.msk.bf16.mxu1 %vm19197_vm1, %v25492_v50 }
 0x7e2   :  { %17178 = vmatprep.subr.bf16.mxu1 %v25492_v50 }
 0x7e4   :  { %17163 = vmatmul.mubr.msk.bf16.vlgmr.msra.gmra.mxu0 %vm21746_vm5, %v25746_v61 }
 0x7e5   :  { %17173 = vmatpush3.bf16.xpose.msra.mxu0 %v25747_v14  ;;  %17174 = vmatprep.mubr.msk.bf16.mxu0 %vm19197_vm1, %v25492_v50 }
 0x7e6   :  { %17184 = vmatprep.subr.bf16.mxu0 %v25492_v50 }
 0x7e8   :  { %17169 = vmatmul.mubr.msk.bf16.vlgmr.msra.gmra.mxu1 %vm21746_vm5, %v25748_v32 }
 0x7e9   :  { %17179 = vmatpush3.bf16.xpose.msra.mxu1 %v25749_v1  ;;  %17180 = vmatprep.mubr.msk.bf16.mxu1 %vm19197_vm1, %v25492_v50 }
 0x7ea   :  { %17190 = vmatprep.subr.bf16.mxu1 %v25492_v50 }
 0x7ec   :  { %17175 = vmatmul.mubr.msk.bf16.vlgmr.msra.gmra.mxu0 %vm21746_vm5, %v25750_v39 }
 0x7ed   :  { %17185 = vmatpush3.bf16.xpose.msra.mxu0 %v25751_v28  ;;  %17186 = vmatprep.mubr.msk.bf16.mxu0 %vm19197_vm1, %v25492_v50 }
 0x7ee   :  { %17196 = vmatprep.subr.bf16.mxu0 %v25492_v50 }
 0x7f0   :  { %17181 = vmatmul.mubr.msk.bf16.vlgmr.msra.gmra.mxu1 %vm21746_vm5, %v25752_v6 }
 0x7f1   :  { %17191 = vmatpush3.bf16.xpose.msra.mxu1 %v25753_v31  ;;  %17192 = vmatprep.mubr.msk.bf16.mxu1 %vm19197_vm1, %v25492_v50 }
 0x7f2   :  { %17202 = vmatprep.subr.bf16.mxu1 %v25492_v50 }
 0x7f4   :  { %17187 = vmatmul.mubr.msk.bf16.vlgmr.msra.gmra.mxu0 %vm21746_vm5, %v25754_v17 }
 0x7f5   :  { %17197 = vmatpush3.bf16.xpose.msra.mxu0 %v25755_v4  ;;  %17198 = vmatprep.mubr.msk.bf16.mxu0 %vm19197_vm1, %v25492_v50 }
 0x7f6   :  { %17208 = vmatprep.subr.bf16.mxu0 %v25492_v50 }
 0x7f8   :  { %17193 = vmatmul.mubr.msk.bf16.vlgmr.msra.gmra.mxu1 %vm21746_vm5, %v25756_v0 }
 0x7f9   :  { %17203 = vmatpush3.bf16.xpose.msra.mxu1 %v25757_v52  ;;  %17204 = vmatprep.mubr.msk.bf16.mxu1 %vm19197_vm1, %v25492_v50 }
 0x7fa   :  { %17214 = vmatprep.subr.bf16.mxu1 %v25492_v50 }
 0x7fc   :  { %17199 = vmatmul.mubr.msk.bf16.vlgmr.msra.gmra.mxu0 %vm21746_vm5, %v25758_v15 }
 0x7fd   :  { %17209 = vmatpush3.bf16.xpose.msra.mxu0 %v25759_v51  ;;  %17210 = vmatprep.mubr.msk.bf16.mxu0 %vm19197_vm1, %v25492_v50 }
 0x7fe   :  { %17220 = vmatprep.subr.bf16.mxu0 %v25492_v50 }
 0x800   :  { %17205 = vmatmul.mubr.msk.bf16.vlgmr.msra.gmra.mxu1 %vm21746_vm5, %v25760_v38 }
 0x801   :  { %17215 = vmatpush3.bf16.xpose.msra.mxu1 %v25761_v11  ;;  %17216 = vmatprep.mubr.msk.bf16.mxu1 %vm19197_vm1, %v25492_v50 }
 0x802   :  { %17226 = vmatprep.subr.bf16.mxu1 %v25492_v50 }
 0x804   :  { %17211 = vmatmul.mubr.msk.bf16.vlgmr.msra.gmra.mxu0 %vm21746_vm5, %v25762_v33 }
 0x805   :  { %17221 = vmatpush3.bf16.xpose.msra.mxu0 %v25763_v54  ;;  %17222 = vmatprep.mubr.msk.bf16.mxu0 %vm19197_vm1, %v25492_v50 }
 0x806   :  { %17232 = vmatprep.subr.bf16.mxu0 %v25492_v50 }
 0x808   :  { %17217 = vmatmul.mubr.msk.bf16.vlgmr.msra.gmra.mxu1 %vm21746_vm5, %v25764_v24 }
 0x809   :  { %17227 = vmatpush3.bf16.xpose.msra.mxu1 %v25765_v2  ;;  %17228 = vmatprep.mubr.msk.bf16.mxu1 %vm19197_vm1, %v25492_v50 }
 0x80a   :  { %17238 = vmatprep.subr.bf16.mxu1 %v25492_v50 }
 0x80c   :  { %17223 = vmatmul.mubr.msk.bf16.vlgmr.msra.gmra.mxu0 %vm21746_vm5, %v25766_v37  ;;  %v25788_v37 = vld [vmem:[#allocation72_spill] sm:$0xff] }
 0x80d   :  { %17233 = vmatpush3.bf16.xpose.msra.mxu0 %v25767_v46  ;;  %17234 = vmatprep.mubr.msk.bf16.mxu0 %vm19197_vm1, %v25492_v50 }
 0x80e   :  { %17244 = vmatprep.subr.bf16.mxu0 %v25492_v50 }
 0x810   :  { %17229 = vmatmul.mubr.msk.bf16.vlgmr.msra.gmra.mxu1 %vm21746_vm5, %v25768_v56  ;;  %v25782_v56 = vld [vmem:[#allocation16_spill] sm:$0xff] }
 0x811   :  { %17239 = vmatpush3.bf16.xpose.msra.mxu1 %v25769_v63  ;;  %17240 = vmatprep.mubr.msk.bf16.mxu1 %vm19197_vm1, %v25492_v50 }
 0x812   :  { %17250 = vmatprep.subr.bf16.mxu1 %v25492_v50 }
 0x814   :  { %17235 = vmatmul.mubr.msk.bf16.vlgmr.msra.gmra.mxu0 %vm21746_vm5, %v25770_v7  ;;  %v25780_v7 = vld [vmem:[#allocation70_spill] sm:$0xff] }
 0x815   :  { %17245 = vmatpush3.bf16.msra.mxu0 %v7266_v22  ;;  %17246 = vmatprep.mubr.msk.bf16.mxu0 %vm19197_vm1, %v25492_v50  ;;  %v25778_v22 = vld [vmem:[#allocation13_spill] sm:$0xff] }
 0x816   :  { %17256 = vmatprep.subr.bf16.mxu0 %v25492_v50 }
 0x818   :  { %17241 = vmatmul.mubr.msk.bf16.vlgmr.msra.gmra.mxu1 %vm21746_vm5, %v25772_v35 }
 0x819   :  { %17251 = vmatpush3.bf16.msra.mxu1 %v7267_v41  ;;  %17252 = vmatprep.mubr.msk.bf16.mxu1 %vm19197_vm1, %v25492_v50 }
 0x81a   :  { %17262 = vmatprep.subr.bf16.mxu1 %v25492_v50 }
 0x85b   :  { %v5515_v26 = vpop.f32.mrf.mxu0 }
 0x85c   :  { %v21867_v34 = vadd.f32 %v5515_v26, %v25774_v62 }
 0x85d   :  { %v17056_v20 = vpop.f32.mrf.mxu0 }
 0x85e   :  { %25775 = vst [vmem:[#allocation32_spill] sm:$0xff] %v21867_v34 }
 0x85f   :  { %v5518_v27 = vpop.f32.mrf.mxu0 }
 0x860   :  { %v21870_v5 = vadd.f32 %v5518_v27, %v25776_v44  ;;  %v5559_v42 = vpop.f32.mrf.mxu1  ;;  %v25784_v27 = vld [vmem:[#allocation71_spill] sm:$0xff] }
 0x861   :  { %v17057_v19 = vpop.f32.mrf.mxu0  ;;  %v21873_v35 = vadd.f32 %v5559_v42, %v25778_v22 }
 0x862   :  { %25777 = vst [vmem:[#allocation85_spill] sm:$0xff] %v21870_v5  ;;  %v17062_v41 = vpop.f32.mrf.mxu1  ;;  %v25786_v19 = vld [vmem:[#allocation17_spill] sm:$0xff] }
 0x863   :  { %25779 = vst [vmem:[#allocation29_spill] sm:$0xff] %v21873_v35 }
 0x864   :  { %v5562_v48 = vpop.f32.mrf.mxu1  ;;  %v5603_v29 = vpop.f32.mrf.mxu0 }
 0x865   :  { %v21876_v63 = vadd.f32 %v5562_v48, %v25780_v7  ;;  %v21879_v46 = vadd.f32 %v5603_v29, %v25782_v56  ;;  %v25790_v48 = vld [vmem:[#allocation20_spill] sm:$0xff] }
 0x866   :  { %v17063_v26 = vpop.f32.mrf.mxu1  ;;  %v17068_v62 = vpop.f32.mrf.mxu0 }
 0x867   :  { %25781 = vst [vmem:[#allocation86_spill] sm:$0xff] %v21876_v63  ;;  %25783 = vst [vmem:[#allocation2_spill] sm:$0xff] %v21879_v46  ;;  %v25792_v63 = vld [vmem:[#allocation73_spill] sm:$0xff] }
 0x868   :  { %v5606_v20 = vpop.f32.mrf.mxu0  ;;  %v5647_v34 = vpop.f32.mrf.mxu1 }
 0x869   :  { %v21882_v44 = vadd.f32 %v5606_v20, %v25784_v27  ;;  %v21885_v5 = vadd.f32 %v5647_v34, %v25786_v19  ;;  %v25794_v27 = vld [vmem:[#allocation21_spill] sm:$0xff] }
 0x86a   :  { %v17069_v42 = vpop.f32.mrf.mxu0  ;;  %v17074_v22 = vpop.f32.mrf.mxu1 }
 0x86b   :  { %25785 = vst [vmem:[#allocation87_spill] sm:$0xff] %v21882_v44  ;;  %25787 = vst [vmem:[#allocation3_spill] sm:$0xff] %v21885_v5  ;;  %v25796_v44 = vld [vmem:[#allocation74_spill] sm:$0xff] }
 0x86c   :  { %v5650_v41 = vpop.f32.mrf.mxu1  ;;  %v5691_v35 = vpop.f32.mrf.mxu0 }
 0x86d   :  { %v21888_v7 = vadd.f32 %v5650_v41, %v25788_v37  ;;  %v21891_v56 = vadd.f32 %v5691_v35, %v25790_v48  ;;  %v25798_v41 = vld [vmem:[#allocation24_spill] sm:$0xff] }
 0x86e   :  { %v17075_v29 = vpop.f32.mrf.mxu1  ;;  %v17080_v26 = vpop.f32.mrf.mxu0 }
 0x86f   :  { %25789 = vst [vmem:[#allocation88_spill] sm:$0xff] %v21888_v7  ;;  %25791 = vst [vmem:[#allocation40_spill] sm:$0xff] %v21891_v56  ;;  %v25800_v7 = vld [vmem:[#allocation75_spill] sm:$0xff] }
 0x870   :  { %v5694_v62 = vpop.f32.mrf.mxu0  ;;  %v5735_v46 = vpop.f32.mrf.mxu1 }
 0x871   :  { %v21894_v20 = vadd.f32 %v5694_v62, %v25792_v63  ;;  %v21897_v34 = vadd.f32 %v5735_v46, %v25794_v27  ;;  %v25802_v62 = vld [vmem:[#allocation25_spill] sm:$0xff] }
 0x872   :  { %v17081_v19 = vpop.f32.mrf.mxu0  ;;  %v17086_v42 = vpop.f32.mrf.mxu1 }
 0x873   :  { %25793 = vst [vmem:[#allocation89_spill] sm:$0xff] %v21894_v20  ;;  %25795 = vst [vmem:[#allocation37_spill] sm:$0xff] %v21897_v34  ;;  %v25804_v20 = vld [vmem:[#allocation76_spill] sm:$0xff] }
 0x874   :  { %v5738_v22 = vpop.f32.mrf.mxu1  ;;  %v5779_v5 = vpop.f32.mrf.mxu0 }
 0x875   :  { %v21900_v37 = vadd.f32 %v5738_v22, %v25796_v44  ;;  %v21903_v35 = vadd.f32 %v5779_v5, %v25798_v41  ;;  %v25806_v22 = vld [vmem:[#allocation30_spill] sm:$0xff] }
 0x876   :  { %v17087_v48 = vpop.f32.mrf.mxu1  ;;  %v17092_v29 = vpop.f32.mrf.mxu0 }
 0x877   :  { %25797 = vst [vmem:[#allocation90_spill] sm:$0xff] %v21900_v37  ;;  %25799 = vst [vmem:[#allocation4_spill] sm:$0xff] %v21903_v35  ;;  %v25808_v37 = vld [vmem:[#allocation77_spill] sm:$0xff] }
 0x878   :  { %v5782_v26 = vpop.f32.mrf.mxu0  ;;  %v5823_v56 = vpop.f32.mrf.mxu1 }
 0x879   :  { %v21906_v63 = vadd.f32 %v5782_v26, %v25800_v7  ;;  %v21909_v46 = vadd.f32 %v5823_v56, %v25802_v62  ;;  %v25810_v26 = vld [vmem:[#allocation31_spill] sm:$0xff] }
 0x87a   :  { %v17093_v27 = vpop.f32.mrf.mxu0  ;;  %v17098_v19 = vpop.f32.mrf.mxu1 }
 0x87b   :  { %25801 = vst [vmem:[#allocation91_spill] sm:$0xff] %v21906_v63  ;;  %25803 = vst [vmem:[#allocation5_spill] sm:$0xff] %v21909_v46  ;;  %v25812_v63 = vld [vmem:[#allocation78_spill] sm:$0xff] }
 0x87c   :  { %v5826_v42 = vpop.f32.mrf.mxu1  ;;  %v5867_v34 = vpop.f32.mrf.mxu0 }
 0x87d   :  { %v21912_v44 = vadd.f32 %v5826_v42, %v25804_v20  ;;  %v21915_v5 = vadd.f32 %v5867_v34, %v25806_v22  ;;  %v25814_v42 = vld [vmem:[#allocation38_spill] sm:$0xff] }
 0x87e   :  { %v17099_v41 = vpop.f32.mrf.mxu1  ;;  %v17104_v48 = vpop.f32.mrf.mxu0 }
 0x87f   :  { %25805 = vst [vmem:[#allocation92_spill] sm:$0xff] %v21912_v44  ;;  %25807 = vst [vmem:[#allocation48_spill] sm:$0xff] %v21915_v5  ;;  %v25816_v44 = vld [vmem:[#allocation79_spill] sm:$0xff] }
 0x880   :  { %v5870_v29 = vpop.f32.mrf.mxu0  ;;  %v5911_v35 = vpop.f32.mrf.mxu1 }
 0x881   :  { %v21918_v7 = vadd.f32 %v5870_v29, %v25808_v37  ;;  %v21921_v56 = vadd.f32 %v5911_v35, %v25810_v26  ;;  %v25818_v29 = vld [vmem:[#allocation39_spill] sm:$0xff] }
 0x882   :  { %v17105_v62 = vpop.f32.mrf.mxu0  ;;  %v17110_v27 = vpop.f32.mrf.mxu1 }
 0x883   :  { %25809 = vst [vmem:[#allocation93_spill] sm:$0xff] %v21918_v7  ;;  %25811 = vst [vmem:[#allocation46_spill] sm:$0xff] %v21921_v56  ;;  %v25820_v7 = vld [vmem:[#allocation80_spill] sm:$0xff] }
 0x884   :  { %v5914_v19 = vpop.f32.mrf.mxu1  ;;  %v5955_v46 = vpop.f32.mrf.mxu0 }
 0x885   :  { %v21924_v20 = vadd.f32 %v5914_v19, %v25812_v63  ;;  %v21927_v34 = vadd.f32 %v5955_v46, %v25814_v42  ;;  %v25822_v19 = vld [vmem:[#allocation47_spill] sm:$0xff] }
 0x886   :  { %v17111_v22 = vpop.f32.mrf.mxu1  ;;  %v17116_v41 = vpop.f32.mrf.mxu0 }
 0x887   :  { %25813 = vst [vmem:[#allocation94_spill] sm:$0xff] %v21924_v20  ;;  %25815 = vst [vmem:[#allocation6_spill] sm:$0xff] %v21927_v34  ;;  %v25824_v20 = vld [vmem:[#allocation81_spill] sm:$0xff] }
 0x888   :  { %v5958_v48 = vpop.f32.mrf.mxu0  ;;  %v5999_v5 = vpop.f32.mrf.mxu1 }
 0x889   :  { %v21930_v37 = vadd.f32 %v5958_v48, %v25816_v44  ;;  %v21933_v35 = vadd.f32 %v5999_v5, %v25818_v29  ;;  %v25826_v48 = vld [vmem:[#allocation45_spill] sm:$0xff] }
 0x88a   :  { %v17117_v26 = vpop.f32.mrf.mxu0  ;;  %v17122_v62 = vpop.f32.mrf.mxu1 }
 0x88b   :  { %25817 = vst [vmem:[#allocation95_spill] sm:$0xff] %v21930_v37  ;;  %25819 = vst [vmem:[#allocation7_spill] sm:$0xff] %v21933_v35  ;;  %v25828_v37 = vld [vmem:[#allocation82_spill] sm:$0xff] }
 0x88c   :  { %v6002_v27 = vpop.f32.mrf.mxu1  ;;  %v6043_v56 = vpop.f32.mrf.mxu0 }
 0x88d   :  { %v21936_v63 = vadd.f32 %v6002_v27, %v25820_v7  ;;  %v21939_v46 = vadd.f32 %v6043_v56, %v25822_v19  ;;  %v25830_v27 = vld [vmem:[#allocation55_spill] sm:$0xff] }
 0x88e   :  { %v17123_v42 = vpop.f32.mrf.mxu1  ;;  %v17128_v22 = vpop.f32.mrf.mxu0 }
 0x88f   :  { %25821 = vst [vmem:[#allocation96_spill] sm:$0xff] %v21936_v63  ;;  %25823 = vst [vmem:[#allocation56_spill] sm:$0xff] %v21939_v46  ;;  %v25832_v63 = vld [vmem:[#allocation83_spill] sm:$0xff] }
 0x890   :  { %v6046_v41 = vpop.f32.mrf.mxu0  ;;  %v6087_v34 = vpop.f32.mrf.mxu1 }
 0x891   :  { %v21942_v44 = vadd.f32 %v6046_v41, %v25824_v20  ;;  %v21945_v5 = vadd.f32 %v6087_v34, %v25826_v48  ;;  %v25834_v41 = vld [vmem:[#allocation53_spill] sm:$0xff] }
 0x892   :  { %v17129_v29 = vpop.f32.mrf.mxu0  ;;  %v17134_v26 = vpop.f32.mrf.mxu1 }
 0x893   :  { %25825 = vst [vmem:[#allocation97_spill] sm:$0xff] %v21942_v44  ;;  %25827 = vst [vmem:[#allocation54_spill] sm:$0xff] %v21945_v5 }
 0x894   :  { %v6090_v62 = vpop.f32.mrf.mxu1  ;;  %v6131_v35 = vpop.f32.mrf.mxu0 }
 0x895   :  { %v21948_v7 = vadd.f32 %v6090_v62, %v25828_v37  ;;  %v21951_v56 = vadd.f32 %v6131_v35, %v25830_v27  ;;  %v25836_v37 = vld [vmem:[#allocation84_spill] sm:$0xff] }
 0x896   :  { %v17135_v19 = vpop.f32.mrf.mxu1  ;;  %v17140_v42 = vpop.f32.mrf.mxu0 }
 0x897   :  { %25829 = vst [vmem:[#allocation98_spill] sm:$0xff] %v21948_v7  ;;  %25831 = vst [vmem:[#allocation8_spill] sm:$0xff] %v21951_v56 }
 0x898   :  { %v6134_v22 = vpop.f32.mrf.mxu0  ;;  %v6175_v46 = vpop.f32.mrf.mxu1 }
 0x899   :  { %v21954_v20 = vadd.f32 %v6134_v22, %v25832_v63  ;;  %v21957_v34 = vadd.f32 %v6175_v46, %v25834_v41 }
 0x89a   :  { %v17141_v48 = vpop.f32.mrf.mxu0  ;;  %v17146_v29 = vpop.f32.mrf.mxu1 }
 0x89b   :  { %25833 = vst [vmem:[#allocation99_spill] sm:$0xff] %v21954_v20  ;;  %25835 = vst [vmem:[#allocation9_spill] sm:$0xff] %v21957_v34 }
 0x89c   :  { %v6178_v26 = vpop.f32.mrf.mxu1  ;;  %v21959_v5 = vpop.f32.mrf.mxu0 }
 0x89d   :  { %v21962_v62 = vadd.f32 %v6178_v26, %v25836_v37  ;;  %v6898_v35 = vsel %vm152_vm0, %v21959_v5, -inf }
 0x89e   :  { %6899 = vmax.xlane.f32.xlu0 %v6898_v35  ;;  %v17147_v27 = vpop.f32.mrf.mxu1  ;;  %v17152_v19 = vpop.f32.mrf.mxu0 }
 0x89f   :  { %25837 = vst [vmem:[#allocation100_spill] sm:$0xff] %v21962_v62 }
 0x8a0   :  { %v21966_v42 = vpop.f32.mrf.mxu0  ;;  %v21968_v63 = vpop.f32.mrf.mxu1 }
 0x8a1   :  { %v6901_v46 = vsel %vm152_vm0, %v21966_v42, -inf  ;;  %v6904_v22 = vsel %vm152_vm0, %v21968_v63, -inf }
 0x8a2   :  { %6902 = vmax.xlane.f32.xlu1 %v6901_v46  ;;  %v17153_v41 = vpop.f32.mrf.mxu0  ;;  %6905 = vmax.xlane.f32.xlu0 %v6904_v22  ;;  %v17158_v48 = vpop.f32.mrf.mxu1 }
 0x8a4   :  { %v21974_v29 = vpop.f32.mrf.mxu1  ;;  %v21976_v26 = vpop.f32.mrf.mxu0 }
 0x8a5   :  { %v6910_v37 = vsel %vm152_vm0, %v21976_v26, -inf  ;;  %v6907_v35 = vsel %vm152_vm0, %v21974_v29, -inf }
 0x8a6   :  { %v17164_v27 = vpop.f32.mrf.mxu0  ;;  %6911 = vmax.xlane.f32.xlu0 %v6910_v37  ;;  %6908 = vmax.xlane.f32.xlu1 %v6907_v35  ;;  %v17159_v19 = vpop.f32.mrf.mxu1 }
 0x8a8   :  { %v21982_v62 = vpop.f32.mrf.mxu0  ;;  %v21984_v46 = vpop.f32.mrf.mxu1 }
 0x8a9   :  { %v6913_v22 = vsel %vm152_vm0, %v21982_v62, -inf  ;;  %v6916_v41 = vsel %vm152_vm0, %v21984_v46, -inf }
 0x8aa   :  { %v17165_v48 = vpop.f32.mrf.mxu0  ;;  %6914 = vmax.xlane.f32.xlu1 %v6913_v22  ;;  %6917 = vmax.xlane.f32.xlu0 %v6916_v41  ;;  %v17170_v34 = vpop.f32.mrf.mxu1 }
 0x8ac   :  { %v21990_v20 = vpop.f32.mrf.mxu1  ;;  %v21992_v27 = vpop.f32.mrf.mxu0 }
 0x8ad   :  { %v6922_v37 = vsel %vm152_vm0, %v21992_v27, -inf  ;;  %v6919_v35 = vsel %vm152_vm0, %v21990_v20, -inf }
 0x8ae   :  { %v17176_v19 = vpop.f32.mrf.mxu0  ;;  %6923 = vmax.xlane.f32.xlu0 %v6922_v37  ;;  %6920 = vmax.xlane.f32.xlu1 %v6919_v35  ;;  %v17171_v56 = vpop.f32.mrf.mxu1 }
 0x8b0   :  { %v21998_v7 = vpop.f32.mrf.mxu0  ;;  %v22000_v48 = vpop.f32.mrf.mxu1 }
 0x8b1   :  { %v6925_v34 = vsel %vm152_vm0, %v21998_v7, -inf  ;;  %v6928_v22 = vsel %vm152_vm0, %v22000_v48, -inf }
 0x8b2   :  { %v17177_v41 = vpop.f32.mrf.mxu0  ;;  %6926 = vmax.xlane.f32.xlu1 %v6925_v34  ;;  %6929 = vmax.xlane.f32.xlu0 %v6928_v22  ;;  %v17182_v44 = vpop.f32.mrf.mxu1 }
 0x8b4   :  { %v22006_v2 = vpop.f32.mrf.mxu1  ;;  %v22008_v19 = vpop.f32.mrf.mxu0 }
 0x8b5   :  { %v6934_v56 = vsel %vm152_vm0, %v22008_v19, -inf  ;;  %v6931_v37 = vsel %vm152_vm0, %v22006_v2, -inf }
 0x8b6   :  { %v17188_v35 = vpop.f32.mrf.mxu0  ;;  %6935 = vmax.xlane.f32.xlu0 %v6934_v56  ;;  %6932 = vmax.xlane.f32.xlu1 %v6931_v37  ;;  %v17183_v24 = vpop.f32.mrf.mxu1 }
 0x8b8   :  { %v22014_v54 = vpop.f32.mrf.mxu0  ;;  %v22016_v41 = vpop.f32.mrf.mxu1 }
 0x8b9   :  { %v6937_v44 = vsel %vm152_vm0, %v22014_v54, -inf  ;;  %v6940_v34 = vsel %vm152_vm0, %v22016_v41, -inf }
 0x8ba   :  { %v17189_v22 = vpop.f32.mrf.mxu0  ;;  %6938 = vmax.xlane.f32.xlu1 %v6937_v44  ;;  %6941 = vmax.xlane.f32.xlu0 %v6940_v34  ;;  %v17194_v33 = vpop.f32.mrf.mxu1 }
 0x8bc   :  { %v22022_v11 = vpop.f32.mrf.mxu1  ;;  %v22024_v35 = vpop.f32.mrf.mxu0 }
 0x8bd   :  { %v6946_v24 = vsel %vm152_vm0, %v22024_v35, -inf  ;;  %v6943_v56 = vsel %vm152_vm0, %v22022_v11, -inf }
 0x8be   :  { %v17200_v37 = vpop.f32.mrf.mxu0  ;;  %6947 = vmax.xlane.f32.xlu0 %v6946_v24  ;;  %6944 = vmax.xlane.f32.xlu1 %v6943_v56  ;;  %v17195_v38 = vpop.f32.mrf.mxu1 }
 0x8c0   :  { %v22030_v51 = vpop.f32.mrf.mxu0  ;;  %v22032_v22 = vpop.f32.mrf.mxu1 }
 0x8c1   :  { %v6949_v33 = vsel %vm152_vm0, %v22030_v51, -inf  ;;  %v6952_v44 = vsel %vm152_vm0, %v22032_v22, -inf }
 0x8c2   :  { %v17201_v34 = vpop.f32.mrf.mxu0  ;;  %6950 = vmax.xlane.f32.xlu1 %v6949_v33  ;;  %6953 = vmax.xlane.f32.xlu0 %v6952_v44  ;;  %v17206_v15 = vpop.f32.mrf.mxu1 }
 0x8c4   :  { %v22038_v52 = vpop.f32.mrf.mxu1  ;;  %v22040_v37 = vpop.f32.mrf.mxu0 }
 0x8c5   :  { %v6958_v38 = vsel %vm152_vm0, %v22040_v37, -inf  ;;  %v6955_v24 = vsel %vm152_vm0, %v22038_v52, -inf }
 0x8c6   :  { %v17212_v56 = vpop.f32.mrf.mxu0  ;;  %6959 = vmax.xlane.f32.xlu0 %v6958_v38  ;;  %6956 = vmax.xlane.f32.xlu1 %v6955_v24  ;;  %v17207_v0 = vpop.f32.mrf.mxu1 }
 0x8c8   :  { %v22046_v4 = vpop.f32.mrf.mxu0  ;;  %v22048_v34 = vpop.f32.mrf.mxu1 }
 0x8c9   :  { %v6961_v15 = vsel %vm152_vm0, %v22046_v4, -inf  ;;  %v6964_v33 = vsel %vm152_vm0, %v22048_v34, -inf }
 0x8ca   :  { %v17213_v44 = vpop.f32.mrf.mxu0  ;;  %6962 = vmax.xlane.f32.xlu1 %v6961_v15  ;;  %6965 = vmax.xlane.f32.xlu0 %v6964_v33  ;;  %v17218_v17 = vpop.f32.mrf.mxu1 }
 0x8cc   :  { %v22054_v31 = vpop.f32.mrf.mxu1  ;;  %v22056_v56 = vpop.f32.mrf.mxu0 }
 0x8cd   :  { %v6970_v0 = vsel %vm152_vm0, %v22056_v56, -inf  ;;  %v6967_v38 = vsel %vm152_vm0, %v22054_v31, -inf }
 0x8ce   :  { %v17224_v24 = vpop.f32.mrf.mxu0  ;;  %6971 = vmax.xlane.f32.xlu0 %v6970_v0  ;;  %6968 = vmax.xlane.f32.xlu1 %v6967_v38  ;;  %v17219_v6 = vpop.f32.mrf.mxu1 }
 0x8d0   :  { %v22062_v28 = vpop.f32.mrf.mxu0  ;;  %v22064_v44 = vpop.f32.mrf.mxu1 }
 0x8d1   :  { %v6973_v17 = vsel %vm152_vm0, %v22062_v28, -inf  ;;  %v6976_v15 = vsel %vm152_vm0, %v22064_v44, -inf }
 0x8d2   :  { %v17225_v33 = vpop.f32.mrf.mxu0  ;;  %6974 = vmax.xlane.f32.xlu1 %v6973_v17  ;;  %6977 = vmax.xlane.f32.xlu0 %v6976_v15  ;;  %v17230_v39 = vpop.f32.mrf.mxu1 }
 0x8d4   :  { %v22070_v1 = vpop.f32.mrf.mxu1  ;;  %v22072_v24 = vpop.f32.mrf.mxu0 }
 0x8d5   :  { %v6982_v6 = vsel %vm152_vm0, %v22072_v24, -inf  ;;  %v6979_v0 = vsel %vm152_vm0, %v22070_v1, -inf }
 0x8d6   :  { %v17236_v38 = vpop.f32.mrf.mxu0  ;;  %6983 = vmax.xlane.f32.xlu0 %v6982_v6  ;;  %6980 = vmax.xlane.f32.xlu1 %v6979_v0  ;;  %v17231_v32 = vpop.f32.mrf.mxu1 }
 0x8d8   :  { %v22078_v14 = vpop.f32.mrf.mxu0  ;;  %v22080_v33 = vpop.f32.mrf.mxu1 }
 0x8d9   :  { %v6985_v39 = vsel %vm152_vm0, %v22078_v14, -inf  ;;  %v6988_v17 = vsel %vm152_vm0, %v22080_v33, -inf }
 0x8da   :  { %v17237_v15 = vpop.f32.mrf.mxu0  ;;  %6986 = vmax.xlane.f32.xlu1 %v6985_v39  ;;  %6989 = vmax.xlane.f32.xlu0 %v6988_v17  ;;  %v17242_v61 = vpop.f32.mrf.mxu1 }
 0x8dc   :  { %v22086_v57 = vpop.f32.mrf.mxu1 }
 0x8dd   :  { %v6991_v6 = vsel %vm152_vm0, %v22086_v57, -inf }
 0x8de   :  { %6992 = vmax.xlane.f32.xlu1 %v6991_v6  ;;  %v17243_v32 = vpop.f32.mrf.mxu1 }
 0x927   :  { %v6900_v0 = vpop.xlane.xlu0 %6899 }
 0x928   :  { %v6994_v38 = vsub.f32 %v21959_v5, %v6900_v0 }
 0x92a   :  { %v7026_v40 = vmul.f32 1.442695, %v6994_v38 }
 0x92b   :  { %v6903_v8 = vpop.xlane.xlu1 %6902  ;;  %v6906_v18 = vpop.xlane.xlu0 %6905 }
 0x92c   :  { %18556 = vpow2.f32 %v7026_v40  ;;  %v6995_v59 = vsub.f32 %v21966_v42, %v6903_v8  ;;  %v6996_v39 = vsub.f32 %v21968_v63, %v6906_v18 }
 0x92e   :  { %v7028_v17 = vmul.f32 1.442695, %v6995_v59  ;;  %v7030_v61 = vmul.f32 1.442695, %v6996_v39 }
 0x92f   :  { %v6912_v15 = vpop.xlane.xlu0 %6911  ;;  %v6909_v21 = vpop.xlane.xlu1 %6908 }
 0x930   :  { %18558 = vpow2.f32 %v7028_v17  ;;  %v6998_v30 = vsub.f32 %v21976_v26, %v6912_v15  ;;  %v6997_v6 = vsub.f32 %v21974_v29, %v6909_v21 }
 0x931   :  { %18560 = vpow2.f32 %v7030_v61 }
 0x932   :  { %v7034_v32 = vmul.f32 1.442695, %v6998_v30  ;;  %v7032_v5 = vmul.f32 1.442695, %v6997_v6 }
 0x933   :  { %v6915_v0 = vpop.xlane.xlu1 %6914  ;;  %v6918_v38 = vpop.xlane.xlu0 %6917 }
 0x934   :  { %18562 = vpow2.f32 %v7034_v32  ;;  %v6999_v40 = vsub.f32 %v21982_v62, %v6915_v0  ;;  %v7000_v8 = vsub.f32 %v21984_v46, %v6918_v38 }
 0x935   :  { %18564 = vpow2.f32 %v7032_v5 }
 0x936   :  { %v7036_v59 = vmul.f32 1.442695, %v6999_v40  ;;  %v7038_v18 = vmul.f32 1.442695, %v7000_v8 }
 0x937   :  { %v6924_v42 = vpop.xlane.xlu0 %6923  ;;  %v6921_v63 = vpop.xlane.xlu1 %6920 }
 0x938   :  { %18566 = vpow2.f32 %v7036_v59  ;;  %v7002_v26 = vsub.f32 %v21992_v27, %v6924_v42  ;;  %v7001_v21 = vsub.f32 %v21990_v20, %v6921_v63 }
 0x939   :  { %v22099_v29 = vpop.eup %18556  ;;  %18568 = vpow2.f32 %v7038_v18 }
 0x93a   :  { %v7042_v30 = vmul.f32 1.442695, %v7002_v26  ;;  %v7040_v39 = vmul.f32 1.442695, %v7001_v21  ;;  %v7090_v62 = vsel %vm152_vm0, %v22099_v29, 0.0 }
 0x93b   :  { %v6927_v17 = vpop.xlane.xlu1 %6926  ;;  %v6930_v46 = vpop.xlane.xlu0 %6929  ;;  %7091 = vadd.xlane.f32.xlu0 %v7090_v62 }
 0x93c   :  { %18570 = vpow2.f32 %v7042_v30  ;;  %v7003_v61 = vsub.f32 %v21998_v7, %v6927_v17  ;;  %v7004_v15 = vsub.f32 %v22000_v48, %v6930_v46 }
 0x93d   :  { %v22105_v6 = vpop.eup %18558  ;;  %18572 = vpow2.f32 %v7040_v39 }
 0x93e   :  { %v22107_v20 = vpop.eup %18560  ;;  %v7044_v27 = vmul.f32 1.442695, %v7003_v61  ;;  %v7046_v32 = vmul.f32 1.442695, %v7004_v15  ;;  %v7093_v5 = vsel %vm152_vm0, %v22105_v6, 0.0 }
 0x93f   :  { %v6936_v0 = vpop.xlane.xlu0 %6935  ;;  %v6933_v38 = vpop.xlane.xlu1 %6932  ;;  %v7096_v40 = vsel %vm152_vm0, %v22107_v20, 0.0  ;;  %7094 = vadd.xlane.f32.xlu1 %v7093_v5 }
 0x940   :  { %18574 = vpow2.f32 %v7044_v27  ;;  %v7006_v7 = vsub.f32 %v22008_v19, %v6936_v0  ;;  %v7005_v48 = vsub.f32 %v22006_v2, %v6933_v38  ;;  %7097 = vadd.xlane.f32.xlu0 %v7096_v40 }
 0x941   :  { %v22115_v8 = vpop.eup %18562  ;;  %18576 = vpow2.f32 %v7046_v32 }
 0x942   :  { %v22117_v59 = vpop.eup %18564  ;;  %v7050_v18 = vmul.f32 1.442695, %v7006_v7  ;;  %v7048_v42 = vmul.f32 1.442695, %v7005_v48  ;;  %v7102_v63 = vsel %vm152_vm0, %v22115_v8, 0.0 }
 0x943   :  { %v6939_v26 = vpop.xlane.xlu1 %6938  ;;  %v6942_v21 = vpop.xlane.xlu0 %6941  ;;  %v7099_v30 = vsel %vm152_vm0, %v22117_v59, 0.0 }
 0x944   :  { %18578 = vpow2.f32 %v7050_v18  ;;  %v7007_v19 = vsub.f32 %v22014_v54, %v6939_v26  ;;  %v7008_v2 = vsub.f32 %v22016_v41, %v6942_v21  ;;  %7103 = vadd.xlane.f32.xlu0 %v7102_v63  ;;  %7100 = vadd.xlane.f32.xlu1 %v7099_v30 }
 0x945   :  { %v22125_v39 = vpop.eup %18566  ;;  %18580 = vpow2.f32 %v7048_v42 }
 0x946   :  { %v22127_v62 = vpop.eup %18568  ;;  %v7052_v17 = vmul.f32 1.442695, %v7007_v19  ;;  %v7054_v46 = vmul.f32 1.442695, %v7008_v2  ;;  %v7105_v61 = vsel %vm152_vm0, %v22125_v39, 0.0 }
 0x947   :  { %v6948_v15 = vpop.xlane.xlu0 %6947  ;;  %v6945_v27 = vpop.xlane.xlu1 %6944  ;;  %v7108_v32 = vsel %vm152_vm0, %v22127_v62, 0.0 }
 0x948   :  { %18582 = vpow2.f32 %v7052_v17  ;;  %v7010_v54 = vsub.f32 %v22024_v35, %v6948_v15  ;;  %v7009_v41 = vsub.f32 %v22022_v11, %v6945_v27  ;;  %7109 = vadd.xlane.f32.xlu0 %v7108_v32  ;;  %7106 = vadd.xlane.f32.xlu1 %v7105_v61 }
 0x949   :  { %v22135_v5 = vpop.eup %18570  ;;  %18584 = vpow2.f32 %v7054_v46 }
 0x94a   :  { %v22137_v0 = vpop.eup %18572  ;;  %v7058_v38 = vmul.f32 1.442695, %v7010_v54  ;;  %v7056_v40 = vmul.f32 1.442695, %v7009_v41  ;;  %v7114_v7 = vsel %vm152_vm0, %v22135_v5, 0.0 }
 0x94b   :  { %v6951_v48 = vpop.xlane.xlu1 %6950  ;;  %v6954_v18 = vpop.xlane.xlu0 %6953  ;;  %v7111_v42 = vsel %vm152_vm0, %v22137_v0, 0.0 }
 0x94c   :  { %18586 = vpow2.f32 %v7058_v38  ;;  %v7011_v11 = vsub.f32 %v22030_v51, %v6951_v48  ;;  %v7012_v35 = vsub.f32 %v22032_v22, %v6954_v18  ;;  %7115 = vadd.xlane.f32.xlu0 %v7114_v7  ;;  %7112 = vadd.xlane.f32.xlu1 %v7111_v42 }
 0x94d   :  { %v22145_v63 = vpop.eup %18574  ;;  %18588 = vpow2.f32 %v7056_v40 }
 0x94e   :  { %v22147_v26 = vpop.eup %18576  ;;  %v7060_v21 = vmul.f32 1.442695, %v7011_v11  ;;  %v7062_v30 = vmul.f32 1.442695, %v7012_v35  ;;  %v7117_v19 = vsel %vm152_vm0, %v22145_v63, 0.0 }
 0x94f   :  { %v6960_v2 = vpop.xlane.xlu0 %6959  ;;  %v6957_v17 = vpop.xlane.xlu1 %6956  ;;  %v7120_v46 = vsel %vm152_vm0, %v22147_v26, 0.0 }
 0x950   :  { %18590 = vpow2.f32 %v7060_v21  ;;  %v7014_v51 = vsub.f32 %v22040_v37, %v6960_v2  ;;  %v7013_v22 = vsub.f32 %v22038_v52, %v6957_v17  ;;  %7121 = vadd.xlane.f32.xlu0 %v7120_v46  ;;  %7118 = vadd.xlane.f32.xlu1 %v7117_v19 }
 0x951   :  { %v22155_v61 = vpop.eup %18578  ;;  %18592 = vpow2.f32 %v7062_v30 }
 0x952   :  { %v22157_v15 = vpop.eup %18580  ;;  %v7066_v27 = vmul.f32 1.442695, %v7014_v51  ;;  %v7064_v32 = vmul.f32 1.442695, %v7013_v22  ;;  %v7126_v54 = vsel %vm152_vm0, %v22155_v61, 0.0 }
 0x953   :  { %v6963_v41 = vpop.xlane.xlu1 %6962  ;;  %v6966_v38 = vpop.xlane.xlu0 %6965  ;;  %v7123_v40 = vsel %vm152_vm0, %v22157_v15, 0.0 }
 0x954   :  { %18594 = vpow2.f32 %v7066_v27  ;;  %v7015_v52 = vsub.f32 %v22046_v4, %v6963_v41  ;;  %v7016_v37 = vsub.f32 %v22048_v34, %v6966_v38  ;;  %7127 = vadd.xlane.f32.xlu0 %v7126_v54  ;;  %7124 = vadd.xlane.f32.xlu1 %v7123_v40 }
 0x955   :  { %v22165_v7 = vpop.eup %18582  ;;  %18596 = vpow2.f32 %v7064_v32 }
 0x956   :  { %v22167_v48 = vpop.eup %18584  ;;  %v7068_v18 = vmul.f32 1.442695, %v7015_v52  ;;  %v7070_v42 = vmul.f32 1.442695, %v7016_v37  ;;  %v7129_v11 = vsel %vm152_vm0, %v22165_v7, 0.0 }
 0x957   :  { %v6972_v35 = vpop.xlane.xlu0 %6971  ;;  %v6969_v21 = vpop.xlane.xlu1 %6968  ;;  %v7132_v30 = vsel %vm152_vm0, %v22167_v48, 0.0 }
 0x958   :  { %18598 = vpow2.f32 %v7068_v18  ;;  %v7018_v4 = vsub.f32 %v22056_v56, %v6972_v35  ;;  %v7017_v34 = vsub.f32 %v22054_v31, %v6969_v21  ;;  %7133 = vadd.xlane.f32.xlu0 %v7132_v30  ;;  %7130 = vadd.xlane.f32.xlu1 %v7129_v11 }
 0x959   :  { %v22175_v19 = vpop.eup %18586  ;;  %18600 = vpow2.f32 %v7070_v42 }
 0x95a   :  { %v22177_v2 = vpop.eup %18588  ;;  %v7074_v17 = vmul.f32 1.442695, %v7018_v4  ;;  %v7072_v46 = vmul.f32 1.442695, %v7017_v34  ;;  %v7138_v51 = vsel %vm152_vm0, %v22175_v19, 0.0 }
 0x95b   :  { %v6975_v22 = vpop.xlane.xlu1 %6974  ;;  %v6978_v27 = vpop.xlane.xlu0 %6977  ;;  %v7135_v32 = vsel %vm152_vm0, %v22177_v2, 0.0 }
 0x95c   :  { %18602 = vpow2.f32 %v7074_v17  ;;  %v7019_v31 = vsub.f32 %v22062_v28, %v6975_v22  ;;  %v7020_v56 = vsub.f32 %v22064_v44, %v6978_v27  ;;  %7139 = vadd.xlane.f32.xlu0 %v7138_v51  ;;  %7136 = vadd.xlane.f32.xlu1 %v7135_v32 }
 0x95d   :  { %v22185_v54 = vpop.eup %18590  ;;  %18604 = vpow2.f32 %v7072_v46 }
 0x95e   :  { %v22187_v41 = vpop.eup %18592  ;;  %v7076_v38 = vmul.f32 1.442695, %v7019_v31  ;;  %v7078_v40 = vmul.f32 1.442695, %v7020_v56  ;;  %v7141_v52 = vsel %vm152_vm0, %v22185_v54, 0.0 }
 0x95f   :  { %v6984_v37 = vpop.xlane.xlu0 %6983  ;;  %v6981_v18 = vpop.xlane.xlu1 %6980  ;;  %v7144_v42 = vsel %vm152_vm0, %v22187_v41, 0.0 }
 0x960   :  { %18606 = vpow2.f32 %v7076_v38  ;;  %v7022_v28 = vsub.f32 %v22072_v24, %v6984_v37  ;;  %v7021_v44 = vsub.f32 %v22070_v1, %v6981_v18  ;;  %7145 = vadd.xlane.f32.xlu0 %v7144_v42  ;;  %7142 = vadd.xlane.f32.xlu1 %v7141_v52 }
 0x961   :  { %v22195_v11 = vpop.eup %18594  ;;  %18608 = vpow2.f32 %v7078_v40 }
 0x962   :  { %v22197_v35 = vpop.eup %18596  ;;  %v7082_v21 = vmul.f32 1.442695, %v7022_v28  ;;  %v7080_v30 = vmul.f32 1.442695, %v7021_v44  ;;  %v7150_v4 = vsel %vm152_vm0, %v22195_v11, 0.0 }
 0x963   :  { %v6987_v34 = vpop.xlane.xlu1 %6986  ;;  %v6990_v17 = vpop.xlane.xlu0 %6989  ;;  %v7147_v46 = vsel %vm152_vm0, %v22197_v35, 0.0 }
 0x964   :  { %18610 = vpow2.f32 %v7082_v21  ;;  %v7023_v1 = vsub.f32 %v22078_v14, %v6987_v34  ;;  %7151 = vadd.xlane.f32.xlu0 %v7150_v4  ;;  %v7024_v24 = vsub.f32 %v22080_v33, %v6990_v17  ;;  %7148 = vadd.xlane.f32.xlu1 %v7147_v46 }
 0x965   :  { %v22205_v51 = vpop.eup %18598  ;;  %18612 = vpow2.f32 %v7080_v30 }
 0x966   :  { %v22207_v22 = vpop.eup %18600  ;;  %v7084_v27 = vmul.f32 1.442695, %v7023_v1  ;;  %v7086_v32 = vmul.f32 1.442695, %v7024_v24  ;;  %v7153_v31 = vsel %vm152_vm0, %v22205_v51, 0.0 }
 0x967   :  { %v7156_v56 = vsel %vm152_vm0, %v22207_v22, 0.0  ;;  %v6993_v38 = vpop.xlane.xlu1 %6992 }
 0x968   :  { %18614 = vpow2.f32 %v7084_v27  ;;  %7157 = vadd.xlane.f32.xlu0 %v7156_v56  ;;  %7154 = vadd.xlane.f32.xlu1 %v7153_v31  ;;  %v7025_v14 = vsub.f32 %v22086_v57, %v6993_v38 }
 0x969   :  { %v22214_v33 = vpop.eup %18602  ;;  %18616 = vpow2.f32 %v7086_v32 }
 0x96a   :  { %v22216_v40 = vpop.eup %18604  ;;  %v7088_v52 = vmul.f32 1.442695, %v7025_v14  ;;  %v7162_v37 = vsel %vm152_vm0, %v22214_v33, 0.0 }
 0x96b   :  { %v7159_v18 = vsel %vm152_vm0, %v22216_v40, 0.0 }
 0x96c   :  { %18618 = vpow2.f32 %v7088_v52  ;;  %7163 = vadd.xlane.f32.xlu0 %v7162_v37  ;;  %7160 = vadd.xlane.f32.xlu1 %v7159_v18 }
 0x96d   :  { %v22222_v42 = vpop.eup %18606 }
 0x96e   :  { %v22224_v28 = vpop.eup %18608  ;;  %v7165_v57 = vsel %vm152_vm0, %v22222_v42, 0.0 }
 0x96f   :  { %v7168_v44 = vsel %vm152_vm0, %v22224_v28, 0.0 }
 0x970   :  { %7169 = vadd.xlane.f32.xlu0 %v7168_v44  ;;  %7166 = vadd.xlane.f32.xlu1 %v7165_v57 }
 0x971   :  { %v22230_v21 = vpop.eup %18610 }
 0x972   :  { %v22232_v30 = vpop.eup %18612  ;;  %v7174_v4 = vsel %vm152_vm0, %v22230_v21, 0.0 }
 0x973   :  { %v7171_v34 = vsel %vm152_vm0, %v22232_v30, 0.0 }
 0x974   :  { %7175 = vadd.xlane.f32.xlu0 %v7174_v4  ;;  %7172 = vadd.xlane.f32.xlu1 %v7171_v34 }
 0x975   :  { %v22238_v17 = vpop.eup %18614 }
 0x976   :  { %v22240_v46 = vpop.eup %18616  ;;  %v7177_v1 = vsel %vm152_vm0, %v22238_v17, 0.0 }
 0x977   :  { %v7180_v24 = vsel %vm152_vm0, %v22240_v46, 0.0 }
 0x978   :  { %7181 = vadd.xlane.f32.xlu0 %v7180_v24  ;;  %7178 = vadd.xlane.f32.xlu1 %v7177_v1 }
 0x979   :  { %v22246_v27 = vpop.eup %18618 }
 0x97a   :  { %v7183_v32 = vsel %vm152_vm0, %v22246_v27, 0.0 }
 0x97c   :  { %7184 = vadd.xlane.f32.xlu1 %v7183_v32 }
 0x9c4   :  { %v7092_v31 = vpop.xlane.xlu0 %7091 }
 0x9c5   :  { %18620 = vrcp.f32 %v7092_v31 }
 0x9c8   :  { %v7095_v56 = vpop.xlane.xlu1 %7094 }
 0x9c9   :  { %v7098_v38 = vpop.xlane.xlu0 %7097  ;;  %18622 = vrcp.f32 %v7095_v56 }
 0x9ca   :  { %18624 = vrcp.f32 %v7098_v38 }
 0x9cd   :  { %v7104_v14 = vpop.xlane.xlu0 %7103  ;;  %v7101_v52 = vpop.xlane.xlu1 %7100 }
 0x9ce   :  { %18626 = vrcp.f32 %v7101_v52 }
 0x9cf   :  { %18628 = vrcp.f32 %v7104_v14  ;;  %v7268_v14 = vsel %vm21746_vm5, %v19819_v49, 0 }
 0x9d1   :  { %v7110_v37 = vpop.xlane.xlu0 %7109  ;;  %v7107_v18 = vpop.xlane.xlu1 %7106 }
 0x9d2   :  { %18630 = vrcp.f32 %v7107_v18  ;;  %v18621_v57 = vpop.eup %18620 }
 0x9d3   :  { %18632 = vrcp.f32 %v7110_v37  ;;  %v7187_v1 = vmul.f32 %v18621_v57, %v22099_v29 }
 0x9d5   :  { %v7116_v44 = vpop.xlane.xlu0 %7115  ;;  %v7113_v4 = vpop.xlane.xlu1 %7112 }
 0x9d6   :  { %v18623_v34 = vpop.eup %18622  ;;  %18634 = vrcp.f32 %v7113_v4 }
 0x9d7   :  { %v7189_v24 = vmul.f32 %v18623_v34, %v22105_v6  ;;  %18636 = vrcp.f32 %v7116_v44  ;;  %v18625_v38 = vpop.eup %18624 }
 0x9d8   :  { %v7191_v29 = vmul.f32 %v18625_v38, %v22107_v20  ;;  %v7269_v20 = vsel %vm21746_vm5, %v19808_v55, 0  ;;  %v7270_v38 = vsel %vm21746_vm5, %v19876_v16, 0 }
 0x9d9   :  { %v7122_v32 = vpop.xlane.xlu0 %7121  ;;  %v7119_v31 = vpop.xlane.xlu1 %7118  ;;  %v7250_v56 = vpack.c.bf16 %v7189_v24, %v7187_v1 }
 0x9da   :  { %18638 = vrcp.f32 %v7119_v31 }
 0x9db   :  { %17247 = vmatmul.mubr.msk.bf16.vlgmr.msra.gmra.mxu0 %vm152_vm0, %v7250_v56  ;;  %v18627_v52 = vpop.eup %18626  ;;  %18640 = vrcp.f32 %v7122_v32 }
 0x9dc   :  { %17257 = vmatpush3.bf16.msra.mxu0 %v7268_v14  ;;  %17258 = vmatprep.mubr.msk.bf16.mxu0 %vm19197_vm1, %v25492_v50  ;;  %v7193_v6 = vmul.f32 %v18627_v52, %v22117_v59  ;;  %v18629_v57 = vpop.eup %18628 }
 0x9dd   :  { %v7128_v37 = vpop.xlane.xlu0 %7127  ;;  %v7125_v18 = vpop.xlane.xlu1 %7124  ;;  %17268 = vmatprep.subr.bf16.mxu0 %v25492_v50  ;;  %v7195_v34 = vmul.f32 %v18629_v57, %v22115_v8 }
 0x9de   :  { %18642 = vrcp.f32 %v7125_v18  ;;  %v7251_v44 = vpack.c.bf16 %v7193_v6, %v7191_v29  ;;  %v7271_v18 = vsel %vm21746_vm5, %v19860_v36, 0 }
 0x9df   :  { %v18631_v4 = vpop.eup %18630  ;;  %18644 = vrcp.f32 %v7128_v37 }
 0x9e0   :  { %v7197_v1 = vmul.f32 %v18631_v4, %v22125_v39  ;;  %17253 = vmatmul.mubr.msk.bf16.vlgmr.msra.gmra.mxu1 %vm152_vm0, %v7251_v44  ;;  %v18633_v32 = vpop.eup %18632 }
 0x9e1   :  { %v7134_v59 = vpop.xlane.xlu0 %7133  ;;  %v7131_v24 = vpop.xlane.xlu1 %7130  ;;  %17263 = vmatpush3.bf16.msra.mxu1 %v7269_v20  ;;  %17264 = vmatprep.mubr.msk.bf16.mxu1 %vm19197_vm1, %v25492_v50  ;;  %v7199_v39 = vmul.f32 %v18633_v32, %v22127_v62  ;;  %v7272_v20 = vsel %vm21746_vm5, %v19905_v12, 0 }
 0x9e2   :  { %18646 = vrcp.f32 %v7131_v24  ;;  %v7252_v31 = vpack.c.bf16 %v7197_v1, %v7195_v34  ;;  %17274 = vmatprep.subr.bf16.mxu1 %v25492_v50 }
 0x9e3   :  { %v18635_v8 = vpop.eup %18634  ;;  %18648 = vrcp.f32 %v7134_v59 }
 0x9e4   :  { %v7201_v56 = vmul.f32 %v18635_v8, %v22137_v0  ;;  %17259 = vmatmul.mubr.msk.bf16.vlgmr.msra.gmra.mxu0 %vm152_vm0, %v7252_v31  ;;  %v18637_v29 = vpop.eup %18636 }
 0x9e5   :  { %v7140_v14 = vpop.xlane.xlu0 %7139  ;;  %v7137_v52 = vpop.xlane.xlu1 %7136  ;;  %17269 = vmatpush3.bf16.msra.mxu0 %v7270_v38  ;;  %17270 = vmatprep.mubr.msk.bf16.mxu0 %vm19197_vm1, %v25492_v50  ;;  %v7203_v0 = vmul.f32 %v18637_v29, %v22135_v5 }
 0x9e6   :  { %18650 = vrcp.f32 %v7137_v52  ;;  %v7253_v6 = vpack.c.bf16 %v7201_v56, %v7199_v39  ;;  %17280 = vmatprep.subr.bf16.mxu0 %v25492_v50  ;;  %v7273_v39 = vsel %vm21746_vm5, %v19896_v23, 0 }
 0x9e7   :  { %v18639_v62 = vpop.eup %18638  ;;  %18652 = vrcp.f32 %v7140_v14 }
 0x9e8   :  { %v7205_v37 = vmul.f32 %v18639_v62, %v22145_v63  ;;  %17265 = vmatmul.mubr.msk.bf16.vlgmr.msra.gmra.mxu1 %vm152_vm0, %v7253_v6  ;;  %v18641_v4 = vpop.eup %18640  ;;  %v7274_v6 = vsel %vm21746_vm5, %v19934_v58, 0 }
 0x9e9   :  { %v7146_v57 = vpop.xlane.xlu0 %7145  ;;  %v7143_v44 = vpop.xlane.xlu1 %7142  ;;  %17275 = vmatpush3.bf16.msra.mxu1 %v7271_v18  ;;  %17276 = vmatprep.mubr.msk.bf16.mxu1 %vm19197_vm1, %v25492_v50  ;;  %v7207_v63 = vmul.f32 %v18641_v4, %v22147_v26 }
 0x9ea   :  { %18654 = vrcp.f32 %v7143_v44  ;;  %v7254_v34 = vpack.c.bf16 %v7205_v37, %v7203_v0  ;;  %17286 = vmatprep.subr.bf16.mxu1 %v25492_v50  ;;  %v7275_v44 = vsel %vm21746_vm5, %v19925_v9, 0 }
 0x9eb   :  { %v18643_v5 = vpop.eup %18642  ;;  %18656 = vrcp.f32 %v7146_v57 }
 0x9ec   :  { %v7209_v1 = vmul.f32 %v18643_v5, %v22157_v15  ;;  %17271 = vmatmul.mubr.msk.bf16.vlgmr.msra.gmra.mxu0 %vm152_vm0, %v7254_v34  ;;  %v18645_v32 = vpop.eup %18644 }
 0x9ed   :  { %v7152_v59 = vpop.xlane.xlu0 %7151  ;;  %v7149_v24 = vpop.xlane.xlu1 %7148  ;;  %17281 = vmatpush3.bf16.msra.mxu0 %v7272_v20  ;;  %17282 = vmatprep.mubr.msk.bf16.mxu0 %vm19197_vm1, %v25492_v50  ;;  %v7211_v15 = vmul.f32 %v18645_v32, %v22155_v61  ;;  %v7276_v20 = vsel %vm21746_vm5, %v19963_v43, 0 }
 0x9ee   :  { %18658 = vrcp.f32 %v7149_v24  ;;  %v7255_v31 = vpack.c.bf16 %v7209_v1, %v7207_v63  ;;  %17292 = vmatprep.subr.bf16.mxu0 %v25492_v50 }
 0x9ef   :  { %v18647_v26 = vpop.eup %18646  ;;  %18660 = vrcp.f32 %v7152_v59 }
 0x9f0   :  { %v7213_v8 = vmul.f32 %v18647_v26, %v22165_v7  ;;  %17277 = vmatmul.mubr.msk.bf16.vlgmr.msra.gmra.mxu1 %vm152_vm0, %v7255_v31  ;;  %v18649_v14 = vpop.eup %18648 }
 0x9f1   :  { %v7158_v56 = vpop.xlane.xlu0 %7157  ;;  %v7155_v38 = vpop.xlane.xlu1 %7154  ;;  %17287 = vmatpush3.bf16.msra.mxu1 %v7273_v39  ;;  %17288 = vmatprep.mubr.msk.bf16.mxu1 %vm19197_vm1, %v25492_v50  ;;  %v7215_v7 = vmul.f32 %v18649_v14, %v22167_v48 }
 0x9f2   :  { %18662 = vrcp.f32 %v7155_v38  ;;  %v7256_v52 = vpack.c.bf16 %v7213_v8, %v7211_v15  ;;  %17298 = vmatprep.subr.bf16.mxu1 %v25492_v50  ;;  %v7277_v15 = vsel %vm21746_vm5, %v19954_v45, 0 }
 0x9f3   :  { %v18651_v61 = vpop.eup %18650  ;;  %18664 = vrcp.f32 %v7158_v56 }
 0x9f4   :  { %v7217_v29 = vmul.f32 %v18651_v61, %v22177_v2  ;;  %17283 = vmatmul.mubr.msk.bf16.vlgmr.msra.gmra.mxu0 %vm152_vm0, %v7256_v52  ;;  %v18653_v37 = vpop.eup %18652  ;;  %v7278_v52 = vsel %vm21746_vm5, %v19984_v53, 0 }
 0x9f5   :  { %v7164_v62 = vpop.xlane.xlu0 %7163  ;;  %v7161_v0 = vpop.xlane.xlu1 %7160  ;;  %17293 = vmatpush3.bf16.msra.mxu0 %v7274_v6  ;;  %17294 = vmatprep.mubr.msk.bf16.mxu0 %vm19197_vm1, %v25492_v50  ;;  %v7219_v2 = vmul.f32 %v18653_v37, %v22175_v19 }
 0x9f6   :  { %18666 = vrcp.f32 %v7161_v0  ;;  %v7257_v18 = vpack.c.bf16 %v7217_v29, %v7215_v7  ;;  %17304 = vmatprep.subr.bf16.mxu0 %v25492_v50 }
 0x9f7   :  { %v18655_v48 = vpop.eup %18654  ;;  %18668 = vrcp.f32 %v7164_v62  ;;  %v7279_v62 = vsel %vm21746_vm5, %v19978_v10, 0 }
 0x9f8   :  { %v7221_v57 = vmul.f32 %v18655_v48, %v22185_v54  ;;  %17289 = vmatmul.mubr.msk.bf16.vlgmr.msra.gmra.mxu1 %vm152_vm0, %v7257_v18  ;;  %v18657_v5 = vpop.eup %18656  ;;  %v7280_v48 = vsel %vm21746_vm5, %v19995_v47, 0 }
 0x9f9   :  { %v7170_v4 = vpop.xlane.xlu0 %7169  ;;  %v7167_v34 = vpop.xlane.xlu1 %7166  ;;  %17299 = vmatpush3.bf16.msra.mxu1 %v7275_v44  ;;  %17300 = vmatprep.mubr.msk.bf16.mxu1 %vm19197_vm1, %v25492_v50  ;;  %v7223_v54 = vmul.f32 %v18657_v5, %v22187_v41  ;;  %v7281_v5 = vsel %vm21746_vm5, %v19992_v60, 0  ;;  %vm11631_vm5 = vmpackc.low %vm23681_vm4, %vm23681_vm4 }
 0x9fa   :  { %18670 = vrcp.f32 %v7167_v34  ;;  %v7258_v63 = vpack.c.bf16 %v7221_v57, %v7219_v2  ;;  %17310 = vmatprep.subr.bf16.mxu1 %v25492_v50 }
 0x9fb   :  { %v18659_v19 = vpop.eup %18658  ;;  %18672 = vrcp.f32 %v7170_v4 }
 0x9fc   :  { %v7225_v1 = vmul.f32 %v18659_v19, %v22197_v35  ;;  %17295 = vmatmul.mubr.msk.bf16.vlgmr.msra.gmra.mxu0 %vm152_vm0, %v7258_v63  ;;  %v18661_v32 = vpop.eup %18660 }
 0x9fd   :  { %v7176_v59 = vpop.xlane.xlu0 %7175  ;;  %v7173_v24 = vpop.xlane.xlu1 %7172  ;;  %17305 = vmatpush3.bf16.msra.mxu0 %v7276_v20  ;;  %17306 = vmatprep.mubr.msk.bf16.mxu0 %vm19197_vm1, %v25492_v50  ;;  %v7227_v35 = vmul.f32 %v18661_v32, %v22195_v11  ;;  %v25841_v20 = vld [vmem:[#allocation10_spill] sm:$0xff]  ;;  %v25846_v32 = vld [vmem:[#allocation19_spill] sm:$0xff] }
 0x9fe   :  { %18674 = vrcp.f32 %v7173_v24  ;;  %v7259_v31 = vpack.c.bf16 %v7225_v1, %v7223_v54  ;;  %17316 = vmatprep.subr.bf16.mxu0 %v25492_v50  ;;  %v25840_v54 = vld [vmem:[#allocation11_spill] sm:$0xff] }
 0x9ff   :  { %v18663_v41 = vpop.eup %18662  ;;  %18676 = vrcp.f32 %v7176_v59  ;;  %v8028_v59 = vrot.slane %v8024_v13, %v25841_v20  ;;  %v25842_v24 = vld [vmem:[#allocation15_spill] sm:$0xff] }
 0xa00   :  { %v7229_v26 = vmul.f32 %v18663_v41, %v22205_v51  ;;  %17301 = vmatmul.mubr.msk.bf16.vlgmr.msra.gmra.mxu1 %vm152_vm0, %v7259_v31  ;;  %v18665_v56 = vpop.eup %18664  ;;  %v25847_v31 = vld [vmem:[#allocation18_spill] sm:$0xff]  ;;  %v25848_v41 = vld [vmem:[#allocation23_spill] sm:$0xff] }
 0xa01   :  { %v7182_v8 = vpop.xlane.xlu0 %7181  ;;  %v7179_v39 = vpop.xlane.xlu1 %7178  ;;  %17311 = vmatpush3.bf16.msra.mxu1 %v7277_v15  ;;  %17312 = vmatprep.mubr.msk.bf16.mxu1 %vm19197_vm1, %v25492_v50  ;;  %v7231_v51 = vmul.f32 %v18665_v56, %v22207_v22  ;;  %vm22401_vm10 = vcmp.ne.s16.totalorder %v8028_v59, 0  ;;  %v25851_v15 = vld [vmem:[#allocation26_spill] sm:$0xff]  ;;  %v25854_v56 = vld [vmem:[#allocation43_spill] sm:$0xff] }
 0xa02   :  { %18678 = vrcp.f32 %v7179_v39  ;;  %v7260_v38 = vpack.c.bf16 %v7229_v26, %v7227_v35  ;;  %17322 = vmatprep.subr.bf16.mxu1 %v25492_v50  ;;  %v25849_v35 = vld [vmem:[#allocation22_spill] sm:$0xff]  ;;  %v25850_v26 = vld [vmem:[#allocation27_spill] sm:$0xff] }
 0xa03   :  { %v18667_v11 = vpop.eup %18666  ;;  %18680 = vrcp.f32 %v7182_v8  ;;  %v25852_v8 = vld [vmem:[#allocation35_spill] sm:$0xff]  ;;  %v25853_v39 = vld [vmem:[#allocation34_spill] sm:$0xff] }
 0xa04   :  { %v7233_v14 = vmul.f32 %v18667_v11, %v22216_v40  ;;  %17307 = vmatmul.mubr.msk.bf16.vlgmr.msra.gmra.mxu0 %vm152_vm0, %v7260_v38  ;;  %v18669_v7 = vpop.eup %18668  ;;  %v25855_v38 = vld [vmem:[#allocation42_spill] sm:$0xff]  ;;  %v25856_v11 = vld [vmem:[#allocation51_spill] sm:$0xff] }
 0xa05   :  { %v7185_v61 = vpop.xlane.xlu1 %7184  ;;  %17317 = vmatpush3.bf16.msra.mxu0 %v7278_v52  ;;  %17318 = vmatprep.mubr.msk.bf16.mxu0 %vm19197_vm1, %v25492_v50  ;;  %v7235_v22 = vmul.f32 %v18669_v7, %v22214_v33  ;;  %v25859_v52 = vld [vmem:[#allocation57_spill] sm:$0xff] }
 0xa06   :  { %18682 = vrcp.f32 %v7185_v61  ;;  %v7261_v29 = vpack.c.bf16 %v7233_v14, %v7231_v51  ;;  %17328 = vmatprep.subr.bf16.mxu0 %v25492_v50  ;;  %v25857_v51 = vld [vmem:[#allocation49_spill] sm:$0xff]  ;;  %v25858_v14 = vld [vmem:[#allocation28_spill] sm:$0xff]  ;;  %v25860_v61 = vld [vmem:[#allocation59_spill] sm:$0xff] }
 0xa07   :  { %v18671_v6 = vpop.eup %18670  ;;  %v25861_v7 = vld [vmem:[#allocation33_spill] sm:$0xff] }
 0xa08   :  { %v7237_v40 = vmul.f32 %v18671_v6, %v22222_v42  ;;  %17313 = vmatmul.mubr.msk.bf16.vlgmr.msra.gmra.mxu1 %vm152_vm0, %v7261_v29  ;;  %v18673_v0 = vpop.eup %18672  ;;  %v25862_v29 = vld [vmem:[#allocation36_spill] sm:$0xff]  ;;  %v25863_v6 = vld [vmem:[#allocation61_spill] sm:$0xff] }
 0xa09   :  { %17323 = vmatpush3.bf16.msra.mxu1 %v7279_v62  ;;  %17324 = vmatprep.mubr.msk.bf16.mxu1 %vm19197_vm1, %v25492_v50  ;;  %v7239_v33 = vmul.f32 %v18673_v0, %v22224_v28  ;;  %v25866_v62 = vld [vmem:[#allocation44_spill] sm:$0xff]  ;;  %v25867_v0 = vld [vmem:[#allocation63_spill] sm:$0xff] }
 0xa0a   :  { %v7262_v37 = vpack.c.bf16 %v7237_v40, %v7235_v22  ;;  %17334 = vmatprep.subr.bf16.mxu1 %v25492_v50  ;;  %v25864_v22 = vld [vmem:[#allocation62_spill] sm:$0xff]  ;;  %v25865_v40 = vld [vmem:[#allocation41_spill] sm:$0xff] }
 0xa0b   :  { %v18675_v18 = vpop.eup %18674 }
 0xa0c   :  { %v7241_v42 = vmul.f32 %v18675_v18, %v22232_v30  ;;  %17319 = vmatmul.mubr.msk.bf16.vlgmr.msra.gmra.mxu0 %vm152_vm0, %v7262_v37  ;;  %v18677_v2 = vpop.eup %18676  ;;  %v25868_v37 = vld [vmem:[#allocation64_spill] sm:$0xff]  ;;  %v25869_v18 = vld [vmem:[#allocation50_spill] sm:$0xff] }
 0xa0d   :  { %17329 = vmatpush3.bf16.msra.mxu0 %v7280_v48  ;;  %17330 = vmatprep.mubr.msk.bf16.mxu0 %vm19197_vm1, %v25492_v50  ;;  %v7243_v4 = vmul.f32 %v18677_v2, %v22230_v21  ;;  %v25872_v48 = vld [vmem:[#allocation66_spill] sm:$0xff] }
 0xa0e   :  { %v7263_v57 = vpack.c.bf16 %v7241_v42, %v7239_v33  ;;  %17340 = vmatprep.subr.bf16.mxu0 %v25492_v50  ;;  %v25870_v33 = vld [vmem:[#allocation52_spill] sm:$0xff]  ;;  %v25871_v42 = vld [vmem:[#allocation65_spill] sm:$0xff]  ;;  %v25873_v2 = vld [vmem:[#allocation58_spill] sm:$0xff] }
 0xa0f   :  { %v18679_v28 = vpop.eup %18678 }
 0xa10   :  { %v18681_v30 = vpop.eup %18680  ;;  %v7245_v34 = vmul.f32 %v18679_v28, %v22238_v17  ;;  %17325 = vmatmul.mubr.msk.bf16.vlgmr.msra.gmra.mxu1 %vm152_vm0, %v7263_v57  ;;  %v25874_v57 = vld [vmem:[#allocation60_spill] sm:$0xff] }
 0xa11   :  { %17335 = vmatpush3.bf16.msra.mxu1 %v7281_v5  ;;  %17336 = vmatprep.mubr.msk.bf16.mxu1 %vm19197_vm1, %v25492_v50  ;;  %v7247_v21 = vmul.f32 %v18681_v30, %v22240_v46  ;;  %v9070_v44 = vsel %vm22401_vm10, %v25874_v57, 0  ;;  %v25875_v28 = vld [vmem:[#allocation68_spill] sm:$0xff]  ;;  %v25876_v30 = vld [vmem:[#allocation67_spill] sm:$0xff]  ;;  %v9828_v46 = vsel %vm9827_vm14, 65537, %v25532_v25 }
 0xa12   :  { %v7264_v19 = vpack.c.bf16 %v7245_v34, %v7243_v4  ;;  %17346 = vmatprep.subr.bf16.mxu1 %v25492_v50  ;;  %v9071_v4 = vsel %vm22401_vm10, %v25876_v30, 0  ;;  %v25877_v5 = vld [vmem:[#allocation32_spill] sm:$0xff] }
 0xa13   :  { %v18683_v63 = vpop.eup %18682 }
 0xa14   :  { %v7249_v17 = vmul.f32 %v18683_v63, %v22246_v27  ;;  %17331 = vmatmul.mubr.msk.bf16.vlgmr.msra.gmra.mxu0 %vm152_vm0, %v7264_v19  ;;  %v25845_v27 = vld [vmem:[#allocation14_spill] sm:$0xff] }
 0xa15   :  { %17341 = vmatpush3.bf16.xpose.msra.mxu0 %v25840_v54  ;;  %17342 = vmatprep.mubr.msk.bf16.mxu0 %vm19197_vm1, %v25492_v50 }
 0xa16   :  { %v7265_v1 = vpack.c.bf16 %v7249_v17, %v7247_v21  ;;  %17352 = vmatprep.subr.bf16.mxu0 %v25492_v50  ;;  %v25879_v17 = vld [vmem:[#allocation85_spill] sm:$0xff] }
 0xa18   :  { %17337 = vmatmul.mubr.msk.bf16.vlgmr.msra.gmra.mxu1 %vm152_vm0, %v7265_v1 }
 0xa19   :  { %17347 = vmatpush3.bf16.xpose.msra.mxu1 %v25842_v24  ;;  %17348 = vmatprep.mubr.msk.bf16.mxu1 %vm19197_vm1, %v25492_v50 }
 0xa1a   :  { %17358 = vmatprep.subr.bf16.mxu1 %v25492_v50 }
 0xa1c   :  { %17343 = vmatmul.mubr.msk.bf16.vlgmr.msra.gmra.mxu0 %vm22401_vm10, %v25845_v27 }
 0xa1d   :  { %17353 = vmatpush3.bf16.xpose.msra.mxu0 %v25846_v32  ;;  %17354 = vmatprep.mubr.msk.bf16.mxu0 %vm19197_vm1, %v25492_v50 }
 0xa1e   :  { %17364 = vmatprep.subr.bf16.mxu0 %v25492_v50 }
 0xa20   :  { %17349 = vmatmul.mubr.msk.bf16.vlgmr.msra.gmra.mxu1 %vm22401_vm10, %v25847_v31 }
 0xa21   :  { %17359 = vmatpush3.bf16.xpose.msra.mxu1 %v25848_v41  ;;  %17360 = vmatprep.mubr.msk.bf16.mxu1 %vm19197_vm1, %v25492_v50 }
 0xa22   :  { %17370 = vmatprep.subr.bf16.mxu1 %v25492_v50 }
 0xa24   :  { %17355 = vmatmul.mubr.msk.bf16.vlgmr.msra.gmra.mxu0 %vm22401_vm10, %v25849_v35 }
 0xa25   :  { %17365 = vmatpush3.bf16.xpose.msra.mxu0 %v25850_v26  ;;  %17366 = vmatprep.mubr.msk.bf16.mxu0 %vm19197_vm1, %v25492_v50 }
 0xa26   :  { %17376 = vmatprep.subr.bf16.mxu0 %v25492_v50 }
 0xa28   :  { %17361 = vmatmul.mubr.msk.bf16.vlgmr.msra.gmra.mxu1 %vm22401_vm10, %v25851_v15 }
 0xa29   :  { %17371 = vmatpush3.bf16.xpose.msra.mxu1 %v25852_v8  ;;  %17372 = vmatprep.mubr.msk.bf16.mxu1 %vm19197_vm1, %v25492_v50 }
 0xa2a   :  { %17382 = vmatprep.subr.bf16.mxu1 %v25492_v50 }
 0xa2c   :  { %17367 = vmatmul.mubr.msk.bf16.vlgmr.msra.gmra.mxu0 %vm22401_vm10, %v25853_v39 }
 0xa2d   :  { %17377 = vmatpush3.bf16.xpose.msra.mxu0 %v25854_v56  ;;  %17378 = vmatprep.mubr.msk.bf16.mxu0 %vm19197_vm1, %v25492_v50 }
 0xa2e   :  { %17388 = vmatprep.subr.bf16.mxu0 %v25492_v50 }
 0xa30   :  { %17373 = vmatmul.mubr.msk.bf16.vlgmr.msra.gmra.mxu1 %vm22401_vm10, %v25855_v38 }
 0xa31   :  { %17383 = vmatpush3.bf16.xpose.msra.mxu1 %v25856_v11  ;;  %17384 = vmatprep.mubr.msk.bf16.mxu1 %vm19197_vm1, %v25492_v50 }
 0xa32   :  { %17394 = vmatprep.subr.bf16.mxu1 %v25492_v50 }
 0xa34   :  { %17379 = vmatmul.mubr.msk.bf16.vlgmr.msra.gmra.mxu0 %vm22401_vm10, %v25857_v51 }
 0xa35   :  { %17389 = vmatpush3.bf16.xpose.msra.mxu0 %v25858_v14  ;;  %17390 = vmatprep.mubr.msk.bf16.mxu0 %vm19197_vm1, %v25492_v50 }
 0xa36   :  { %17400 = vmatprep.subr.bf16.mxu0 %v25492_v50 }
 0xa38   :  { %17385 = vmatmul.mubr.msk.bf16.vlgmr.msra.gmra.mxu1 %vm22401_vm10, %v25859_v52 }
 0xa39   :  { %17395 = vmatpush3.bf16.xpose.msra.mxu1 %v25860_v61  ;;  %17396 = vmatprep.mubr.msk.bf16.mxu1 %vm19197_vm1, %v25492_v50 }
 0xa3a   :  { %17406 = vmatprep.subr.bf16.mxu1 %v25492_v50 }
 0xa3c   :  { %17391 = vmatmul.mubr.msk.bf16.vlgmr.msra.gmra.mxu0 %vm22401_vm10, %v25861_v7 }
 0xa3d   :  { %17401 = vmatpush3.bf16.xpose.msra.mxu0 %v25862_v29  ;;  %17402 = vmatprep.mubr.msk.bf16.mxu0 %vm19197_vm1, %v25492_v50 }
 0xa3e   :  { %17412 = vmatprep.subr.bf16.mxu0 %v25492_v50 }
 0xa40   :  { %17397 = vmatmul.mubr.msk.bf16.vlgmr.msra.gmra.mxu1 %vm22401_vm10, %v25863_v6 }
 0xa41   :  { %17407 = vmatpush3.bf16.xpose.msra.mxu1 %v25864_v22  ;;  %17408 = vmatprep.mubr.msk.bf16.mxu1 %vm19197_vm1, %v25492_v50 }
 0xa42   :  { %17418 = vmatprep.subr.bf16.mxu1 %v25492_v50 }
 0xa44   :  { %17403 = vmatmul.mubr.msk.bf16.vlgmr.msra.gmra.mxu0 %vm22401_vm10, %v25865_v40 }
 0xa45   :  { %17413 = vmatpush3.bf16.xpose.msra.mxu0 %v25866_v62  ;;  %17414 = vmatprep.mubr.msk.bf16.mxu0 %vm19197_vm1, %v25492_v50 }
 0xa46   :  { %17424 = vmatprep.subr.bf16.mxu0 %v25492_v50 }
 0xa48   :  { %17409 = vmatmul.mubr.msk.bf16.vlgmr.msra.gmra.mxu1 %vm22401_vm10, %v25867_v0 }
 0xa49   :  { %17419 = vmatpush3.bf16.xpose.msra.mxu1 %v25868_v37  ;;  %17420 = vmatprep.mubr.msk.bf16.mxu1 %vm19197_vm1, %v25492_v50 }
 0xa4a   :  { %17430 = vmatprep.subr.bf16.mxu1 %v25492_v50 }
 0xa4c   :  { %17415 = vmatmul.mubr.msk.bf16.vlgmr.msra.gmra.mxu0 %vm22401_vm10, %v25869_v18  ;;  %v25891_v18 = vld [vmem:[#allocation88_spill] sm:$0xff] }
 0xa4d   :  { %17425 = vmatpush3.bf16.xpose.msra.mxu0 %v25870_v33  ;;  %17426 = vmatprep.mubr.msk.bf16.mxu0 %vm19197_vm1, %v25492_v50 }
 0xa4e   :  { %17436 = vmatprep.subr.bf16.mxu0 %v25492_v50 }
 0xa50   :  { %17421 = vmatmul.mubr.msk.bf16.vlgmr.msra.gmra.mxu1 %vm22401_vm10, %v25871_v42  ;;  %v25885_v42 = vld [vmem:[#allocation2_spill] sm:$0xff] }
 0xa51   :  { %17431 = vmatpush3.bf16.xpose.msra.mxu1 %v25872_v48  ;;  %17432 = vmatprep.mubr.msk.bf16.mxu1 %vm19197_vm1, %v25492_v50 }
 0xa52   :  { %17442 = vmatprep.subr.bf16.mxu1 %v25492_v50 }
 0xa54   :  { %17427 = vmatmul.mubr.msk.bf16.vlgmr.msra.gmra.mxu0 %vm22401_vm10, %v25873_v2  ;;  %v25883_v2 = vld [vmem:[#allocation86_spill] sm:$0xff] }
 0xa55   :  { %17437 = vmatpush3.bf16.msra.mxu0 %v9070_v44  ;;  %17438 = vmatprep.mubr.msk.bf16.mxu0 %vm19197_vm1, %v25492_v50  ;;  %v25881_v44 = vld [vmem:[#allocation29_spill] sm:$0xff] }
 0xa56   :  { %17448 = vmatprep.subr.bf16.mxu0 %v25492_v50 }
 0xa58   :  { %17433 = vmatmul.mubr.msk.bf16.vlgmr.msra.gmra.mxu1 %vm22401_vm10, %v25875_v28 }
 0xa59   :  { %17443 = vmatpush3.bf16.msra.mxu1 %v9071_v4  ;;  %17444 = vmatprep.mubr.msk.bf16.mxu1 %vm19197_vm1, %v25492_v50 }
 0xa5a   :  { %17454 = vmatprep.subr.bf16.mxu1 %v25492_v50 }
 0xa9b   :  { %v7319_v34 = vpop.f32.mrf.mxu0 }
 0xa9c   :  { %v22522_v63 = vadd.f32 %v7319_v34, %v25877_v5 }
 0xa9d   :  { %v17248_v19 = vpop.f32.mrf.mxu0 }
 0xa9e   :  { %25878 = vst [vmem:[#allocation12_spill] sm:$0xff] %v22522_v63 }
 0xa9f   :  { %v7322_v21 = vpop.f32.mrf.mxu0 }
 0xaa0   :  { %v22525_v13 = vadd.f32 %v7322_v21, %v25879_v17  ;;  %v7363_v1 = vpop.f32.mrf.mxu1  ;;  %v25887_v21 = vld [vmem:[#allocation87_spill] sm:$0xff] }
 0xaa1   :  { %v17249_v59 = vpop.f32.mrf.mxu0  ;;  %v22528_v28 = vadd.f32 %v7363_v1, %v25881_v44 }
 0xaa2   :  { %25880 = vst [vmem:[#allocation69_spill] sm:$0xff] %v22525_v13  ;;  %v17254_v4 = vpop.f32.mrf.mxu1  ;;  %v25889_v59 = vld [vmem:[#allocation3_spill] sm:$0xff] }
 0xaa3   :  { %25882 = vst [vmem:[#allocation13_spill] sm:$0xff] %v22528_v28 }
 0xaa4   :  { %v7366_v30 = vpop.f32.mrf.mxu1  ;;  %v7407_v57 = vpop.f32.mrf.mxu0 }
 0xaa5   :  { %v22531_v48 = vadd.f32 %v7366_v30, %v25883_v2  ;;  %v22534_v33 = vadd.f32 %v7407_v57, %v25885_v42  ;;  %v25893_v30 = vld [vmem:[#allocation40_spill] sm:$0xff] }
 0xaa6   :  { %v17255_v34 = vpop.f32.mrf.mxu1  ;;  %v17260_v5 = vpop.f32.mrf.mxu0 }
 0xaa7   :  { %25884 = vst [vmem:[#allocation70_spill] sm:$0xff] %v22531_v48  ;;  %25886 = vst [vmem:[#allocation16_spill] sm:$0xff] %v22534_v33  ;;  %v25895_v48 = vld [vmem:[#allocation89_spill] sm:$0xff] }
 0xaa8   :  { %v7410_v19 = vpop.f32.mrf.mxu0  ;;  %v7451_v63 = vpop.f32.mrf.mxu1 }
 0xaa9   :  { %v22537_v17 = vadd.f32 %v7410_v19, %v25887_v21  ;;  %v22540_v13 = vadd.f32 %v7451_v63, %v25889_v59  ;;  %v25897_v21 = vld [vmem:[#allocation37_spill] sm:$0xff] }
 0xaaa   :  { %v17261_v1 = vpop.f32.mrf.mxu0  ;;  %v17266_v44 = vpop.f32.mrf.mxu1 }
 0xaab   :  { %25888 = vst [vmem:[#allocation71_spill] sm:$0xff] %v22537_v17  ;;  %25890 = vst [vmem:[#allocation17_spill] sm:$0xff] %v22540_v13  ;;  %v25899_v17 = vld [vmem:[#allocation90_spill] sm:$0xff] }
 0xaac   :  { %v7454_v4 = vpop.f32.mrf.mxu1  ;;  %v7495_v28 = vpop.f32.mrf.mxu0 }
 0xaad   :  { %v22543_v2 = vadd.f32 %v7454_v4, %v25891_v18  ;;  %v22546_v42 = vadd.f32 %v7495_v28, %v25893_v30  ;;  %v25901_v4 = vld [vmem:[#allocation4_spill] sm:$0xff] }
 0xaae   :  { %v17267_v57 = vpop.f32.mrf.mxu1  ;;  %v17272_v34 = vpop.f32.mrf.mxu0 }
 0xaaf   :  { %25892 = vst [vmem:[#allocation72_spill] sm:$0xff] %v22543_v2  ;;  %25894 = vst [vmem:[#allocation20_spill] sm:$0xff] %v22546_v42  ;;  %v25903_v2 = vld [vmem:[#allocation91_spill] sm:$0xff] }
 0xab0   :  { %v7498_v5 = vpop.f32.mrf.mxu0  ;;  %v7539_v33 = vpop.f32.mrf.mxu1 }
 0xab1   :  { %v22549_v19 = vadd.f32 %v7498_v5, %v25895_v48  ;;  %v22552_v63 = vadd.f32 %v7539_v33, %v25897_v21  ;;  %v25905_v5 = vld [vmem:[#allocation5_spill] sm:$0xff] }
 0xab2   :  { %v17273_v59 = vpop.f32.mrf.mxu0  ;;  %v17278_v1 = vpop.f32.mrf.mxu1 }
 0xab3   :  { %25896 = vst [vmem:[#allocation73_spill] sm:$0xff] %v22549_v19  ;;  %25898 = vst [vmem:[#allocation21_spill] sm:$0xff] %v22552_v63  ;;  %v25907_v19 = vld [vmem:[#allocation92_spill] sm:$0xff] }
 0xab4   :  { %v7542_v44 = vpop.f32.mrf.mxu1  ;;  %v7583_v13 = vpop.f32.mrf.mxu0 }
 0xab5   :  { %v22555_v18 = vadd.f32 %v7542_v44, %v25899_v17  ;;  %v22558_v28 = vadd.f32 %v7583_v13, %v25901_v4  ;;  %v25909_v44 = vld [vmem:[#allocation48_spill] sm:$0xff] }
 0xab6   :  { %v17279_v30 = vpop.f32.mrf.mxu1  ;;  %v17284_v57 = vpop.f32.mrf.mxu0 }
 0xab7   :  { %25900 = vst [vmem:[#allocation74_spill] sm:$0xff] %v22555_v18  ;;  %25902 = vst [vmem:[#allocation24_spill] sm:$0xff] %v22558_v28  ;;  %v25911_v18 = vld [vmem:[#allocation93_spill] sm:$0xff] }
 0xab8   :  { %v7586_v34 = vpop.f32.mrf.mxu0  ;;  %v7627_v42 = vpop.f32.mrf.mxu1 }
 0xab9   :  { %v22561_v48 = vadd.f32 %v7586_v34, %v25903_v2  ;;  %v22564_v33 = vadd.f32 %v7627_v42, %v25905_v5  ;;  %v25913_v34 = vld [vmem:[#allocation46_spill] sm:$0xff] }
 0xaba   :  { %v17285_v21 = vpop.f32.mrf.mxu0  ;;  %v17290_v59 = vpop.f32.mrf.mxu1 }
 0xabb   :  { %25904 = vst [vmem:[#allocation75_spill] sm:$0xff] %v22561_v48  ;;  %25906 = vst [vmem:[#allocation25_spill] sm:$0xff] %v22564_v33  ;;  %v25915_v48 = vld [vmem:[#allocation94_spill] sm:$0xff] }
 0xabc   :  { %v7630_v1 = vpop.f32.mrf.mxu1  ;;  %v7671_v63 = vpop.f32.mrf.mxu0 }
 0xabd   :  { %v22567_v17 = vadd.f32 %v7630_v1, %v25907_v19  ;;  %v22570_v13 = vadd.f32 %v7671_v63, %v25909_v44  ;;  %v25917_v1 = vld [vmem:[#allocation6_spill] sm:$0xff] }
 0xabe   :  { %v17291_v4 = vpop.f32.mrf.mxu1  ;;  %v17296_v30 = vpop.f32.mrf.mxu0 }
 0xabf   :  { %25908 = vst [vmem:[#allocation76_spill] sm:$0xff] %v22567_v17  ;;  %25910 = vst [vmem:[#allocation30_spill] sm:$0xff] %v22570_v13  ;;  %v25919_v17 = vld [vmem:[#allocation95_spill] sm:$0xff] }
 0xac0   :  { %v7674_v57 = vpop.f32.mrf.mxu0  ;;  %v7715_v28 = vpop.f32.mrf.mxu1 }
 0xac1   :  { %v22573_v2 = vadd.f32 %v7674_v57, %v25911_v18  ;;  %v22576_v42 = vadd.f32 %v7715_v28, %v25913_v34  ;;  %v25921_v57 = vld [vmem:[#allocation7_spill] sm:$0xff] }
 0xac2   :  { %v17297_v5 = vpop.f32.mrf.mxu0  ;;  %v17302_v21 = vpop.f32.mrf.mxu1 }
 0xac3   :  { %25912 = vst [vmem:[#allocation77_spill] sm:$0xff] %v22573_v2  ;;  %25914 = vst [vmem:[#allocation31_spill] sm:$0xff] %v22576_v42  ;;  %v25923_v2 = vld [vmem:[#allocation96_spill] sm:$0xff] }
 0xac4   :  { %v7718_v59 = vpop.f32.mrf.mxu1  ;;  %v7759_v33 = vpop.f32.mrf.mxu0 }
 0xac5   :  { %v22579_v19 = vadd.f32 %v7718_v59, %v25915_v48  ;;  %v22582_v63 = vadd.f32 %v7759_v33, %v25917_v1  ;;  %v25925_v59 = vld [vmem:[#allocation56_spill] sm:$0xff] }
 0xac6   :  { %v17303_v44 = vpop.f32.mrf.mxu1  ;;  %v17308_v4 = vpop.f32.mrf.mxu0 }
 0xac7   :  { %25916 = vst [vmem:[#allocation78_spill] sm:$0xff] %v22579_v19  ;;  %25918 = vst [vmem:[#allocation38_spill] sm:$0xff] %v22582_v63  ;;  %v25927_v19 = vld [vmem:[#allocation97_spill] sm:$0xff] }
 0xac8   :  { %v7762_v30 = vpop.f32.mrf.mxu0  ;;  %v7803_v13 = vpop.f32.mrf.mxu1 }
 0xac9   :  { %v22585_v18 = vadd.f32 %v7762_v30, %v25919_v17  ;;  %v22588_v28 = vadd.f32 %v7803_v13, %v25921_v57  ;;  %v25929_v30 = vld [vmem:[#allocation54_spill] sm:$0xff] }
 0xaca   :  { %v17309_v34 = vpop.f32.mrf.mxu0  ;;  %v17314_v5 = vpop.f32.mrf.mxu1 }
 0xacb   :  { %25920 = vst [vmem:[#allocation79_spill] sm:$0xff] %v22585_v18  ;;  %25922 = vst [vmem:[#allocation39_spill] sm:$0xff] %v22588_v28  ;;  %v25931_v18 = vld [vmem:[#allocation98_spill] sm:$0xff] }
 0xacc   :  { %v7806_v21 = vpop.f32.mrf.mxu1  ;;  %v7847_v42 = vpop.f32.mrf.mxu0 }
 0xacd   :  { %v22591_v48 = vadd.f32 %v7806_v21, %v25923_v2  ;;  %v22594_v33 = vadd.f32 %v7847_v42, %v25925_v59  ;;  %v25933_v21 = vld [vmem:[#allocation8_spill] sm:$0xff] }
 0xace   :  { %v17315_v1 = vpop.f32.mrf.mxu1  ;;  %v17320_v44 = vpop.f32.mrf.mxu0 }
 0xacf   :  { %25924 = vst [vmem:[#allocation80_spill] sm:$0xff] %v22591_v48  ;;  %25926 = vst [vmem:[#allocation47_spill] sm:$0xff] %v22594_v33  ;;  %v25935_v48 = vld [vmem:[#allocation99_spill] sm:$0xff] }
 0xad0   :  { %v7850_v4 = vpop.f32.mrf.mxu0  ;;  %v7891_v63 = vpop.f32.mrf.mxu1 }
 0xad1   :  { %v22597_v17 = vadd.f32 %v7850_v4, %v25927_v19  ;;  %v22600_v13 = vadd.f32 %v7891_v63, %v25929_v30  ;;  %v25937_v4 = vld [vmem:[#allocation9_spill] sm:$0xff] }
 0xad2   :  { %v17321_v57 = vpop.f32.mrf.mxu0  ;;  %v17326_v34 = vpop.f32.mrf.mxu1 }
 0xad3   :  { %25928 = vst [vmem:[#allocation81_spill] sm:$0xff] %v22597_v17  ;;  %25930 = vst [vmem:[#allocation45_spill] sm:$0xff] %v22600_v13 }
 0xad4   :  { %v7894_v5 = vpop.f32.mrf.mxu1  ;;  %v7935_v28 = vpop.f32.mrf.mxu0 }
 0xad5   :  { %v22603_v2 = vadd.f32 %v7894_v5, %v25931_v18  ;;  %v22606_v42 = vadd.f32 %v7935_v28, %v25933_v21  ;;  %v25939_v18 = vld [vmem:[#allocation100_spill] sm:$0xff] }
 0xad6   :  { %v17327_v59 = vpop.f32.mrf.mxu1  ;;  %v17332_v1 = vpop.f32.mrf.mxu0 }
 0xad7   :  { %25932 = vst [vmem:[#allocation82_spill] sm:$0xff] %v22603_v2  ;;  %25934 = vst [vmem:[#allocation55_spill] sm:$0xff] %v22606_v42 }
 0xad8   :  { %v7938_v44 = vpop.f32.mrf.mxu0  ;;  %v7979_v33 = vpop.f32.mrf.mxu1 }
 0xad9   :  { %v22609_v19 = vadd.f32 %v7938_v44, %v25935_v48  ;;  %v22612_v63 = vadd.f32 %v7979_v33, %v25937_v4 }
 0xada   :  { %v17333_v30 = vpop.f32.mrf.mxu0  ;;  %v17338_v57 = vpop.f32.mrf.mxu1 }
 0xadb   :  { %25936 = vst [vmem:[#allocation83_spill] sm:$0xff] %v22609_v19  ;;  %25938 = vst [vmem:[#allocation53_spill] sm:$0xff] %v22612_v63 }
 0xadc   :  { %v7982_v34 = vpop.f32.mrf.mxu1  ;;  %v22614_v13 = vpop.f32.mrf.mxu0 }
 0xadd   :  { %v22617_v5 = vadd.f32 %v7982_v34, %v25939_v18  ;;  %v8702_v28 = vsel %vm152_vm0, %v22614_v13, -inf }
 0xade   :  { %8703 = vmax.xlane.f32.xlu0 %v8702_v28  ;;  %v17339_v21 = vpop.f32.mrf.mxu1  ;;  %v17344_v59 = vpop.f32.mrf.mxu0 }
 0xadf   :  { %25940 = vst [vmem:[#allocation84_spill] sm:$0xff] %v22617_v5 }
 0xae0   :  { %v22621_v1 = vpop.f32.mrf.mxu0  ;;  %v22623_v48 = vpop.f32.mrf.mxu1 }
 0xae1   :  { %v8705_v33 = vsel %vm152_vm0, %v22621_v1, -inf  ;;  %v8708_v44 = vsel %vm152_vm0, %v22623_v48, -inf }
 0xae2   :  { %8706 = vmax.xlane.f32.xlu1 %v8705_v33  ;;  %v17345_v4 = vpop.f32.mrf.mxu0  ;;  %8709 = vmax.xlane.f32.xlu0 %v8708_v44  ;;  %v17350_v30 = vpop.f32.mrf.mxu1 }
 0xae4   :  { %v22629_v57 = vpop.f32.mrf.mxu1  ;;  %v22631_v34 = vpop.f32.mrf.mxu0 }
 0xae5   :  { %v8714_v18 = vsel %vm152_vm0, %v22631_v34, -inf  ;;  %v8711_v28 = vsel %vm152_vm0, %v22629_v57, -inf }
 0xae6   :  { %v17356_v21 = vpop.f32.mrf.mxu0  ;;  %8715 = vmax.xlane.f32.xlu0 %v8714_v18  ;;  %8712 = vmax.xlane.f32.xlu1 %v8711_v28  ;;  %v17351_v59 = vpop.f32.mrf.mxu1 }
 0xae8   :  { %v22637_v5 = vpop.f32.mrf.mxu0  ;;  %v22639_v33 = vpop.f32.mrf.mxu1 }
 0xae9   :  { %v8717_v44 = vsel %vm152_vm0, %v22637_v5, -inf  ;;  %v8720_v4 = vsel %vm152_vm0, %v22639_v33, -inf }
 0xaea   :  { %v17357_v30 = vpop.f32.mrf.mxu0  ;;  %8718 = vmax.xlane.f32.xlu1 %v8717_v44  ;;  %8721 = vmax.xlane.f32.xlu0 %v8720_v4  ;;  %v17362_v63 = vpop.f32.mrf.mxu1 }
 0xaec   :  { %v22645_v19 = vpop.f32.mrf.mxu1  ;;  %v22647_v21 = vpop.f32.mrf.mxu0 }
 0xaed   :  { %v8726_v18 = vsel %vm152_vm0, %v22647_v21, -inf  ;;  %v8723_v28 = vsel %vm152_vm0, %v22645_v19, -inf }
 0xaee   :  { %v17368_v59 = vpop.f32.mrf.mxu0  ;;  %8727 = vmax.xlane.f32.xlu0 %v8726_v18  ;;  %8724 = vmax.xlane.f32.xlu1 %v8723_v28  ;;  %v17363_v42 = vpop.f32.mrf.mxu1 }
 0xaf0   :  { %v22653_v2 = vpop.f32.mrf.mxu0  ;;  %v22655_v30 = vpop.f32.mrf.mxu1 }
 0xaf1   :  { %v8729_v63 = vsel %vm152_vm0, %v22653_v2, -inf  ;;  %v8732_v44 = vsel %vm152_vm0, %v22655_v30, -inf }
 0xaf2   :  { %v17369_v4 = vpop.f32.mrf.mxu0  ;;  %8730 = vmax.xlane.f32.xlu1 %v8729_v63  ;;  %8733 = vmax.xlane.f32.xlu0 %v8732_v44  ;;  %v17374_v17 = vpop.f32.mrf.mxu1 }
 0xaf4   :  { %v22661_v37 = vpop.f32.mrf.mxu1  ;;  %v22663_v59 = vpop.f32.mrf.mxu0 }
 0xaf5   :  { %v8738_v42 = vsel %vm152_vm0, %v22663_v59, -inf  ;;  %v8735_v18 = vsel %vm152_vm0, %v22661_v37, -inf }
 0xaf6   :  { %v17380_v28 = vpop.f32.mrf.mxu0  ;;  %8739 = vmax.xlane.f32.xlu0 %v8738_v42  ;;  %8736 = vmax.xlane.f32.xlu1 %v8735_v18  ;;  %v17375_v0 = vpop.f32.mrf.mxu1 }
 0xaf8   :  { %v22669_v62 = vpop.f32.mrf.mxu0  ;;  %v22671_v4 = vpop.f32.mrf.mxu1 }
 0xaf9   :  { %v8741_v17 = vsel %vm152_vm0, %v22669_v62, -inf  ;;  %v8744_v63 = vsel %vm152_vm0, %v22671_v4, -inf }
 0xafa   :  { %v17381_v44 = vpop.f32.mrf.mxu0  ;;  %8742 = vmax.xlane.f32.xlu1 %v8741_v17  ;;  %8745 = vmax.xlane.f32.xlu0 %v8744_v63  ;;  %v17386_v40 = vpop.f32.mrf.mxu1 }
 0xafc   :  { %v22677_v22 = vpop.f32.mrf.mxu1  ;;  %v22679_v28 = vpop.f32.mrf.mxu0 }
 0xafd   :  { %v8750_v0 = vsel %vm152_vm0, %v22679_v28, -inf  ;;  %v8747_v42 = vsel %vm152_vm0, %v22677_v22, -inf }
 0xafe   :  { %v17392_v18 = vpop.f32.mrf.mxu0  ;;  %8751 = vmax.xlane.f32.xlu0 %v8750_v0  ;;  %8748 = vmax.xlane.f32.xlu1 %v8747_v42  ;;  %v17387_v6 = vpop.f32.mrf.mxu1 }
 0xb00   :  { %v22685_v29 = vpop.f32.mrf.mxu0  ;;  %v22687_v44 = vpop.f32.mrf.mxu1 }
 0xb01   :  { %v8753_v40 = vsel %vm152_vm0, %v22685_v29, -inf  ;;  %v8756_v17 = vsel %vm152_vm0, %v22687_v44, -inf }
 0xb02   :  { %v17393_v63 = vpop.f32.mrf.mxu0  ;;  %8754 = vmax.xlane.f32.xlu1 %v8753_v40  ;;  %8757 = vmax.xlane.f32.xlu0 %v8756_v17  ;;  %v17398_v7 = vpop.f32.mrf.mxu1 }
 0xb04   :  { %v22693_v61 = vpop.f32.mrf.mxu1  ;;  %v22695_v18 = vpop.f32.mrf.mxu0 }
 0xb05   :  { %v8762_v6 = vsel %vm152_vm0, %v22695_v18, -inf  ;;  %v8759_v0 = vsel %vm152_vm0, %v22693_v61, -inf }
 0xb06   :  { %v17404_v42 = vpop.f32.mrf.mxu0  ;;  %8763 = vmax.xlane.f32.xlu0 %v8762_v6  ;;  %8760 = vmax.xlane.f32.xlu1 %v8759_v0  ;;  %v17399_v52 = vpop.f32.mrf.mxu1 }
 0xb08   :  { %v22701_v14 = vpop.f32.mrf.mxu0  ;;  %v22703_v63 = vpop.f32.mrf.mxu1 }
 0xb09   :  { %v8765_v7 = vsel %vm152_vm0, %v22701_v14, -inf  ;;  %v8768_v40 = vsel %vm152_vm0, %v22703_v63, -inf }
 0xb0a   :  { %v17405_v17 = vpop.f32.mrf.mxu0  ;;  %8766 = vmax.xlane.f32.xlu1 %v8765_v7  ;;  %8769 = vmax.xlane.f32.xlu0 %v8768_v40  ;;  %v17410_v51 = vpop.f32.mrf.mxu1 }
 0xb0c   :  { %v22709_v11 = vpop.f32.mrf.mxu1  ;;  %v22711_v42 = vpop.f32.mrf.mxu0 }
 0xb0d   :  { %v8774_v52 = vsel %vm152_vm0, %v22711_v42, -inf  ;;  %v8771_v6 = vsel %vm152_vm0, %v22709_v11, -inf }
 0xb0e   :  { %v17416_v0 = vpop.f32.mrf.mxu0  ;;  %8775 = vmax.xlane.f32.xlu0 %v8774_v52  ;;  %8772 = vmax.xlane.f32.xlu1 %v8771_v6  ;;  %v17411_v38 = vpop.f32.mrf.mxu1 }
 0xb10   :  { %v22717_v56 = vpop.f32.mrf.mxu0  ;;  %v22719_v17 = vpop.f32.mrf.mxu1 }
 0xb11   :  { %v8777_v51 = vsel %vm152_vm0, %v22717_v56, -inf  ;;  %v8780_v7 = vsel %vm152_vm0, %v22719_v17, -inf }
 0xb12   :  { %v17417_v40 = vpop.f32.mrf.mxu0  ;;  %8778 = vmax.xlane.f32.xlu1 %v8777_v51  ;;  %8781 = vmax.xlane.f32.xlu0 %v8780_v7  ;;  %v17422_v39 = vpop.f32.mrf.mxu1 }
 0xb14   :  { %v22725_v8 = vpop.f32.mrf.mxu1  ;;  %v22727_v0 = vpop.f32.mrf.mxu0 }
 0xb15   :  { %v8786_v38 = vsel %vm152_vm0, %v22727_v0, -inf  ;;  %v8783_v52 = vsel %vm152_vm0, %v22725_v8, -inf }
 0xb16   :  { %v17428_v6 = vpop.f32.mrf.mxu0  ;;  %8787 = vmax.xlane.f32.xlu0 %v8786_v38  ;;  %8784 = vmax.xlane.f32.xlu1 %v8783_v52  ;;  %v17423_v15 = vpop.f32.mrf.mxu1 }
 0xb18   :  { %v22733_v26 = vpop.f32.mrf.mxu0  ;;  %v22735_v40 = vpop.f32.mrf.mxu1 }
 0xb19   :  { %v8789_v39 = vsel %vm152_vm0, %v22733_v26, -inf  ;;  %v8792_v51 = vsel %vm152_vm0, %v22735_v40, -inf }
 0xb1a   :  { %v17429_v7 = vpop.f32.mrf.mxu0  ;;  %8790 = vmax.xlane.f32.xlu1 %v8789_v39  ;;  %8793 = vmax.xlane.f32.xlu0 %v8792_v51  ;;  %v17434_v35 = vpop.f32.mrf.mxu1 }
 0xb1c   :  { %v22741_v41 = vpop.f32.mrf.mxu1 }
 0xb1d   :  { %v8795_v38 = vsel %vm152_vm0, %v22741_v41, -inf }
 0xb1e   :  { %8796 = vmax.xlane.f32.xlu1 %v8795_v38  ;;  %v17435_v15 = vpop.f32.mrf.mxu1 }
 0xb67   :  { %v8704_v52 = vpop.xlane.xlu0 %8703 }
 0xb68   :  { %v8798_v6 = vsub.f32 %v22614_v13, %v8704_v52 }
 0xb6a   :  { %v8830_v31 = vmul.f32 1.442695, %v8798_v6 }
 0xb6b   :  { %v8707_v32 = vpop.xlane.xlu1 %8706  ;;  %v8710_v27 = vpop.xlane.xlu0 %8709 }
 0xb6c   :  { %18684 = vpow2.f32 %v8830_v31  ;;  %v8799_v24 = vsub.f32 %v22621_v1, %v8707_v32  ;;  %v8800_v39 = vsub.f32 %v22623_v48, %v8710_v27 }
 0xb6e   :  { %v8832_v51 = vmul.f32 1.442695, %v8799_v24  ;;  %v8834_v35 = vmul.f32 1.442695, %v8800_v39 }
 0xb6f   :  { %v8716_v7 = vpop.xlane.xlu0 %8715  ;;  %v8713_v20 = vpop.xlane.xlu1 %8712 }
 0xb70   :  { %18686 = vpow2.f32 %v8832_v51  ;;  %v8802_v54 = vsub.f32 %v22631_v34, %v8716_v7  ;;  %v8801_v38 = vsub.f32 %v22629_v57, %v8713_v20 }
 0xb71   :  { %18688 = vpow2.f32 %v8834_v35 }
 0xb72   :  { %v8838_v15 = vmul.f32 1.442695, %v8802_v54  ;;  %v8836_v13 = vmul.f32 1.442695, %v8801_v38 }
 0xb73   :  { %v8719_v52 = vpop.xlane.xlu1 %8718  ;;  %v8722_v6 = vpop.xlane.xlu0 %8721 }
 0xb74   :  { %18690 = vpow2.f32 %v8838_v15  ;;  %v8803_v31 = vsub.f32 %v22637_v5, %v8719_v52  ;;  %v8804_v32 = vsub.f32 %v22639_v33, %v8722_v6 }
 0xb75   :  { %18692 = vpow2.f32 %v8836_v13 }
 0xb76   :  { %v8840_v24 = vmul.f32 1.442695, %v8803_v31  ;;  %v8842_v27 = vmul.f32 1.442695, %v8804_v32 }
 0xb77   :  { %v8728_v1 = vpop.xlane.xlu0 %8727  ;;  %v8725_v48 = vpop.xlane.xlu1 %8724 }
 0xb78   :  { %18694 = vpow2.f32 %v8840_v24  ;;  %v8806_v34 = vsub.f32 %v22647_v21, %v8728_v1  ;;  %v8805_v20 = vsub.f32 %v22645_v19, %v8725_v48 }
 0xb79   :  { %v22754_v57 = vpop.eup %18684  ;;  %18696 = vpow2.f32 %v8842_v27 }
 0xb7a   :  { %v8846_v54 = vmul.f32 1.442695, %v8806_v34  ;;  %v8844_v39 = vmul.f32 1.442695, %v8805_v20  ;;  %v8894_v5 = vsel %vm152_vm0, %v22754_v57, 0.0 }
 0xb7b   :  { %v8731_v51 = vpop.xlane.xlu1 %8730  ;;  %v8734_v33 = vpop.xlane.xlu0 %8733  ;;  %8895 = vadd.xlane.f32.xlu0 %v8894_v5 }
 0xb7c   :  { %18698 = vpow2.f32 %v8846_v54  ;;  %v8807_v35 = vsub.f32 %v22653_v2, %v8731_v51  ;;  %v8808_v7 = vsub.f32 %v22655_v30, %v8734_v33 }
 0xb7d   :  { %v22760_v38 = vpop.eup %18686  ;;  %18700 = vpow2.f32 %v8844_v39 }
 0xb7e   :  { %v22762_v19 = vpop.eup %18688  ;;  %v8848_v21 = vmul.f32 1.442695, %v8807_v35  ;;  %v8850_v15 = vmul.f32 1.442695, %v8808_v7  ;;  %v8897_v13 = vsel %vm152_vm0, %v22760_v38, 0.0 }
 0xb7f   :  { %v8740_v52 = vpop.xlane.xlu0 %8739  ;;  %v8737_v6 = vpop.xlane.xlu1 %8736  ;;  %v8900_v31 = vsel %vm152_vm0, %v22762_v19, 0.0  ;;  %8898 = vadd.xlane.f32.xlu1 %v8897_v13 }
 0xb80   :  { %18702 = vpow2.f32 %v8848_v21  ;;  %v8810_v2 = vsub.f32 %v22663_v59, %v8740_v52  ;;  %v8809_v30 = vsub.f32 %v22661_v37, %v8737_v6  ;;  %8901 = vadd.xlane.f32.xlu0 %v8900_v31 }
 0xb81   :  { %v22770_v32 = vpop.eup %18690  ;;  %18704 = vpow2.f32 %v8850_v15 }
 0xb82   :  { %v22772_v24 = vpop.eup %18692  ;;  %v8854_v27 = vmul.f32 1.442695, %v8810_v2  ;;  %v8852_v1 = vmul.f32 1.442695, %v8809_v30  ;;  %v8906_v48 = vsel %vm152_vm0, %v22770_v32, 0.0 }
 0xb83   :  { %v8743_v34 = vpop.xlane.xlu1 %8742  ;;  %v8746_v20 = vpop.xlane.xlu0 %8745  ;;  %v8903_v54 = vsel %vm152_vm0, %v22772_v24, 0.0 }
 0xb84   :  { %18706 = vpow2.f32 %v8854_v27  ;;  %v8811_v59 = vsub.f32 %v22669_v62, %v8743_v34  ;;  %v8812_v37 = vsub.f32 %v22671_v4, %v8746_v20  ;;  %8907 = vadd.xlane.f32.xlu0 %v8906_v48  ;;  %8904 = vadd.xlane.f32.xlu1 %v8903_v54 }
 0xb85   :  { %v22780_v39 = vpop.eup %18694  ;;  %18708 = vpow2.f32 %v8852_v1 }
 0xb86   :  { %v22782_v5 = vpop.eup %18696  ;;  %v8856_v51 = vmul.f32 1.442695, %v8811_v59  ;;  %v8858_v33 = vmul.f32 1.442695, %v8812_v37  ;;  %v8909_v35 = vsel %vm152_vm0, %v22780_v39, 0.0 }
 0xb87   :  { %v8752_v7 = vpop.xlane.xlu0 %8751  ;;  %v8749_v21 = vpop.xlane.xlu1 %8748  ;;  %v8912_v15 = vsel %vm152_vm0, %v22782_v5, 0.0 }
 0xb88   :  { %18710 = vpow2.f32 %v8856_v51  ;;  %v8814_v62 = vsub.f32 %v22679_v28, %v8752_v7  ;;  %v8813_v4 = vsub.f32 %v22677_v22, %v8749_v21  ;;  %8913 = vadd.xlane.f32.xlu0 %v8912_v15  ;;  %8910 = vadd.xlane.f32.xlu1 %v8909_v35 }
 0xb89   :  { %v22790_v13 = vpop.eup %18698  ;;  %18712 = vpow2.f32 %v8858_v33 }
 0xb8a   :  { %v22792_v52 = vpop.eup %18700  ;;  %v8862_v6 = vmul.f32 1.442695, %v8814_v62  ;;  %v8860_v31 = vmul.f32 1.442695, %v8813_v4  ;;  %v8918_v2 = vsel %vm152_vm0, %v22790_v13, 0.0 }
 0xb8b   :  { %v8755_v30 = vpop.xlane.xlu1 %8754  ;;  %v8758_v27 = vpop.xlane.xlu0 %8757  ;;  %v8915_v1 = vsel %vm152_vm0, %v22792_v52, 0.0 }
 0xb8c   :  { %18714 = vpow2.f32 %v8862_v6  ;;  %v8815_v22 = vsub.f32 %v22685_v29, %v8755_v30  ;;  %v8816_v28 = vsub.f32 %v22687_v44, %v8758_v27  ;;  %8919 = vadd.xlane.f32.xlu0 %v8918_v2  ;;  %8916 = vadd.xlane.f32.xlu1 %v8915_v1 }
 0xb8d   :  { %v22800_v48 = vpop.eup %18702  ;;  %18716 = vpow2.f32 %v8860_v31 }
 0xb8e   :  { %v22802_v34 = vpop.eup %18704  ;;  %v8864_v20 = vmul.f32 1.442695, %v8815_v22  ;;  %v8866_v54 = vmul.f32 1.442695, %v8816_v28  ;;  %v8921_v59 = vsel %vm152_vm0, %v22800_v48, 0.0 }
 0xb8f   :  { %v8764_v37 = vpop.xlane.xlu0 %8763  ;;  %v8761_v51 = vpop.xlane.xlu1 %8760  ;;  %v8924_v33 = vsel %vm152_vm0, %v22802_v34, 0.0 }
 0xb90   :  { %18718 = vpow2.f32 %v8864_v20  ;;  %v8818_v29 = vsub.f32 %v22695_v18, %v8764_v37  ;;  %v8817_v44 = vsub.f32 %v22693_v61, %v8761_v51  ;;  %8925 = vadd.xlane.f32.xlu0 %v8924_v33  ;;  %8922 = vadd.xlane.f32.xlu1 %v8921_v59 }
 0xb91   :  { %v22810_v35 = vpop.eup %18706  ;;  %18720 = vpow2.f32 %v8866_v54 }
 0xb92   :  { %v22812_v7 = vpop.eup %18708  ;;  %v8870_v21 = vmul.f32 1.442695, %v8818_v29  ;;  %v8868_v15 = vmul.f32 1.442695, %v8817_v44  ;;  %v8930_v62 = vsel %vm152_vm0, %v22810_v35, 0.0 }
 0xb93   :  { %v8767_v4 = vpop.xlane.xlu1 %8766  ;;  %v8770_v6 = vpop.xlane.xlu0 %8769  ;;  %v8927_v31 = vsel %vm152_vm0, %v22812_v7, 0.0 }
 0xb94   :  { %18722 = vpow2.f32 %v8870_v21  ;;  %v8819_v61 = vsub.f32 %v22701_v14, %v8767_v4  ;;  %v8820_v18 = vsub.f32 %v22703_v63, %v8770_v6  ;;  %8931 = vadd.xlane.f32.xlu0 %v8930_v62  ;;  %8928 = vadd.xlane.f32.xlu1 %v8927_v31 }
 0xb95   :  { %v22820_v2 = vpop.eup %18710  ;;  %18724 = vpow2.f32 %v8868_v15 }
 0xb96   :  { %v22822_v30 = vpop.eup %18712  ;;  %v8872_v27 = vmul.f32 1.442695, %v8819_v61  ;;  %v8874_v1 = vmul.f32 1.442695, %v8820_v18  ;;  %v8933_v22 = vsel %vm152_vm0, %v22820_v2, 0.0 }
 0xb97   :  { %v8776_v28 = vpop.xlane.xlu0 %8775  ;;  %v8773_v20 = vpop.xlane.xlu1 %8772  ;;  %v8936_v54 = vsel %vm152_vm0, %v22822_v30, 0.0 }
 0xb98   :  { %18726 = vpow2.f32 %v8872_v27  ;;  %v8822_v14 = vsub.f32 %v22711_v42, %v8776_v28  ;;  %v8821_v63 = vsub.f32 %v22709_v11, %v8773_v20  ;;  %8937 = vadd.xlane.f32.xlu0 %v8936_v54  ;;  %8934 = vadd.xlane.f32.xlu1 %v8933_v22 }
 0xb99   :  { %v22830_v59 = vpop.eup %18714  ;;  %18728 = vpow2.f32 %v8874_v1 }
 0xb9a   :  { %v22832_v37 = vpop.eup %18716  ;;  %v8878_v51 = vmul.f32 1.442695, %v8822_v14  ;;  %v8876_v33 = vmul.f32 1.442695, %v8821_v63  ;;  %v8942_v29 = vsel %vm152_vm0, %v22830_v59, 0.0 }
 0xb9b   :  { %v8779_v44 = vpop.xlane.xlu1 %8778  ;;  %v8782_v21 = vpop.xlane.xlu0 %8781  ;;  %v8939_v15 = vsel %vm152_vm0, %v22832_v37, 0.0 }
 0xb9c   :  { %18730 = vpow2.f32 %v8878_v51  ;;  %v8823_v11 = vsub.f32 %v22717_v56, %v8779_v44  ;;  %v8824_v42 = vsub.f32 %v22719_v17, %v8782_v21  ;;  %8943 = vadd.xlane.f32.xlu0 %v8942_v29  ;;  %8940 = vadd.xlane.f32.xlu1 %v8939_v15 }
 0xb9d   :  { %v22840_v62 = vpop.eup %18718  ;;  %18732 = vpow2.f32 %v8876_v33 }
 0xb9e   :  { %v22842_v4 = vpop.eup %18720  ;;  %v8880_v6 = vmul.f32 1.442695, %v8823_v11  ;;  %v8882_v31 = vmul.f32 1.442695, %v8824_v42  ;;  %v8945_v61 = vsel %vm152_vm0, %v22840_v62, 0.0 }
 0xb9f   :  { %v8788_v18 = vpop.xlane.xlu0 %8787  ;;  %v8785_v27 = vpop.xlane.xlu1 %8784  ;;  %v8948_v1 = vsel %vm152_vm0, %v22842_v4, 0.0 }
 0xba0   :  { %18734 = vpow2.f32 %v8880_v6  ;;  %v8826_v56 = vsub.f32 %v22727_v0, %v8788_v18  ;;  %v8825_v17 = vsub.f32 %v22725_v8, %v8785_v27  ;;  %8949 = vadd.xlane.f32.xlu0 %v8948_v1  ;;  %8946 = vadd.xlane.f32.xlu1 %v8945_v61 }
 0xba1   :  { %v22850_v22 = vpop.eup %18722  ;;  %18736 = vpow2.f32 %v8882_v31 }
 0xba2   :  { %v22852_v28 = vpop.eup %18724  ;;  %v8886_v20 = vmul.f32 1.442695, %v8826_v56  ;;  %v8884_v54 = vmul.f32 1.442695, %v8825_v17  ;;  %v8954_v14 = vsel %vm152_vm0, %v22850_v22, 0.0 }
 0xba3   :  { %v8791_v63 = vpop.xlane.xlu1 %8790  ;;  %v8794_v51 = vpop.xlane.xlu0 %8793  ;;  %v8951_v33 = vsel %vm152_vm0, %v22852_v28, 0.0 }
 0xba4   :  { %18738 = vpow2.f32 %v8886_v20  ;;  %v8827_v8 = vsub.f32 %v22733_v26, %v8791_v63  ;;  %8955 = vadd.xlane.f32.xlu0 %v8954_v14  ;;  %v8828_v0 = vsub.f32 %v22735_v40, %v8794_v51  ;;  %8952 = vadd.xlane.f32.xlu1 %v8951_v33 }
 0xba5   :  { %v22860_v29 = vpop.eup %18726  ;;  %18740 = vpow2.f32 %v8884_v54 }
 0xba6   :  { %v22862_v44 = vpop.eup %18728  ;;  %v8888_v21 = vmul.f32 1.442695, %v8827_v8  ;;  %v8890_v15 = vmul.f32 1.442695, %v8828_v0  ;;  %v8957_v11 = vsel %vm152_vm0, %v22860_v29, 0.0 }
 0xba7   :  { %v8960_v42 = vsel %vm152_vm0, %v22862_v44, 0.0  ;;  %v8797_v6 = vpop.xlane.xlu1 %8796 }
 0xba8   :  { %18742 = vpow2.f32 %v8888_v21  ;;  %8961 = vadd.xlane.f32.xlu0 %v8960_v42  ;;  %8958 = vadd.xlane.f32.xlu1 %v8957_v11  ;;  %v8829_v26 = vsub.f32 %v22741_v41, %v8797_v6 }
 0xba9   :  { %v22869_v40 = vpop.eup %18730  ;;  %18744 = vpow2.f32 %v8890_v15 }
 0xbaa   :  { %v22871_v31 = vpop.eup %18732  ;;  %v8892_v61 = vmul.f32 1.442695, %v8829_v26  ;;  %v8966_v18 = vsel %vm152_vm0, %v22869_v40, 0.0 }
 0xbab   :  { %v8963_v27 = vsel %vm152_vm0, %v22871_v31, 0.0 }
 0xbac   :  { %18746 = vpow2.f32 %v8892_v61  ;;  %8967 = vadd.xlane.f32.xlu0 %v8966_v18  ;;  %8964 = vadd.xlane.f32.xlu1 %v8963_v27 }
 0xbad   :  { %v22877_v1 = vpop.eup %18734 }
 0xbae   :  { %v22879_v56 = vpop.eup %18736  ;;  %v8969_v41 = vsel %vm152_vm0, %v22877_v1, 0.0 }
 0xbaf   :  { %v8972_v17 = vsel %vm152_vm0, %v22879_v56, 0.0 }
 0xbb0   :  { %8973 = vadd.xlane.f32.xlu0 %v8972_v17  ;;  %8970 = vadd.xlane.f32.xlu1 %v8969_v41 }
 0xbb1   :  { %v22885_v20 = vpop.eup %18738 }
 0xbb2   :  { %v22887_v54 = vpop.eup %18740  ;;  %v8978_v14 = vsel %vm152_vm0, %v22885_v20, 0.0 }
 0xbb3   :  { %v8975_v63 = vsel %vm152_vm0, %v22887_v54, 0.0 }
 0xbb4   :  { %8979 = vadd.xlane.f32.xlu0 %v8978_v14  ;;  %8976 = vadd.xlane.f32.xlu1 %v8975_v63 }
 0xbb5   :  { %v22893_v51 = vpop.eup %18742 }
 0xbb6   :  { %v22895_v33 = vpop.eup %18744  ;;  %v8981_v8 = vsel %vm152_vm0, %v22893_v51, 0.0 }
 0xbb7   :  { %v8984_v0 = vsel %vm152_vm0, %v22895_v33, 0.0 }
 0xbb8   :  { %8985 = vadd.xlane.f32.xlu0 %v8984_v0  ;;  %8982 = vadd.xlane.f32.xlu1 %v8981_v8 }
 0xbb9   :  { %v22901_v21 = vpop.eup %18746 }
 0xbba   :  { %v8987_v15 = vsel %vm152_vm0, %v22901_v21, 0.0 }
 0xbbc   :  { %8988 = vadd.xlane.f32.xlu1 %v8987_v15 }
 0xc04   :  { %v8896_v11 = vpop.xlane.xlu0 %8895 }
 0xc05   :  { %18748 = vrcp.f32 %v8896_v11 }
 0xc08   :  { %v8899_v42 = vpop.xlane.xlu1 %8898 }
 0xc09   :  { %v8902_v6 = vpop.xlane.xlu0 %8901  ;;  %18750 = vrcp.f32 %v8899_v42 }
 0xc0a   :  { %18752 = vrcp.f32 %v8902_v6 }
 0xc0d   :  { %v8908_v26 = vpop.xlane.xlu0 %8907  ;;  %v8905_v61 = vpop.xlane.xlu1 %8904 }
 0xc0e   :  { %18754 = vrcp.f32 %v8905_v61 }
 0xc0f   :  { %18756 = vrcp.f32 %v8908_v26  ;;  %v9072_v26 = vsel %vm22401_vm10, %v19819_v49, 0 }
 0xc11   :  { %v8914_v18 = vpop.xlane.xlu0 %8913  ;;  %v8911_v27 = vpop.xlane.xlu1 %8910 }
 0xc12   :  { %18758 = vrcp.f32 %v8911_v27  ;;  %v18749_v41 = vpop.eup %18748 }
 0xc13   :  { %18760 = vrcp.f32 %v8914_v18  ;;  %v8991_v8 = vmul.f32 %v18749_v41, %v22754_v57 }
 0xc15   :  { %v8920_v17 = vpop.xlane.xlu0 %8919  ;;  %v8917_v14 = vpop.xlane.xlu1 %8916 }
 0xc16   :  { %v18751_v63 = vpop.eup %18750  ;;  %18762 = vrcp.f32 %v8917_v14 }
 0xc17   :  { %v8993_v0 = vmul.f32 %v18751_v63, %v22760_v38  ;;  %18764 = vrcp.f32 %v8920_v17  ;;  %v18753_v6 = vpop.eup %18752 }
 0xc18   :  { %v8995_v57 = vmul.f32 %v18753_v6, %v22762_v19  ;;  %v9073_v19 = vsel %vm22401_vm10, %v19808_v55, 0  ;;  %v9074_v6 = vsel %vm22401_vm10, %v19876_v16, 0 }
 0xc19   :  { %v8926_v15 = vpop.xlane.xlu0 %8925  ;;  %v8923_v11 = vpop.xlane.xlu1 %8922  ;;  %v9054_v42 = vpack.c.bf16 %v8993_v0, %v8991_v8 }
 0xc1a   :  { %18766 = vrcp.f32 %v8923_v11 }
 0xc1b   :  { %17439 = vmatmul.mubr.msk.bf16.vlgmr.msra.gmra.mxu0 %vm152_vm0, %v9054_v42  ;;  %v18755_v61 = vpop.eup %18754  ;;  %18768 = vrcp.f32 %v8926_v15 }
 0xc1c   :  { %17449 = vmatpush3.bf16.msra.mxu0 %v9072_v26  ;;  %17450 = vmatprep.mubr.msk.bf16.mxu0 %vm19197_vm1, %v25492_v50  ;;  %v8997_v38 = vmul.f32 %v18755_v61, %v22772_v24  ;;  %v18757_v41 = vpop.eup %18756 }
 0xc1d   :  { %v8932_v18 = vpop.xlane.xlu0 %8931  ;;  %v8929_v27 = vpop.xlane.xlu1 %8928  ;;  %17460 = vmatprep.subr.bf16.mxu0 %v25492_v50  ;;  %v8999_v63 = vmul.f32 %v18757_v41, %v22770_v32 }
 0xc1e   :  { %18770 = vrcp.f32 %v8929_v27  ;;  %v9055_v17 = vpack.c.bf16 %v8997_v38, %v8995_v57  ;;  %v9075_v27 = vsel %vm22401_vm10, %v19860_v36, 0 }
 0xc1f   :  { %v18759_v14 = vpop.eup %18758  ;;  %18772 = vrcp.f32 %v8932_v18 }
 0xc20   :  { %v9001_v8 = vmul.f32 %v18759_v14, %v22780_v39  ;;  %17445 = vmatmul.mubr.msk.bf16.vlgmr.msra.gmra.mxu1 %vm152_vm0, %v9055_v17  ;;  %v18761_v15 = vpop.eup %18760 }
 0xc21   :  { %v8938_v24 = vpop.xlane.xlu0 %8937  ;;  %v8935_v0 = vpop.xlane.xlu1 %8934  ;;  %17455 = vmatpush3.bf16.msra.mxu1 %v9073_v19  ;;  %17456 = vmatprep.mubr.msk.bf16.mxu1 %vm19197_vm1, %v25492_v50  ;;  %v9003_v39 = vmul.f32 %v18761_v15, %v22782_v5  ;;  %v9076_v19 = vsel %vm22401_vm10, %v19905_v12, 0 }
 0xc22   :  { %18774 = vrcp.f32 %v8935_v0  ;;  %v9056_v11 = vpack.c.bf16 %v9001_v8, %v8999_v63  ;;  %17466 = vmatprep.subr.bf16.mxu1 %v25492_v50 }
 0xc23   :  { %v18763_v32 = vpop.eup %18762  ;;  %18776 = vrcp.f32 %v8938_v24 }
 0xc24   :  { %v9005_v42 = vmul.f32 %v18763_v32, %v22792_v52  ;;  %17451 = vmatmul.mubr.msk.bf16.vlgmr.msra.gmra.mxu0 %vm152_vm0, %v9056_v11  ;;  %v18765_v57 = vpop.eup %18764 }
 0xc25   :  { %v8944_v26 = vpop.xlane.xlu0 %8943  ;;  %v8941_v61 = vpop.xlane.xlu1 %8940  ;;  %17461 = vmatpush3.bf16.msra.mxu0 %v9074_v6  ;;  %17462 = vmatprep.mubr.msk.bf16.mxu0 %vm19197_vm1, %v25492_v50  ;;  %v9007_v52 = vmul.f32 %v18765_v57, %v22790_v13 }
 0xc26   :  { %18778 = vrcp.f32 %v8941_v61  ;;  %v9057_v38 = vpack.c.bf16 %v9005_v42, %v9003_v39  ;;  %17472 = vmatprep.subr.bf16.mxu0 %v25492_v50  ;;  %v9077_v39 = vsel %vm22401_vm10, %v19896_v23, 0 }
 0xc27   :  { %v18767_v5 = vpop.eup %18766  ;;  %18780 = vrcp.f32 %v8944_v26 }
 0xc28   :  { %v9009_v18 = vmul.f32 %v18767_v5, %v22800_v48  ;;  %17457 = vmatmul.mubr.msk.bf16.vlgmr.msra.gmra.mxu1 %vm152_vm0, %v9057_v38  ;;  %v18769_v14 = vpop.eup %18768  ;;  %v9078_v38 = vsel %vm22401_vm10, %v19934_v58, 0 }
 0xc29   :  { %v8950_v41 = vpop.xlane.xlu0 %8949  ;;  %v8947_v17 = vpop.xlane.xlu1 %8946  ;;  %17467 = vmatpush3.bf16.msra.mxu1 %v9075_v27  ;;  %17468 = vmatprep.mubr.msk.bf16.mxu1 %vm19197_vm1, %v25492_v50  ;;  %v9011_v48 = vmul.f32 %v18769_v14, %v22802_v34 }
 0xc2a   :  { %18782 = vrcp.f32 %v8947_v17  ;;  %v9058_v63 = vpack.c.bf16 %v9009_v18, %v9007_v52  ;;  %17478 = vmatprep.subr.bf16.mxu1 %v25492_v50  ;;  %v9079_v17 = vsel %vm22401_vm10, %v19925_v9, 0 }
 0xc2b   :  { %v18771_v13 = vpop.eup %18770  ;;  %18784 = vrcp.f32 %v8950_v41 }
 0xc2c   :  { %v9013_v8 = vmul.f32 %v18771_v13, %v22812_v7  ;;  %17463 = vmatmul.mubr.msk.bf16.vlgmr.msra.gmra.mxu0 %vm152_vm0, %v9058_v63  ;;  %v18773_v15 = vpop.eup %18772 }
 0xc2d   :  { %v8956_v24 = vpop.xlane.xlu0 %8955  ;;  %v8953_v0 = vpop.xlane.xlu1 %8952  ;;  %17473 = vmatpush3.bf16.msra.mxu0 %v9076_v19  ;;  %17474 = vmatprep.mubr.msk.bf16.mxu0 %vm19197_vm1, %v25492_v50  ;;  %v9015_v7 = vmul.f32 %v18773_v15, %v22810_v35  ;;  %v9080_v19 = vsel %vm22401_vm10, %v19963_v43, 0 }
 0xc2e   :  { %18786 = vrcp.f32 %v8953_v0  ;;  %v9059_v11 = vpack.c.bf16 %v9013_v8, %v9011_v48  ;;  %17484 = vmatprep.subr.bf16.mxu0 %v25492_v50 }
 0xc2f   :  { %v18775_v34 = vpop.eup %18774  ;;  %18788 = vrcp.f32 %v8956_v24 }
 0xc30   :  { %v9017_v32 = vmul.f32 %v18775_v34, %v22820_v2  ;;  %17469 = vmatmul.mubr.msk.bf16.vlgmr.msra.gmra.mxu1 %vm152_vm0, %v9059_v11  ;;  %v18777_v26 = vpop.eup %18776 }
 0xc31   :  { %v8962_v42 = vpop.xlane.xlu0 %8961  ;;  %v8959_v6 = vpop.xlane.xlu1 %8958  ;;  %17479 = vmatpush3.bf16.msra.mxu1 %v9077_v39  ;;  %17480 = vmatprep.mubr.msk.bf16.mxu1 %vm19197_vm1, %v25492_v50  ;;  %v9019_v2 = vmul.f32 %v18777_v26, %v22822_v30 }
 0xc32   :  { %18790 = vrcp.f32 %v8959_v6  ;;  %v9060_v61 = vpack.c.bf16 %v9017_v32, %v9015_v7  ;;  %17490 = vmatprep.subr.bf16.mxu1 %v25492_v50  ;;  %v9081_v7 = vsel %vm22401_vm10, %v19954_v45, 0 }
 0xc33   :  { %v18779_v35 = vpop.eup %18778  ;;  %18792 = vrcp.f32 %v8962_v42 }
 0xc34   :  { %v9021_v57 = vmul.f32 %v18779_v35, %v22832_v37  ;;  %17475 = vmatmul.mubr.msk.bf16.vlgmr.msra.gmra.mxu0 %vm152_vm0, %v9060_v61  ;;  %v18781_v18 = vpop.eup %18780  ;;  %v9082_v61 = vsel %vm22401_vm10, %v19984_v53, 0 }
 0xc35   :  { %v8968_v5 = vpop.xlane.xlu0 %8967  ;;  %v8965_v52 = vpop.xlane.xlu1 %8964  ;;  %17485 = vmatpush3.bf16.msra.mxu0 %v9078_v38  ;;  %17486 = vmatprep.mubr.msk.bf16.mxu0 %vm19197_vm1, %v25492_v50  ;;  %v9023_v37 = vmul.f32 %v18781_v18, %v22830_v59 }
 0xc36   :  { %18794 = vrcp.f32 %v8965_v52  ;;  %v9061_v27 = vpack.c.bf16 %v9021_v57, %v9019_v2  ;;  %17496 = vmatprep.subr.bf16.mxu0 %v25492_v50 }
 0xc37   :  { %v18783_v30 = vpop.eup %18782  ;;  %18796 = vrcp.f32 %v8968_v5  ;;  %v9083_v5 = vsel %vm22401_vm10, %v19978_v10, 0 }
 0xc38   :  { %v9025_v41 = vmul.f32 %v18783_v30, %v22840_v62  ;;  %17481 = vmatmul.mubr.msk.bf16.vlgmr.msra.gmra.mxu1 %vm152_vm0, %v9061_v27  ;;  %v18785_v13 = vpop.eup %18784  ;;  %v9084_v30 = vsel %vm22401_vm10, %v19995_v47, 0 }
 0xc39   :  { %v8974_v14 = vpop.xlane.xlu0 %8973  ;;  %v8971_v63 = vpop.xlane.xlu1 %8970  ;;  %17491 = vmatpush3.bf16.msra.mxu1 %v9079_v17  ;;  %17492 = vmatprep.mubr.msk.bf16.mxu1 %vm19197_vm1, %v25492_v50  ;;  %v9027_v62 = vmul.f32 %v18785_v13, %v22842_v4  ;;  %v9085_v13 = vsel %vm22401_vm10, %v19992_v60, 0  ;;  %vm13435_vm10 = vmpackc.low %vm24336_vm9, %vm24336_vm9 }
 0xc3a   :  { %18798 = vrcp.f32 %v8971_v63  ;;  %v9062_v48 = vpack.c.bf16 %v9025_v41, %v9023_v37  ;;  %17502 = vmatprep.subr.bf16.mxu1 %v25492_v50 }
 0xc3b   :  { %v18787_v59 = vpop.eup %18786  ;;  %18800 = vrcp.f32 %v8974_v14 }
 0xc3c   :  { %v9029_v8 = vmul.f32 %v18787_v59, %v22852_v28  ;;  %17487 = vmatmul.mubr.msk.bf16.vlgmr.msra.gmra.mxu0 %vm152_vm0, %v9062_v48  ;;  %v18789_v15 = vpop.eup %18788 }
 0xc3d   :  { %v8980_v24 = vpop.xlane.xlu0 %8979  ;;  %v8977_v0 = vpop.xlane.xlu1 %8976  ;;  %17497 = vmatpush3.bf16.msra.mxu0 %v9080_v19  ;;  %17498 = vmatprep.mubr.msk.bf16.mxu0 %vm19197_vm1, %v25492_v50  ;;  %v9031_v28 = vmul.f32 %v18789_v15, %v22850_v22  ;;  %v25944_v19 = vld [vmem:[#allocation10_spill] sm:$0xff]  ;;  %v25949_v15 = vld [vmem:[#allocation19_spill] sm:$0xff] }
 0xc3e   :  { %18802 = vrcp.f32 %v8977_v0  ;;  %v9063_v11 = vpack.c.bf16 %v9029_v8, %v9027_v62  ;;  %17508 = vmatprep.subr.bf16.mxu0 %v25492_v50  ;;  %v25943_v62 = vld [vmem:[#allocation11_spill] sm:$0xff] }
 0xc3f   :  { %v18791_v4 = vpop.eup %18790  ;;  %18804 = vrcp.f32 %v8980_v24  ;;  %v9832_v24 = vrot.slane %v9828_v46, %v25944_v19  ;;  %v25945_v0 = vld [vmem:[#allocation15_spill] sm:$0xff] }
 0xc40   :  { %v9033_v34 = vmul.f32 %v18791_v4, %v22860_v29  ;;  %17493 = vmatmul.mubr.msk.bf16.vlgmr.msra.gmra.mxu1 %vm152_vm0, %v9063_v11  ;;  %v18793_v42 = vpop.eup %18792  ;;  %v25950_v11 = vld [vmem:[#allocation18_spill] sm:$0xff]  ;;  %v25951_v4 = vld [vmem:[#allocation23_spill] sm:$0xff] }
 0xc41   :  { %v8986_v32 = vpop.xlane.xlu0 %8985  ;;  %v8983_v39 = vpop.xlane.xlu1 %8982  ;;  %17503 = vmatpush3.bf16.msra.mxu1 %v9081_v7  ;;  %17504 = vmatprep.mubr.msk.bf16.mxu1 %vm19197_vm1, %v25492_v50  ;;  %v9035_v29 = vmul.f32 %v18793_v42, %v22862_v44  ;;  %vm23056_vm15 = vcmp.ne.s16.totalorder %v9832_v24, 0  ;;  %v25954_v7 = vld [vmem:[#allocation26_spill] sm:$0xff]  ;;  %v25957_v42 = vld [vmem:[#allocation43_spill] sm:$0xff] }
 0xc42   :  { %18806 = vrcp.f32 %v8983_v39  ;;  %v9064_v6 = vpack.c.bf16 %v9033_v34, %v9031_v28  ;;  %17514 = vmatprep.subr.bf16.mxu1 %v25492_v50  ;;  %v25952_v28 = vld [vmem:[#allocation22_spill] sm:$0xff]  ;;  %v25953_v34 = vld [vmem:[#allocation27_spill] sm:$0xff] }
 0xc43   :  { %v18795_v22 = vpop.eup %18794  ;;  %18808 = vrcp.f32 %v8986_v32  ;;  %v25955_v32 = vld [vmem:[#allocation35_spill] sm:$0xff]  ;;  %v25956_v39 = vld [vmem:[#allocation34_spill] sm:$0xff] }
 0xc44   :  { %v9037_v26 = vmul.f32 %v18795_v22, %v22871_v31  ;;  %17499 = vmatmul.mubr.msk.bf16.vlgmr.msra.gmra.mxu0 %vm152_vm0, %v9064_v6  ;;  %v18797_v2 = vpop.eup %18796  ;;  %v25958_v6 = vld [vmem:[#allocation42_spill] sm:$0xff]  ;;  %v25959_v22 = vld [vmem:[#allocation51_spill] sm:$0xff] }
 0xc45   :  { %v8989_v35 = vpop.xlane.xlu1 %8988  ;;  %17509 = vmatpush3.bf16.msra.mxu0 %v9082_v61  ;;  %17510 = vmatprep.mubr.msk.bf16.mxu0 %vm19197_vm1, %v25492_v50  ;;  %v9039_v44 = vmul.f32 %v18797_v2, %v22869_v40  ;;  %v25962_v61 = vld [vmem:[#allocation57_spill] sm:$0xff] }
 0xc46   :  { %18810 = vrcp.f32 %v8989_v35  ;;  %v9065_v57 = vpack.c.bf16 %v9037_v26, %v9035_v29  ;;  %17520 = vmatprep.subr.bf16.mxu0 %v25492_v50  ;;  %v25960_v29 = vld [vmem:[#allocation49_spill] sm:$0xff]  ;;  %v25961_v26 = vld [vmem:[#allocation28_spill] sm:$0xff]  ;;  %v25963_v35 = vld [vmem:[#allocation59_spill] sm:$0xff] }
 0xc47   :  { %v18799_v38 = vpop.eup %18798  ;;  %v25964_v2 = vld [vmem:[#allocation33_spill] sm:$0xff] }
 0xc48   :  { %v9041_v31 = vmul.f32 %v18799_v38, %v22877_v1  ;;  %17505 = vmatmul.mubr.msk.bf16.vlgmr.msra.gmra.mxu1 %vm152_vm0, %v9065_v57  ;;  %v18801_v52 = vpop.eup %18800  ;;  %v25965_v57 = vld [vmem:[#allocation36_spill] sm:$0xff]  ;;  %v25966_v38 = vld [vmem:[#allocation61_spill] sm:$0xff] }
 0xc49   :  { %17515 = vmatpush3.bf16.msra.mxu1 %v9083_v5  ;;  %17516 = vmatprep.mubr.msk.bf16.mxu1 %vm19197_vm1, %v25492_v50  ;;  %v9043_v40 = vmul.f32 %v18801_v52, %v22879_v56  ;;  %v25969_v5 = vld [vmem:[#allocation44_spill] sm:$0xff]  ;;  %v25970_v52 = vld [vmem:[#allocation63_spill] sm:$0xff] }
 0xc4a   :  { %v9066_v18 = vpack.c.bf16 %v9041_v31, %v9039_v44  ;;  %17526 = vmatprep.subr.bf16.mxu1 %v25492_v50  ;;  %v25967_v44 = vld [vmem:[#allocation62_spill] sm:$0xff]  ;;  %v25968_v31 = vld [vmem:[#allocation41_spill] sm:$0xff] }
 0xc4b   :  { %v18803_v27 = vpop.eup %18802 }
 0xc4c   :  { %v9045_v1 = vmul.f32 %v18803_v27, %v22887_v54  ;;  %17511 = vmatmul.mubr.msk.bf16.vlgmr.msra.gmra.mxu0 %vm152_vm0, %v9066_v18  ;;  %v18805_v37 = vpop.eup %18804  ;;  %v25971_v18 = vld [vmem:[#allocation64_spill] sm:$0xff]  ;;  %v25972_v27 = vld [vmem:[#allocation50_spill] sm:$0xff] }
 0xc4d   :  { %17521 = vmatpush3.bf16.msra.mxu0 %v9084_v30  ;;  %17522 = vmatprep.mubr.msk.bf16.mxu0 %vm19197_vm1, %v25492_v50  ;;  %v9047_v14 = vmul.f32 %v18805_v37, %v22885_v20  ;;  %v25975_v30 = vld [vmem:[#allocation66_spill] sm:$0xff] }
 0xc4e   :  { %v9067_v41 = vpack.c.bf16 %v9045_v1, %v9043_v40  ;;  %17532 = vmatprep.subr.bf16.mxu0 %v25492_v50  ;;  %v25973_v40 = vld [vmem:[#allocation52_spill] sm:$0xff]  ;;  %v25974_v1 = vld [vmem:[#allocation65_spill] sm:$0xff]  ;;  %v25976_v37 = vld [vmem:[#allocation58_spill] sm:$0xff] }
 0xc4f   :  { %v18807_v56 = vpop.eup %18806 }
 0xc50   :  { %v18809_v54 = vpop.eup %18808  ;;  %v9049_v63 = vmul.f32 %v18807_v56, %v22893_v51  ;;  %17517 = vmatmul.mubr.msk.bf16.vlgmr.msra.gmra.mxu1 %vm152_vm0, %v9067_v41  ;;  %v25977_v41 = vld [vmem:[#allocation60_spill] sm:$0xff] }
 0xc51   :  { %17527 = vmatpush3.bf16.msra.mxu1 %v9085_v13  ;;  %17528 = vmatprep.mubr.msk.bf16.mxu1 %vm19197_vm1, %v25492_v50  ;;  %v9051_v20 = vmul.f32 %v18809_v54, %v22895_v33  ;;  %v10874_v17 = vsel %vm23056_vm15, %v25977_v41, 0  ;;  %v25978_v56 = vld [vmem:[#allocation68_spill] sm:$0xff]  ;;  %v25979_v54 = vld [vmem:[#allocation67_spill] sm:$0xff]  ;;  %v11632_v33 = vsel %vm11631_vm5, 65537, %v25532_v25 }
 0xc52   :  { %v9068_v59 = vpack.c.bf16 %v9049_v63, %v9047_v14  ;;  %17538 = vmatprep.subr.bf16.mxu1 %v25492_v50  ;;  %v10875_v14 = vsel %vm23056_vm15, %v25979_v54, 0  ;;  %v25980_v13 = vld [vmem:[#allocation12_spill] sm:$0xff] }
 0xc53   :  { %v18811_v48 = vpop.eup %18810 }
 0xc54   :  { %v9053_v51 = vmul.f32 %v18811_v48, %v22901_v21  ;;  %17523 = vmatmul.mubr.msk.bf16.vlgmr.msra.gmra.mxu0 %vm152_vm0, %v9068_v59  ;;  %v25948_v21 = vld [vmem:[#allocation14_spill] sm:$0xff] }
 0xc55   :  { %17533 = vmatpush3.bf16.xpose.msra.mxu0 %v25943_v62  ;;  %17534 = vmatprep.mubr.msk.bf16.mxu0 %vm19197_vm1, %v25492_v50 }
 0xc56   :  { %v9069_v8 = vpack.c.bf16 %v9053_v51, %v9051_v20  ;;  %17544 = vmatprep.subr.bf16.mxu0 %v25492_v50  ;;  %v25982_v51 = vld [vmem:[#allocation69_spill] sm:$0xff] }
 0xc58   :  { %17529 = vmatmul.mubr.msk.bf16.vlgmr.msra.gmra.mxu1 %vm152_vm0, %v9069_v8 }
 0xc59   :  { %17539 = vmatpush3.bf16.xpose.msra.mxu1 %v25945_v0  ;;  %17540 = vmatprep.mubr.msk.bf16.mxu1 %vm19197_vm1, %v25492_v50 }
 0xc5a   :  { %17550 = vmatprep.subr.bf16.mxu1 %v25492_v50 }
 0xc5c   :  { %17535 = vmatmul.mubr.msk.bf16.vlgmr.msra.gmra.mxu0 %vm23056_vm15, %v25948_v21 }
 0xc5d   :  { %17545 = vmatpush3.bf16.xpose.msra.mxu0 %v25949_v15  ;;  %17546 = vmatprep.mubr.msk.bf16.mxu0 %vm19197_vm1, %v25492_v50 }
 0xc5e   :  { %17556 = vmatprep.subr.bf16.mxu0 %v25492_v50 }
 0xc60   :  { %17541 = vmatmul.mubr.msk.bf16.vlgmr.msra.gmra.mxu1 %vm23056_vm15, %v25950_v11 }
 0xc61   :  { %17551 = vmatpush3.bf16.xpose.msra.mxu1 %v25951_v4  ;;  %17552 = vmatprep.mubr.msk.bf16.mxu1 %vm19197_vm1, %v25492_v50 }
 0xc62   :  { %17562 = vmatprep.subr.bf16.mxu1 %v25492_v50 }
 0xc64   :  { %17547 = vmatmul.mubr.msk.bf16.vlgmr.msra.gmra.mxu0 %vm23056_vm15, %v25952_v28 }
 0xc65   :  { %17557 = vmatpush3.bf16.xpose.msra.mxu0 %v25953_v34  ;;  %17558 = vmatprep.mubr.msk.bf16.mxu0 %vm19197_vm1, %v25492_v50 }
 0xc66   :  { %17568 = vmatprep.subr.bf16.mxu0 %v25492_v50 }
 0xc68   :  { %17553 = vmatmul.mubr.msk.bf16.vlgmr.msra.gmra.mxu1 %vm23056_vm15, %v25954_v7 }
 0xc69   :  { %17563 = vmatpush3.bf16.xpose.msra.mxu1 %v25955_v32  ;;  %17564 = vmatprep.mubr.msk.bf16.mxu1 %vm19197_vm1, %v25492_v50 }
 0xc6a   :  { %17574 = vmatprep.subr.bf16.mxu1 %v25492_v50 }
 0xc6c   :  { %17559 = vmatmul.mubr.msk.bf16.vlgmr.msra.gmra.mxu0 %vm23056_vm15, %v25956_v39 }
 0xc6d   :  { %17569 = vmatpush3.bf16.xpose.msra.mxu0 %v25957_v42  ;;  %17570 = vmatprep.mubr.msk.bf16.mxu0 %vm19197_vm1, %v25492_v50 }
 0xc6e   :  { %17580 = vmatprep.subr.bf16.mxu0 %v25492_v50 }
 0xc70   :  { %17565 = vmatmul.mubr.msk.bf16.vlgmr.msra.gmra.mxu1 %vm23056_vm15, %v25958_v6 }
 0xc71   :  { %17575 = vmatpush3.bf16.xpose.msra.mxu1 %v25959_v22  ;;  %17576 = vmatprep.mubr.msk.bf16.mxu1 %vm19197_vm1, %v25492_v50 }
 0xc72   :  { %17586 = vmatprep.subr.bf16.mxu1 %v25492_v50 }
 0xc74   :  { %17571 = vmatmul.mubr.msk.bf16.vlgmr.msra.gmra.mxu0 %vm23056_vm15, %v25960_v29 }
 0xc75   :  { %17581 = vmatpush3.bf16.xpose.msra.mxu0 %v25961_v26  ;;  %17582 = vmatprep.mubr.msk.bf16.mxu0 %vm19197_vm1, %v25492_v50 }
 0xc76   :  { %17592 = vmatprep.subr.bf16.mxu0 %v25492_v50 }
 0xc78   :  { %17577 = vmatmul.mubr.msk.bf16.vlgmr.msra.gmra.mxu1 %vm23056_vm15, %v25962_v61 }
 0xc79   :  { %17587 = vmatpush3.bf16.xpose.msra.mxu1 %v25963_v35  ;;  %17588 = vmatprep.mubr.msk.bf16.mxu1 %vm19197_vm1, %v25492_v50 }
 0xc7a   :  { %17598 = vmatprep.subr.bf16.mxu1 %v25492_v50 }
 0xc7c   :  { %17583 = vmatmul.mubr.msk.bf16.vlgmr.msra.gmra.mxu0 %vm23056_vm15, %v25964_v2 }
 0xc7d   :  { %17593 = vmatpush3.bf16.xpose.msra.mxu0 %v25965_v57  ;;  %17594 = vmatprep.mubr.msk.bf16.mxu0 %vm19197_vm1, %v25492_v50 }
 0xc7e   :  { %17604 = vmatprep.subr.bf16.mxu0 %v25492_v50 }
 0xc80   :  { %17589 = vmatmul.mubr.msk.bf16.vlgmr.msra.gmra.mxu1 %vm23056_vm15, %v25966_v38 }
 0xc81   :  { %17599 = vmatpush3.bf16.xpose.msra.mxu1 %v25967_v44  ;;  %17600 = vmatprep.mubr.msk.bf16.mxu1 %vm19197_vm1, %v25492_v50 }
 0xc82   :  { %17610 = vmatprep.subr.bf16.mxu1 %v25492_v50 }
 0xc84   :  { %17595 = vmatmul.mubr.msk.bf16.vlgmr.msra.gmra.mxu0 %vm23056_vm15, %v25968_v31 }
 0xc85   :  { %17605 = vmatpush3.bf16.xpose.msra.mxu0 %v25969_v5  ;;  %17606 = vmatprep.mubr.msk.bf16.mxu0 %vm19197_vm1, %v25492_v50 }
 0xc86   :  { %17616 = vmatprep.subr.bf16.mxu0 %v25492_v50 }
 0xc88   :  { %17601 = vmatmul.mubr.msk.bf16.vlgmr.msra.gmra.mxu1 %vm23056_vm15, %v25970_v52 }
 0xc89   :  { %17611 = vmatpush3.bf16.xpose.msra.mxu1 %v25971_v18  ;;  %17612 = vmatprep.mubr.msk.bf16.mxu1 %vm19197_vm1, %v25492_v50 }
 0xc8a   :  { %17622 = vmatprep.subr.bf16.mxu1 %v25492_v50 }
 0xc8c   :  { %17607 = vmatmul.mubr.msk.bf16.vlgmr.msra.gmra.mxu0 %vm23056_vm15, %v25972_v27  ;;  %v25994_v27 = vld [vmem:[#allocation72_spill] sm:$0xff] }
 0xc8d   :  { %17617 = vmatpush3.bf16.xpose.msra.mxu0 %v25973_v40  ;;  %17618 = vmatprep.mubr.msk.bf16.mxu0 %vm19197_vm1, %v25492_v50 }
 0xc8e   :  { %17628 = vmatprep.subr.bf16.mxu0 %v25492_v50 }
 0xc90   :  { %17613 = vmatmul.mubr.msk.bf16.vlgmr.msra.gmra.mxu1 %vm23056_vm15, %v25974_v1  ;;  %v25988_v1 = vld [vmem:[#allocation16_spill] sm:$0xff] }
 0xc91   :  { %17623 = vmatpush3.bf16.xpose.msra.mxu1 %v25975_v30  ;;  %17624 = vmatprep.mubr.msk.bf16.mxu1 %vm19197_vm1, %v25492_v50 }
 0xc92   :  { %17634 = vmatprep.subr.bf16.mxu1 %v25492_v50 }
 0xc94   :  { %17619 = vmatmul.mubr.msk.bf16.vlgmr.msra.gmra.mxu0 %vm23056_vm15, %v25976_v37  ;;  %v25986_v37 = vld [vmem:[#allocation70_spill] sm:$0xff] }
 0xc95   :  { %17629 = vmatpush3.bf16.msra.mxu0 %v10874_v17  ;;  %17630 = vmatprep.mubr.msk.bf16.mxu0 %vm19197_vm1, %v25492_v50  ;;  %v25984_v17 = vld [vmem:[#allocation13_spill] sm:$0xff] }
 0xc96   :  { %17640 = vmatprep.subr.bf16.mxu0 %v25492_v50 }
 0xc98   :  { %17625 = vmatmul.mubr.msk.bf16.vlgmr.msra.gmra.mxu1 %vm23056_vm15, %v25978_v56 }
 0xc99   :  { %17635 = vmatpush3.bf16.msra.mxu1 %v10875_v14  ;;  %17636 = vmatprep.mubr.msk.bf16.mxu1 %vm19197_vm1, %v25492_v50 }
 0xc9a   :  { %17646 = vmatprep.subr.bf16.mxu1 %v25492_v50 }
 0xcdb   :  { %v9123_v63 = vpop.f32.mrf.mxu0 }
 0xcdc   :  { %v23177_v48 = vadd.f32 %v9123_v63, %v25980_v13 }
 0xcdd   :  { %v17440_v59 = vpop.f32.mrf.mxu0 }
 0xcde   :  { %25981 = vst [vmem:[#allocation32_spill] sm:$0xff] %v23177_v48 }
 0xcdf   :  { %v9126_v20 = vpop.f32.mrf.mxu0 }
 0xce0   :  { %v23180_v46 = vadd.f32 %v9126_v20, %v25982_v51  ;;  %v9167_v8 = vpop.f32.mrf.mxu1  ;;  %v25990_v20 = vld [vmem:[#allocation71_spill] sm:$0xff] }
 0xce1   :  { %v17441_v24 = vpop.f32.mrf.mxu0  ;;  %v23183_v56 = vadd.f32 %v9167_v8, %v25984_v17 }
 0xce2   :  { %25983 = vst [vmem:[#allocation85_spill] sm:$0xff] %v23180_v46  ;;  %v17446_v14 = vpop.f32.mrf.mxu1  ;;  %v25992_v24 = vld [vmem:[#allocation17_spill] sm:$0xff] }
 0xce3   :  { %25985 = vst [vmem:[#allocation29_spill] sm:$0xff] %v23183_v56 }
 0xce4   :  { %v9170_v54 = vpop.f32.mrf.mxu1  ;;  %v9211_v41 = vpop.f32.mrf.mxu0 }
 0xce5   :  { %v23186_v30 = vadd.f32 %v9170_v54, %v25986_v37  ;;  %v23189_v40 = vadd.f32 %v9211_v41, %v25988_v1  ;;  %v25996_v54 = vld [vmem:[#allocation20_spill] sm:$0xff] }
 0xce6   :  { %v17447_v63 = vpop.f32.mrf.mxu1  ;;  %v17452_v13 = vpop.f32.mrf.mxu0 }
 0xce7   :  { %25987 = vst [vmem:[#allocation86_spill] sm:$0xff] %v23186_v30  ;;  %25989 = vst [vmem:[#allocation2_spill] sm:$0xff] %v23189_v40  ;;  %v25998_v30 = vld [vmem:[#allocation73_spill] sm:$0xff] }
 0xce8   :  { %v9214_v59 = vpop.f32.mrf.mxu0  ;;  %v9255_v48 = vpop.f32.mrf.mxu1 }
 0xce9   :  { %v23192_v51 = vadd.f32 %v9214_v59, %v25990_v20  ;;  %v23195_v46 = vadd.f32 %v9255_v48, %v25992_v24  ;;  %v26000_v20 = vld [vmem:[#allocation21_spill] sm:$0xff] }
 0xcea   :  { %v17453_v8 = vpop.f32.mrf.mxu0  ;;  %v17458_v17 = vpop.f32.mrf.mxu1 }
 0xceb   :  { %25991 = vst [vmem:[#allocation87_spill] sm:$0xff] %v23192_v51  ;;  %25993 = vst [vmem:[#allocation3_spill] sm:$0xff] %v23195_v46  ;;  %v26002_v51 = vld [vmem:[#allocation74_spill] sm:$0xff] }
 0xcec   :  { %v9258_v14 = vpop.f32.mrf.mxu1  ;;  %v9299_v56 = vpop.f32.mrf.mxu0 }
 0xced   :  { %v23198_v37 = vadd.f32 %v9258_v14, %v25994_v27  ;;  %v23201_v1 = vadd.f32 %v9299_v56, %v25996_v54  ;;  %v26004_v14 = vld [vmem:[#allocation24_spill] sm:$0xff] }
 0xcee   :  { %v17459_v41 = vpop.f32.mrf.mxu1  ;;  %v17464_v63 = vpop.f32.mrf.mxu0 }
 0xcef   :  { %25995 = vst [vmem:[#allocation88_spill] sm:$0xff] %v23198_v37  ;;  %25997 = vst [vmem:[#allocation40_spill] sm:$0xff] %v23201_v1  ;;  %v26006_v37 = vld [vmem:[#allocation75_spill] sm:$0xff] }
 0xcf0   :  { %v9302_v13 = vpop.f32.mrf.mxu0  ;;  %v9343_v40 = vpop.f32.mrf.mxu1 }
 0xcf1   :  { %v23204_v59 = vadd.f32 %v9302_v13, %v25998_v30  ;;  %v23207_v48 = vadd.f32 %v9343_v40, %v26000_v20  ;;  %v26008_v13 = vld [vmem:[#allocation25_spill] sm:$0xff] }
 0xcf2   :  { %v17465_v24 = vpop.f32.mrf.mxu0  ;;  %v17470_v8 = vpop.f32.mrf.mxu1 }
 0xcf3   :  { %25999 = vst [vmem:[#allocation89_spill] sm:$0xff] %v23204_v59  ;;  %26001 = vst [vmem:[#allocation37_spill] sm:$0xff] %v23207_v48  ;;  %v26010_v59 = vld [vmem:[#allocation76_spill] sm:$0xff] }
 0xcf4   :  { %v9346_v17 = vpop.f32.mrf.mxu1  ;;  %v9387_v46 = vpop.f32.mrf.mxu0 }
 0xcf5   :  { %v23210_v27 = vadd.f32 %v9346_v17, %v26002_v51  ;;  %v23213_v56 = vadd.f32 %v9387_v46, %v26004_v14  ;;  %v26012_v17 = vld [vmem:[#allocation30_spill] sm:$0xff] }
 0xcf6   :  { %v17471_v54 = vpop.f32.mrf.mxu1  ;;  %v17476_v41 = vpop.f32.mrf.mxu0 }
 0xcf7   :  { %26003 = vst [vmem:[#allocation90_spill] sm:$0xff] %v23210_v27  ;;  %26005 = vst [vmem:[#allocation4_spill] sm:$0xff] %v23213_v56  ;;  %v26014_v27 = vld [vmem:[#allocation77_spill] sm:$0xff] }
 0xcf8   :  { %v9390_v63 = vpop.f32.mrf.mxu0  ;;  %v9431_v1 = vpop.f32.mrf.mxu1 }
 0xcf9   :  { %v23216_v30 = vadd.f32 %v9390_v63, %v26006_v37  ;;  %v23219_v40 = vadd.f32 %v9431_v1, %v26008_v13  ;;  %v26016_v63 = vld [vmem:[#allocation31_spill] sm:$0xff] }
 0xcfa   :  { %v17477_v20 = vpop.f32.mrf.mxu0  ;;  %v17482_v24 = vpop.f32.mrf.mxu1 }
 0xcfb   :  { %26007 = vst [vmem:[#allocation91_spill] sm:$0xff] %v23216_v30  ;;  %26009 = vst [vmem:[#allocation5_spill] sm:$0xff] %v23219_v40  ;;  %v26018_v30 = vld [vmem:[#allocation78_spill] sm:$0xff] }
 0xcfc   :  { %v9434_v8 = vpop.f32.mrf.mxu1  ;;  %v9475_v48 = vpop.f32.mrf.mxu0 }
 0xcfd   :  { %v23222_v51 = vadd.f32 %v9434_v8, %v26010_v59  ;;  %v23225_v46 = vadd.f32 %v9475_v48, %v26012_v17  ;;  %v26020_v8 = vld [vmem:[#allocation38_spill] sm:$0xff] }
 0xcfe   :  { %v17483_v14 = vpop.f32.mrf.mxu1  ;;  %v17488_v54 = vpop.f32.mrf.mxu0 }
 0xcff   :  { %26011 = vst [vmem:[#allocation92_spill] sm:$0xff] %v23222_v51  ;;  %26013 = vst [vmem:[#allocation48_spill] sm:$0xff] %v23225_v46  ;;  %v26022_v51 = vld [vmem:[#allocation79_spill] sm:$0xff] }
 0xd00   :  { %v9478_v41 = vpop.f32.mrf.mxu0  ;;  %v9519_v56 = vpop.f32.mrf.mxu1 }
 0xd01   :  { %v23228_v37 = vadd.f32 %v9478_v41, %v26014_v27  ;;  %v23231_v1 = vadd.f32 %v9519_v56, %v26016_v63  ;;  %v26024_v41 = vld [vmem:[#allocation39_spill] sm:$0xff] }
 0xd02   :  { %v17489_v13 = vpop.f32.mrf.mxu0  ;;  %v17494_v20 = vpop.f32.mrf.mxu1 }
 0xd03   :  { %26015 = vst [vmem:[#allocation93_spill] sm:$0xff] %v23228_v37  ;;  %26017 = vst [vmem:[#allocation46_spill] sm:$0xff] %v23231_v1  ;;  %v26026_v37 = vld [vmem:[#allocation80_spill] sm:$0xff] }
 0xd04   :  { %v9522_v24 = vpop.f32.mrf.mxu1  ;;  %v9563_v40 = vpop.f32.mrf.mxu0 }
 0xd05   :  { %v23234_v59 = vadd.f32 %v9522_v24, %v26018_v30  ;;  %v23237_v48 = vadd.f32 %v9563_v40, %v26020_v8  ;;  %v26028_v24 = vld [vmem:[#allocation47_spill] sm:$0xff] }
 0xd06   :  { %v17495_v17 = vpop.f32.mrf.mxu1  ;;  %v17500_v14 = vpop.f32.mrf.mxu0 }
 0xd07   :  { %26019 = vst [vmem:[#allocation94_spill] sm:$0xff] %v23234_v59  ;;  %26021 = vst [vmem:[#allocation6_spill] sm:$0xff] %v23237_v48  ;;  %v26030_v59 = vld [vmem:[#allocation81_spill] sm:$0xff] }
 0xd08   :  { %v9566_v54 = vpop.f32.mrf.mxu0  ;;  %v9607_v46 = vpop.f32.mrf.mxu1 }
 0xd09   :  { %v23240_v27 = vadd.f32 %v9566_v54, %v26022_v51  ;;  %v23243_v56 = vadd.f32 %v9607_v46, %v26024_v41  ;;  %v26032_v54 = vld [vmem:[#allocation45_spill] sm:$0xff] }
 0xd0a   :  { %v17501_v63 = vpop.f32.mrf.mxu0  ;;  %v17506_v13 = vpop.f32.mrf.mxu1 }
 0xd0b   :  { %26023 = vst [vmem:[#allocation95_spill] sm:$0xff] %v23240_v27  ;;  %26025 = vst [vmem:[#allocation7_spill] sm:$0xff] %v23243_v56  ;;  %v26034_v27 = vld [vmem:[#allocation82_spill] sm:$0xff] }
 0xd0c   :  { %v9610_v20 = vpop.f32.mrf.mxu1  ;;  %v9651_v1 = vpop.f32.mrf.mxu0 }
 0xd0d   :  { %v23246_v30 = vadd.f32 %v9610_v20, %v26026_v37  ;;  %v23249_v40 = vadd.f32 %v9651_v1, %v26028_v24  ;;  %v26036_v20 = vld [vmem:[#allocation55_spill] sm:$0xff] }
 0xd0e   :  { %v17507_v8 = vpop.f32.mrf.mxu1  ;;  %v17512_v17 = vpop.f32.mrf.mxu0 }
 0xd0f   :  { %26027 = vst [vmem:[#allocation96_spill] sm:$0xff] %v23246_v30  ;;  %26029 = vst [vmem:[#allocation56_spill] sm:$0xff] %v23249_v40  ;;  %v26038_v30 = vld [vmem:[#allocation83_spill] sm:$0xff] }
 0xd10   :  { %v9654_v14 = vpop.f32.mrf.mxu0  ;;  %v9695_v48 = vpop.f32.mrf.mxu1 }
 0xd11   :  { %v23252_v51 = vadd.f32 %v9654_v14, %v26030_v59  ;;  %v23255_v46 = vadd.f32 %v9695_v48, %v26032_v54  ;;  %v26040_v14 = vld [vmem:[#allocation53_spill] sm:$0xff] }
 0xd12   :  { %v17513_v41 = vpop.f32.mrf.mxu0  ;;  %v17518_v63 = vpop.f32.mrf.mxu1 }
 0xd13   :  { %26031 = vst [vmem:[#allocation97_spill] sm:$0xff] %v23252_v51  ;;  %26033 = vst [vmem:[#allocation54_spill] sm:$0xff] %v23255_v46 }
 0xd14   :  { %v9698_v13 = vpop.f32.mrf.mxu1  ;;  %v9739_v56 = vpop.f32.mrf.mxu0 }
 0xd15   :  { %v23258_v37 = vadd.f32 %v9698_v13, %v26034_v27  ;;  %v23261_v1 = vadd.f32 %v9739_v56, %v26036_v20  ;;  %v26042_v27 = vld [vmem:[#allocation84_spill] sm:$0xff] }
 0xd16   :  { %v17519_v24 = vpop.f32.mrf.mxu1  ;;  %v17524_v8 = vpop.f32.mrf.mxu0 }
 0xd17   :  { %26035 = vst [vmem:[#allocation98_spill] sm:$0xff] %v23258_v37  ;;  %26037 = vst [vmem:[#allocation8_spill] sm:$0xff] %v23261_v1 }
 0xd18   :  { %v9742_v17 = vpop.f32.mrf.mxu0  ;;  %v9783_v40 = vpop.f32.mrf.mxu1 }
 0xd19   :  { %v23264_v59 = vadd.f32 %v9742_v17, %v26038_v30  ;;  %v23267_v48 = vadd.f32 %v9783_v40, %v26040_v14 }
 0xd1a   :  { %v17525_v54 = vpop.f32.mrf.mxu0  ;;  %v17530_v41 = vpop.f32.mrf.mxu1 }
 0xd1b   :  { %26039 = vst [vmem:[#allocation99_spill] sm:$0xff] %v23264_v59  ;;  %26041 = vst [vmem:[#allocation9_spill] sm:$0xff] %v23267_v48 }
 0xd1c   :  { %v9786_v63 = vpop.f32.mrf.mxu1  ;;  %v23269_v46 = vpop.f32.mrf.mxu0 }
 0xd1d   :  { %v23272_v13 = vadd.f32 %v9786_v63, %v26042_v27  ;;  %v10506_v56 = vsel %vm152_vm0, %v23269_v46, -inf }
 0xd1e   :  { %10507 = vmax.xlane.f32.xlu0 %v10506_v56  ;;  %v17531_v20 = vpop.f32.mrf.mxu1  ;;  %v17536_v24 = vpop.f32.mrf.mxu0 }
 0xd1f   :  { %26043 = vst [vmem:[#allocation100_spill] sm:$0xff] %v23272_v13 }
 0xd20   :  { %v23276_v8 = vpop.f32.mrf.mxu0  ;;  %v23278_v30 = vpop.f32.mrf.mxu1 }
 0xd21   :  { %v10509_v40 = vsel %vm152_vm0, %v23276_v8, -inf  ;;  %v10512_v17 = vsel %vm152_vm0, %v23278_v30, -inf }
 0xd22   :  { %10510 = vmax.xlane.f32.xlu1 %v10509_v40  ;;  %v17537_v14 = vpop.f32.mrf.mxu0  ;;  %10513 = vmax.xlane.f32.xlu0 %v10512_v17  ;;  %v17542_v54 = vpop.f32.mrf.mxu1 }
 0xd24   :  { %v23284_v41 = vpop.f32.mrf.mxu1  ;;  %v23286_v63 = vpop.f32.mrf.mxu0 }
 0xd25   :  { %v10518_v27 = vsel %vm152_vm0, %v23286_v63, -inf  ;;  %v10515_v56 = vsel %vm152_vm0, %v23284_v41, -inf }
 0xd26   :  { %v17548_v20 = vpop.f32.mrf.mxu0  ;;  %10519 = vmax.xlane.f32.xlu0 %v10518_v27  ;;  %10516 = vmax.xlane.f32.xlu1 %v10515_v56  ;;  %v17543_v24 = vpop.f32.mrf.mxu1 }
 0xd28   :  { %v23292_v13 = vpop.f32.mrf.mxu0  ;;  %v23294_v40 = vpop.f32.mrf.mxu1 }
 0xd29   :  { %v10521_v17 = vsel %vm152_vm0, %v23292_v13, -inf  ;;  %v10524_v14 = vsel %vm152_vm0, %v23294_v40, -inf }
 0xd2a   :  { %v17549_v54 = vpop.f32.mrf.mxu0  ;;  %10522 = vmax.xlane.f32.xlu1 %v10521_v17  ;;  %10525 = vmax.xlane.f32.xlu0 %v10524_v14  ;;  %v17554_v48 = vpop.f32.mrf.mxu1 }
 0xd2c   :  { %v23300_v59 = vpop.f32.mrf.mxu1  ;;  %v23302_v20 = vpop.f32.mrf.mxu0 }
 0xd2d   :  { %v10530_v27 = vsel %vm152_vm0, %v23302_v20, -inf  ;;  %v10527_v56 = vsel %vm152_vm0, %v23300_v59, -inf }
 0xd2e   :  { %v17560_v24 = vpop.f32.mrf.mxu0  ;;  %10531 = vmax.xlane.f32.xlu0 %v10530_v27  ;;  %10528 = vmax.xlane.f32.xlu1 %v10527_v56  ;;  %v17555_v1 = vpop.f32.mrf.mxu1 }
 0xd30   :  { %v23308_v37 = vpop.f32.mrf.mxu0  ;;  %v23310_v54 = vpop.f32.mrf.mxu1 }
 0xd31   :  { %v10533_v48 = vsel %vm152_vm0, %v23308_v37, -inf  ;;  %v10536_v17 = vsel %vm152_vm0, %v23310_v54, -inf }
 0xd32   :  { %v17561_v14 = vpop.f32.mrf.mxu0  ;;  %10534 = vmax.xlane.f32.xlu1 %v10533_v48  ;;  %10537 = vmax.xlane.f32.xlu0 %v10536_v17  ;;  %v17566_v51 = vpop.f32.mrf.mxu1 }
 0xd34   :  { %v23316_v18 = vpop.f32.mrf.mxu1  ;;  %v23318_v24 = vpop.f32.mrf.mxu0 }
 0xd35   :  { %v10542_v1 = vsel %vm152_vm0, %v23318_v24, -inf  ;;  %v10539_v27 = vsel %vm152_vm0, %v23316_v18, -inf }
 0xd36   :  { %v17572_v56 = vpop.f32.mrf.mxu0  ;;  %10543 = vmax.xlane.f32.xlu0 %v10542_v1  ;;  %10540 = vmax.xlane.f32.xlu1 %v10539_v27  ;;  %v17567_v52 = vpop.f32.mrf.mxu1 }
 0xd38   :  { %v23324_v5 = vpop.f32.mrf.mxu0  ;;  %v23326_v14 = vpop.f32.mrf.mxu1 }
 0xd39   :  { %v10545_v51 = vsel %vm152_vm0, %v23324_v5, -inf  ;;  %v10548_v48 = vsel %vm152_vm0, %v23326_v14, -inf }
 0xd3a   :  { %v17573_v17 = vpop.f32.mrf.mxu0  ;;  %10546 = vmax.xlane.f32.xlu1 %v10545_v51  ;;  %10549 = vmax.xlane.f32.xlu0 %v10548_v48  ;;  %v17578_v31 = vpop.f32.mrf.mxu1 }
 0xd3c   :  { %v23332_v44 = vpop.f32.mrf.mxu1  ;;  %v23334_v56 = vpop.f32.mrf.mxu0 }
 0xd3d   :  { %v10554_v52 = vsel %vm152_vm0, %v23334_v56, -inf  ;;  %v10551_v1 = vsel %vm152_vm0, %v23332_v44, -inf }
 0xd3e   :  { %v17584_v27 = vpop.f32.mrf.mxu0  ;;  %10555 = vmax.xlane.f32.xlu0 %v10554_v52  ;;  %10552 = vmax.xlane.f32.xlu1 %v10551_v1  ;;  %v17579_v38 = vpop.f32.mrf.mxu1 }
 0xd40   :  { %v23340_v57 = vpop.f32.mrf.mxu0  ;;  %v23342_v17 = vpop.f32.mrf.mxu1 }
 0xd41   :  { %v10557_v31 = vsel %vm152_vm0, %v23340_v57, -inf  ;;  %v10560_v51 = vsel %vm152_vm0, %v23342_v17, -inf }
 0xd42   :  { %v17585_v48 = vpop.f32.mrf.mxu0  ;;  %10558 = vmax.xlane.f32.xlu1 %v10557_v31  ;;  %10561 = vmax.xlane.f32.xlu0 %v10560_v51  ;;  %v17590_v2 = vpop.f32.mrf.mxu1 }
 0xd44   :  { %v23348_v35 = vpop.f32.mrf.mxu1  ;;  %v23350_v27 = vpop.f32.mrf.mxu0 }
 0xd45   :  { %v10566_v38 = vsel %vm152_vm0, %v23350_v27, -inf  ;;  %v10563_v52 = vsel %vm152_vm0, %v23348_v35, -inf }
 0xd46   :  { %v17596_v1 = vpop.f32.mrf.mxu0  ;;  %10567 = vmax.xlane.f32.xlu0 %v10566_v38  ;;  %10564 = vmax.xlane.f32.xlu1 %v10563_v52  ;;  %v17591_v61 = vpop.f32.mrf.mxu1 }
 0xd48   :  { %v23356_v26 = vpop.f32.mrf.mxu0  ;;  %v23358_v48 = vpop.f32.mrf.mxu1 }
 0xd49   :  { %v10569_v2 = vsel %vm152_vm0, %v23356_v26, -inf  ;;  %v10572_v31 = vsel %vm152_vm0, %v23358_v48, -inf }
 0xd4a   :  { %v17597_v51 = vpop.f32.mrf.mxu0  ;;  %10570 = vmax.xlane.f32.xlu1 %v10569_v2  ;;  %10573 = vmax.xlane.f32.xlu0 %v10572_v31  ;;  %v17602_v29 = vpop.f32.mrf.mxu1 }
 0xd4c   :  { %v23364_v22 = vpop.f32.mrf.mxu1  ;;  %v23366_v1 = vpop.f32.mrf.mxu0 }
 0xd4d   :  { %v10578_v61 = vsel %vm152_vm0, %v23366_v1, -inf  ;;  %v10575_v38 = vsel %vm152_vm0, %v23364_v22, -inf }
 0xd4e   :  { %v17608_v52 = vpop.f32.mrf.mxu0  ;;  %10579 = vmax.xlane.f32.xlu0 %v10578_v61  ;;  %10576 = vmax.xlane.f32.xlu1 %v10575_v38  ;;  %v17603_v6 = vpop.f32.mrf.mxu1 }
 0xd50   :  { %v23372_v42 = vpop.f32.mrf.mxu0  ;;  %v23374_v51 = vpop.f32.mrf.mxu1 }
 0xd51   :  { %v10581_v29 = vsel %vm152_vm0, %v23372_v42, -inf  ;;  %v10584_v2 = vsel %vm152_vm0, %v23374_v51, -inf }
 0xd52   :  { %v17609_v31 = vpop.f32.mrf.mxu0  ;;  %10582 = vmax.xlane.f32.xlu1 %v10581_v29  ;;  %10585 = vmax.xlane.f32.xlu0 %v10584_v2  ;;  %v17614_v39 = vpop.f32.mrf.mxu1 }
 0xd54   :  { %v23380_v32 = vpop.f32.mrf.mxu1  ;;  %v23382_v52 = vpop.f32.mrf.mxu0 }
 0xd55   :  { %v10590_v6 = vsel %vm152_vm0, %v23382_v52, -inf  ;;  %v10587_v61 = vsel %vm152_vm0, %v23380_v32, -inf }
 0xd56   :  { %v17620_v38 = vpop.f32.mrf.mxu0  ;;  %10591 = vmax.xlane.f32.xlu0 %v10590_v6  ;;  %10588 = vmax.xlane.f32.xlu1 %v10587_v61  ;;  %v17615_v7 = vpop.f32.mrf.mxu1 }
 0xd58   :  { %v23388_v34 = vpop.f32.mrf.mxu0  ;;  %v23390_v31 = vpop.f32.mrf.mxu1 }
 0xd59   :  { %v10593_v39 = vsel %vm152_vm0, %v23388_v34, -inf  ;;  %v10596_v29 = vsel %vm152_vm0, %v23390_v31, -inf }
 0xd5a   :  { %v17621_v2 = vpop.f32.mrf.mxu0  ;;  %10594 = vmax.xlane.f32.xlu1 %v10593_v39  ;;  %10597 = vmax.xlane.f32.xlu0 %v10596_v29  ;;  %v17626_v28 = vpop.f32.mrf.mxu1 }
 0xd5c   :  { %v23396_v4 = vpop.f32.mrf.mxu1 }
 0xd5d   :  { %v10599_v6 = vsel %vm152_vm0, %v23396_v4, -inf }
 0xd5e   :  { %10600 = vmax.xlane.f32.xlu1 %v10599_v6  ;;  %v17627_v7 = vpop.f32.mrf.mxu1 }
 0xda7   :  { %v10508_v61 = vpop.xlane.xlu0 %10507 }
 0xda8   :  { %v10602_v38 = vsub.f32 %v23269_v46, %v10508_v61 }
 0xdaa   :  { %v10634_v11 = vmul.f32 1.442695, %v10602_v38 }
 0xdab   :  { %v10511_v15 = vpop.xlane.xlu1 %10510  ;;  %v10514_v21 = vpop.xlane.xlu0 %10513 }
 0xdac   :  { %18812 = vpow2.f32 %v10634_v11  ;;  %v10603_v0 = vsub.f32 %v23276_v8, %v10511_v15  ;;  %v10604_v39 = vsub.f32 %v23278_v30, %v10514_v21 }
 0xdae   :  { %v10636_v29 = vmul.f32 1.442695, %v10603_v0  ;;  %v10638_v28 = vmul.f32 1.442695, %v10604_v39 }
 0xdaf   :  { %v10520_v2 = vpop.xlane.xlu0 %10519  ;;  %v10517_v19 = vpop.xlane.xlu1 %10516 }
 0xdb0   :  { %18814 = vpow2.f32 %v10636_v29  ;;  %v10606_v62 = vsub.f32 %v23286_v63, %v10520_v2  ;;  %v10605_v6 = vsub.f32 %v23284_v41, %v10517_v19 }
 0xdb1   :  { %18816 = vpow2.f32 %v10638_v28 }
 0xdb2   :  { %v10642_v7 = vmul.f32 1.442695, %v10606_v62  ;;  %v10640_v46 = vmul.f32 1.442695, %v10605_v6 }
 0xdb3   :  { %v10523_v61 = vpop.xlane.xlu1 %10522  ;;  %v10526_v38 = vpop.xlane.xlu0 %10525 }
 0xdb4   :  { %18818 = vpow2.f32 %v10642_v7  ;;  %v10607_v11 = vsub.f32 %v23292_v13, %v10523_v61  ;;  %v10608_v15 = vsub.f32 %v23294_v40, %v10526_v38 }
 0xdb5   :  { %18820 = vpow2.f32 %v10640_v46 }
 0xdb6   :  { %v10644_v0 = vmul.f32 1.442695, %v10607_v11  ;;  %v10646_v21 = vmul.f32 1.442695, %v10608_v15 }
 0xdb7   :  { %v10532_v8 = vpop.xlane.xlu0 %10531  ;;  %v10529_v30 = vpop.xlane.xlu1 %10528 }
 0xdb8   :  { %18822 = vpow2.f32 %v10644_v0  ;;  %v10610_v63 = vsub.f32 %v23302_v20, %v10532_v8  ;;  %v10609_v19 = vsub.f32 %v23300_v59, %v10529_v30 }
 0xdb9   :  { %v23409_v41 = vpop.eup %18812  ;;  %18824 = vpow2.f32 %v10646_v21 }
 0xdba   :  { %v10650_v62 = vmul.f32 1.442695, %v10610_v63  ;;  %v10648_v39 = vmul.f32 1.442695, %v10609_v19  ;;  %v10698_v13 = vsel %vm152_vm0, %v23409_v41, 0.0 }
 0xdbb   :  { %v10535_v29 = vpop.xlane.xlu1 %10534  ;;  %v10538_v40 = vpop.xlane.xlu0 %10537  ;;  %10699 = vadd.xlane.f32.xlu0 %v10698_v13 }
 0xdbc   :  { %18826 = vpow2.f32 %v10650_v62  ;;  %v10611_v28 = vsub.f32 %v23308_v37, %v10535_v29  ;;  %v10612_v2 = vsub.f32 %v23310_v54, %v10538_v40 }
 0xdbd   :  { %v23415_v6 = vpop.eup %18814  ;;  %18828 = vpow2.f32 %v10648_v39 }
 0xdbe   :  { %v23417_v59 = vpop.eup %18816  ;;  %v10652_v20 = vmul.f32 1.442695, %v10611_v28  ;;  %v10654_v7 = vmul.f32 1.442695, %v10612_v2  ;;  %v10701_v46 = vsel %vm152_vm0, %v23415_v6, 0.0 }
 0xdbf   :  { %v10544_v61 = vpop.xlane.xlu0 %10543  ;;  %v10541_v38 = vpop.xlane.xlu1 %10540  ;;  %v10704_v11 = vsel %vm152_vm0, %v23417_v59, 0.0  ;;  %10702 = vadd.xlane.f32.xlu1 %v10701_v46 }
 0xdc0   :  { %18830 = vpow2.f32 %v10652_v20  ;;  %v10614_v37 = vsub.f32 %v23318_v24, %v10544_v61  ;;  %v10613_v54 = vsub.f32 %v23316_v18, %v10541_v38  ;;  %10705 = vadd.xlane.f32.xlu0 %v10704_v11 }
 0xdc1   :  { %v23425_v15 = vpop.eup %18818  ;;  %18832 = vpow2.f32 %v10654_v7 }
 0xdc2   :  { %v23427_v0 = vpop.eup %18820  ;;  %v10658_v21 = vmul.f32 1.442695, %v10614_v37  ;;  %v10656_v8 = vmul.f32 1.442695, %v10613_v54  ;;  %v10710_v30 = vsel %vm152_vm0, %v23425_v15, 0.0 }
 0xdc3   :  { %v10547_v63 = vpop.xlane.xlu1 %10546  ;;  %v10550_v19 = vpop.xlane.xlu0 %10549  ;;  %v10707_v62 = vsel %vm152_vm0, %v23427_v0, 0.0 }
 0xdc4   :  { %18834 = vpow2.f32 %v10658_v21  ;;  %v10615_v24 = vsub.f32 %v23324_v5, %v10547_v63  ;;  %v10616_v18 = vsub.f32 %v23326_v14, %v10550_v19  ;;  %10711 = vadd.xlane.f32.xlu0 %v10710_v30  ;;  %10708 = vadd.xlane.f32.xlu1 %v10707_v62 }
 0xdc5   :  { %v23435_v39 = vpop.eup %18822  ;;  %18836 = vpow2.f32 %v10656_v8 }
 0xdc6   :  { %v23437_v13 = vpop.eup %18824  ;;  %v10660_v29 = vmul.f32 1.442695, %v10615_v24  ;;  %v10662_v40 = vmul.f32 1.442695, %v10616_v18  ;;  %v10713_v28 = vsel %vm152_vm0, %v23435_v39, 0.0 }
 0xdc7   :  { %v10556_v2 = vpop.xlane.xlu0 %10555  ;;  %v10553_v20 = vpop.xlane.xlu1 %10552  ;;  %v10716_v7 = vsel %vm152_vm0, %v23437_v13, 0.0 }
 0xdc8   :  { %18838 = vpow2.f32 %v10660_v29  ;;  %v10618_v5 = vsub.f32 %v23334_v56, %v10556_v2  ;;  %v10617_v14 = vsub.f32 %v23332_v44, %v10553_v20  ;;  %10717 = vadd.xlane.f32.xlu0 %v10716_v7  ;;  %10714 = vadd.xlane.f32.xlu1 %v10713_v28 }
 0xdc9   :  { %v23445_v46 = vpop.eup %18826  ;;  %18840 = vpow2.f32 %v10662_v40 }
 0xdca   :  { %v23447_v61 = vpop.eup %18828  ;;  %v10666_v38 = vmul.f32 1.442695, %v10618_v5  ;;  %v10664_v11 = vmul.f32 1.442695, %v10617_v14  ;;  %v10722_v37 = vsel %vm152_vm0, %v23445_v46, 0.0 }
 0xdcb   :  { %v10559_v54 = vpop.xlane.xlu1 %10558  ;;  %v10562_v21 = vpop.xlane.xlu0 %10561  ;;  %v10719_v8 = vsel %vm152_vm0, %v23447_v61, 0.0 }
 0xdcc   :  { %18842 = vpow2.f32 %v10666_v38  ;;  %v10619_v44 = vsub.f32 %v23340_v57, %v10559_v54  ;;  %v10620_v56 = vsub.f32 %v23342_v17, %v10562_v21  ;;  %10723 = vadd.xlane.f32.xlu0 %v10722_v37  ;;  %10720 = vadd.xlane.f32.xlu1 %v10719_v8 }
 0xdcd   :  { %v23455_v30 = vpop.eup %18830  ;;  %18844 = vpow2.f32 %v10664_v11 }
 0xdce   :  { %v23457_v63 = vpop.eup %18832  ;;  %v10668_v19 = vmul.f32 1.442695, %v10619_v44  ;;  %v10670_v62 = vmul.f32 1.442695, %v10620_v56  ;;  %v10725_v24 = vsel %vm152_vm0, %v23455_v30, 0.0 }
 0xdcf   :  { %v10568_v18 = vpop.xlane.xlu0 %10567  ;;  %v10565_v29 = vpop.xlane.xlu1 %10564  ;;  %v10728_v40 = vsel %vm152_vm0, %v23457_v63, 0.0 }
 0xdd0   :  { %18846 = vpow2.f32 %v10668_v19  ;;  %v10622_v57 = vsub.f32 %v23350_v27, %v10568_v18  ;;  %v10621_v17 = vsub.f32 %v23348_v35, %v10565_v29  ;;  %10729 = vadd.xlane.f32.xlu0 %v10728_v40  ;;  %10726 = vadd.xlane.f32.xlu1 %v10725_v24 }
 0xdd1   :  { %v23465_v28 = vpop.eup %18834  ;;  %18848 = vpow2.f32 %v10670_v62 }
 0xdd2   :  { %v23467_v2 = vpop.eup %18836  ;;  %v10674_v20 = vmul.f32 1.442695, %v10622_v57  ;;  %v10672_v7 = vmul.f32 1.442695, %v10621_v17  ;;  %v10734_v5 = vsel %vm152_vm0, %v23465_v28, 0.0 }
 0xdd3   :  { %v10571_v14 = vpop.xlane.xlu1 %10570  ;;  %v10574_v38 = vpop.xlane.xlu0 %10573  ;;  %v10731_v11 = vsel %vm152_vm0, %v23467_v2, 0.0 }
 0xdd4   :  { %18850 = vpow2.f32 %v10674_v20  ;;  %v10623_v35 = vsub.f32 %v23356_v26, %v10571_v14  ;;  %v10624_v27 = vsub.f32 %v23358_v48, %v10574_v38  ;;  %10735 = vadd.xlane.f32.xlu0 %v10734_v5  ;;  %10732 = vadd.xlane.f32.xlu1 %v10731_v11 }
 0xdd5   :  { %v23475_v37 = vpop.eup %18838  ;;  %18852 = vpow2.f32 %v10672_v7 }
 0xdd6   :  { %v23477_v54 = vpop.eup %18840  ;;  %v10676_v21 = vmul.f32 1.442695, %v10623_v35  ;;  %v10678_v8 = vmul.f32 1.442695, %v10624_v27  ;;  %v10737_v44 = vsel %vm152_vm0, %v23475_v37, 0.0 }
 0xdd7   :  { %v10580_v56 = vpop.xlane.xlu0 %10579  ;;  %v10577_v19 = vpop.xlane.xlu1 %10576  ;;  %v10740_v62 = vsel %vm152_vm0, %v23477_v54, 0.0 }
 0xdd8   :  { %18854 = vpow2.f32 %v10676_v21  ;;  %v10626_v26 = vsub.f32 %v23366_v1, %v10580_v56  ;;  %v10625_v48 = vsub.f32 %v23364_v22, %v10577_v19  ;;  %10741 = vadd.xlane.f32.xlu0 %v10740_v62  ;;  %10738 = vadd.xlane.f32.xlu1 %v10737_v44 }
 0xdd9   :  { %v23485_v24 = vpop.eup %18842  ;;  %18856 = vpow2.f32 %v10678_v8 }
 0xdda   :  { %v23487_v18 = vpop.eup %18844  ;;  %v10682_v29 = vmul.f32 1.442695, %v10626_v26  ;;  %v10680_v40 = vmul.f32 1.442695, %v10625_v48  ;;  %v10746_v57 = vsel %vm152_vm0, %v23485_v24, 0.0 }
 0xddb   :  { %v10583_v17 = vpop.xlane.xlu1 %10582  ;;  %v10586_v20 = vpop.xlane.xlu0 %10585  ;;  %v10743_v7 = vsel %vm152_vm0, %v23487_v18, 0.0 }
 0xddc   :  { %18858 = vpow2.f32 %v10682_v29  ;;  %v10627_v22 = vsub.f32 %v23372_v42, %v10583_v17  ;;  %v10628_v1 = vsub.f32 %v23374_v51, %v10586_v20  ;;  %10747 = vadd.xlane.f32.xlu0 %v10746_v57  ;;  %10744 = vadd.xlane.f32.xlu1 %v10743_v7 }
 0xddd   :  { %v23495_v5 = vpop.eup %18846  ;;  %18860 = vpow2.f32 %v10680_v40 }
 0xdde   :  { %v23497_v14 = vpop.eup %18848  ;;  %v10684_v38 = vmul.f32 1.442695, %v10627_v22  ;;  %v10686_v11 = vmul.f32 1.442695, %v10628_v1  ;;  %v10749_v35 = vsel %vm152_vm0, %v23495_v5, 0.0 }
 0xddf   :  { %v10592_v27 = vpop.xlane.xlu0 %10591  ;;  %v10589_v21 = vpop.xlane.xlu1 %10588  ;;  %v10752_v8 = vsel %vm152_vm0, %v23497_v14, 0.0 }
 0xde0   :  { %18862 = vpow2.f32 %v10684_v38  ;;  %v10630_v42 = vsub.f32 %v23382_v52, %v10592_v27  ;;  %v10629_v51 = vsub.f32 %v23380_v32, %v10589_v21  ;;  %10753 = vadd.xlane.f32.xlu0 %v10752_v8  ;;  %10750 = vadd.xlane.f32.xlu1 %v10749_v35 }
 0xde1   :  { %v23505_v44 = vpop.eup %18850  ;;  %18864 = vpow2.f32 %v10686_v11 }
 0xde2   :  { %v23507_v56 = vpop.eup %18852  ;;  %v10690_v19 = vmul.f32 1.442695, %v10630_v42  ;;  %v10688_v62 = vmul.f32 1.442695, %v10629_v51  ;;  %v10758_v26 = vsel %vm152_vm0, %v23505_v44, 0.0 }
 0xde3   :  { %v10595_v48 = vpop.xlane.xlu1 %10594  ;;  %v10598_v29 = vpop.xlane.xlu0 %10597  ;;  %v10755_v40 = vsel %vm152_vm0, %v23507_v56, 0.0 }
 0xde4   :  { %18866 = vpow2.f32 %v10690_v19  ;;  %v10631_v32 = vsub.f32 %v23388_v34, %v10595_v48  ;;  %10759 = vadd.xlane.f32.xlu0 %v10758_v26  ;;  %v10632_v52 = vsub.f32 %v23390_v31, %v10598_v29  ;;  %10756 = vadd.xlane.f32.xlu1 %v10755_v40 }
 0xde5   :  { %v23515_v57 = vpop.eup %18854  ;;  %18868 = vpow2.f32 %v10688_v62 }
 0xde6   :  { %v23517_v17 = vpop.eup %18856  ;;  %v10692_v20 = vmul.f32 1.442695, %v10631_v32  ;;  %v10694_v7 = vmul.f32 1.442695, %v10632_v52  ;;  %v10761_v22 = vsel %vm152_vm0, %v23515_v57, 0.0 }
 0xde7   :  { %v10764_v1 = vsel %vm152_vm0, %v23517_v17, 0.0  ;;  %v10601_v38 = vpop.xlane.xlu1 %10600 }
 0xde8   :  { %18870 = vpow2.f32 %v10692_v20  ;;  %10765 = vadd.xlane.f32.xlu0 %v10764_v1  ;;  %10762 = vadd.xlane.f32.xlu1 %v10761_v22  ;;  %v10633_v34 = vsub.f32 %v23396_v4, %v10601_v38 }
 0xde9   :  { %v23524_v31 = vpop.eup %18858  ;;  %18872 = vpow2.f32 %v10694_v7 }
 0xdea   :  { %v23526_v11 = vpop.eup %18860  ;;  %v10696_v35 = vmul.f32 1.442695, %v10633_v34  ;;  %v10770_v27 = vsel %vm152_vm0, %v23524_v31, 0.0 }
 0xdeb   :  { %v10767_v21 = vsel %vm152_vm0, %v23526_v11, 0.0 }
 0xdec   :  { %18874 = vpow2.f32 %v10696_v35  ;;  %10771 = vadd.xlane.f32.xlu0 %v10770_v27  ;;  %10768 = vadd.xlane.f32.xlu1 %v10767_v21 }
 0xded   :  { %v23532_v8 = vpop.eup %18862 }
 0xdee   :  { %v23534_v42 = vpop.eup %18864  ;;  %v10773_v4 = vsel %vm152_vm0, %v23532_v8, 0.0 }
 0xdef   :  { %v10776_v51 = vsel %vm152_vm0, %v23534_v42, 0.0 }
 0xdf0   :  { %10777 = vadd.xlane.f32.xlu0 %v10776_v51  ;;  %10774 = vadd.xlane.f32.xlu1 %v10773_v4 }
 0xdf1   :  { %v23540_v19 = vpop.eup %18866 }
 0xdf2   :  { %v23542_v62 = vpop.eup %18868  ;;  %v10782_v26 = vsel %vm152_vm0, %v23540_v19, 0.0 }
 0xdf3   :  { %v10779_v48 = vsel %vm152_vm0, %v23542_v62, 0.0 }
 0xdf4   :  { %10783 = vadd.xlane.f32.xlu0 %v10782_v26  ;;  %10780 = vadd.xlane.f32.xlu1 %v10779_v48 }
 0xdf5   :  { %v23548_v29 = vpop.eup %18870 }
 0xdf6   :  { %v23550_v40 = vpop.eup %18872  ;;  %v10785_v32 = vsel %vm152_vm0, %v23548_v29, 0.0 }
 0xdf7   :  { %v10788_v52 = vsel %vm152_vm0, %v23550_v40, 0.0 }
 0xdf8   :  { %10789 = vadd.xlane.f32.xlu0 %v10788_v52  ;;  %10786 = vadd.xlane.f32.xlu1 %v10785_v32 }
 0xdf9   :  { %v23556_v20 = vpop.eup %18874 }
 0xdfa   :  { %v10791_v7 = vsel %vm152_vm0, %v23556_v20, 0.0 }
 0xdfc   :  { %10792 = vadd.xlane.f32.xlu1 %v10791_v7 }
 0xe44   :  { %v10700_v22 = vpop.xlane.xlu0 %10699 }
 0xe45   :  { %18876 = vrcp.f32 %v10700_v22 }
 0xe48   :  { %v10703_v1 = vpop.xlane.xlu1 %10702 }
 0xe49   :  { %v10706_v38 = vpop.xlane.xlu0 %10705  ;;  %18878 = vrcp.f32 %v10703_v1 }
 0xe4a   :  { %18880 = vrcp.f32 %v10706_v38 }
 0xe4d   :  { %v10712_v34 = vpop.xlane.xlu0 %10711  ;;  %v10709_v35 = vpop.xlane.xlu1 %10708 }
 0xe4e   :  { %18882 = vrcp.f32 %v10709_v35 }
 0xe4f   :  { %18884 = vrcp.f32 %v10712_v34  ;;  %v10876_v34 = vsel %vm23056_vm15, %v19819_v49, 0 }
 0xe51   :  { %v10718_v27 = vpop.xlane.xlu0 %10717  ;;  %v10715_v21 = vpop.xlane.xlu1 %10714 }
 0xe52   :  { %18886 = vrcp.f32 %v10715_v21  ;;  %v18877_v4 = vpop.eup %18876 }
 0xe53   :  { %18888 = vrcp.f32 %v10718_v27  ;;  %v10795_v32 = vmul.f32 %v18877_v4, %v23409_v41 }
 0xe55   :  { %v10724_v51 = vpop.xlane.xlu0 %10723  ;;  %v10721_v26 = vpop.xlane.xlu1 %10720 }
 0xe56   :  { %v18879_v48 = vpop.eup %18878  ;;  %18890 = vrcp.f32 %v10721_v26 }
 0xe57   :  { %v10797_v52 = vmul.f32 %v18879_v48, %v23415_v6  ;;  %18892 = vrcp.f32 %v10724_v51  ;;  %v18881_v38 = vpop.eup %18880 }
 0xe58   :  { %v10799_v41 = vmul.f32 %v18881_v38, %v23417_v59  ;;  %v10877_v59 = vsel %vm23056_vm15, %v19808_v55, 0  ;;  %v10878_v38 = vsel %vm23056_vm15, %v19876_v16, 0 }
 0xe59   :  { %v10730_v7 = vpop.xlane.xlu0 %10729  ;;  %v10727_v22 = vpop.xlane.xlu1 %10726  ;;  %v10858_v1 = vpack.c.bf16 %v10797_v52, %v10795_v32 }
 0xe5a   :  { %18894 = vrcp.f32 %v10727_v22 }
 0xe5b   :  { %17631 = vmatmul.mubr.msk.bf16.vlgmr.msra.gmra.mxu0 %vm152_vm0, %v10858_v1  ;;  %v18883_v35 = vpop.eup %18882  ;;  %18896 = vrcp.f32 %v10730_v7 }
 0xe5c   :  { %17641 = vmatpush3.bf16.msra.mxu0 %v10876_v34  ;;  %17642 = vmatprep.mubr.msk.bf16.mxu0 %vm19197_vm1, %v25492_v50  ;;  %v10801_v6 = vmul.f32 %v18883_v35, %v23427_v0  ;;  %v18885_v4 = vpop.eup %18884 }
 0xe5d   :  { %v10736_v27 = vpop.xlane.xlu0 %10735  ;;  %v10733_v21 = vpop.xlane.xlu1 %10732  ;;  %17652 = vmatprep.subr.bf16.mxu0 %v25492_v50  ;;  %v10803_v48 = vmul.f32 %v18885_v4, %v23425_v15 }
 0xe5e   :  { %18898 = vrcp.f32 %v10733_v21  ;;  %v10859_v51 = vpack.c.bf16 %v10801_v6, %v10799_v41  ;;  %v10879_v21 = vsel %vm23056_vm15, %v19860_v36, 0 }
 0xe5f   :  { %v18887_v26 = vpop.eup %18886  ;;  %18900 = vrcp.f32 %v10736_v27 }
 0xe60   :  { %v10805_v32 = vmul.f32 %v18887_v26, %v23435_v39  ;;  %17637 = vmatmul.mubr.msk.bf16.vlgmr.msra.gmra.mxu1 %vm152_vm0, %v10859_v51  ;;  %v18889_v7 = vpop.eup %18888 }
 0xe61   :  { %v10742_v0 = vpop.xlane.xlu0 %10741  ;;  %v10739_v52 = vpop.xlane.xlu1 %10738  ;;  %17647 = vmatpush3.bf16.msra.mxu1 %v10877_v59  ;;  %17648 = vmatprep.mubr.msk.bf16.mxu1 %vm19197_vm1, %v25492_v50  ;;  %v10807_v39 = vmul.f32 %v18889_v7, %v23437_v13  ;;  %v10880_v59 = vsel %vm23056_vm15, %v19905_v12, 0 }
 0xe62   :  { %18902 = vrcp.f32 %v10739_v52  ;;  %v10860_v22 = vpack.c.bf16 %v10805_v32, %v10803_v48  ;;  %17658 = vmatprep.subr.bf16.mxu1 %v25492_v50 }
 0xe63   :  { %v18891_v15 = vpop.eup %18890  ;;  %18904 = vrcp.f32 %v10742_v0 }
 0xe64   :  { %v10809_v1 = vmul.f32 %v18891_v15, %v23447_v61  ;;  %17643 = vmatmul.mubr.msk.bf16.vlgmr.msra.gmra.mxu0 %vm152_vm0, %v10860_v22  ;;  %v18893_v41 = vpop.eup %18892 }
 0xe65   :  { %v10748_v34 = vpop.xlane.xlu0 %10747  ;;  %v10745_v35 = vpop.xlane.xlu1 %10744  ;;  %17653 = vmatpush3.bf16.msra.mxu0 %v10878_v38  ;;  %17654 = vmatprep.mubr.msk.bf16.mxu0 %vm19197_vm1, %v25492_v50  ;;  %v10811_v61 = vmul.f32 %v18893_v41, %v23445_v46 }
 0xe66   :  { %18906 = vrcp.f32 %v10745_v35  ;;  %v10861_v6 = vpack.c.bf16 %v10809_v1, %v10807_v39  ;;  %17664 = vmatprep.subr.bf16.mxu0 %v25492_v50  ;;  %v10881_v39 = vsel %vm23056_vm15, %v19896_v23, 0 }
 0xe67   :  { %v18895_v13 = vpop.eup %18894  ;;  %18908 = vrcp.f32 %v10748_v34 }
 0xe68   :  { %v10813_v27 = vmul.f32 %v18895_v13, %v23455_v30  ;;  %17649 = vmatmul.mubr.msk.bf16.vlgmr.msra.gmra.mxu1 %vm152_vm0, %v10861_v6  ;;  %v18897_v26 = vpop.eup %18896  ;;  %v10882_v6 = vsel %vm23056_vm15, %v19934_v58, 0 }
 0xe69   :  { %v10754_v4 = vpop.xlane.xlu0 %10753  ;;  %v10751_v51 = vpop.xlane.xlu1 %10750  ;;  %17659 = vmatpush3.bf16.msra.mxu1 %v10879_v21  ;;  %17660 = vmatprep.mubr.msk.bf16.mxu1 %vm19197_vm1, %v25492_v50  ;;  %v10815_v30 = vmul.f32 %v18897_v26, %v23457_v63 }
 0xe6a   :  { %18910 = vrcp.f32 %v10751_v51  ;;  %v10862_v48 = vpack.c.bf16 %v10813_v27, %v10811_v61  ;;  %17670 = vmatprep.subr.bf16.mxu1 %v25492_v50  ;;  %v10883_v51 = vsel %vm23056_vm15, %v19925_v9, 0 }
 0xe6b   :  { %v18899_v46 = vpop.eup %18898  ;;  %18912 = vrcp.f32 %v10754_v4 }
 0xe6c   :  { %v10817_v32 = vmul.f32 %v18899_v46, %v23467_v2  ;;  %17655 = vmatmul.mubr.msk.bf16.vlgmr.msra.gmra.mxu0 %vm152_vm0, %v10862_v48  ;;  %v18901_v7 = vpop.eup %18900 }
 0xe6d   :  { %v10760_v0 = vpop.xlane.xlu0 %10759  ;;  %v10757_v52 = vpop.xlane.xlu1 %10756  ;;  %17665 = vmatpush3.bf16.msra.mxu0 %v10880_v59  ;;  %17666 = vmatprep.mubr.msk.bf16.mxu0 %vm19197_vm1, %v25492_v50  ;;  %v10819_v2 = vmul.f32 %v18901_v7, %v23465_v28  ;;  %v10884_v59 = vsel %vm23056_vm15, %v19963_v43, 0 }
 0xe6e   :  { %18914 = vrcp.f32 %v10757_v52  ;;  %v10863_v22 = vpack.c.bf16 %v10817_v32, %v10815_v30  ;;  %17676 = vmatprep.subr.bf16.mxu0 %v25492_v50 }
 0xe6f   :  { %v18903_v63 = vpop.eup %18902  ;;  %18916 = vrcp.f32 %v10760_v0 }
 0xe70   :  { %v10821_v15 = vmul.f32 %v18903_v63, %v23475_v37  ;;  %17661 = vmatmul.mubr.msk.bf16.vlgmr.msra.gmra.mxu1 %vm152_vm0, %v10863_v22  ;;  %v18905_v34 = vpop.eup %18904 }
 0xe71   :  { %v10766_v1 = vpop.xlane.xlu0 %10765  ;;  %v10763_v38 = vpop.xlane.xlu1 %10762  ;;  %17671 = vmatpush3.bf16.msra.mxu1 %v10881_v39  ;;  %17672 = vmatprep.mubr.msk.bf16.mxu1 %vm19197_vm1, %v25492_v50  ;;  %v10823_v37 = vmul.f32 %v18905_v34, %v23477_v54 }
 0xe72   :  { %18918 = vrcp.f32 %v10763_v38  ;;  %v10864_v35 = vpack.c.bf16 %v10821_v15, %v10819_v2  ;;  %17682 = vmatprep.subr.bf16.mxu1 %v25492_v50  ;;  %v10885_v2 = vsel %vm23056_vm15, %v19954_v45, 0 }
 0xe73   :  { %v18907_v28 = vpop.eup %18906  ;;  %18920 = vrcp.f32 %v10766_v1 }
 0xe74   :  { %v10825_v41 = vmul.f32 %v18907_v28, %v23487_v18  ;;  %17667 = vmatmul.mubr.msk.bf16.vlgmr.msra.gmra.mxu0 %vm152_vm0, %v10864_v35  ;;  %v18909_v27 = vpop.eup %18908  ;;  %v10886_v35 = vsel %vm23056_vm15, %v19984_v53, 0 }
 0xe75   :  { %v10772_v13 = vpop.xlane.xlu0 %10771  ;;  %v10769_v61 = vpop.xlane.xlu1 %10768  ;;  %17677 = vmatpush3.bf16.msra.mxu0 %v10882_v6  ;;  %17678 = vmatprep.mubr.msk.bf16.mxu0 %vm19197_vm1, %v25492_v50  ;;  %v10827_v18 = vmul.f32 %v18909_v27, %v23485_v24 }
 0xe76   :  { %18922 = vrcp.f32 %v10769_v61  ;;  %v10865_v21 = vpack.c.bf16 %v10825_v41, %v10823_v37  ;;  %17688 = vmatprep.subr.bf16.mxu0 %v25492_v50 }
 0xe77   :  { %v18911_v54 = vpop.eup %18910  ;;  %18924 = vrcp.f32 %v10772_v13  ;;  %v10887_v13 = vsel %vm23056_vm15, %v19978_v10, 0 }
 0xe78   :  { %v10829_v4 = vmul.f32 %v18911_v54, %v23495_v5  ;;  %17673 = vmatmul.mubr.msk.bf16.vlgmr.msra.gmra.mxu1 %vm152_vm0, %v10865_v21  ;;  %v18913_v46 = vpop.eup %18912  ;;  %v10888_v54 = vsel %vm23056_vm15, %v19995_v47, 0 }
 0xe79   :  { %v10778_v26 = vpop.xlane.xlu0 %10777  ;;  %v10775_v48 = vpop.xlane.xlu1 %10774  ;;  %17683 = vmatpush3.bf16.msra.mxu1 %v10883_v51  ;;  %17684 = vmatprep.mubr.msk.bf16.mxu1 %vm19197_vm1, %v25492_v50  ;;  %v10831_v5 = vmul.f32 %v18913_v46, %v23497_v14  ;;  %v10889_v46 = vsel %vm23056_vm15, %v19992_v60, 0 }
 0xe7a   :  { %18926 = vrcp.f32 %v10775_v48  ;;  %v10866_v30 = vpack.c.bf16 %v10829_v4, %v10827_v18  ;;  %17694 = vmatprep.subr.bf16.mxu1 %v25492_v50 }
 0xe7b   :  { %v18915_v24 = vpop.eup %18914  ;;  %18928 = vrcp.f32 %v10778_v26 }
 0xe7c   :  { %v10833_v32 = vmul.f32 %v18915_v24, %v23507_v56  ;;  %17679 = vmatmul.mubr.msk.bf16.vlgmr.msra.gmra.mxu0 %vm152_vm0, %v10866_v30  ;;  %v18917_v7 = vpop.eup %18916 }
 0xe7d   :  { %v10784_v0 = vpop.xlane.xlu0 %10783  ;;  %v10781_v52 = vpop.xlane.xlu1 %10780  ;;  %17689 = vmatpush3.bf16.msra.mxu0 %v10884_v59  ;;  %17690 = vmatprep.mubr.msk.bf16.mxu0 %vm19197_vm1, %v25492_v50  ;;  %v10835_v56 = vmul.f32 %v18917_v7, %v23505_v44  ;;  %v26047_v59 = vld [vmem:[#allocation10_spill] sm:$0xff]  ;;  %v26052_v7 = vld [vmem:[#allocation19_spill] sm:$0xff] }
 0xe7e   :  { %18930 = vrcp.f32 %v10781_v52  ;;  %v10867_v22 = vpack.c.bf16 %v10833_v32, %v10831_v5  ;;  %17700 = vmatprep.subr.bf16.mxu0 %v25492_v50  ;;  %v26046_v5 = vld [vmem:[#allocation11_spill] sm:$0xff] }
 0xe7f   :  { %v18919_v14 = vpop.eup %18918  ;;  %18932 = vrcp.f32 %v10784_v0  ;;  %v11636_v0 = vrot.slane %v11632_v33, %v26047_v59  ;;  %v26048_v52 = vld [vmem:[#allocation15_spill] sm:$0xff] }
 0xe80   :  { %v10837_v63 = vmul.f32 %v18919_v14, %v23515_v57  ;;  %17685 = vmatmul.mubr.msk.bf16.vlgmr.msra.gmra.mxu1 %vm152_vm0, %v10867_v22  ;;  %v18921_v1 = vpop.eup %18920  ;;  %v26053_v22 = vld [vmem:[#allocation18_spill] sm:$0xff]  ;;  %v26054_v14 = vld [vmem:[#allocation23_spill] sm:$0xff] }
 0xe81   :  { %v10790_v15 = vpop.xlane.xlu0 %10789  ;;  %v10787_v39 = vpop.xlane.xlu1 %10786  ;;  %17695 = vmatpush3.bf16.msra.mxu1 %v10885_v2  ;;  %17696 = vmatprep.mubr.msk.bf16.mxu1 %vm19197_vm1, %v25492_v50  ;;  %v10839_v57 = vmul.f32 %v18921_v1, %v23517_v17  ;;  %vm23711_vm6 = vcmp.ne.s16.totalorder %v11636_v0, 0  ;;  %v26057_v2 = vld [vmem:[#allocation26_spill] sm:$0xff]  ;;  %v26060_v1 = vld [vmem:[#allocation43_spill] sm:$0xff] }
 0xe82   :  { %18934 = vrcp.f32 %v10787_v39  ;;  %v10868_v38 = vpack.c.bf16 %v10837_v63, %v10835_v56  ;;  %17706 = vmatprep.subr.bf16.mxu1 %v25492_v50  ;;  %v26055_v56 = vld [vmem:[#allocation22_spill] sm:$0xff]  ;;  %v26056_v63 = vld [vmem:[#allocation27_spill] sm:$0xff] }
 0xe83   :  { %v18923_v44 = vpop.eup %18922  ;;  %18936 = vrcp.f32 %v10790_v15  ;;  %v26058_v15 = vld [vmem:[#allocation35_spill] sm:$0xff]  ;;  %v26059_v39 = vld [vmem:[#allocation34_spill] sm:$0xff] }
 0xe84   :  { %v10841_v34 = vmul.f32 %v18923_v44, %v23526_v11  ;;  %17691 = vmatmul.mubr.msk.bf16.vlgmr.msra.gmra.mxu0 %vm152_vm0, %v10868_v38  ;;  %v18925_v37 = vpop.eup %18924  ;;  %v26061_v38 = vld [vmem:[#allocation42_spill] sm:$0xff]  ;;  %v26062_v44 = vld [vmem:[#allocation51_spill] sm:$0xff] }
 0xe85   :  { %v10793_v28 = vpop.xlane.xlu1 %10792  ;;  %17701 = vmatpush3.bf16.msra.mxu0 %v10886_v35  ;;  %17702 = vmatprep.mubr.msk.bf16.mxu0 %vm19197_vm1, %v25492_v50  ;;  %v10843_v17 = vmul.f32 %v18925_v37, %v23524_v31  ;;  %v26065_v35 = vld [vmem:[#allocation57_spill] sm:$0xff] }
 0xe86   :  { %18938 = vrcp.f32 %v10793_v28  ;;  %v10869_v41 = vpack.c.bf16 %v10841_v34, %v10839_v57  ;;  %17712 = vmatprep.subr.bf16.mxu0 %v25492_v50  ;;  %v26063_v57 = vld [vmem:[#allocation49_spill] sm:$0xff]  ;;  %v26064_v34 = vld [vmem:[#allocation28_spill] sm:$0xff]  ;;  %v26066_v28 = vld [vmem:[#allocation59_spill] sm:$0xff] }
 0xe87   :  { %v18927_v6 = vpop.eup %18926  ;;  %v26067_v37 = vld [vmem:[#allocation33_spill] sm:$0xff] }
 0xe88   :  { %v10845_v11 = vmul.f32 %v18927_v6, %v23532_v8  ;;  %17697 = vmatmul.mubr.msk.bf16.vlgmr.msra.gmra.mxu1 %vm152_vm0, %v10869_v41  ;;  %v18929_v61 = vpop.eup %18928  ;;  %v26068_v41 = vld [vmem:[#allocation36_spill] sm:$0xff]  ;;  %v26069_v6 = vld [vmem:[#allocation61_spill] sm:$0xff] }
 0xe89   :  { %17707 = vmatpush3.bf16.msra.mxu1 %v10887_v13  ;;  %17708 = vmatprep.mubr.msk.bf16.mxu1 %vm19197_vm1, %v25492_v50  ;;  %v10847_v31 = vmul.f32 %v18929_v61, %v23534_v42  ;;  %v26072_v13 = vld [vmem:[#allocation44_spill] sm:$0xff]  ;;  %v26073_v61 = vld [vmem:[#allocation63_spill] sm:$0xff] }
 0xe8a   :  { %v10870_v27 = vpack.c.bf16 %v10845_v11, %v10843_v17  ;;  %17718 = vmatprep.subr.bf16.mxu1 %v25492_v50  ;;  %v26070_v17 = vld [vmem:[#allocation62_spill] sm:$0xff]  ;;  %v26071_v11 = vld [vmem:[#allocation41_spill] sm:$0xff] }
 0xe8b   :  { %v18931_v21 = vpop.eup %18930 }
 0xe8c   :  { %v10849_v8 = vmul.f32 %v18931_v21, %v23542_v62  ;;  %17703 = vmatmul.mubr.msk.bf16.vlgmr.msra.gmra.mxu0 %vm152_vm0, %v10870_v27  ;;  %v18933_v18 = vpop.eup %18932  ;;  %v26074_v27 = vld [vmem:[#allocation64_spill] sm:$0xff]  ;;  %v26075_v21 = vld [vmem:[#allocation50_spill] sm:$0xff] }
 0xe8d   :  { %17713 = vmatpush3.bf16.msra.mxu0 %v10888_v54  ;;  %17714 = vmatprep.mubr.msk.bf16.mxu0 %vm19197_vm1, %v25492_v50  ;;  %v10851_v26 = vmul.f32 %v18933_v18, %v23540_v19  ;;  %v26078_v54 = vld [vmem:[#allocation66_spill] sm:$0xff] }
 0xe8e   :  { %v10871_v4 = vpack.c.bf16 %v10849_v8, %v10847_v31  ;;  %17724 = vmatprep.subr.bf16.mxu0 %v25492_v50  ;;  %v26076_v31 = vld [vmem:[#allocation52_spill] sm:$0xff]  ;;  %v26077_v8 = vld [vmem:[#allocation65_spill] sm:$0xff]  ;;  %v26079_v18 = vld [vmem:[#allocation58_spill] sm:$0xff] }
 0xe8f   :  { %v18935_v42 = vpop.eup %18934 }
 0xe90   :  { %v18937_v62 = vpop.eup %18936  ;;  %v10853_v48 = vmul.f32 %v18935_v42, %v23548_v29  ;;  %17709 = vmatmul.mubr.msk.bf16.vlgmr.msra.gmra.mxu1 %vm152_vm0, %v10871_v4  ;;  %v26080_v4 = vld [vmem:[#allocation60_spill] sm:$0xff] }
 0xe91   :  { %17719 = vmatpush3.bf16.msra.mxu1 %v10889_v46  ;;  %17720 = vmatprep.mubr.msk.bf16.mxu1 %vm19197_vm1, %v25492_v50  ;;  %v10855_v19 = vmul.f32 %v18937_v62, %v23550_v40  ;;  %v12678_v51 = vsel %vm23711_vm6, %v26080_v4, 0  ;;  %v26081_v42 = vld [vmem:[#allocation68_spill] sm:$0xff]  ;;  %v26082_v62 = vld [vmem:[#allocation67_spill] sm:$0xff]  ;;  %v13436_v40 = vsel %vm13435_vm10, 65537, %v25532_v25 }
 0xe92   :  { %v10872_v24 = vpack.c.bf16 %v10853_v48, %v10851_v26  ;;  %17730 = vmatprep.subr.bf16.mxu1 %v25492_v50  ;;  %v12679_v26 = vsel %vm23711_vm6, %v26082_v62, 0  ;;  %v26083_v46 = vld [vmem:[#allocation32_spill] sm:$0xff] }
 0xe93   :  { %v18939_v30 = vpop.eup %18938  ;;  %v18168_v25 = vld [vmem:[%s25349_s2 + $0x30] sm:$0xff]  }
 0xe94   :  { %v10857_v29 = vmul.f32 %v18939_v30, %v23556_v20  ;;  %17715 = vmatmul.mubr.msk.bf16.vlgmr.msra.gmra.mxu0 %vm152_vm0, %v10872_v24  ;;  %v26051_v20 = vld [vmem:[#allocation14_spill] sm:$0xff] }
 0xe95   :  { %17725 = vmatpush3.bf16.xpose.msra.mxu0 %v26046_v5  ;;  %17726 = vmatprep.mubr.msk.bf16.mxu0 %vm19197_vm1, %v25492_v50 }
 0xe96   :  { %v10873_v32 = vpack.c.bf16 %v10857_v29, %v10855_v19  ;;  %17736 = vmatprep.subr.bf16.mxu0 %v25492_v50  ;;  %v26085_v29 = vld [vmem:[#allocation85_spill] sm:$0xff] }
 0xe98   :  { %17721 = vmatmul.mubr.msk.bf16.vlgmr.msra.gmra.mxu1 %vm152_vm0, %v10873_v32 }
 0xe99   :  { %17731 = vmatpush3.bf16.xpose.msra.mxu1 %v26048_v52  ;;  %17732 = vmatprep.mubr.msk.bf16.mxu1 %vm19197_vm1, %v25492_v50 }
 0xe9a   :  { %17742 = vmatprep.subr.bf16.mxu1 %v25492_v50 }
 0xe9c   :  { %17727 = vmatmul.mubr.msk.bf16.vlgmr.msra.gmra.mxu0 %vm23711_vm6, %v26051_v20 }
 0xe9d   :  { %17737 = vmatpush3.bf16.xpose.msra.mxu0 %v26052_v7  ;;  %17738 = vmatprep.mubr.msk.bf16.mxu0 %vm19197_vm1, %v25492_v50 }
 0xe9e   :  { %17748 = vmatprep.subr.bf16.mxu0 %v25492_v50 }
 0xea0   :  { %17733 = vmatmul.mubr.msk.bf16.vlgmr.msra.gmra.mxu1 %vm23711_vm6, %v26053_v22 }
 0xea1   :  { %17743 = vmatpush3.bf16.xpose.msra.mxu1 %v26054_v14  ;;  %17744 = vmatprep.mubr.msk.bf16.mxu1 %vm19197_vm1, %v25492_v50 }
 0xea2   :  { %17754 = vmatprep.subr.bf16.mxu1 %v25492_v50 }
 0xea4   :  { %17739 = vmatmul.mubr.msk.bf16.vlgmr.msra.gmra.mxu0 %vm23711_vm6, %v26055_v56 }
 0xea5   :  { %17749 = vmatpush3.bf16.xpose.msra.mxu0 %v26056_v63  ;;  %17750 = vmatprep.mubr.msk.bf16.mxu0 %vm19197_vm1, %v25492_v50 }
 0xea6   :  { %17760 = vmatprep.subr.bf16.mxu0 %v25492_v50 }
 0xea8   :  { %17745 = vmatmul.mubr.msk.bf16.vlgmr.msra.gmra.mxu1 %vm23711_vm6, %v26057_v2 }
 0xea9   :  { %17755 = vmatpush3.bf16.xpose.msra.mxu1 %v26058_v15  ;;  %17756 = vmatprep.mubr.msk.bf16.mxu1 %vm19197_vm1, %v25492_v50 }
 0xeaa   :  { %17766 = vmatprep.subr.bf16.mxu1 %v25492_v50 }
 0xeac   :  { %17751 = vmatmul.mubr.msk.bf16.vlgmr.msra.gmra.mxu0 %vm23711_vm6, %v26059_v39 }
 0xead   :  { %17761 = vmatpush3.bf16.xpose.msra.mxu0 %v26060_v1  ;;  %17762 = vmatprep.mubr.msk.bf16.mxu0 %vm19197_vm1, %v25492_v50 }
 0xeae   :  { %17772 = vmatprep.subr.bf16.mxu0 %v25492_v50 }
 0xeb0   :  { %17757 = vmatmul.mubr.msk.bf16.vlgmr.msra.gmra.mxu1 %vm23711_vm6, %v26061_v38 }
 0xeb1   :  { %17767 = vmatpush3.bf16.xpose.msra.mxu1 %v26062_v44  ;;  %17768 = vmatprep.mubr.msk.bf16.mxu1 %vm19197_vm1, %v25492_v50 }
 0xeb2   :  { %17778 = vmatprep.subr.bf16.mxu1 %v25492_v50 }
 0xeb4   :  { %17763 = vmatmul.mubr.msk.bf16.vlgmr.msra.gmra.mxu0 %vm23711_vm6, %v26063_v57 }
 0xeb5   :  { %17773 = vmatpush3.bf16.xpose.msra.mxu0 %v26064_v34  ;;  %17774 = vmatprep.mubr.msk.bf16.mxu0 %vm19197_vm1, %v25492_v50 }
 0xeb6   :  { %17784 = vmatprep.subr.bf16.mxu0 %v25492_v50 }
 0xeb8   :  { %17769 = vmatmul.mubr.msk.bf16.vlgmr.msra.gmra.mxu1 %vm23711_vm6, %v26065_v35 }
 0xeb9   :  { %17779 = vmatpush3.bf16.xpose.msra.mxu1 %v26066_v28  ;;  %17780 = vmatprep.mubr.msk.bf16.mxu1 %vm19197_vm1, %v25492_v50 }
 0xeba   :  { %17790 = vmatprep.subr.bf16.mxu1 %v25492_v50 }
 0xebc   :  { %17775 = vmatmul.mubr.msk.bf16.vlgmr.msra.gmra.mxu0 %vm23711_vm6, %v26067_v37 }
 0xebd   :  { %17785 = vmatpush3.bf16.xpose.msra.mxu0 %v26068_v41  ;;  %17786 = vmatprep.mubr.msk.bf16.mxu0 %vm19197_vm1, %v25492_v50 }
 0xebe   :  { %17796 = vmatprep.subr.bf16.mxu0 %v25492_v50 }
 0xec0   :  { %17781 = vmatmul.mubr.msk.bf16.vlgmr.msra.gmra.mxu1 %vm23711_vm6, %v26069_v6 }
 0xec1   :  { %17791 = vmatpush3.bf16.xpose.msra.mxu1 %v26070_v17  ;;  %17792 = vmatprep.mubr.msk.bf16.mxu1 %vm19197_vm1, %v25492_v50 }
 0xec2   :  { %17802 = vmatprep.subr.bf16.mxu1 %v25492_v50 }
 0xec4   :  { %17787 = vmatmul.mubr.msk.bf16.vlgmr.msra.gmra.mxu0 %vm23711_vm6, %v26071_v11 }
 0xec5   :  { %17797 = vmatpush3.bf16.xpose.msra.mxu0 %v26072_v13  ;;  %17798 = vmatprep.mubr.msk.bf16.mxu0 %vm19197_vm1, %v25492_v50 }
 0xec6   :  { %17808 = vmatprep.subr.bf16.mxu0 %v25492_v50 }
 0xec8   :  { %17793 = vmatmul.mubr.msk.bf16.vlgmr.msra.gmra.mxu1 %vm23711_vm6, %v26073_v61 }
 0xec9   :  { %17803 = vmatpush3.bf16.xpose.msra.mxu1 %v26074_v27  ;;  %17804 = vmatprep.mubr.msk.bf16.mxu1 %vm19197_vm1, %v25492_v50 }
 0xeca   :  { %17814 = vmatprep.subr.bf16.mxu1 %v25492_v50 }
 0xecc   :  { %17799 = vmatmul.mubr.msk.bf16.vlgmr.msra.gmra.mxu0 %vm23711_vm6, %v26075_v21  ;;  %v26097_v21 = vld [vmem:[#allocation88_spill] sm:$0xff] }
 0xecd   :  { %17809 = vmatpush3.bf16.xpose.msra.mxu0 %v26076_v31  ;;  %17810 = vmatprep.mubr.msk.bf16.mxu0 %vm19197_vm1, %v25492_v50 }
 0xece   :  { %17820 = vmatprep.subr.bf16.mxu0 %v25492_v50 }
 0xed0   :  { %17805 = vmatmul.mubr.msk.bf16.vlgmr.msra.gmra.mxu1 %vm23711_vm6, %v26077_v8  ;;  %v26091_v8 = vld [vmem:[#allocation2_spill] sm:$0xff] }
 0xed1   :  { %17815 = vmatpush3.bf16.xpose.msra.mxu1 %v26078_v54  ;;  %17816 = vmatprep.mubr.msk.bf16.mxu1 %vm19197_vm1, %v25492_v50 }
 0xed2   :  { %17826 = vmatprep.subr.bf16.mxu1 %v25492_v50 }
 0xed4   :  { %17811 = vmatmul.mubr.msk.bf16.vlgmr.msra.gmra.mxu0 %vm23711_vm6, %v26079_v18  ;;  %v26089_v18 = vld [vmem:[#allocation86_spill] sm:$0xff] }
 0xed5   :  { %17821 = vmatpush3.bf16.msra.mxu0 %v12678_v51  ;;  %17822 = vmatprep.mubr.msk.bf16.mxu0 %vm19197_vm1, %v25492_v50  ;;  %v26087_v51 = vld [vmem:[#allocation29_spill] sm:$0xff] }
 0xed6   :  { %17832 = vmatprep.subr.bf16.mxu0 %v25492_v50 }
 0xed8   :  { %17817 = vmatmul.mubr.msk.bf16.vlgmr.msra.gmra.mxu1 %vm23711_vm6, %v26081_v42 }
 0xed9   :  { %17827 = vmatpush3.bf16.msra.mxu1 %v12679_v26  ;;  %17828 = vmatprep.mubr.msk.bf16.mxu1 %vm19197_vm1, %v25492_v50 }
 0xeda   :  { %17838 = vmatprep.subr.bf16.mxu1 %v25492_v50 }
 0xf1b   :  { %v10927_v48 = vpop.f32.mrf.mxu0 }
 0xf1c   :  { %v23832_v30 = vadd.f32 %v10927_v48, %v26083_v46 }
 0xf1d   :  { %v17632_v24 = vpop.f32.mrf.mxu0 }
 0xf1e   :  { %26084 = vst [vmem:[#allocation12_spill] sm:$0xff] %v23832_v30 }
 0xf1f   :  { %v10930_v19 = vpop.f32.mrf.mxu0 }
 0xf20   :  { %v23835_v33 = vadd.f32 %v10930_v19, %v26085_v29  ;;  %v10971_v32 = vpop.f32.mrf.mxu1  ;;  %v26093_v19 = vld [vmem:[#allocation87_spill] sm:$0xff] }
 0xf21   :  { %v17633_v0 = vpop.f32.mrf.mxu0  ;;  %v23838_v42 = vadd.f32 %v10971_v32, %v26087_v51 }
 0xf22   :  { %26086 = vst [vmem:[#allocation69_spill] sm:$0xff] %v23835_v33  ;;  %v17638_v26 = vpop.f32.mrf.mxu1  ;;  %v26095_v0 = vld [vmem:[#allocation3_spill] sm:$0xff] }
 0xf23   :  { %26088 = vst [vmem:[#allocation13_spill] sm:$0xff] %v23838_v42 }
 0xf24   :  { %v10974_v62 = vpop.f32.mrf.mxu1  ;;  %v11015_v4 = vpop.f32.mrf.mxu0 }
 0xf25   :  { %v23841_v54 = vadd.f32 %v10974_v62, %v26089_v18  ;;  %v23844_v31 = vadd.f32 %v11015_v4, %v26091_v8  ;;  %v26099_v62 = vld [vmem:[#allocation40_spill] sm:$0xff] }
 0xf26   :  { %v17639_v48 = vpop.f32.mrf.mxu1  ;;  %v17644_v46 = vpop.f32.mrf.mxu0 }
 0xf27   :  { %26090 = vst [vmem:[#allocation70_spill] sm:$0xff] %v23841_v54  ;;  %26092 = vst [vmem:[#allocation16_spill] sm:$0xff] %v23844_v31  ;;  %v26101_v54 = vld [vmem:[#allocation89_spill] sm:$0xff] }
 0xf28   :  { %v11018_v24 = vpop.f32.mrf.mxu0  ;;  %v11059_v30 = vpop.f32.mrf.mxu1 }
 0xf29   :  { %v23847_v29 = vadd.f32 %v11018_v24, %v26093_v19  ;;  %v23850_v33 = vadd.f32 %v11059_v30, %v26095_v0  ;;  %v26103_v19 = vld [vmem:[#allocation37_spill] sm:$0xff] }
 0xf2a   :  { %v17645_v32 = vpop.f32.mrf.mxu0  ;;  %v17650_v51 = vpop.f32.mrf.mxu1 }
 0xf2b   :  { %26094 = vst [vmem:[#allocation71_spill] sm:$0xff] %v23847_v29  ;;  %26096 = vst [vmem:[#allocation17_spill] sm:$0xff] %v23850_v33  ;;  %v26105_v29 = vld [vmem:[#allocation90_spill] sm:$0xff] }
 0xf2c   :  { %v11062_v26 = vpop.f32.mrf.mxu1  ;;  %v11103_v42 = vpop.f32.mrf.mxu0 }
 0xf2d   :  { %v23853_v18 = vadd.f32 %v11062_v26, %v26097_v21  ;;  %v23856_v8 = vadd.f32 %v11103_v42, %v26099_v62  ;;  %v26107_v26 = vld [vmem:[#allocation4_spill] sm:$0xff] }
 0xf2e   :  { %v17651_v4 = vpop.f32.mrf.mxu1  ;;  %v17656_v48 = vpop.f32.mrf.mxu0 }
 0xf2f   :  { %26098 = vst [vmem:[#allocation72_spill] sm:$0xff] %v23853_v18  ;;  %26100 = vst [vmem:[#allocation20_spill] sm:$0xff] %v23856_v8  ;;  %v26109_v18 = vld [vmem:[#allocation91_spill] sm:$0xff] }
 0xf30   :  { %v11106_v46 = vpop.f32.mrf.mxu0  ;;  %v11147_v31 = vpop.f32.mrf.mxu1 }
 0xf31   :  { %v23859_v24 = vadd.f32 %v11106_v46, %v26101_v54  ;;  %v23862_v30 = vadd.f32 %v11147_v31, %v26103_v19  ;;  %v26111_v46 = vld [vmem:[#allocation5_spill] sm:$0xff] }
 0xf32   :  { %v17657_v0 = vpop.f32.mrf.mxu0  ;;  %v17662_v32 = vpop.f32.mrf.mxu1 }
 0xf33   :  { %26102 = vst [vmem:[#allocation73_spill] sm:$0xff] %v23859_v24  ;;  %26104 = vst [vmem:[#allocation21_spill] sm:$0xff] %v23862_v30  ;;  %v26113_v24 = vld [vmem:[#allocation92_spill] sm:$0xff] }
 0xf34   :  { %v11150_v51 = vpop.f32.mrf.mxu1  ;;  %v11191_v33 = vpop.f32.mrf.mxu0 }
 0xf35   :  { %v23865_v21 = vadd.f32 %v11150_v51, %v26105_v29  ;;  %v23868_v42 = vadd.f32 %v11191_v33, %v26107_v26  ;;  %v26115_v51 = vld [vmem:[#allocation48_spill] sm:$0xff] }
 0xf36   :  { %v17663_v62 = vpop.f32.mrf.mxu1  ;;  %v17668_v4 = vpop.f32.mrf.mxu0 }
 0xf37   :  { %26106 = vst [vmem:[#allocation74_spill] sm:$0xff] %v23865_v21  ;;  %26108 = vst [vmem:[#allocation24_spill] sm:$0xff] %v23868_v42  ;;  %v26117_v21 = vld [vmem:[#allocation93_spill] sm:$0xff] }
 0xf38   :  { %v11194_v48 = vpop.f32.mrf.mxu0  ;;  %v11235_v8 = vpop.f32.mrf.mxu1 }
 0xf39   :  { %v23871_v54 = vadd.f32 %v11194_v48, %v26109_v18  ;;  %v23874_v31 = vadd.f32 %v11235_v8, %v26111_v46  ;;  %v26119_v48 = vld [vmem:[#allocation46_spill] sm:$0xff] }
 0xf3a   :  { %v17669_v19 = vpop.f32.mrf.mxu0  ;;  %v17674_v0 = vpop.f32.mrf.mxu1 }
 0xf3b   :  { %26110 = vst [vmem:[#allocation75_spill] sm:$0xff] %v23871_v54  ;;  %26112 = vst [vmem:[#allocation25_spill] sm:$0xff] %v23874_v31  ;;  %v26121_v54 = vld [vmem:[#allocation94_spill] sm:$0xff] }
 0xf3c   :  { %v11238_v32 = vpop.f32.mrf.mxu1  ;;  %v11279_v30 = vpop.f32.mrf.mxu0 }
 0xf3d   :  { %v23877_v29 = vadd.f32 %v11238_v32, %v26113_v24  ;;  %v23880_v33 = vadd.f32 %v11279_v30, %v26115_v51  ;;  %v26123_v32 = vld [vmem:[#allocation6_spill] sm:$0xff] }
 0xf3e   :  { %v17675_v26 = vpop.f32.mrf.mxu1  ;;  %v17680_v62 = vpop.f32.mrf.mxu0 }
 0xf3f   :  { %26114 = vst [vmem:[#allocation76_spill] sm:$0xff] %v23877_v29  ;;  %26116 = vst [vmem:[#allocation30_spill] sm:$0xff] %v23880_v33  ;;  %v26125_v29 = vld [vmem:[#allocation95_spill] sm:$0xff] }
 0xf40   :  { %v11282_v4 = vpop.f32.mrf.mxu0  ;;  %v11323_v42 = vpop.f32.mrf.mxu1 }
 0xf41   :  { %v23883_v18 = vadd.f32 %v11282_v4, %v26117_v21  ;;  %v23886_v8 = vadd.f32 %v11323_v42, %v26119_v48  ;;  %v26127_v4 = vld [vmem:[#allocation7_spill] sm:$0xff] }
 0xf42   :  { %v17681_v46 = vpop.f32.mrf.mxu0  ;;  %v17686_v19 = vpop.f32.mrf.mxu1 }
 0xf43   :  { %26118 = vst [vmem:[#allocation77_spill] sm:$0xff] %v23883_v18  ;;  %26120 = vst [vmem:[#allocation31_spill] sm:$0xff] %v23886_v8  ;;  %v26129_v18 = vld [vmem:[#allocation96_spill] sm:$0xff] }
 0xf44   :  { %v11326_v0 = vpop.f32.mrf.mxu1  ;;  %v11367_v31 = vpop.f32.mrf.mxu0 }
 0xf45   :  { %v23889_v24 = vadd.f32 %v11326_v0, %v26121_v54  ;;  %v23892_v30 = vadd.f32 %v11367_v31, %v26123_v32  ;;  %v26131_v0 = vld [vmem:[#allocation56_spill] sm:$0xff] }
 0xf46   :  { %v17687_v51 = vpop.f32.mrf.mxu1  ;;  %v17692_v26 = vpop.f32.mrf.mxu0 }
 0xf47   :  { %26122 = vst [vmem:[#allocation78_spill] sm:$0xff] %v23889_v24  ;;  %26124 = vst [vmem:[#allocation38_spill] sm:$0xff] %v23892_v30  ;;  %v26133_v24 = vld [vmem:[#allocation97_spill] sm:$0xff] }
 0xf48   :  { %v11370_v62 = vpop.f32.mrf.mxu0  ;;  %v11411_v33 = vpop.f32.mrf.mxu1 }
 0xf49   :  { %v23895_v21 = vadd.f32 %v11370_v62, %v26125_v29  ;;  %v23898_v42 = vadd.f32 %v11411_v33, %v26127_v4  ;;  %v26135_v62 = vld [vmem:[#allocation54_spill] sm:$0xff] }
 0xf4a   :  { %v17693_v48 = vpop.f32.mrf.mxu0  ;;  %v17698_v46 = vpop.f32.mrf.mxu1 }
 0xf4b   :  { %26126 = vst [vmem:[#allocation79_spill] sm:$0xff] %v23895_v21  ;;  %26128 = vst [vmem:[#allocation39_spill] sm:$0xff] %v23898_v42  ;;  %v26137_v21 = vld [vmem:[#allocation98_spill] sm:$0xff] }
 0xf4c   :  { %v11414_v19 = vpop.f32.mrf.mxu1  ;;  %v11455_v8 = vpop.f32.mrf.mxu0 }
 0xf4d   :  { %v23901_v54 = vadd.f32 %v11414_v19, %v26129_v18  ;;  %v23904_v31 = vadd.f32 %v11455_v8, %v26131_v0  ;;  %v26139_v19 = vld [vmem:[#allocation8_spill] sm:$0xff] }
 0xf4e   :  { %v17699_v32 = vpop.f32.mrf.mxu1  ;;  %v17704_v51 = vpop.f32.mrf.mxu0 }
 0xf4f   :  { %26130 = vst [vmem:[#allocation80_spill] sm:$0xff] %v23901_v54  ;;  %26132 = vst [vmem:[#allocation47_spill] sm:$0xff] %v23904_v31  ;;  %v26141_v54 = vld [vmem:[#allocation99_spill] sm:$0xff] }
 0xf50   :  { %v11458_v26 = vpop.f32.mrf.mxu0  ;;  %v11499_v30 = vpop.f32.mrf.mxu1 }
 0xf51   :  { %v23907_v29 = vadd.f32 %v11458_v26, %v26133_v24  ;;  %v23910_v33 = vadd.f32 %v11499_v30, %v26135_v62  ;;  %v26143_v26 = vld [vmem:[#allocation9_spill] sm:$0xff] }
 0xf52   :  { %v17705_v4 = vpop.f32.mrf.mxu0  ;;  %v17710_v48 = vpop.f32.mrf.mxu1 }
 0xf53   :  { %26134 = vst [vmem:[#allocation81_spill] sm:$0xff] %v23907_v29  ;;  %26136 = vst [vmem:[#allocation45_spill] sm:$0xff] %v23910_v33 }
 0xf54   :  { %v11502_v46 = vpop.f32.mrf.mxu1  ;;  %v11543_v42 = vpop.f32.mrf.mxu0 }
 0xf55   :  { %v23913_v18 = vadd.f32 %v11502_v46, %v26137_v21  ;;  %v23916_v8 = vadd.f32 %v11543_v42, %v26139_v19  ;;  %v26145_v21 = vld [vmem:[#allocation100_spill] sm:$0xff] }
 0xf56   :  { %v17711_v0 = vpop.f32.mrf.mxu1  ;;  %v17716_v32 = vpop.f32.mrf.mxu0 }
 0xf57   :  { %26138 = vst [vmem:[#allocation82_spill] sm:$0xff] %v23913_v18  ;;  %26140 = vst [vmem:[#allocation55_spill] sm:$0xff] %v23916_v8 }
 0xf58   :  { %v11546_v51 = vpop.f32.mrf.mxu0  ;;  %v11587_v31 = vpop.f32.mrf.mxu1 }
 0xf59   :  { %v23919_v24 = vadd.f32 %v11546_v51, %v26141_v54  ;;  %v23922_v30 = vadd.f32 %v11587_v31, %v26143_v26 }
 0xf5a   :  { %v17717_v62 = vpop.f32.mrf.mxu0  ;;  %v17722_v4 = vpop.f32.mrf.mxu1 }
 0xf5b   :  { %26142 = vst [vmem:[#allocation83_spill] sm:$0xff] %v23919_v24  ;;  %26144 = vst [vmem:[#allocation53_spill] sm:$0xff] %v23922_v30 }
 0xf5c   :  { %v11590_v48 = vpop.f32.mrf.mxu1  ;;  %v23924_v33 = vpop.f32.mrf.mxu0 }
 0xf5d   :  { %v23927_v46 = vadd.f32 %v11590_v48, %v26145_v21  ;;  %v12310_v42 = vsel %vm152_vm0, %v23924_v33, -inf }
 0xf5e   :  { %12311 = vmax.xlane.f32.xlu0 %v12310_v42  ;;  %v17723_v19 = vpop.f32.mrf.mxu1  ;;  %v17728_v0 = vpop.f32.mrf.mxu0 }
 0xf5f   :  { %26146 = vst [vmem:[#allocation84_spill] sm:$0xff] %v23927_v46 }
 0xf60   :  { %v23931_v32 = vpop.f32.mrf.mxu0  ;;  %v23933_v54 = vpop.f32.mrf.mxu1 }
 0xf61   :  { %v12313_v31 = vsel %vm152_vm0, %v23931_v32, -inf  ;;  %v12316_v51 = vsel %vm152_vm0, %v23933_v54, -inf }
 0xf62   :  { %12314 = vmax.xlane.f32.xlu1 %v12313_v31  ;;  %v17729_v26 = vpop.f32.mrf.mxu0  ;;  %12317 = vmax.xlane.f32.xlu0 %v12316_v51  ;;  %v17734_v62 = vpop.f32.mrf.mxu1 }
 0xf64   :  { %v23939_v4 = vpop.f32.mrf.mxu1  ;;  %v23941_v48 = vpop.f32.mrf.mxu0 }
 0xf65   :  { %v12322_v21 = vsel %vm152_vm0, %v23941_v48, -inf  ;;  %v12319_v42 = vsel %vm152_vm0, %v23939_v4, -inf }
 0xf66   :  { %v17740_v19 = vpop.f32.mrf.mxu0  ;;  %12323 = vmax.xlane.f32.xlu0 %v12322_v21  ;;  %12320 = vmax.xlane.f32.xlu1 %v12319_v42  ;;  %v17735_v0 = vpop.f32.mrf.mxu1 }
 0xf68   :  { %v23947_v46 = vpop.f32.mrf.mxu0  ;;  %v23949_v31 = vpop.f32.mrf.mxu1 }
 0xf69   :  { %v12325_v51 = vsel %vm152_vm0, %v23947_v46, -inf  ;;  %v12328_v26 = vsel %vm152_vm0, %v23949_v31, -inf }
 0xf6a   :  { %v17741_v62 = vpop.f32.mrf.mxu0  ;;  %12326 = vmax.xlane.f32.xlu1 %v12325_v51  ;;  %12329 = vmax.xlane.f32.xlu0 %v12328_v26  ;;  %v17746_v30 = vpop.f32.mrf.mxu1 }
 0xf6c   :  { %v23955_v24 = vpop.f32.mrf.mxu1  ;;  %v23957_v19 = vpop.f32.mrf.mxu0 }
 0xf6d   :  { %v12334_v21 = vsel %vm152_vm0, %v23957_v19, -inf  ;;  %v12331_v42 = vsel %vm152_vm0, %v23955_v24, -inf }
 0xf6e   :  { %v17752_v0 = vpop.f32.mrf.mxu0  ;;  %12335 = vmax.xlane.f32.xlu0 %v12334_v21  ;;  %12332 = vmax.xlane.f32.xlu1 %v12331_v42  ;;  %v17747_v8 = vpop.f32.mrf.mxu1 }
 0xf70   :  { %v23963_v18 = vpop.f32.mrf.mxu0  ;;  %v23965_v62 = vpop.f32.mrf.mxu1 }
 0xf71   :  { %v12337_v30 = vsel %vm152_vm0, %v23963_v18, -inf  ;;  %v12340_v51 = vsel %vm152_vm0, %v23965_v62, -inf }
 0xf72   :  { %v17753_v26 = vpop.f32.mrf.mxu0  ;;  %12338 = vmax.xlane.f32.xlu1 %v12337_v30  ;;  %12341 = vmax.xlane.f32.xlu0 %v12340_v51  ;;  %v17758_v29 = vpop.f32.mrf.mxu1 }
 0xf74   :  { %v23971_v27 = vpop.f32.mrf.mxu1  ;;  %v23973_v0 = vpop.f32.mrf.mxu0 }
 0xf75   :  { %v12346_v8 = vsel %vm152_vm0, %v23973_v0, -inf  ;;  %v12343_v21 = vsel %vm152_vm0, %v23971_v27, -inf }
 0xf76   :  { %v17764_v42 = vpop.f32.mrf.mxu0  ;;  %12347 = vmax.xlane.f32.xlu0 %v12346_v8  ;;  %12344 = vmax.xlane.f32.xlu1 %v12343_v21  ;;  %v17759_v61 = vpop.f32.mrf.mxu1 }
 0xf78   :  { %v23979_v13 = vpop.f32.mrf.mxu0  ;;  %v23981_v26 = vpop.f32.mrf.mxu1 }
 0xf79   :  { %v12349_v29 = vsel %vm152_vm0, %v23979_v13, -inf  ;;  %v12352_v30 = vsel %vm152_vm0, %v23981_v26, -inf }
 0xf7a   :  { %v17765_v51 = vpop.f32.mrf.mxu0  ;;  %12350 = vmax.xlane.f32.xlu1 %v12349_v29  ;;  %12353 = vmax.xlane.f32.xlu0 %v12352_v30  ;;  %v17770_v11 = vpop.f32.mrf.mxu1 }
 0xf7c   :  { %v23987_v17 = vpop.f32.mrf.mxu1  ;;  %v23989_v42 = vpop.f32.mrf.mxu0 }
 0xf7d   :  { %v12358_v61 = vsel %vm152_vm0, %v23989_v42, -inf  ;;  %v12355_v8 = vsel %vm152_vm0, %v23987_v17, -inf }
 0xf7e   :  { %v17776_v21 = vpop.f32.mrf.mxu0  ;;  %12359 = vmax.xlane.f32.xlu0 %v12358_v61  ;;  %12356 = vmax.xlane.f32.xlu1 %v12355_v8  ;;  %v17771_v6 = vpop.f32.mrf.mxu1 }
 0xf80   :  { %v23995_v41 = vpop.f32.mrf.mxu0  ;;  %v23997_v51 = vpop.f32.mrf.mxu1 }
 0xf81   :  { %v12361_v11 = vsel %vm152_vm0, %v23995_v41, -inf  ;;  %v12364_v29 = vsel %vm152_vm0, %v23997_v51, -inf }
 0xf82   :  { %v17777_v30 = vpop.f32.mrf.mxu0  ;;  %12362 = vmax.xlane.f32.xlu1 %v12361_v11  ;;  %12365 = vmax.xlane.f32.xlu0 %v12364_v29  ;;  %v17782_v37 = vpop.f32.mrf.mxu1 }
 0xf84   :  { %v24003_v28 = vpop.f32.mrf.mxu1  ;;  %v24005_v21 = vpop.f32.mrf.mxu0 }
 0xf85   :  { %v12370_v6 = vsel %vm152_vm0, %v24005_v21, -inf  ;;  %v12367_v61 = vsel %vm152_vm0, %v24003_v28, -inf }
 0xf86   :  { %v17788_v8 = vpop.f32.mrf.mxu0  ;;  %12371 = vmax.xlane.f32.xlu0 %v12370_v6  ;;  %12368 = vmax.xlane.f32.xlu1 %v12367_v61  ;;  %v17783_v35 = vpop.f32.mrf.mxu1 }
 0xf88   :  { %v24011_v34 = vpop.f32.mrf.mxu0  ;;  %v24013_v30 = vpop.f32.mrf.mxu1 }
 0xf89   :  { %v12373_v37 = vsel %vm152_vm0, %v24011_v34, -inf  ;;  %v12376_v11 = vsel %vm152_vm0, %v24013_v30, -inf }
 0xf8a   :  { %v17789_v29 = vpop.f32.mrf.mxu0  ;;  %12374 = vmax.xlane.f32.xlu1 %v12373_v37  ;;  %12377 = vmax.xlane.f32.xlu0 %v12376_v11  ;;  %v17794_v57 = vpop.f32.mrf.mxu1 }
 0xf8c   :  { %v24019_v44 = vpop.f32.mrf.mxu1  ;;  %v24021_v8 = vpop.f32.mrf.mxu0 }
 0xf8d   :  { %v12382_v35 = vsel %vm152_vm0, %v24021_v8, -inf  ;;  %v12379_v6 = vsel %vm152_vm0, %v24019_v44, -inf }
 0xf8e   :  { %v17800_v61 = vpop.f32.mrf.mxu0  ;;  %12383 = vmax.xlane.f32.xlu0 %v12382_v35  ;;  %12380 = vmax.xlane.f32.xlu1 %v12379_v6  ;;  %v17795_v38 = vpop.f32.mrf.mxu1 }
 0xf90   :  { %v24027_v1 = vpop.f32.mrf.mxu0  ;;  %v24029_v29 = vpop.f32.mrf.mxu1 }
 0xf91   :  { %v12385_v57 = vsel %vm152_vm0, %v24027_v1, -inf  ;;  %v12388_v37 = vsel %vm152_vm0, %v24029_v29, -inf }
 0xf92   :  { %v17801_v11 = vpop.f32.mrf.mxu0  ;;  %12386 = vmax.xlane.f32.xlu1 %v12385_v57  ;;  %12389 = vmax.xlane.f32.xlu0 %v12388_v37  ;;  %v17806_v39 = vpop.f32.mrf.mxu1 }
 0xf94   :  { %v24035_v15 = vpop.f32.mrf.mxu1  ;;  %v24037_v61 = vpop.f32.mrf.mxu0 }
 0xf95   :  { %v12394_v38 = vsel %vm152_vm0, %v24037_v61, -inf  ;;  %v12391_v35 = vsel %vm152_vm0, %v24035_v15, -inf }
 0xf96   :  { %v17812_v6 = vpop.f32.mrf.mxu0  ;;  %12395 = vmax.xlane.f32.xlu0 %v12394_v38  ;;  %12392 = vmax.xlane.f32.xlu1 %v12391_v35  ;;  %v17807_v2 = vpop.f32.mrf.mxu1 }
 0xf98   :  { %v24043_v63 = vpop.f32.mrf.mxu0  ;;  %v24045_v11 = vpop.f32.mrf.mxu1 }
 0xf99   :  { %v12397_v39 = vsel %vm152_vm0, %v24043_v63, -inf  ;;  %v12400_v57 = vsel %vm152_vm0, %v24045_v11, -inf }
 0xf9a   :  { %v17813_v37 = vpop.f32.mrf.mxu0  ;;  %12398 = vmax.xlane.f32.xlu1 %v12397_v39  ;;  %12401 = vmax.xlane.f32.xlu0 %v12400_v57  ;;  %v17818_v56 = vpop.f32.mrf.mxu1 }
 0xf9c   :  { %v24051_v14 = vpop.f32.mrf.mxu1 }
 0xf9d   :  { %v12403_v38 = vsel %vm152_vm0, %v24051_v14, -inf }
 0xf9e   :  { %12404 = vmax.xlane.f32.xlu1 %v12403_v38  ;;  %v17819_v2 = vpop.f32.mrf.mxu1 }
 0xfe7   :  { %v12312_v35 = vpop.xlane.xlu0 %12311 }
 0xfe8   :  { %v12406_v6 = vsub.f32 %v23924_v33, %v12312_v35 }
 0xfea   :  { %v12438_v22 = vmul.f32 1.442695, %v12406_v6 }
 0xfeb   :  { %v12315_v7 = vpop.xlane.xlu1 %12314  ;;  %v12318_v20 = vpop.xlane.xlu0 %12317 }
 0xfec   :  { %18940 = vpow2.f32 %v12438_v22  ;;  %v12407_v52 = vsub.f32 %v23931_v32, %v12315_v7  ;;  %v12408_v39 = vsub.f32 %v23933_v54, %v12318_v20 }
 0xfee   :  { %v12440_v57 = vmul.f32 1.442695, %v12407_v52  ;;  %v12442_v56 = vmul.f32 1.442695, %v12408_v39 }
 0xfef   :  { %v12324_v37 = vpop.xlane.xlu0 %12323  ;;  %v12321_v59 = vpop.xlane.xlu1 %12320 }
 0xff0   :  { %18942 = vpow2.f32 %v12440_v57  ;;  %v12410_v5 = vsub.f32 %v23941_v48, %v12324_v37  ;;  %v12409_v38 = vsub.f32 %v23939_v4, %v12321_v59 }
 0xff1   :  { %18944 = vpow2.f32 %v12442_v56 }
 0xff2   :  { %v12446_v2 = vmul.f32 1.442695, %v12410_v5  ;;  %v12444_v33 = vmul.f32 1.442695, %v12409_v38 }
 0xff3   :  { %v12327_v35 = vpop.xlane.xlu1 %12326  ;;  %v12330_v6 = vpop.xlane.xlu0 %12329 }
 0xff4   :  { %18946 = vpow2.f32 %v12446_v2  ;;  %v12411_v22 = vsub.f32 %v23947_v46, %v12327_v35  ;;  %v12412_v7 = vsub.f32 %v23949_v31, %v12330_v6 }
 0xff5   :  { %18948 = vpow2.f32 %v12444_v33 }
 0xff6   :  { %v12448_v52 = vmul.f32 1.442695, %v12411_v22  ;;  %v12450_v20 = vmul.f32 1.442695, %v12412_v7 }
 0xff7   :  { %v12336_v32 = vpop.xlane.xlu0 %12335  ;;  %v12333_v54 = vpop.xlane.xlu1 %12332 }
 0xff8   :  { %18950 = vpow2.f32 %v12448_v52  ;;  %v12414_v48 = vsub.f32 %v23957_v19, %v12336_v32  ;;  %v12413_v59 = vsub.f32 %v23955_v24, %v12333_v54 }
 0xff9   :  { %v24064_v4 = vpop.eup %18940  ;;  %18952 = vpow2.f32 %v12450_v20 }
 0xffa   :  { %v12454_v5 = vmul.f32 1.442695, %v12414_v48  ;;  %v12452_v39 = vmul.f32 1.442695, %v12413_v59  ;;  %v12502_v46 = vsel %vm152_vm0, %v24064_v4, 0.0 }
 0xffb   :  { %v12339_v57 = vpop.xlane.xlu1 %12338  ;;  %v12342_v31 = vpop.xlane.xlu0 %12341  ;;  %12503 = vadd.xlane.f32.xlu0 %v12502_v46 }
 0xffc   :  { %18954 = vpow2.f32 %v12454_v5  ;;  %v12415_v56 = vsub.f32 %v23963_v18, %v12339_v57  ;;  %v12416_v37 = vsub.f32 %v23965_v62, %v12342_v31 }
 0xffd   :  { %v24070_v38 = vpop.eup %18942  ;;  %18956 = vpow2.f32 %v12452_v39 }
 0xffe   :  { %v24072_v24 = vpop.eup %18944  ;;  %v12456_v19 = vmul.f32 1.442695, %v12415_v56  ;;  %v12458_v2 = vmul.f32 1.442695, %v12416_v37  ;;  %v12505_v33 = vsel %vm152_vm0, %v24070_v38, 0.0 }
 0xfff   :  { %v12348_v35 = vpop.xlane.xlu0 %12347  ;;  %v12345_v6 = vpop.xlane.xlu1 %12344  ;;  %v12508_v22 = vsel %vm152_vm0, %v24072_v24, 0.0  ;;  %12506 = vadd.xlane.f32.xlu1 %v12505_v33 }
0x1000   :  { %18958 = vpow2.f32 %v12456_v19  ;;  %v12418_v18 = vsub.f32 %v23973_v0, %v12348_v35  ;;  %v12417_v62 = vsub.f32 %v23971_v27, %v12345_v6  ;;  %12509 = vadd.xlane.f32.xlu0 %v12508_v22 }
0x1001   :  { %v24080_v7 = vpop.eup %18946  ;;  %18960 = vpow2.f32 %v12458_v2 }
0x1002   :  { %v24082_v52 = vpop.eup %18948  ;;  %v12462_v20 = vmul.f32 1.442695, %v12418_v18  ;;  %v12460_v32 = vmul.f32 1.442695, %v12417_v62  ;;  %v12514_v54 = vsel %vm152_vm0, %v24080_v7, 0.0 }
0x1003   :  { %v12351_v48 = vpop.xlane.xlu1 %12350  ;;  %v12354_v59 = vpop.xlane.xlu0 %12353  ;;  %v12511_v5 = vsel %vm152_vm0, %v24082_v52, 0.0 }
0x1004   :  { %18962 = vpow2.f32 %v12462_v20  ;;  %v12419_v0 = vsub.f32 %v23979_v13, %v12351_v48  ;;  %v12420_v27 = vsub.f32 %v23981_v26, %v12354_v59  ;;  %12515 = vadd.xlane.f32.xlu0 %v12514_v54  ;;  %12512 = vadd.xlane.f32.xlu1 %v12511_v5 }
0x1005   :  { %v24090_v39 = vpop.eup %18950  ;;  %18964 = vpow2.f32 %v12460_v32 }
0x1006   :  { %v24092_v46 = vpop.eup %18952  ;;  %v12464_v57 = vmul.f32 1.442695, %v12419_v0  ;;  %v12466_v31 = vmul.f32 1.442695, %v12420_v27  ;;  %v12517_v56 = vsel %vm152_vm0, %v24090_v39, 0.0 }
0x1007   :  { %v12360_v37 = vpop.xlane.xlu0 %12359  ;;  %v12357_v19 = vpop.xlane.xlu1 %12356  ;;  %v12520_v2 = vsel %vm152_vm0, %v24092_v46, 0.0 }
0x1008   :  { %18966 = vpow2.f32 %v12464_v57  ;;  %v12422_v13 = vsub.f32 %v23989_v42, %v12360_v37  ;;  %v12421_v26 = vsub.f32 %v23987_v17, %v12357_v19  ;;  %12521 = vadd.xlane.f32.xlu0 %v12520_v2  ;;  %12518 = vadd.xlane.f32.xlu1 %v12517_v56 }
0x1009   :  { %v24100_v33 = vpop.eup %18954  ;;  %18968 = vpow2.f32 %v12466_v31 }
0x100a   :  { %v24102_v35 = vpop.eup %18956  ;;  %v12470_v6 = vmul.f32 1.442695, %v12422_v13  ;;  %v12468_v22 = vmul.f32 1.442695, %v12421_v26  ;;  %v12526_v18 = vsel %vm152_vm0, %v24100_v33, 0.0 }
0x100b   :  { %v12363_v62 = vpop.xlane.xlu1 %12362  ;;  %v12366_v20 = vpop.xlane.xlu0 %12365  ;;  %v12523_v32 = vsel %vm152_vm0, %v24102_v35, 0.0 }
0x100c   :  { %18970 = vpow2.f32 %v12470_v6  ;;  %v12423_v17 = vsub.f32 %v23995_v41, %v12363_v62  ;;  %v12424_v42 = vsub.f32 %v23997_v51, %v12366_v20  ;;  %12527 = vadd.xlane.f32.xlu0 %v12526_v18  ;;  %12524 = vadd.xlane.f32.xlu1 %v12523_v32 }
0x100d   :  { %v24110_v54 = vpop.eup %18958  ;;  %18972 = vpow2.f32 %v12468_v22 }
0x100e   :  { %v24112_v48 = vpop.eup %18960  ;;  %v12472_v59 = vmul.f32 1.442695, %v12423_v17  ;;  %v12474_v5 = vmul.f32 1.442695, %v12424_v42  ;;  %v12529_v0 = vsel %vm152_vm0, %v24110_v54, 0.0 }
0x100f   :  { %v12372_v27 = vpop.xlane.xlu0 %12371  ;;  %v12369_v57 = vpop.xlane.xlu1 %12368  ;;  %v12532_v31 = vsel %vm152_vm0, %v24112_v48, 0.0 }
0x1010   :  { %18974 = vpow2.f32 %v12472_v59  ;;  %v12426_v41 = vsub.f32 %v24005_v21, %v12372_v27  ;;  %v12425_v51 = vsub.f32 %v24003_v28, %v12369_v57  ;;  %12533 = vadd.xlane.f32.xlu0 %v12532_v31  ;;  %12530 = vadd.xlane.f32.xlu1 %v12529_v0 }
0x1011   :  { %v24120_v56 = vpop.eup %18962  ;;  %18976 = vpow2.f32 %v12474_v5 }
0x1012   :  { %v24122_v37 = vpop.eup %18964  ;;  %v12478_v19 = vmul.f32 1.442695, %v12426_v41  ;;  %v12476_v2 = vmul.f32 1.442695, %v12425_v51  ;;  %v12538_v13 = vsel %vm152_vm0, %v24120_v56, 0.0 }
0x1013   :  { %v12375_v26 = vpop.xlane.xlu1 %12374  ;;  %v12378_v6 = vpop.xlane.xlu0 %12377  ;;  %v12535_v22 = vsel %vm152_vm0, %v24122_v37, 0.0 }
0x1014   :  { %18978 = vpow2.f32 %v12478_v19  ;;  %v12427_v28 = vsub.f32 %v24011_v34, %v12375_v26  ;;  %v12428_v21 = vsub.f32 %v24013_v30, %v12378_v6  ;;  %12539 = vadd.xlane.f32.xlu0 %v12538_v13  ;;  %12536 = vadd.xlane.f32.xlu1 %v12535_v22 }
0x1015   :  { %v24130_v18 = vpop.eup %18966  ;;  %18980 = vpow2.f32 %v12476_v2 }
0x1016   :  { %v24132_v62 = vpop.eup %18968  ;;  %v12480_v20 = vmul.f32 1.442695, %v12427_v28  ;;  %v12482_v32 = vmul.f32 1.442695, %v12428_v21  ;;  %v12541_v17 = vsel %vm152_vm0, %v24130_v18, 0.0 }
0x1017   :  { %v12384_v42 = vpop.xlane.xlu0 %12383  ;;  %v12381_v59 = vpop.xlane.xlu1 %12380  ;;  %v12544_v5 = vsel %vm152_vm0, %v24132_v62, 0.0 }
0x1018   :  { %18982 = vpow2.f32 %v12480_v20  ;;  %v12430_v34 = vsub.f32 %v24021_v8, %v12384_v42  ;;  %v12429_v30 = vsub.f32 %v24019_v44, %v12381_v59  ;;  %12545 = vadd.xlane.f32.xlu0 %v12544_v5  ;;  %12542 = vadd.xlane.f32.xlu1 %v12541_v17 }
0x1019   :  { %v24140_v0 = vpop.eup %18970  ;;  %18984 = vpow2.f32 %v12482_v32 }
0x101a   :  { %v24142_v27 = vpop.eup %18972  ;;  %v12486_v57 = vmul.f32 1.442695, %v12430_v34  ;;  %v12484_v31 = vmul.f32 1.442695, %v12429_v30  ;;  %v12550_v41 = vsel %vm152_vm0, %v24140_v0, 0.0 }
0x101b   :  { %v12387_v51 = vpop.xlane.xlu1 %12386  ;;  %v12390_v19 = vpop.xlane.xlu0 %12389  ;;  %v12547_v2 = vsel %vm152_vm0, %v24142_v27, 0.0 }
0x101c   :  { %18986 = vpow2.f32 %v12486_v57  ;;  %v12431_v44 = vsub.f32 %v24027_v1, %v12387_v51  ;;  %v12432_v8 = vsub.f32 %v24029_v29, %v12390_v19  ;;  %12551 = vadd.xlane.f32.xlu0 %v12550_v41  ;;  %12548 = vadd.xlane.f32.xlu1 %v12547_v2 }
0x101d   :  { %v24150_v13 = vpop.eup %18974  ;;  %18988 = vpow2.f32 %v12484_v31 }
0x101e   :  { %v24152_v26 = vpop.eup %18976  ;;  %v12488_v6 = vmul.f32 1.442695, %v12431_v44  ;;  %v12490_v22 = vmul.f32 1.442695, %v12432_v8  ;;  %v12553_v28 = vsel %vm152_vm0, %v24150_v13, 0.0 }
0x101f   :  { %v12396_v21 = vpop.xlane.xlu0 %12395  ;;  %v12393_v20 = vpop.xlane.xlu1 %12392  ;;  %v12556_v32 = vsel %vm152_vm0, %v24152_v26, 0.0 }
0x1020   :  { %18990 = vpow2.f32 %v12488_v6  ;;  %v12434_v1 = vsub.f32 %v24037_v61, %v12396_v21  ;;  %v12433_v29 = vsub.f32 %v24035_v15, %v12393_v20  ;;  %12557 = vadd.xlane.f32.xlu0 %v12556_v32  ;;  %12554 = vadd.xlane.f32.xlu1 %v12553_v28 }
0x1021   :  { %v24160_v17 = vpop.eup %18978  ;;  %18992 = vpow2.f32 %v12490_v22 }
0x1022   :  { %v24162_v42 = vpop.eup %18980  ;;  %v12494_v59 = vmul.f32 1.442695, %v12434_v1  ;;  %v12492_v5 = vmul.f32 1.442695, %v12433_v29  ;;  %v12562_v34 = vsel %vm152_vm0, %v24160_v17, 0.0 }
0x1023   :  { %v12399_v30 = vpop.xlane.xlu1 %12398  ;;  %v12402_v57 = vpop.xlane.xlu0 %12401  ;;  %v12559_v31 = vsel %vm152_vm0, %v24162_v42, 0.0 }
0x1024   :  { %18994 = vpow2.f32 %v12494_v59  ;;  %v12435_v15 = vsub.f32 %v24043_v63, %v12399_v30  ;;  %12563 = vadd.xlane.f32.xlu0 %v12562_v34  ;;  %v12436_v61 = vsub.f32 %v24045_v11, %v12402_v57  ;;  %12560 = vadd.xlane.f32.xlu1 %v12559_v31 }
0x1025   :  { %v24170_v41 = vpop.eup %18982  ;;  %18996 = vpow2.f32 %v12492_v5 }
0x1026   :  { %v24172_v51 = vpop.eup %18984  ;;  %v12496_v19 = vmul.f32 1.442695, %v12435_v15  ;;  %v12498_v2 = vmul.f32 1.442695, %v12436_v61  ;;  %v12565_v44 = vsel %vm152_vm0, %v24170_v41, 0.0 }
0x1027   :  { %v12568_v8 = vsel %vm152_vm0, %v24172_v51, 0.0  ;;  %v12405_v6 = vpop.xlane.xlu1 %12404 }
0x1028   :  { %18998 = vpow2.f32 %v12496_v19  ;;  %12569 = vadd.xlane.f32.xlu0 %v12568_v8  ;;  %12566 = vadd.xlane.f32.xlu1 %v12565_v44  ;;  %v12437_v63 = vsub.f32 %v24051_v14, %v12405_v6 }
0x1029   :  { %v24179_v11 = vpop.eup %18986  ;;  %19000 = vpow2.f32 %v12498_v2 }
0x102a   :  { %v24181_v22 = vpop.eup %18988  ;;  %v12500_v28 = vmul.f32 1.442695, %v12437_v63  ;;  %v12574_v21 = vsel %vm152_vm0, %v24179_v11, 0.0 }
0x102b   :  { %v12571_v20 = vsel %vm152_vm0, %v24181_v22, 0.0 }
0x102c   :  { %19002 = vpow2.f32 %v12500_v28  ;;  %12575 = vadd.xlane.f32.xlu0 %v12574_v21  ;;  %12572 = vadd.xlane.f32.xlu1 %v12571_v20 }
0x102d   :  { %v24187_v32 = vpop.eup %18990 }
0x102e   :  { %v24189_v1 = vpop.eup %18992  ;;  %v12577_v14 = vsel %vm152_vm0, %v24187_v32, 0.0 }
0x102f   :  { %v12580_v29 = vsel %vm152_vm0, %v24189_v1, 0.0 }
0x1030   :  { %12581 = vadd.xlane.f32.xlu0 %v12580_v29  ;;  %12578 = vadd.xlane.f32.xlu1 %v12577_v14 }
0x1031   :  { %v24195_v59 = vpop.eup %18994 }
0x1032   :  { %v24197_v5 = vpop.eup %18996  ;;  %v12586_v34 = vsel %vm152_vm0, %v24195_v59, 0.0 }
0x1033   :  { %v12583_v30 = vsel %vm152_vm0, %v24197_v5, 0.0 }
0x1034   :  { %12587 = vadd.xlane.f32.xlu0 %v12586_v34  ;;  %12584 = vadd.xlane.f32.xlu1 %v12583_v30 }
0x1035   :  { %v24203_v57 = vpop.eup %18998 }
0x1036   :  { %v24205_v31 = vpop.eup %19000  ;;  %v12589_v15 = vsel %vm152_vm0, %v24203_v57, 0.0 }
0x1037   :  { %v12592_v61 = vsel %vm152_vm0, %v24205_v31, 0.0 }
0x1038   :  { %12593 = vadd.xlane.f32.xlu0 %v12592_v61  ;;  %12590 = vadd.xlane.f32.xlu1 %v12589_v15 }
0x1039   :  { %v24211_v19 = vpop.eup %19002 }
0x103a   :  { %v12595_v2 = vsel %vm152_vm0, %v24211_v19, 0.0 }
0x103c   :  { %12596 = vadd.xlane.f32.xlu1 %v12595_v2 }
0x1084   :  { %v12504_v44 = vpop.xlane.xlu0 %12503 }
0x1085   :  { %19004 = vrcp.f32 %v12504_v44 }
0x1088   :  { %v12507_v8 = vpop.xlane.xlu1 %12506 }
0x1089   :  { %v12510_v6 = vpop.xlane.xlu0 %12509  ;;  %19006 = vrcp.f32 %v12507_v8 }
0x108a   :  { %19008 = vrcp.f32 %v12510_v6 }
0x108d   :  { %v12516_v63 = vpop.xlane.xlu0 %12515  ;;  %v12513_v28 = vpop.xlane.xlu1 %12512 }
0x108e   :  { %19010 = vrcp.f32 %v12513_v28 }
0x108f   :  { %19012 = vrcp.f32 %v12516_v63  ;;  %v12680_v63 = vsel %vm23711_vm6, %v19819_v49, 0 }
0x1091   :  { %v12522_v21 = vpop.xlane.xlu0 %12521  ;;  %v12519_v20 = vpop.xlane.xlu1 %12518 }
0x1092   :  { %19014 = vrcp.f32 %v12519_v20  ;;  %v19005_v14 = vpop.eup %19004 }
0x1093   :  { %19016 = vrcp.f32 %v12522_v21  ;;  %v12599_v15 = vmul.f32 %v19005_v14, %v24064_v4 }
0x1095   :  { %v12528_v29 = vpop.xlane.xlu0 %12527  ;;  %v12525_v34 = vpop.xlane.xlu1 %12524 }
0x1096   :  { %v19007_v30 = vpop.eup %19006  ;;  %19018 = vrcp.f32 %v12525_v34 }
0x1097   :  { %v12601_v61 = vmul.f32 %v19007_v30, %v24070_v38  ;;  %19020 = vrcp.f32 %v12528_v29  ;;  %v19009_v6 = vpop.eup %19008 }
0x1098   :  { %v12603_v4 = vmul.f32 %v19009_v6, %v24072_v24  ;;  %v12681_v24 = vsel %vm23711_vm6, %v19808_v55, 0  ;;  %v12682_v6 = vsel %vm23711_vm6, %v19876_v16, 0 }
0x1099   :  { %v12662_v2 = vpack.c.bf16 %v12601_v61, %v12599_v15  ;;  %v12534_v44 = vpop.xlane.xlu0 %12533  ;;  %v12531_v8 = vpop.xlane.xlu1 %12530 }
0x109a   :  { %19022 = vrcp.f32 %v12531_v8 }
0x109b   :  { %17823 = vmatmul.mubr.msk.bf16.vlgmr.msra.gmra.mxu0 %vm152_vm0, %v12662_v2  ;;  %v19011_v28 = vpop.eup %19010  ;;  %19024 = vrcp.f32 %v12534_v44 }
0x109c   :  { %17833 = vmatpush3.bf16.msra.mxu0 %v12680_v63  ;;  %17834 = vmatprep.mubr.msk.bf16.mxu0 %vm19197_vm1, %v25492_v50  ;;  %v12605_v38 = vmul.f32 %v19011_v28, %v24082_v52  ;;  %v19013_v14 = vpop.eup %19012 }
0x109d   :  { %v12540_v21 = vpop.xlane.xlu0 %12539  ;;  %v12537_v20 = vpop.xlane.xlu1 %12536  ;;  %17844 = vmatprep.subr.bf16.mxu0 %v25492_v50  ;;  %v12607_v30 = vmul.f32 %v19013_v14, %v24080_v7 }
0x109e   :  { %v12663_v29 = vpack.c.bf16 %v12605_v38, %v12603_v4  ;;  %19026 = vrcp.f32 %v12537_v20  ;;  %v12683_v20 = vsel %vm23711_vm6, %v19860_v36, 0 }
0x109f   :  { %v19015_v34 = vpop.eup %19014  ;;  %19028 = vrcp.f32 %v12540_v21 }
0x10a0   :  { %v12609_v15 = vmul.f32 %v19015_v34, %v24090_v39  ;;  %17829 = vmatmul.mubr.msk.bf16.vlgmr.msra.gmra.mxu1 %vm152_vm0, %v12663_v29  ;;  %v19017_v2 = vpop.eup %19016 }
0x10a1   :  { %v12546_v52 = vpop.xlane.xlu0 %12545  ;;  %v12543_v61 = vpop.xlane.xlu1 %12542  ;;  %17839 = vmatpush3.bf16.msra.mxu1 %v12681_v24  ;;  %17840 = vmatprep.mubr.msk.bf16.mxu1 %vm19197_vm1, %v25492_v50  ;;  %v12611_v39 = vmul.f32 %v19017_v2, %v24092_v46  ;;  %v12684_v24 = vsel %vm23711_vm6, %v19905_v12, 0 }
0x10a2   :  { %v12664_v44 = vpack.c.bf16 %v12609_v15, %v12607_v30  ;;  %19030 = vrcp.f32 %v12543_v61  ;;  %17850 = vmatprep.subr.bf16.mxu1 %v25492_v50 }
0x10a3   :  { %v19019_v7 = vpop.eup %19018  ;;  %19032 = vrcp.f32 %v12546_v52 }
0x10a4   :  { %v12613_v8 = vmul.f32 %v19019_v7, %v24102_v35  ;;  %17835 = vmatmul.mubr.msk.bf16.vlgmr.msra.gmra.mxu0 %vm152_vm0, %v12664_v44  ;;  %v19021_v4 = vpop.eup %19020 }
0x10a5   :  { %v12552_v63 = vpop.xlane.xlu0 %12551  ;;  %v12549_v28 = vpop.xlane.xlu1 %12548  ;;  %17845 = vmatpush3.bf16.msra.mxu0 %v12682_v6  ;;  %17846 = vmatprep.mubr.msk.bf16.mxu0 %vm19197_vm1, %v25492_v50  ;;  %v12615_v35 = vmul.f32 %v19021_v4, %v24100_v33 }
0x10a6   :  { %v12665_v38 = vpack.c.bf16 %v12613_v8, %v12611_v39  ;;  %19034 = vrcp.f32 %v12549_v28  ;;  %17856 = vmatprep.subr.bf16.mxu0 %v25492_v50  ;;  %v12685_v39 = vsel %vm23711_vm6, %v19896_v23, 0 }
0x10a7   :  { %v19023_v46 = vpop.eup %19022  ;;  %19036 = vrcp.f32 %v12552_v63 }
0x10a8   :  { %v12617_v21 = vmul.f32 %v19023_v46, %v24110_v54  ;;  %17841 = vmatmul.mubr.msk.bf16.vlgmr.msra.gmra.mxu1 %vm152_vm0, %v12665_v38  ;;  %v19025_v34 = vpop.eup %19024  ;;  %v12686_v38 = vsel %vm23711_vm6, %v19934_v58, 0 }
0x10a9   :  { %v12558_v14 = vpop.xlane.xlu0 %12557  ;;  %v12555_v29 = vpop.xlane.xlu1 %12554  ;;  %17851 = vmatpush3.bf16.msra.mxu1 %v12683_v20  ;;  %17852 = vmatprep.mubr.msk.bf16.mxu1 %vm19197_vm1, %v25492_v50  ;;  %v12619_v54 = vmul.f32 %v19025_v34, %v24112_v48 }
0x10aa   :  { %v12666_v30 = vpack.c.bf16 %v12617_v21, %v12615_v35  ;;  %19038 = vrcp.f32 %v12555_v29  ;;  %17862 = vmatprep.subr.bf16.mxu1 %v25492_v50  ;;  %v12687_v29 = vsel %vm23711_vm6, %v19925_v9, 0 }
0x10ab   :  { %v19027_v33 = vpop.eup %19026  ;;  %19040 = vrcp.f32 %v12558_v14 }
0x10ac   :  { %v12621_v15 = vmul.f32 %v19027_v33, %v24122_v37  ;;  %17847 = vmatmul.mubr.msk.bf16.vlgmr.msra.gmra.mxu0 %vm152_vm0, %v12666_v30  ;;  %v19029_v2 = vpop.eup %19028 }
0x10ad   :  { %v12564_v52 = vpop.xlane.xlu0 %12563  ;;  %v12561_v61 = vpop.xlane.xlu1 %12560  ;;  %17857 = vmatpush3.bf16.msra.mxu0 %v12684_v24  ;;  %17858 = vmatprep.mubr.msk.bf16.mxu0 %vm19197_vm1, %v25492_v50  ;;  %v12623_v37 = vmul.f32 %v19029_v2, %v24120_v56  ;;  %v12688_v24 = vsel %vm23711_vm6, %v19963_v43, 0 }
0x10ae   :  { %v12667_v44 = vpack.c.bf16 %v12621_v15, %v12619_v54  ;;  %19042 = vrcp.f32 %v12561_v61  ;;  %17868 = vmatprep.subr.bf16.mxu0 %v25492_v50 }
0x10af   :  { %v19031_v48 = vpop.eup %19030  ;;  %19044 = vrcp.f32 %v12564_v52 }
0x10b0   :  { %v12625_v7 = vmul.f32 %v19031_v48, %v24130_v18  ;;  %17853 = vmatmul.mubr.msk.bf16.vlgmr.msra.gmra.mxu1 %vm152_vm0, %v12667_v44  ;;  %v19033_v63 = vpop.eup %19032 }
0x10b1   :  { %v12570_v8 = vpop.xlane.xlu0 %12569  ;;  %v12567_v6 = vpop.xlane.xlu1 %12566  ;;  %17863 = vmatpush3.bf16.msra.mxu1 %v12685_v39  ;;  %17864 = vmatprep.mubr.msk.bf16.mxu1 %vm19197_vm1, %v25492_v50  ;;  %v12627_v18 = vmul.f32 %v19033_v63, %v24132_v62 }
0x10b2   :  { %v12668_v28 = vpack.c.bf16 %v12625_v7, %v12623_v37  ;;  %19046 = vrcp.f32 %v12567_v6  ;;  %17874 = vmatprep.subr.bf16.mxu1 %v25492_v50  ;;  %v12689_v37 = vsel %vm23711_vm6, %v19954_v45, 0 }
0x10b3   :  { %v19035_v56 = vpop.eup %19034  ;;  %19048 = vrcp.f32 %v12570_v8 }
0x10b4   :  { %v12629_v4 = vmul.f32 %v19035_v56, %v24142_v27  ;;  %17859 = vmatmul.mubr.msk.bf16.vlgmr.msra.gmra.mxu0 %vm152_vm0, %v12668_v28  ;;  %v19037_v21 = vpop.eup %19036  ;;  %v12690_v28 = vsel %vm23711_vm6, %v19984_v53, 0 }
0x10b5   :  { %v12576_v46 = vpop.xlane.xlu0 %12575  ;;  %v12573_v35 = vpop.xlane.xlu1 %12572  ;;  %17869 = vmatpush3.bf16.msra.mxu0 %v12686_v38  ;;  %17870 = vmatprep.mubr.msk.bf16.mxu0 %vm19197_vm1, %v25492_v50  ;;  %v12631_v27 = vmul.f32 %v19037_v21, %v24140_v0 }
0x10b6   :  { %v12669_v20 = vpack.c.bf16 %v12629_v4, %v12627_v18  ;;  %19050 = vrcp.f32 %v12573_v35  ;;  %17880 = vmatprep.subr.bf16.mxu0 %v25492_v50 }
0x10b7   :  { %v19039_v62 = vpop.eup %19038  ;;  %19052 = vrcp.f32 %v12576_v46  ;;  %v12691_v46 = vsel %vm23711_vm6, %v19978_v10, 0 }
0x10b8   :  { %v12633_v14 = vmul.f32 %v19039_v62, %v24150_v13  ;;  %17865 = vmatmul.mubr.msk.bf16.vlgmr.msra.gmra.mxu1 %vm152_vm0, %v12669_v20  ;;  %v19041_v33 = vpop.eup %19040  ;;  %v12692_v62 = vsel %vm23711_vm6, %v19995_v47, 0 }
0x10b9   :  { %v12582_v34 = vpop.xlane.xlu0 %12581  ;;  %v12579_v30 = vpop.xlane.xlu1 %12578  ;;  %17875 = vmatpush3.bf16.msra.mxu1 %v12687_v29  ;;  %17876 = vmatprep.mubr.msk.bf16.mxu1 %vm19197_vm1, %v25492_v50  ;;  %v12635_v13 = vmul.f32 %v19041_v33, %v24152_v26 }
0x10ba   :  { %v12670_v54 = vpack.c.bf16 %v12633_v14, %v12631_v27  ;;  %19054 = vrcp.f32 %v12579_v30  ;;  %17886 = vmatprep.subr.bf16.mxu1 %v25492_v50  ;;  %v12693_v30 = vsel %vm23711_vm6, %v19992_v60, 0 }
0x10bb   :  { %v19043_v0 = vpop.eup %19042  ;;  %19056 = vrcp.f32 %v12582_v34 }
0x10bc   :  { %v12637_v15 = vmul.f32 %v19043_v0, %v24162_v42  ;;  %17871 = vmatmul.mubr.msk.bf16.vlgmr.msra.gmra.mxu0 %vm152_vm0, %v12670_v54  ;;  %v19045_v2 = vpop.eup %19044 }
0x10bd   :  { %v12588_v52 = vpop.xlane.xlu0 %12587  ;;  %v12585_v61 = vpop.xlane.xlu1 %12584  ;;  %17881 = vmatpush3.bf16.msra.mxu0 %v12688_v24  ;;  %17882 = vmatprep.mubr.msk.bf16.mxu0 %vm19197_vm1, %v25492_v50  ;;  %v12639_v42 = vmul.f32 %v19045_v2, %v24160_v17  ;;  %v26157_v2 = vld [vmem:[#allocation23_spill] sm:$0xff] }
0x10be   :  { %v12671_v44 = vpack.c.bf16 %v12637_v15, %v12635_v13  ;;  %19058 = vrcp.f32 %v12585_v61  ;;  %17892 = vmatprep.subr.bf16.mxu0 %v25492_v50  ;;  %v26149_v13 = vld [vmem:[#allocation11_spill] sm:$0xff]  ;;  %v26150_v15 = vld [vmem:[#allocation10_spill] sm:$0xff] }
0x10bf   :  { %v19047_v26 = vpop.eup %19046  ;;  %19060 = vrcp.f32 %v12588_v52  ;;  %v13440_v24 = vrot.slane %v13436_v40, %v26150_v15  ;;  %v26151_v52 = vld [vmem:[#allocation15_spill] sm:$0xff]  ;;  %v26156_v61 = vld [vmem:[#allocation18_spill] sm:$0xff] }
0x10c0   :  { %v12641_v48 = vmul.f32 %v19047_v26, %v24170_v41  ;;  %17877 = vmatmul.mubr.msk.bf16.vlgmr.msra.gmra.mxu1 %vm152_vm0, %v12671_v44  ;;  %v19049_v8 = vpop.eup %19048  ;;  %v26158_v44 = vld [vmem:[#allocation22_spill] sm:$0xff]  ;;  %v26159_v26 = vld [vmem:[#allocation27_spill] sm:$0xff] }
0x10c1   :  { %v12594_v7 = vpop.xlane.xlu0 %12593  ;;  %v12591_v39 = vpop.xlane.xlu1 %12590  ;;  %17887 = vmatpush3.bf16.msra.mxu1 %v12689_v37  ;;  %17888 = vmatprep.mubr.msk.bf16.mxu1 %vm19197_vm1, %v25492_v50  ;;  %v12643_v41 = vmul.f32 %v19049_v8, %v24172_v51  ;;  %vm24366_vm11 = vcmp.ne.s16.totalorder %v13440_v24, 0  ;;  %v26162_v37 = vld [vmem:[#allocation34_spill] sm:$0xff]  ;;  %v26165_v8 = vld [vmem:[#allocation51_spill] sm:$0xff] }
0x10c2   :  { %v12672_v6 = vpack.c.bf16 %v12641_v48, %v12639_v42  ;;  %19062 = vrcp.f32 %v12591_v39  ;;  %17898 = vmatprep.subr.bf16.mxu1 %v25492_v50  ;;  %v26160_v42 = vld [vmem:[#allocation26_spill] sm:$0xff]  ;;  %v26161_v48 = vld [vmem:[#allocation35_spill] sm:$0xff] }
0x10c3   :  { %v19051_v17 = vpop.eup %19050  ;;  %19064 = vrcp.f32 %v12594_v7  ;;  %v26163_v7 = vld [vmem:[#allocation43_spill] sm:$0xff]  ;;  %v26164_v39 = vld [vmem:[#allocation42_spill] sm:$0xff] }
0x10c4   :  { %v12645_v63 = vmul.f32 %v19051_v17, %v24181_v22  ;;  %17883 = vmatmul.mubr.msk.bf16.vlgmr.msra.gmra.mxu0 %vm152_vm0, %v12672_v6  ;;  %v19053_v18 = vpop.eup %19052  ;;  %v26166_v6 = vld [vmem:[#allocation49_spill] sm:$0xff]  ;;  %v26167_v17 = vld [vmem:[#allocation28_spill] sm:$0xff] }
0x10c5   :  { %v12597_v56 = vpop.xlane.xlu1 %12596  ;;  %17893 = vmatpush3.bf16.msra.mxu0 %v12690_v28  ;;  %17894 = vmatprep.mubr.msk.bf16.mxu0 %vm19197_vm1, %v25492_v50  ;;  %v12647_v51 = vmul.f32 %v19053_v18, %v24179_v11  ;;  %v26170_v28 = vld [vmem:[#allocation33_spill] sm:$0xff] }
0x10c6   :  { %19066 = vrcp.f32 %v12597_v56  ;;  %v12673_v4 = vpack.c.bf16 %v12645_v63, %v12643_v41  ;;  %17904 = vmatprep.subr.bf16.mxu0 %v25492_v50  ;;  %v26168_v41 = vld [vmem:[#allocation57_spill] sm:$0xff]  ;;  %v26169_v63 = vld [vmem:[#allocation59_spill] sm:$0xff]  ;;  %v26171_v56 = vld [vmem:[#allocation36_spill] sm:$0xff] }
0x10c7   :  { %v19055_v38 = vpop.eup %19054  ;;  %v26172_v18 = vld [vmem:[#allocation61_spill] sm:$0xff] }
0x10c8   :  { %v12649_v22 = vmul.f32 %v19055_v38, %v24187_v32  ;;  %17889 = vmatmul.mubr.msk.bf16.vlgmr.msra.gmra.mxu1 %vm152_vm0, %v12673_v4  ;;  %v19057_v35 = vpop.eup %19056  ;;  %v26173_v4 = vld [vmem:[#allocation62_spill] sm:$0xff]  ;;  %v26174_v38 = vld [vmem:[#allocation41_spill] sm:$0xff] }
0x10c9   :  { %17899 = vmatpush3.bf16.msra.mxu1 %v12691_v46  ;;  %17900 = vmatprep.mubr.msk.bf16.mxu1 %vm19197_vm1, %v25492_v50  ;;  %v12651_v11 = vmul.f32 %v19057_v35, %v24189_v1  ;;  %v26177_v46 = vld [vmem:[#allocation64_spill] sm:$0xff]  ;;  %v26178_v35 = vld [vmem:[#allocation50_spill] sm:$0xff] }
0x10ca   :  { %v12674_v21 = vpack.c.bf16 %v12649_v22, %v12647_v51  ;;  %17910 = vmatprep.subr.bf16.mxu1 %v25492_v50  ;;  %v26175_v51 = vld [vmem:[#allocation44_spill] sm:$0xff]  ;;  %v26176_v22 = vld [vmem:[#allocation63_spill] sm:$0xff] }
0x10cb   :  { %v19059_v20 = vpop.eup %19058 }
0x10cc   :  { %v12653_v32 = vmul.f32 %v19059_v20, %v24197_v5  ;;  %17895 = vmatmul.mubr.msk.bf16.vlgmr.msra.gmra.mxu0 %vm152_vm0, %v12674_v21  ;;  %v19061_v27 = vpop.eup %19060  ;;  %v26179_v21 = vld [vmem:[#allocation52_spill] sm:$0xff]  ;;  %v26180_v20 = vld [vmem:[#allocation65_spill] sm:$0xff] }
0x10cd   :  { %17905 = vmatpush3.bf16.msra.mxu0 %v12692_v62  ;;  %17906 = vmatprep.mubr.msk.bf16.mxu0 %vm19197_vm1, %v25492_v50  ;;  %v12655_v29 = vmul.f32 %v19061_v27, %v24195_v59  ;;  %v26183_v62 = vld [vmem:[#allocation60_spill] sm:$0xff] }
0x10ce   :  { %v12675_v14 = vpack.c.bf16 %v12653_v32, %v12651_v11  ;;  %17916 = vmatprep.subr.bf16.mxu0 %v25492_v50  ;;  %v26181_v11 = vld [vmem:[#allocation66_spill] sm:$0xff]  ;;  %v14482_v27 = vsel %vm24366_vm11, %v26183_v62, 0 }
0x10cf   :  { %v19063_v1 = vpop.eup %19062  ;;  %v26182_v32 = vld [vmem:[#allocation58_spill] sm:$0xff] }
0x10d0   :  { %v19065_v5 = vpop.eup %19064  ;;  %v12657_v34 = vmul.f32 %v19063_v1, %v24203_v57  ;;  %17901 = vmatmul.mubr.msk.bf16.vlgmr.msra.gmra.mxu1 %vm152_vm0, %v12675_v14  ;;  %v26184_v14 = vld [vmem:[#allocation68_spill] sm:$0xff]  ;;  %v14483_v1 = vsel %vm24366_vm11, %v26185_v3, 0  ;;  %v26206_v3 = vld [vmem:[#allocation74_spill] sm:$0xff] }
0x10d1   :  { %17911 = vmatpush3.bf16.msra.mxu1 %v12693_v30  ;;  %17912 = vmatprep.mubr.msk.bf16.mxu1 %vm19197_vm1, %v25492_v50  ;;  %v12659_v59 = vmul.f32 %v19065_v5, %v24205_v31  ;;  %v26154_v31 = vld [vmem:[#allocation14_spill] sm:$0xff] }
0x10d2   :  { %v12676_v54 = vpack.c.bf16 %v12657_v34, %v12655_v29  ;;  %17922 = vmatprep.subr.bf16.mxu1 %v25492_v50  ;;  %v26186_v29 = vld [vmem:[#allocation12_spill] sm:$0xff] }
0x10d3   :  { %v19067_v33 = vpop.eup %19066 }
0x10d4   :  { %v12661_v57 = vmul.f32 %v19067_v33, %v24211_v19  ;;  %17907 = vmatmul.mubr.msk.bf16.vlgmr.msra.gmra.mxu0 %vm152_vm0, %v12676_v54  ;;  %v26155_v19 = vld [vmem:[#allocation19_spill] sm:$0xff]  ;;  %v26187_v54 = vld [vmem:[#allocation69_spill] sm:$0xff] }
0x10d5   :  { %17917 = vmatpush3.bf16.xpose.msra.mxu0 %v26149_v13  ;;  %17918 = vmatprep.mubr.msk.bf16.mxu0 %vm19197_vm1, %v25492_v50 }
0x10d6   :  { %v12677_v0 = vpack.c.bf16 %v12661_v57, %v12659_v59  ;;  %17928 = vmatprep.subr.bf16.mxu0 %v25492_v50 }
0x10d8   :  { %17913 = vmatmul.mubr.msk.bf16.vlgmr.msra.gmra.mxu1 %vm152_vm0, %v12677_v0  ;;  %v26188_v0 = vld [vmem:[#allocation13_spill] sm:$0xff] }
0x10d9   :  { %17923 = vmatpush3.bf16.xpose.msra.mxu1 %v26151_v52  ;;  %17924 = vmatprep.mubr.msk.bf16.mxu1 %vm19197_vm1, %v25492_v50 }
0x10da   :  { %17934 = vmatprep.subr.bf16.mxu1 %v25492_v50 }
0x10dc   :  { %17919 = vmatmul.mubr.msk.bf16.vlgmr.msra.gmra.mxu0 %vm24366_vm11, %v26154_v31  ;;  %v26190_v31 = vld [vmem:[#allocation70_spill] sm:$0xff] }
0x10dd   :  { %17929 = vmatpush3.bf16.xpose.msra.mxu0 %v26155_v19  ;;  %17930 = vmatprep.mubr.msk.bf16.mxu0 %vm19197_vm1, %v25492_v50 }
0x10de   :  { %17940 = vmatprep.subr.bf16.mxu0 %v25492_v50 }
0x10e0   :  { %17925 = vmatmul.mubr.msk.bf16.vlgmr.msra.gmra.mxu1 %vm24366_vm11, %v26156_v61  ;;  %v26192_v61 = vld [vmem:[#allocation16_spill] sm:$0xff] }
0x10e1   :  { %17935 = vmatpush3.bf16.xpose.msra.mxu1 %v26157_v2  ;;  %17936 = vmatprep.mubr.msk.bf16.mxu1 %vm19197_vm1, %v25492_v50 }
0x10e2   :  { %17946 = vmatprep.subr.bf16.mxu1 %v25492_v50 }
0x10e4   :  { %17931 = vmatmul.mubr.msk.bf16.vlgmr.msra.gmra.mxu0 %vm24366_vm11, %v26158_v44 }
0x10e5   :  { %17941 = vmatpush3.bf16.xpose.msra.mxu0 %v26159_v26  ;;  %17942 = vmatprep.mubr.msk.bf16.mxu0 %vm19197_vm1, %v25492_v50 }
0x10e6   :  { %17952 = vmatprep.subr.bf16.mxu0 %v25492_v50 }
0x10e8   :  { %17937 = vmatmul.mubr.msk.bf16.vlgmr.msra.gmra.mxu1 %vm24366_vm11, %v26160_v42 }
0x10e9   :  { %17947 = vmatpush3.bf16.xpose.msra.mxu1 %v26161_v48  ;;  %17948 = vmatprep.mubr.msk.bf16.mxu1 %vm19197_vm1, %v25492_v50 }
0x10ea   :  { %17958 = vmatprep.subr.bf16.mxu1 %v25492_v50 }
0x10ec   :  { %17943 = vmatmul.mubr.msk.bf16.vlgmr.msra.gmra.mxu0 %vm24366_vm11, %v26162_v37  ;;  %v26194_v37 = vld [vmem:[#allocation71_spill] sm:$0xff] }
0x10ed   :  { %17953 = vmatpush3.bf16.xpose.msra.mxu0 %v26163_v7  ;;  %17954 = vmatprep.mubr.msk.bf16.mxu0 %vm19197_vm1, %v25492_v50 }
0x10ee   :  { %17964 = vmatprep.subr.bf16.mxu0 %v25492_v50 }
0x10f0   :  { %17949 = vmatmul.mubr.msk.bf16.vlgmr.msra.gmra.mxu1 %vm24366_vm11, %v26164_v39  ;;  %v26196_v39 = vld [vmem:[#allocation17_spill] sm:$0xff] }
0x10f1   :  { %17959 = vmatpush3.bf16.xpose.msra.mxu1 %v26165_v8  ;;  %17960 = vmatprep.mubr.msk.bf16.mxu1 %vm19197_vm1, %v25492_v50 }
0x10f2   :  { %17970 = vmatprep.subr.bf16.mxu1 %v25492_v50 }
0x10f4   :  { %17955 = vmatmul.mubr.msk.bf16.vlgmr.msra.gmra.mxu0 %vm24366_vm11, %v26166_v6 }
0x10f5   :  { %17965 = vmatpush3.bf16.xpose.msra.mxu0 %v26167_v17  ;;  %17966 = vmatprep.mubr.msk.bf16.mxu0 %vm19197_vm1, %v25492_v50 }
0x10f6   :  { %17976 = vmatprep.subr.bf16.mxu0 %v25492_v50 }
0x10f8   :  { %17961 = vmatmul.mubr.msk.bf16.vlgmr.msra.gmra.mxu1 %vm24366_vm11, %v26168_v41 }
0x10f9   :  { %17971 = vmatpush3.bf16.xpose.msra.mxu1 %v26169_v63  ;;  %17972 = vmatprep.mubr.msk.bf16.mxu1 %vm19197_vm1, %v25492_v50 }
0x10fa   :  { %17982 = vmatprep.subr.bf16.mxu1 %v25492_v50 }
0x10fc   :  { %17967 = vmatmul.mubr.msk.bf16.vlgmr.msra.gmra.mxu0 %vm24366_vm11, %v26170_v28  ;;  %v26198_v28 = vld [vmem:[#allocation72_spill] sm:$0xff] }
0x10fd   :  { %17977 = vmatpush3.bf16.xpose.msra.mxu0 %v26171_v56  ;;  %17978 = vmatprep.mubr.msk.bf16.mxu0 %vm19197_vm1, %v25492_v50 }
0x10fe   :  { %17988 = vmatprep.subr.bf16.mxu0 %v25492_v50 }
0x1100   :  { %17973 = vmatmul.mubr.msk.bf16.vlgmr.msra.gmra.mxu1 %vm24366_vm11, %v26172_v18  ;;  %v26200_v18 = vld [vmem:[#allocation20_spill] sm:$0xff] }
0x1101   :  { %17983 = vmatpush3.bf16.xpose.msra.mxu1 %v26173_v4  ;;  %17984 = vmatprep.mubr.msk.bf16.mxu1 %vm19197_vm1, %v25492_v50 }
0x1102   :  { %17994 = vmatprep.subr.bf16.mxu1 %v25492_v50 }
0x1104   :  { %17979 = vmatmul.mubr.msk.bf16.vlgmr.msra.gmra.mxu0 %vm24366_vm11, %v26174_v38 }
0x1105   :  { %17989 = vmatpush3.bf16.xpose.msra.mxu0 %v26175_v51  ;;  %17990 = vmatprep.mubr.msk.bf16.mxu0 %vm19197_vm1, %v25492_v50 }
0x1106   :  { %18000 = vmatprep.subr.bf16.mxu0 %v25492_v50 }
0x1108   :  { %17985 = vmatmul.mubr.msk.bf16.vlgmr.msra.gmra.mxu1 %vm24366_vm11, %v26176_v22 }
0x1109   :  { %17995 = vmatpush3.bf16.xpose.msra.mxu1 %v26177_v46  ;;  %17996 = vmatprep.mubr.msk.bf16.mxu1 %vm19197_vm1, %v25492_v50 }
0x110a   :  { %18006 = vmatprep.subr.bf16.mxu1 %v25492_v50 }
0x110c   :  { %17991 = vmatmul.mubr.msk.bf16.vlgmr.msra.gmra.mxu0 %vm24366_vm11, %v26178_v35  ;;  %v26202_v35 = vld [vmem:[#allocation73_spill] sm:$0xff] }
0x110d   :  { %18001 = vmatpush3.bf16.xpose.msra.mxu0 %v26179_v21  ;;  %18002 = vmatprep.mubr.msk.bf16.mxu0 %vm19197_vm1, %v25492_v50 }
0x110e   :  { %18012 = vmatprep.subr.bf16.mxu0 %v25492_v50 }
0x1110   :  { %17997 = vmatmul.mubr.msk.bf16.vlgmr.msra.gmra.mxu1 %vm24366_vm11, %v26180_v20  ;;  %v26204_v20 = vld [vmem:[#allocation21_spill] sm:$0xff] }
0x1111   :  { %18007 = vmatpush3.bf16.xpose.msra.mxu1 %v26181_v11  ;;  %18008 = vmatprep.mubr.msk.bf16.mxu1 %vm19197_vm1, %v25492_v50 }
0x1112   :  { %18018 = vmatprep.subr.bf16.mxu1 %v25492_v50 }
0x1114   :  { %18003 = vmatmul.mubr.msk.bf16.vlgmr.msra.gmra.mxu0 %vm24366_vm11, %v26182_v32 }
0x1115   :  { %18013 = vmatpush3.bf16.msra.mxu0 %v14482_v27  ;;  %18014 = vmatprep.mubr.msk.bf16.mxu0 %vm19197_vm1, %v25492_v50 }
0x1116   :  { %18024 = vmatprep.subr.bf16.mxu0 %v25492_v50 }
0x1118   :  { %18009 = vmatmul.mubr.msk.bf16.vlgmr.msra.gmra.mxu1 %vm24366_vm11, %v26184_v14 }
0x1119   :  { %18019 = vmatpush3.bf16.msra.mxu1 %v14483_v1  ;;  %18020 = vmatprep.mubr.msk.bf16.mxu1 %vm19197_vm1, %v25492_v50 }
0x111a   :  { %18030 = vmatprep.subr.bf16.mxu1 %v25492_v50 }
0x115b   :  { %v12731_v5 = vpop.f32.mrf.mxu0 }
0x115c   :  { %v24487_v34 = vadd.f32 %v12731_v5, %v26186_v29  ;;  %v26208_v5 = vld [vmem:[#allocation24_spill] sm:$0xff] }
0x115d   :  { %v17824_v30 = vpop.f32.mrf.mxu0 }
0x115f   :  { %v12734_v33 = vpop.f32.mrf.mxu0 }
0x1160   :  { %v24490_v59 = vadd.f32 %v12734_v33, %v26187_v54  ;;  %v12775_v57 = vpop.f32.mrf.mxu1 }
0x1161   :  { %v17825_v40 = vpop.f32.mrf.mxu0  ;;  %v24493_v13 = vadd.f32 %v12775_v57, %v26188_v0 }
0x1162   :  { %v17830_v15 = vpop.f32.mrf.mxu1  ;;  %v26210_v40 = vld [vmem:[#allocation75_spill] sm:$0xff] }
0x1163   :  { %26189 = vst [vmem:[#allocation32_spill] sm:$0xff] %v24493_v13  ;;  %v26212_v15 = vld [vmem:[#allocation25_spill] sm:$0xff] }
0x1164   :  { %v12778_v24 = vpop.f32.mrf.mxu1  ;;  %v12819_v52 = vpop.f32.mrf.mxu0 }
0x1165   :  { %v24496_v19 = vadd.f32 %v12778_v24, %v26190_v31  ;;  %v24499_v2 = vadd.f32 %v12819_v52, %v26192_v61 }
0x1166   :  { %v17831_v44 = vpop.f32.mrf.mxu1  ;;  %v17836_v26 = vpop.f32.mrf.mxu0 }
0x1167   :  { %26191 = vst [vmem:[#allocation85_spill] sm:$0xff] %v24496_v19  ;;  %26193 = vst [vmem:[#allocation29_spill] sm:$0xff] %v24499_v2  ;;  %v26214_v26 = vld [vmem:[#allocation76_spill] sm:$0xff] }
0x1168   :  { %v12822_v42 = vpop.f32.mrf.mxu0  ;;  %v12863_v48 = vpop.f32.mrf.mxu1 }
0x1169   :  { %v24502_v7 = vadd.f32 %v12822_v42, %v26194_v37  ;;  %v24505_v8 = vadd.f32 %v12863_v48, %v26196_v39  ;;  %v26216_v48 = vld [vmem:[#allocation30_spill] sm:$0xff] }
0x116a   :  { %v17837_v6 = vpop.f32.mrf.mxu0  ;;  %v17842_v17 = vpop.f32.mrf.mxu1 }
0x116b   :  { %26195 = vst [vmem:[#allocation86_spill] sm:$0xff] %v24502_v7  ;;  %26197 = vst [vmem:[#allocation2_spill] sm:$0xff] %v24505_v8 }
0x116c   :  { %v12866_v41 = vpop.f32.mrf.mxu1  ;;  %v12907_v63 = vpop.f32.mrf.mxu0 }
0x116d   :  { %v24508_v56 = vadd.f32 %v12866_v41, %v26198_v28  ;;  %v24511_v4 = vadd.f32 %v12907_v63, %v26200_v18  ;;  %v26218_v63 = vld [vmem:[#allocation77_spill] sm:$0xff]  ;;  %v26220_v18 = vld [vmem:[#allocation31_spill] sm:$0xff] }
0x116e   :  { %v17843_v38 = vpop.f32.mrf.mxu1  ;;  %v17848_v51 = vpop.f32.mrf.mxu0 }
0x116f   :  { %26199 = vst [vmem:[#allocation87_spill] sm:$0xff] %v24508_v56  ;;  %26201 = vst [vmem:[#allocation3_spill] sm:$0xff] %v24511_v4 }
0x1170   :  { %v12910_v22 = vpop.f32.mrf.mxu0  ;;  %v12951_v46 = vpop.f32.mrf.mxu1 }
0x1171   :  { %v24514_v21 = vadd.f32 %v12910_v22, %v26202_v35  ;;  %v24517_v11 = vadd.f32 %v12951_v46, %v26204_v20  ;;  %v26222_v20 = vld [vmem:[#allocation78_spill] sm:$0xff] }
0x1172   :  { %v17849_v32 = vpop.f32.mrf.mxu0  ;;  %v17854_v62 = vpop.f32.mrf.mxu1 }
0x1173   :  { %26203 = vst [vmem:[#allocation88_spill] sm:$0xff] %v24514_v21  ;;  %26205 = vst [vmem:[#allocation40_spill] sm:$0xff] %v24517_v11  ;;  %v26224_v62 = vld [vmem:[#allocation38_spill] sm:$0xff] }
0x1174   :  { %v12954_v27 = vpop.f32.mrf.mxu1  ;;  %v12995_v14 = vpop.f32.mrf.mxu0 }
0x1175   :  { %v24520_v1 = vadd.f32 %v12954_v27, %v26206_v3  ;;  %v24523_v29 = vadd.f32 %v12995_v14, %v26208_v5 }
0x1176   :  { %v17855_v30 = vpop.f32.mrf.mxu1  ;;  %v17860_v33 = vpop.f32.mrf.mxu0 }
0x1177   :  { %26207 = vst [vmem:[#allocation89_spill] sm:$0xff] %v24520_v1  ;;  %26209 = vst [vmem:[#allocation37_spill] sm:$0xff] %v24523_v29  ;;  %v26226_v33 = vld [vmem:[#allocation79_spill] sm:$0xff] }
0x1178   :  { %v12998_v54 = vpop.f32.mrf.mxu0  ;;  %v13039_v57 = vpop.f32.mrf.mxu1 }
0x1179   :  { %v24526_v0 = vadd.f32 %v12998_v54, %v26210_v40  ;;  %v24529_v24 = vadd.f32 %v13039_v57, %v26212_v15  ;;  %v26228_v57 = vld [vmem:[#allocation39_spill] sm:$0xff] }
0x117a   :  { %v17861_v52 = vpop.f32.mrf.mxu0  ;;  %v17866_v31 = vpop.f32.mrf.mxu1 }
0x117b   :  { %26211 = vst [vmem:[#allocation90_spill] sm:$0xff] %v24526_v0  ;;  %26213 = vst [vmem:[#allocation4_spill] sm:$0xff] %v24529_v24 }
0x117c   :  { %v13042_v61 = vpop.f32.mrf.mxu1  ;;  %v13083_v44 = vpop.f32.mrf.mxu0 }
0x117d   :  { %v24532_v42 = vadd.f32 %v13042_v61, %v26214_v26  ;;  %v24535_v37 = vadd.f32 %v13083_v44, %v26216_v48  ;;  %v26230_v44 = vld [vmem:[#allocation80_spill] sm:$0xff]  ;;  %v26232_v48 = vld [vmem:[#allocation47_spill] sm:$0xff] }
0x117e   :  { %v17867_v39 = vpop.f32.mrf.mxu1  ;;  %v17872_v6 = vpop.f32.mrf.mxu0 }
0x117f   :  { %26215 = vst [vmem:[#allocation91_spill] sm:$0xff] %v24532_v42  ;;  %26217 = vst [vmem:[#allocation5_spill] sm:$0xff] %v24535_v37 }
0x1180   :  { %v13086_v17 = vpop.f32.mrf.mxu0  ;;  %v13127_v41 = vpop.f32.mrf.mxu1 }
0x1181   :  { %v24538_v28 = vadd.f32 %v13086_v17, %v26218_v63  ;;  %v24541_v38 = vadd.f32 %v13127_v41, %v26220_v18  ;;  %v26234_v18 = vld [vmem:[#allocation81_spill] sm:$0xff] }
0x1182   :  { %v17873_v51 = vpop.f32.mrf.mxu0  ;;  %v17878_v22 = vpop.f32.mrf.mxu1 }
0x1183   :  { %26219 = vst [vmem:[#allocation92_spill] sm:$0xff] %v24538_v28  ;;  %26221 = vst [vmem:[#allocation48_spill] sm:$0xff] %v24541_v38  ;;  %v26236_v22 = vld [vmem:[#allocation45_spill] sm:$0xff] }
0x1184   :  { %v13130_v46 = vpop.f32.mrf.mxu1  ;;  %v13171_v35 = vpop.f32.mrf.mxu0 }
0x1185   :  { %v24544_v32 = vadd.f32 %v13130_v46, %v26222_v20  ;;  %v24547_v27 = vadd.f32 %v13171_v35, %v26224_v62 }
0x1186   :  { %v17879_v14 = vpop.f32.mrf.mxu1  ;;  %v17884_v3 = vpop.f32.mrf.mxu0 }
0x1187   :  { %26223 = vst [vmem:[#allocation93_spill] sm:$0xff] %v24544_v32  ;;  %26225 = vst [vmem:[#allocation46_spill] sm:$0xff] %v24547_v27  ;;  %v26238_v3 = vld [vmem:[#allocation82_spill] sm:$0xff] }
0x1188   :  { %v13174_v5 = vpop.f32.mrf.mxu0  ;;  %v13215_v30 = vpop.f32.mrf.mxu1 }
0x1189   :  { %v24550_v54 = vadd.f32 %v13174_v5, %v26226_v33  ;;  %v24553_v40 = vadd.f32 %v13215_v30, %v26228_v57  ;;  %v26240_v30 = vld [vmem:[#allocation55_spill] sm:$0xff] }
0x118a   :  { %v17885_v15 = vpop.f32.mrf.mxu0  ;;  %v17890_v52 = vpop.f32.mrf.mxu1 }
0x118b   :  { %26227 = vst [vmem:[#allocation94_spill] sm:$0xff] %v24550_v54  ;;  %26229 = vst [vmem:[#allocation6_spill] sm:$0xff] %v24553_v40 }
0x118c   :  { %v13218_v31 = vpop.f32.mrf.mxu1  ;;  %v13259_v61 = vpop.f32.mrf.mxu0 }
0x118d   :  { %v24556_v26 = vadd.f32 %v13218_v31, %v26230_v44  ;;  %v24559_v39 = vadd.f32 %v13259_v61, %v26232_v48  ;;  %v26242_v61 = vld [vmem:[#allocation83_spill] sm:$0xff]  ;;  %v26244_v48 = vld [vmem:[#allocation53_spill] sm:$0xff] }
0x118e   :  { %v17891_v6 = vpop.f32.mrf.mxu1  ;;  %v17896_v17 = vpop.f32.mrf.mxu0 }
0x118f   :  { %26231 = vst [vmem:[#allocation95_spill] sm:$0xff] %v24556_v26  ;;  %26233 = vst [vmem:[#allocation7_spill] sm:$0xff] %v24559_v39 }
0x1190   :  { %v13262_v41 = vpop.f32.mrf.mxu0  ;;  %v13303_v63 = vpop.f32.mrf.mxu1 }
0x1191   :  { %v24562_v51 = vadd.f32 %v13262_v41, %v26234_v18  ;;  %v24565_v46 = vadd.f32 %v13303_v63, %v26236_v22  ;;  %v26246_v22 = vld [vmem:[#allocation84_spill] sm:$0xff] }
0x1192   :  { %v17897_v35 = vpop.f32.mrf.mxu0  ;;  %v17902_v20 = vpop.f32.mrf.mxu1 }
0x1193   :  { %26235 = vst [vmem:[#allocation96_spill] sm:$0xff] %v24562_v51  ;;  %26237 = vst [vmem:[#allocation56_spill] sm:$0xff] %v24565_v46 }
0x1194   :  { %v13306_v62 = vpop.f32.mrf.mxu1  ;;  %v13347_v14 = vpop.f32.mrf.mxu0 }
0x1195   :  { %v24568_v5 = vadd.f32 %v13306_v62, %v26238_v3  ;;  %v24571_v33 = vadd.f32 %v13347_v14, %v26240_v30 }
0x1196   :  { %v17903_v57 = vpop.f32.mrf.mxu1  ;;  %v17908_v15 = vpop.f32.mrf.mxu0 }
0x1197   :  { %26239 = vst [vmem:[#allocation97_spill] sm:$0xff] %v24568_v5  ;;  %26241 = vst [vmem:[#allocation54_spill] sm:$0xff] %v24571_v33 }
0x1198   :  { %v13350_v52 = vpop.f32.mrf.mxu0  ;;  %v13391_v31 = vpop.f32.mrf.mxu1 }
0x1199   :  { %v24574_v44 = vadd.f32 %v13350_v52, %v26242_v61  ;;  %v24577_v6 = vadd.f32 %v13391_v31, %v26244_v48 }
0x119a   :  { %v17909_v17 = vpop.f32.mrf.mxu0  ;;  %v17914_v41 = vpop.f32.mrf.mxu1 }
0x119b   :  { %26243 = vst [vmem:[#allocation98_spill] sm:$0xff] %v24574_v44  ;;  %26245 = vst [vmem:[#allocation8_spill] sm:$0xff] %v24577_v6 }
0x119c   :  { %v13394_v63 = vpop.f32.mrf.mxu1  ;;  %v24579_v18 = vpop.f32.mrf.mxu0 }
0x119d   :  { %v24582_v35 = vadd.f32 %v13394_v63, %v26246_v22  ;;  %v14114_v20 = vsel %vm152_vm0, %v24579_v18, -inf }
0x119e   :  { %14115 = vmax.xlane.f32.xlu0 %v14114_v20  ;;  %v17915_v62 = vpop.f32.mrf.mxu1  ;;  %v17920_v14 = vpop.f32.mrf.mxu0 }
0x119f   :  { %26247 = vst [vmem:[#allocation99_spill] sm:$0xff] %v24582_v35 }
0x11a0   :  { %v24586_v3 = vpop.f32.mrf.mxu0  ;;  %v24588_v30 = vpop.f32.mrf.mxu1 }
0x11a1   :  { %v14117_v57 = vsel %vm152_vm0, %v24586_v3, -inf  ;;  %v14120_v15 = vsel %vm152_vm0, %v24588_v30, -inf }
0x11a2   :  { %14118 = vmax.xlane.f32.xlu1 %v14117_v57  ;;  %v17921_v52 = vpop.f32.mrf.mxu0  ;;  %14121 = vmax.xlane.f32.xlu0 %v14120_v15  ;;  %v17926_v31 = vpop.f32.mrf.mxu1 }
0x11a4   :  { %v24594_v61 = vpop.f32.mrf.mxu1  ;;  %v24596_v48 = vpop.f32.mrf.mxu0 }
0x11a5   :  { %v14126_v17 = vsel %vm152_vm0, %v24596_v48, -inf  ;;  %v14123_v41 = vsel %vm152_vm0, %v24594_v61, -inf }
0x11a6   :  { %v17932_v63 = vpop.f32.mrf.mxu0  ;;  %14127 = vmax.xlane.f32.xlu0 %v14126_v17  ;;  %14124 = vmax.xlane.f32.xlu1 %v14123_v41  ;;  %v17927_v22 = vpop.f32.mrf.mxu1 }
0x11a8   :  { %v24602_v20 = vpop.f32.mrf.mxu0  ;;  %v24604_v62 = vpop.f32.mrf.mxu1 }
0x11a9   :  { %v14129_v14 = vsel %vm152_vm0, %v24602_v20, -inf  ;;  %v14132_v57 = vsel %vm152_vm0, %v24604_v62, -inf }
0x11aa   :  { %v17933_v15 = vpop.f32.mrf.mxu0  ;;  %14130 = vmax.xlane.f32.xlu1 %v14129_v14  ;;  %14133 = vmax.xlane.f32.xlu0 %v14132_v57  ;;  %v17938_v52 = vpop.f32.mrf.mxu1 }
0x11ac   :  { %v24610_v31 = vpop.f32.mrf.mxu1  ;;  %v24612_v63 = vpop.f32.mrf.mxu0 }
0x11ad   :  { %v14138_v17 = vsel %vm152_vm0, %v24612_v63, -inf  ;;  %v14135_v41 = vsel %vm152_vm0, %v24610_v31, -inf }
0x11ae   :  { %v17944_v22 = vpop.f32.mrf.mxu0  ;;  %14139 = vmax.xlane.f32.xlu0 %v14138_v17  ;;  %14136 = vmax.xlane.f32.xlu1 %v14135_v41  ;;  %v17939_v35 = vpop.f32.mrf.mxu1 }
0x11b0   :  { %v24618_v6 = vpop.f32.mrf.mxu0  ;;  %v24620_v15 = vpop.f32.mrf.mxu1 }
0x11b1   :  { %v14141_v14 = vsel %vm152_vm0, %v24618_v6, -inf  ;;  %v14144_v57 = vsel %vm152_vm0, %v24620_v15, -inf }
0x11b2   :  { %v17945_v52 = vpop.f32.mrf.mxu0  ;;  %14142 = vmax.xlane.f32.xlu1 %v14141_v14  ;;  %14145 = vmax.xlane.f32.xlu0 %v14144_v57  ;;  %v17950_v44 = vpop.f32.mrf.mxu1 }
0x11b4   :  { %v24626_v33 = vpop.f32.mrf.mxu1  ;;  %v24628_v22 = vpop.f32.mrf.mxu0 }
0x11b5   :  { %v14150_v35 = vsel %vm152_vm0, %v24628_v22, -inf  ;;  %v14147_v17 = vsel %vm152_vm0, %v24626_v33, -inf }
0x11b6   :  { %v17956_v41 = vpop.f32.mrf.mxu0  ;;  %14151 = vmax.xlane.f32.xlu0 %v14150_v35  ;;  %14148 = vmax.xlane.f32.xlu1 %v14147_v17  ;;  %v17951_v5 = vpop.f32.mrf.mxu1 }
0x11b8   :  { %v24634_v46 = vpop.f32.mrf.mxu0  ;;  %v24636_v52 = vpop.f32.mrf.mxu1 }
0x11b9   :  { %v14153_v44 = vsel %vm152_vm0, %v24634_v46, -inf  ;;  %v14156_v14 = vsel %vm152_vm0, %v24636_v52, -inf }
0x11ba   :  { %v17957_v57 = vpop.f32.mrf.mxu0  ;;  %14154 = vmax.xlane.f32.xlu1 %v14153_v44  ;;  %14157 = vmax.xlane.f32.xlu0 %v14156_v14  ;;  %v17962_v51 = vpop.f32.mrf.mxu1 }
0x11bc   :  { %v24642_v39 = vpop.f32.mrf.mxu1  ;;  %v24644_v41 = vpop.f32.mrf.mxu0 }
0x11bd   :  { %v14162_v5 = vsel %vm152_vm0, %v24644_v41, -inf  ;;  %v14159_v35 = vsel %vm152_vm0, %v24642_v39, -inf }
0x11be   :  { %v17968_v17 = vpop.f32.mrf.mxu0  ;;  %14163 = vmax.xlane.f32.xlu0 %v14162_v5  ;;  %14160 = vmax.xlane.f32.xlu1 %v14159_v35  ;;  %v17963_v26 = vpop.f32.mrf.mxu1 }
0x11c0   :  { %v24650_v40 = vpop.f32.mrf.mxu0  ;;  %v24652_v57 = vpop.f32.mrf.mxu1 }
0x11c1   :  { %v14165_v51 = vsel %vm152_vm0, %v24650_v40, -inf  ;;  %v14168_v44 = vsel %vm152_vm0, %v24652_v57, -inf }
0x11c2   :  { %v17969_v14 = vpop.f32.mrf.mxu0  ;;  %14166 = vmax.xlane.f32.xlu1 %v14165_v51  ;;  %14169 = vmax.xlane.f32.xlu0 %v14168_v44  ;;  %v17974_v54 = vpop.f32.mrf.mxu1 }
0x11c4   :  { %v24658_v27 = vpop.f32.mrf.mxu1  ;;  %v24660_v17 = vpop.f32.mrf.mxu0 }
0x11c5   :  { %v14174_v26 = vsel %vm152_vm0, %v24660_v17, -inf  ;;  %v14171_v5 = vsel %vm152_vm0, %v24658_v27, -inf }
0x11c6   :  { %v17980_v35 = vpop.f32.mrf.mxu0  ;;  %14175 = vmax.xlane.f32.xlu0 %v14174_v26  ;;  %14172 = vmax.xlane.f32.xlu1 %v14171_v5  ;;  %v17975_v32 = vpop.f32.mrf.mxu1 }
0x11c8   :  { %v24666_v38 = vpop.f32.mrf.mxu0  ;;  %v24668_v14 = vpop.f32.mrf.mxu1 }
0x11c9   :  { %v14177_v54 = vsel %vm152_vm0, %v24666_v38, -inf  ;;  %v14180_v51 = vsel %vm152_vm0, %v24668_v14, -inf }
0x11ca   :  { %v17981_v44 = vpop.f32.mrf.mxu0  ;;  %14178 = vmax.xlane.f32.xlu1 %v14177_v54  ;;  %14181 = vmax.xlane.f32.xlu0 %v14180_v51  ;;  %v17986_v28 = vpop.f32.mrf.mxu1 }
0x11cc   :  { %v24674_v37 = vpop.f32.mrf.mxu1  ;;  %v24676_v35 = vpop.f32.mrf.mxu0 }
0x11cd   :  { %v14186_v32 = vsel %vm152_vm0, %v24676_v35, -inf  ;;  %v14183_v26 = vsel %vm152_vm0, %v24674_v37, -inf }
0x11ce   :  { %v17992_v5 = vpop.f32.mrf.mxu0  ;;  %14187 = vmax.xlane.f32.xlu0 %v14186_v32  ;;  %14184 = vmax.xlane.f32.xlu1 %v14183_v26  ;;  %v17987_v42 = vpop.f32.mrf.mxu1 }
0x11d0   :  { %v24682_v24 = vpop.f32.mrf.mxu0  ;;  %v24684_v44 = vpop.f32.mrf.mxu1 }
0x11d1   :  { %v14189_v28 = vsel %vm152_vm0, %v24682_v24, -inf  ;;  %v14192_v54 = vsel %vm152_vm0, %v24684_v44, -inf }
0x11d2   :  { %v17993_v51 = vpop.f32.mrf.mxu0  ;;  %14190 = vmax.xlane.f32.xlu1 %v14189_v28  ;;  %14193 = vmax.xlane.f32.xlu0 %v14192_v54  ;;  %v17998_v0 = vpop.f32.mrf.mxu1 }
0x11d4   :  { %v24690_v29 = vpop.f32.mrf.mxu1  ;;  %v24692_v5 = vpop.f32.mrf.mxu0 }
0x11d5   :  { %v14198_v42 = vsel %vm152_vm0, %v24692_v5, -inf  ;;  %v14195_v32 = vsel %vm152_vm0, %v24690_v29, -inf }
0x11d6   :  { %v18004_v26 = vpop.f32.mrf.mxu0  ;;  %14199 = vmax.xlane.f32.xlu0 %v14198_v42  ;;  %14196 = vmax.xlane.f32.xlu1 %v14195_v32  ;;  %v17999_v1 = vpop.f32.mrf.mxu1 }
0x11d8   :  { %v24698_v11 = vpop.f32.mrf.mxu0  ;;  %v24700_v51 = vpop.f32.mrf.mxu1 }
0x11d9   :  { %v14201_v0 = vsel %vm152_vm0, %v24698_v11, -inf  ;;  %v14204_v28 = vsel %vm152_vm0, %v24700_v51, -inf }
0x11da   :  { %v18005_v54 = vpop.f32.mrf.mxu0  ;;  %14202 = vmax.xlane.f32.xlu1 %v14201_v0  ;;  %14205 = vmax.xlane.f32.xlu0 %v14204_v28  ;;  %v18010_v21 = vpop.f32.mrf.mxu1 }
0x11dc   :  { %v24706_v4 = vpop.f32.mrf.mxu1 }
0x11dd   :  { %v14207_v42 = vsel %vm152_vm0, %v24706_v4, -inf }
0x11de   :  { %14208 = vmax.xlane.f32.xlu1 %v14207_v42  ;;  %v18011_v1 = vpop.f32.mrf.mxu1 }
0x1227   :  { %v14116_v32 = vpop.xlane.xlu0 %14115 }
0x1228   :  { %v14210_v26 = vsub.f32 %v24579_v18, %v14116_v32 }
0x122a   :  { %v14242_v56 = vmul.f32 1.442695, %v14210_v26 }
0x122b   :  { %v14119_v8 = vpop.xlane.xlu1 %14118  ;;  %v14122_v7 = vpop.xlane.xlu0 %14121 }
0x122c   :  { %19068 = vpow2.f32 %v14242_v56  ;;  %v14211_v2 = vsub.f32 %v24586_v3, %v14119_v8  ;;  %v14212_v0 = vsub.f32 %v24588_v30, %v14122_v7 }
0x122e   :  { %v14244_v28 = vmul.f32 1.442695, %v14211_v2  ;;  %v14246_v21 = vmul.f32 1.442695, %v14212_v0 }
0x122f   :  { %v14128_v54 = vpop.xlane.xlu0 %14127  ;;  %v14125_v19 = vpop.xlane.xlu1 %14124 }
0x1230   :  { %19070 = vpow2.f32 %v14244_v28  ;;  %v14214_v13 = vsub.f32 %v24596_v48, %v14128_v54  ;;  %v14213_v42 = vsub.f32 %v24594_v61, %v14125_v19 }
0x1231   :  { %19072 = vpow2.f32 %v14246_v21 }
0x1232   :  { %v14250_v1 = vmul.f32 1.442695, %v14214_v13  ;;  %v14248_v18 = vmul.f32 1.442695, %v14213_v42 }
0x1233   :  { %v14131_v32 = vpop.xlane.xlu1 %14130  ;;  %v14134_v26 = vpop.xlane.xlu0 %14133 }
0x1234   :  { %19074 = vpow2.f32 %v14250_v1  ;;  %v14215_v56 = vsub.f32 %v24602_v20, %v14131_v32  ;;  %v14216_v8 = vsub.f32 %v24604_v62, %v14134_v26 }
0x1235   :  { %19076 = vpow2.f32 %v14248_v18 }
0x1236   :  { %v14252_v2 = vmul.f32 1.442695, %v14215_v56  ;;  %v14254_v7 = vmul.f32 1.442695, %v14216_v8 }
0x1237   :  { %v14140_v3 = vpop.xlane.xlu0 %14139  ;;  %v14137_v30 = vpop.xlane.xlu1 %14136 }
0x1238   :  { %19078 = vpow2.f32 %v14252_v2  ;;  %v14218_v48 = vsub.f32 %v24612_v63, %v14140_v3  ;;  %v14217_v19 = vsub.f32 %v24610_v31, %v14137_v30 }
0x1239   :  { %v24719_v61 = vpop.eup %19068  ;;  %19080 = vpow2.f32 %v14254_v7 }
0x123a   :  { %v14258_v13 = vmul.f32 1.442695, %v14218_v48  ;;  %v14256_v0 = vmul.f32 1.442695, %v14217_v19  ;;  %v14306_v20 = vsel %vm152_vm0, %v24719_v61, 0.0 }
0x123b   :  { %v14143_v28 = vpop.xlane.xlu1 %14142  ;;  %v14146_v62 = vpop.xlane.xlu0 %14145  ;;  %14307 = vadd.xlane.f32.xlu0 %v14306_v20 }
0x123c   :  { %19082 = vpow2.f32 %v14258_v13  ;;  %v14219_v21 = vsub.f32 %v24618_v6, %v14143_v28  ;;  %v14220_v54 = vsub.f32 %v24620_v15, %v14146_v62 }
0x123d   :  { %v24725_v42 = vpop.eup %19070  ;;  %19084 = vpow2.f32 %v14256_v0 }
0x123e   :  { %v24727_v31 = vpop.eup %19072  ;;  %v14260_v63 = vmul.f32 1.442695, %v14219_v21  ;;  %v14262_v1 = vmul.f32 1.442695, %v14220_v54  ;;  %v14309_v18 = vsel %vm152_vm0, %v24725_v42, 0.0 }
0x123f   :  { %v14152_v32 = vpop.xlane.xlu0 %14151  ;;  %v14149_v26 = vpop.xlane.xlu1 %14148  ;;  %v14312_v56 = vsel %vm152_vm0, %v24727_v31, 0.0  ;;  %14310 = vadd.xlane.f32.xlu1 %v14309_v18 }
0x1240   :  { %19086 = vpow2.f32 %v14260_v63  ;;  %v14222_v6 = vsub.f32 %v24628_v22, %v14152_v32  ;;  %v14221_v15 = vsub.f32 %v24626_v33, %v14149_v26  ;;  %14313 = vadd.xlane.f32.xlu0 %v14312_v56 }
0x1241   :  { %v24735_v8 = vpop.eup %19074  ;;  %19088 = vpow2.f32 %v14262_v1 }
0x1242   :  { %v24737_v2 = vpop.eup %19076  ;;  %v14266_v7 = vmul.f32 1.442695, %v14222_v6  ;;  %v14264_v3 = vmul.f32 1.442695, %v14221_v15  ;;  %v14318_v30 = vsel %vm152_vm0, %v24735_v8, 0.0 }
0x1243   :  { %v14155_v48 = vpop.xlane.xlu1 %14154  ;;  %v14158_v19 = vpop.xlane.xlu0 %14157  ;;  %v14315_v13 = vsel %vm152_vm0, %v24737_v2, 0.0 }
0x1244   :  { %19090 = vpow2.f32 %v14266_v7  ;;  %v14223_v22 = vsub.f32 %v24634_v46, %v14155_v48  ;;  %v14224_v33 = vsub.f32 %v24636_v52, %v14158_v19  ;;  %14319 = vadd.xlane.f32.xlu0 %v14318_v30  ;;  %14316 = vadd.xlane.f32.xlu1 %v14315_v13 }
0x1245   :  { %v24745_v0 = vpop.eup %19078  ;;  %19092 = vpow2.f32 %v14264_v3 }
0x1246   :  { %v24747_v20 = vpop.eup %19080  ;;  %v14268_v28 = vmul.f32 1.442695, %v14223_v22  ;;  %v14270_v62 = vmul.f32 1.442695, %v14224_v33  ;;  %v14321_v21 = vsel %vm152_vm0, %v24745_v0, 0.0 }
0x1247   :  { %v14164_v54 = vpop.xlane.xlu0 %14163  ;;  %v14161_v63 = vpop.xlane.xlu1 %14160  ;;  %v14324_v1 = vsel %vm152_vm0, %v24747_v20, 0.0 }
0x1248   :  { %19094 = vpow2.f32 %v14268_v28  ;;  %v14226_v46 = vsub.f32 %v24644_v41, %v14164_v54  ;;  %v14225_v52 = vsub.f32 %v24642_v39, %v14161_v63  ;;  %14325 = vadd.xlane.f32.xlu0 %v14324_v1  ;;  %14322 = vadd.xlane.f32.xlu1 %v14321_v21 }
0x1249   :  { %v24755_v18 = vpop.eup %19082  ;;  %19096 = vpow2.f32 %v14270_v62 }
0x124a   :  { %v24757_v32 = vpop.eup %19084  ;;  %v14274_v26 = vmul.f32 1.442695, %v14226_v46  ;;  %v14272_v56 = vmul.f32 1.442695, %v14225_v52  ;;  %v14330_v6 = vsel %vm152_vm0, %v24755_v18, 0.0 }
0x124b   :  { %v14167_v15 = vpop.xlane.xlu1 %14166  ;;  %v14170_v7 = vpop.xlane.xlu0 %14169  ;;  %v14327_v3 = vsel %vm152_vm0, %v24757_v32, 0.0 }
0x124c   :  { %19098 = vpow2.f32 %v14274_v26  ;;  %v14227_v39 = vsub.f32 %v24650_v40, %v14167_v15  ;;  %v14228_v41 = vsub.f32 %v24652_v57, %v14170_v7  ;;  %14331 = vadd.xlane.f32.xlu0 %v14330_v6  ;;  %14328 = vadd.xlane.f32.xlu1 %v14327_v3 }
0x124d   :  { %v24765_v30 = vpop.eup %19086  ;;  %19100 = vpow2.f32 %v14272_v56 }
0x124e   :  { %v24767_v48 = vpop.eup %19088  ;;  %v14276_v19 = vmul.f32 1.442695, %v14227_v39  ;;  %v14278_v13 = vmul.f32 1.442695, %v14228_v41  ;;  %v14333_v22 = vsel %vm152_vm0, %v24765_v30, 0.0 }
0x124f   :  { %v14176_v33 = vpop.xlane.xlu0 %14175  ;;  %v14173_v28 = vpop.xlane.xlu1 %14172  ;;  %v14336_v62 = vsel %vm152_vm0, %v24767_v48, 0.0 }
0x1250   :  { %19102 = vpow2.f32 %v14276_v19  ;;  %v14230_v40 = vsub.f32 %v24660_v17, %v14176_v33  ;;  %v14229_v57 = vsub.f32 %v24658_v27, %v14173_v28  ;;  %14337 = vadd.xlane.f32.xlu0 %v14336_v62  ;;  %14334 = vadd.xlane.f32.xlu1 %v14333_v22 }
0x1251   :  { %v24775_v21 = vpop.eup %19090  ;;  %19104 = vpow2.f32 %v14278_v13 }
0x1252   :  { %v24777_v54 = vpop.eup %19092  ;;  %v14282_v63 = vmul.f32 1.442695, %v14230_v40  ;;  %v14280_v1 = vmul.f32 1.442695, %v14229_v57  ;;  %v14342_v46 = vsel %vm152_vm0, %v24775_v21, 0.0 }
0x1253   :  { %v14179_v52 = vpop.xlane.xlu1 %14178  ;;  %v14182_v26 = vpop.xlane.xlu0 %14181  ;;  %v14339_v56 = vsel %vm152_vm0, %v24777_v54, 0.0 }
0x1254   :  { %19106 = vpow2.f32 %v14282_v63  ;;  %v14231_v27 = vsub.f32 %v24666_v38, %v14179_v52  ;;  %v14232_v17 = vsub.f32 %v24668_v14, %v14182_v26  ;;  %14343 = vadd.xlane.f32.xlu0 %v14342_v46  ;;  %14340 = vadd.xlane.f32.xlu1 %v14339_v56 }
0x1255   :  { %v24785_v6 = vpop.eup %19094  ;;  %19108 = vpow2.f32 %v14280_v1 }
0x1256   :  { %v24787_v15 = vpop.eup %19096  ;;  %v14284_v7 = vmul.f32 1.442695, %v14231_v27  ;;  %v14286_v3 = vmul.f32 1.442695, %v14232_v17  ;;  %v14345_v39 = vsel %vm152_vm0, %v24785_v6, 0.0 }
0x1257   :  { %v14188_v41 = vpop.xlane.xlu0 %14187  ;;  %v14185_v19 = vpop.xlane.xlu1 %14184  ;;  %v14348_v13 = vsel %vm152_vm0, %v24787_v15, 0.0 }
0x1258   :  { %19110 = vpow2.f32 %v14284_v7  ;;  %v14234_v38 = vsub.f32 %v24676_v35, %v14188_v41  ;;  %v14233_v14 = vsub.f32 %v24674_v37, %v14185_v19  ;;  %14349 = vadd.xlane.f32.xlu0 %v14348_v13  ;;  %14346 = vadd.xlane.f32.xlu1 %v14345_v39 }
0x1259   :  { %v24795_v22 = vpop.eup %19098  ;;  %19112 = vpow2.f32 %v14286_v3 }
0x125a   :  { %v24797_v33 = vpop.eup %19100  ;;  %v14290_v28 = vmul.f32 1.442695, %v14234_v38  ;;  %v14288_v62 = vmul.f32 1.442695, %v14233_v14  ;;  %v14354_v40 = vsel %vm152_vm0, %v24795_v22, 0.0 }
0x125b   :  { %v14191_v57 = vpop.xlane.xlu1 %14190  ;;  %v14194_v63 = vpop.xlane.xlu0 %14193  ;;  %v14351_v1 = vsel %vm152_vm0, %v24797_v33, 0.0 }
0x125c   :  { %19114 = vpow2.f32 %v14290_v28  ;;  %v14235_v37 = vsub.f32 %v24682_v24, %v14191_v57  ;;  %v14236_v35 = vsub.f32 %v24684_v44, %v14194_v63  ;;  %14355 = vadd.xlane.f32.xlu0 %v14354_v40  ;;  %14352 = vadd.xlane.f32.xlu1 %v14351_v1 }
0x125d   :  { %v24805_v46 = vpop.eup %19102  ;;  %19116 = vpow2.f32 %v14288_v62 }
0x125e   :  { %v24807_v52 = vpop.eup %19104  ;;  %v14292_v26 = vmul.f32 1.442695, %v14235_v37  ;;  %v14294_v56 = vmul.f32 1.442695, %v14236_v35  ;;  %v14357_v27 = vsel %vm152_vm0, %v24805_v46, 0.0 }
0x125f   :  { %v14200_v17 = vpop.xlane.xlu0 %14199  ;;  %v14197_v7 = vpop.xlane.xlu1 %14196  ;;  %v14360_v3 = vsel %vm152_vm0, %v24807_v52, 0.0 }
0x1260   :  { %19118 = vpow2.f32 %v14292_v26  ;;  %v14238_v24 = vsub.f32 %v24692_v5, %v14200_v17  ;;  %v14237_v44 = vsub.f32 %v24690_v29, %v14197_v7  ;;  %14361 = vadd.xlane.f32.xlu0 %v14360_v3  ;;  %14358 = vadd.xlane.f32.xlu1 %v14357_v27 }
0x1261   :  { %v24815_v39 = vpop.eup %19106  ;;  %19120 = vpow2.f32 %v14294_v56 }
0x1262   :  { %v24817_v41 = vpop.eup %19108  ;;  %v14298_v19 = vmul.f32 1.442695, %v14238_v24  ;;  %v14296_v13 = vmul.f32 1.442695, %v14237_v44  ;;  %v14366_v38 = vsel %vm152_vm0, %v24815_v39, 0.0 }
0x1263   :  { %v14203_v14 = vpop.xlane.xlu1 %14202  ;;  %v14206_v28 = vpop.xlane.xlu0 %14205  ;;  %v14363_v62 = vsel %vm152_vm0, %v24817_v41, 0.0 }
0x1264   :  { %19122 = vpow2.f32 %v14298_v19  ;;  %v14239_v29 = vsub.f32 %v24698_v11, %v14203_v14  ;;  %14367 = vadd.xlane.f32.xlu0 %v14366_v38  ;;  %v14240_v5 = vsub.f32 %v24700_v51, %v14206_v28  ;;  %14364 = vadd.xlane.f32.xlu1 %v14363_v62 }
0x1265   :  { %v24825_v40 = vpop.eup %19110  ;;  %19124 = vpow2.f32 %v14296_v13 }
0x1266   :  { %v24827_v57 = vpop.eup %19112  ;;  %v14300_v63 = vmul.f32 1.442695, %v14239_v29  ;;  %v14302_v1 = vmul.f32 1.442695, %v14240_v5  ;;  %v14369_v37 = vsel %vm152_vm0, %v24825_v40, 0.0 }
0x1267   :  { %v14372_v35 = vsel %vm152_vm0, %v24827_v57, 0.0  ;;  %v14209_v26 = vpop.xlane.xlu1 %14208 }
0x1268   :  { %19126 = vpow2.f32 %v14300_v63  ;;  %14373 = vadd.xlane.f32.xlu0 %v14372_v35  ;;  %14370 = vadd.xlane.f32.xlu1 %v14369_v37  ;;  %v14241_v11 = vsub.f32 %v24706_v4, %v14209_v26 }
0x1269   :  { %v24834_v51 = vpop.eup %19114  ;;  %19128 = vpow2.f32 %v14302_v1 }
0x126a   :  { %v24836_v56 = vpop.eup %19116  ;;  %v14304_v27 = vmul.f32 1.442695, %v14241_v11  ;;  %v14378_v17 = vsel %vm152_vm0, %v24834_v51, 0.0 }
0x126b   :  { %v14375_v7 = vsel %vm152_vm0, %v24836_v56, 0.0 }
0x126c   :  { %19130 = vpow2.f32 %v14304_v27  ;;  %14379 = vadd.xlane.f32.xlu0 %v14378_v17  ;;  %14376 = vadd.xlane.f32.xlu1 %v14375_v7 }
0x126d   :  { %v24842_v3 = vpop.eup %19118 }
0x126e   :  { %v24844_v24 = vpop.eup %19120  ;;  %v14381_v4 = vsel %vm152_vm0, %v24842_v3, 0.0 }
0x126f   :  { %v14384_v44 = vsel %vm152_vm0, %v24844_v24, 0.0 }
0x1270   :  { %14385 = vadd.xlane.f32.xlu0 %v14384_v44  ;;  %14382 = vadd.xlane.f32.xlu1 %v14381_v4 }
0x1271   :  { %v24850_v19 = vpop.eup %19122 }
0x1272   :  { %v24852_v13 = vpop.eup %19124  ;;  %v14390_v38 = vsel %vm152_vm0, %v24850_v19, 0.0 }
0x1273   :  { %v14387_v14 = vsel %vm152_vm0, %v24852_v13, 0.0 }
0x1274   :  { %14391 = vadd.xlane.f32.xlu0 %v14390_v38  ;;  %14388 = vadd.xlane.f32.xlu1 %v14387_v14 }
0x1275   :  { %v24858_v28 = vpop.eup %19126 }
0x1276   :  { %v24860_v62 = vpop.eup %19128  ;;  %v14393_v29 = vsel %vm152_vm0, %v24858_v28, 0.0 }
0x1277   :  { %v14396_v5 = vsel %vm152_vm0, %v24860_v62, 0.0 }
0x1278   :  { %14397 = vadd.xlane.f32.xlu0 %v14396_v5  ;;  %14394 = vadd.xlane.f32.xlu1 %v14393_v29 }
0x1279   :  { %v24866_v63 = vpop.eup %19130 }
0x127a   :  { %v14399_v1 = vsel %vm152_vm0, %v24866_v63, 0.0 }
0x127c   :  { %14400 = vadd.xlane.f32.xlu1 %v14399_v1 }
0x12c4   :  { %v14308_v37 = vpop.xlane.xlu0 %14307 }
0x12c5   :  { %19132 = vrcp.f32 %v14308_v37 }
0x12c8   :  { %v14311_v35 = vpop.xlane.xlu1 %14310 }
0x12c9   :  { %v14314_v26 = vpop.xlane.xlu0 %14313  ;;  %19134 = vrcp.f32 %v14311_v35 }
0x12ca   :  { %19136 = vrcp.f32 %v14314_v26 }
0x12cd   :  { %v14320_v11 = vpop.xlane.xlu0 %14319  ;;  %v14317_v27 = vpop.xlane.xlu1 %14316 }
0x12ce   :  { %19138 = vrcp.f32 %v14317_v27 }
0x12cf   :  { %19140 = vrcp.f32 %v14320_v11  ;;  %v14484_v11 = vsel %vm24366_vm11, %v19819_v49, 0 }
0x12d1   :  { %v14326_v17 = vpop.xlane.xlu0 %14325  ;;  %v14323_v7 = vpop.xlane.xlu1 %14322 }
0x12d2   :  { %19142 = vrcp.f32 %v14323_v7  ;;  %v19133_v4 = vpop.eup %19132 }
0x12d3   :  { %19144 = vrcp.f32 %v14326_v17  ;;  %v14403_v29 = vmul.f32 %v19133_v4, %v24719_v61 }
0x12d5   :  { %v14332_v44 = vpop.xlane.xlu0 %14331  ;;  %v14329_v38 = vpop.xlane.xlu1 %14328 }
0x12d6   :  { %v19135_v14 = vpop.eup %19134  ;;  %19146 = vrcp.f32 %v14329_v38 }
0x12d7   :  { %v14405_v5 = vmul.f32 %v19135_v14, %v24725_v42  ;;  %19148 = vrcp.f32 %v14332_v44  ;;  %v19137_v26 = vpop.eup %19136 }
0x12d8   :  { %v14407_v61 = vmul.f32 %v19137_v26, %v24727_v31  ;;  %v14485_v31 = vsel %vm24366_vm11, %v19808_v55, 0  ;;  %v14486_v55 = vsel %vm24366_vm11, %v19876_v16, 0  ;;  %v14487_v16 = vsel %vm24366_vm11, %v19860_v36, 0 }
0x12d9   :  { %v14466_v1 = vpack.c.bf16 %v14405_v5, %v14403_v29  ;;  %v14338_v37 = vpop.xlane.xlu0 %14337  ;;  %v14335_v35 = vpop.xlane.xlu1 %14334  ;;  %v14488_v36 = vsel %vm24366_vm11, %v19905_v12, 0  ;;  %v14489_v12 = vsel %vm24366_vm11, %v19896_v23, 0  ;;  %v14490_v23 = vsel %vm24366_vm11, %v19934_v58, 0 }
0x12da   :  { %19150 = vrcp.f32 %v14335_v35  ;;  %v14491_v58 = vsel %vm24366_vm11, %v19925_v9, 0  ;;  %v14492_v9 = vsel %vm24366_vm11, %v19963_v43, 0  ;;  %v14493_v43 = vsel %vm24366_vm11, %v19954_v45, 0 }
0x12db   :  { %18015 = vmatmul.mubr.msk.bf16.vlgmr.msra.gmra.mxu0 %vm152_vm0, %v14466_v1  ;;  %v19139_v27 = vpop.eup %19138  ;;  %19152 = vrcp.f32 %v14338_v37  ;;  %v14494_v45 = vsel %vm24366_vm11, %v19984_v53, 0  ;;  %v14495_v53 = vsel %vm24366_vm11, %v19978_v10, 0  ;;  %v14496_v10 = vsel %vm24366_vm11, %v19995_v47, 0 }
0x12dc   :  { %18025 = vmatpush3.bf16.msra.mxu0 %v14484_v11  ;;  %18026 = vmatprep.mubr.msk.bf16.mxu0 %vm19197_vm1, %v25492_v50  ;;  %v14409_v42 = vmul.f32 %v19139_v27, %v24737_v2  ;;  %v19141_v4 = vpop.eup %19140 }
0x12dd   :  { %v14344_v17 = vpop.xlane.xlu0 %14343  ;;  %v14341_v7 = vpop.xlane.xlu1 %14340  ;;  %18036 = vmatprep.subr.bf16.mxu0 %v25492_v50  ;;  %v14411_v49 = vmul.f32 %v19141_v4, %v24735_v8 }
0x12de   :  { %v14467_v44 = vpack.c.bf16 %v14409_v42, %v14407_v61  ;;  %19154 = vrcp.f32 %v14341_v7 }
0x12df   :  { %v19143_v38 = vpop.eup %19142  ;;  %19156 = vrcp.f32 %v14344_v17 }
0x12e0   :  { %v14413_v14 = vmul.f32 %v19143_v38, %v24745_v0  ;;  %18021 = vmatmul.mubr.msk.bf16.vlgmr.msra.gmra.mxu1 %vm152_vm0, %v14467_v44  ;;  %v19145_v5 = vpop.eup %19144 }
0x12e1   :  { %v14350_v2 = vpop.xlane.xlu0 %14349  ;;  %v14347_v29 = vpop.xlane.xlu1 %14346  ;;  %18031 = vmatpush3.bf16.msra.mxu1 %v14485_v31  ;;  %18032 = vmatprep.mubr.msk.bf16.mxu1 %vm19197_vm1, %v25492_v50  ;;  %v14415_v0 = vmul.f32 %v19145_v5, %v24747_v20 }
0x12e2   :  { %v14468_v1 = vpack.c.bf16 %v14413_v14, %v14411_v49  ;;  %19158 = vrcp.f32 %v14347_v29  ;;  %18042 = vmatprep.subr.bf16.mxu1 %v25492_v50 }
0x12e3   :  { %v19147_v8 = vpop.eup %19146  ;;  %19160 = vrcp.f32 %v14350_v2 }
0x12e4   :  { %v14417_v37 = vmul.f32 %v19147_v8, %v24757_v32  ;;  %18027 = vmatmul.mubr.msk.bf16.vlgmr.msra.gmra.mxu0 %vm152_vm0, %v14468_v1  ;;  %v19149_v11 = vpop.eup %19148 }
0x12e5   :  { %v14356_v35 = vpop.xlane.xlu0 %14355  ;;  %v14353_v26 = vpop.xlane.xlu1 %14352  ;;  %18037 = vmatpush3.bf16.msra.mxu0 %v14486_v55  ;;  %18038 = vmatprep.mubr.msk.bf16.mxu0 %vm19197_vm1, %v25492_v50  ;;  %v14419_v32 = vmul.f32 %v19149_v11, %v24755_v18 }
0x12e6   :  { %v14469_v27 = vpack.c.bf16 %v14417_v37, %v14415_v0  ;;  %19162 = vrcp.f32 %v14353_v26  ;;  %18048 = vmatprep.subr.bf16.mxu0 %v25492_v50 }
0x12e7   :  { %v19151_v20 = vpop.eup %19150  ;;  %19164 = vrcp.f32 %v14356_v35 }
0x12e8   :  { %v14421_v61 = vmul.f32 %v19151_v20, %v24765_v30  ;;  %18033 = vmatmul.mubr.msk.bf16.vlgmr.msra.gmra.mxu1 %vm152_vm0, %v14469_v27  ;;  %v19153_v7 = vpop.eup %19152 }
0x12e9   :  { %v14362_v42 = vpop.xlane.xlu0 %14361  ;;  %v14359_v17 = vpop.xlane.xlu1 %14358  ;;  %18043 = vmatpush3.bf16.msra.mxu1 %v14487_v16  ;;  %18044 = vmatprep.mubr.msk.bf16.mxu1 %vm19197_vm1, %v25492_v50  ;;  %v14423_v30 = vmul.f32 %v19153_v7, %v24767_v48 }
0x12ea   :  { %v14470_v4 = vpack.c.bf16 %v14421_v61, %v14419_v32  ;;  %19166 = vrcp.f32 %v14359_v17  ;;  %18054 = vmatprep.subr.bf16.mxu1 %v25492_v50 }
0x12eb   :  { %v19155_v18 = vpop.eup %19154  ;;  %19168 = vrcp.f32 %v14362_v42 }
0x12ec   :  { %v14425_v44 = vmul.f32 %v19155_v18, %v24777_v54  ;;  %18039 = vmatmul.mubr.msk.bf16.vlgmr.msra.gmra.mxu0 %vm152_vm0, %v14470_v4  ;;  %v19157_v14 = vpop.eup %19156 }
0x12ed   :  { %v14368_v38 = vpop.xlane.xlu0 %14367  ;;  %v14365_v49 = vpop.xlane.xlu1 %14364  ;;  %18049 = vmatpush3.bf16.msra.mxu0 %v14488_v36  ;;  %18050 = vmatprep.mubr.msk.bf16.mxu0 %vm19197_vm1, %v25492_v50  ;;  %v14427_v54 = vmul.f32 %v19157_v14, %v24775_v21 }
0x12ee   :  { %v14471_v31 = vpack.c.bf16 %v14425_v44, %v14423_v30  ;;  %19170 = vrcp.f32 %v14365_v49  ;;  %18060 = vmatprep.subr.bf16.mxu0 %v25492_v50 }
0x12ef   :  { %v19159_v48 = vpop.eup %19158  ;;  %19172 = vrcp.f32 %v14368_v38 }
0x12f0   :  { %v14429_v2 = vmul.f32 %v19159_v48, %v24785_v6  ;;  %18045 = vmatmul.mubr.msk.bf16.vlgmr.msra.gmra.mxu1 %vm152_vm0, %v14471_v31  ;;  %v19161_v1 = vpop.eup %19160 }
0x12f1   :  { %v14374_v29 = vpop.xlane.xlu0 %14373  ;;  %v14371_v5 = vpop.xlane.xlu1 %14370  ;;  %18055 = vmatpush3.bf16.msra.mxu1 %v14489_v12  ;;  %18056 = vmatprep.mubr.msk.bf16.mxu1 %vm19197_vm1, %v25492_v50  ;;  %v14431_v6 = vmul.f32 %v19161_v1, %v24787_v15 }
0x12f2   :  { %v14472_v8 = vpack.c.bf16 %v14429_v2, %v14427_v54  ;;  %19174 = vrcp.f32 %v14371_v5  ;;  %18066 = vmatprep.subr.bf16.mxu1 %v25492_v50 }
0x12f3   :  { %v19163_v21 = vpop.eup %19162  ;;  %19176 = vrcp.f32 %v14374_v29 }
0x12f4   :  { %v14433_v0 = vmul.f32 %v19163_v21, %v24797_v33  ;;  %18051 = vmatmul.mubr.msk.bf16.vlgmr.msra.gmra.mxu0 %vm152_vm0, %v14472_v8  ;;  %v19165_v35 = vpop.eup %19164 }
0x12f5   :  { %v14380_v37 = vpop.xlane.xlu0 %14379  ;;  %v14377_v55 = vpop.xlane.xlu1 %14376  ;;  %18061 = vmatpush3.bf16.msra.mxu0 %v14490_v23  ;;  %18062 = vmatprep.mubr.msk.bf16.mxu0 %vm19197_vm1, %v25492_v50  ;;  %v14435_v33 = vmul.f32 %v19165_v35, %v24795_v22  ;;  %v18171_v35 = vld [vmem:[%s25349_s2 + $0x18] sm:$0xff]  }
0x12f6   :  { %v14473_v26 = vpack.c.bf16 %v14433_v0, %v14431_v6  ;;  %19178 = vrcp.f32 %v14377_v55  ;;  %18072 = vmatprep.subr.bf16.mxu0 %v25492_v50 }
0x12f7   :  { %v19167_v15 = vpop.eup %19166  ;;  %19180 = vrcp.f32 %v14380_v37  ;;  %v18165_v37 = vld [vmem:[%s25349_s2 + $0x48] sm:$0xff]  }
0x12f8   :  { %v14437_v11 = vmul.f32 %v19167_v15, %v24805_v46  ;;  %18057 = vmatmul.mubr.msk.bf16.vlgmr.msra.gmra.mxu1 %vm152_vm0, %v14473_v26  ;;  %v19169_v32 = vpop.eup %19168 }
0x12f9   :  { %v14386_v27 = vpop.xlane.xlu0 %14385  ;;  %v14383_v20 = vpop.xlane.xlu1 %14382  ;;  %18067 = vmatpush3.bf16.msra.mxu1 %v14491_v58  ;;  %18068 = vmatprep.mubr.msk.bf16.mxu1 %vm19197_vm1, %v25492_v50  ;;  %v14439_v46 = vmul.f32 %v19169_v32, %v24807_v52 }
0x12fa   :  { %v14474_v61 = vpack.c.bf16 %v14437_v11, %v14435_v33  ;;  %19182 = vrcp.f32 %v14383_v20  ;;  %18078 = vmatprep.subr.bf16.mxu1 %v25492_v50 }
0x12fb   :  { %v19171_v22 = vpop.eup %19170  ;;  %19184 = vrcp.f32 %v14386_v27 }
0x12fc   :  { %v14441_v16 = vmul.f32 %v19171_v22, %v24817_v41  ;;  %18063 = vmatmul.mubr.msk.bf16.vlgmr.msra.gmra.mxu0 %vm152_vm0, %v14474_v61  ;;  %v19173_v7 = vpop.eup %19172 }
0x12fd   :  { %v14392_v42 = vpop.xlane.xlu0 %14391  ;;  %v14389_v17 = vpop.xlane.xlu1 %14388  ;;  %18073 = vmatpush3.bf16.msra.mxu0 %v14492_v9  ;;  %18074 = vmatprep.mubr.msk.bf16.mxu0 %vm19197_vm1, %v25492_v50  ;;  %v14443_v41 = vmul.f32 %v19173_v7, %v24815_v39 }
0x12fe   :  { %v14475_v4 = vpack.c.bf16 %v14441_v16, %v14439_v46  ;;  %19186 = vrcp.f32 %v14389_v17  ;;  %18084 = vmatprep.subr.bf16.mxu0 %v25492_v50  ;;  %v26248_v16 = vld [vmem:[#allocation32_spill] sm:$0xff] }
0x12ff   :  { %v19175_v52 = vpop.eup %19174  ;;  %19188 = vrcp.f32 %v14392_v42  ;;  %v26249_v42 = vld [vmem:[#allocation85_spill] sm:$0xff] }
0x1300   :  { %v14445_v18 = vmul.f32 %v19175_v52, %v24825_v40  ;;  %18069 = vmatmul.mubr.msk.bf16.vlgmr.msra.gmra.mxu1 %vm152_vm0, %v14475_v4  ;;  %v19177_v36 = vpop.eup %19176 }
0x1301   :  { %v14398_v30 = vpop.xlane.xlu0 %14397  ;;  %v14395_v44 = vpop.xlane.xlu1 %14394  ;;  %18079 = vmatpush3.bf16.msra.mxu1 %v14493_v43  ;;  %18080 = vmatprep.mubr.msk.bf16.mxu1 %vm19197_vm1, %v25492_v50  ;;  %v14447_v40 = vmul.f32 %v19177_v36, %v24827_v57  ;;  %v26251_v43 = vld [vmem:[#allocation86_spill] sm:$0xff] }
0x1302   :  { %v14476_v38 = vpack.c.bf16 %v14445_v18, %v14443_v41  ;;  %19190 = vrcp.f32 %v14395_v44  ;;  %18090 = vmatprep.subr.bf16.mxu1 %v25492_v50  ;;  %v26250_v41 = vld [vmem:[#allocation29_spill] sm:$0xff] }
0x1303   :  { %v19179_v39 = vpop.eup %19178  ;;  %19192 = vrcp.f32 %v14398_v30 }
0x1304   :  { %v14449_v49 = vmul.f32 %v19179_v39, %v24836_v56  ;;  %18075 = vmatmul.mubr.msk.bf16.vlgmr.msra.gmra.mxu0 %vm152_vm0, %v14476_v38  ;;  %v19181_v31 = vpop.eup %19180 }
0x1305   :  { %v14401_v14 = vpop.xlane.xlu1 %14400  ;;  %18085 = vmatpush3.bf16.msra.mxu0 %v14494_v45  ;;  %18086 = vmatprep.mubr.msk.bf16.mxu0 %vm19197_vm1, %v25492_v50  ;;  %v14451_v57 = vmul.f32 %v19181_v31, %v24834_v51  ;;  %v18164_v51 = vld [vmem:[%s25349_s2 + $0x50] sm:$0xff]  }
0x1306   :  { %19194 = vrcp.f32 %v14401_v14  ;;  %v14477_v48 = vpack.c.bf16 %v14449_v49, %v14447_v40  ;;  %18096 = vmatprep.subr.bf16.mxu0 %v25492_v50  ;;  %v26252_v49 = vld [vmem:[#allocation2_spill] sm:$0xff]  ;;  %v26253_v14 = vld [vmem:[#allocation87_spill] sm:$0xff] }
0x1307   :  { %v19183_v54 = vpop.eup %19182 }
0x1308   :  { %v14453_v56 = vmul.f32 %v19183_v54, %v24842_v3  ;;  %18081 = vmatmul.mubr.msk.bf16.vlgmr.msra.gmra.mxu1 %vm152_vm0, %v14477_v48  ;;  %v19185_v2 = vpop.eup %19184 }
0x1309   :  { %18091 = vmatpush3.bf16.msra.mxu1 %v14495_v53  ;;  %18092 = vmatprep.mubr.msk.bf16.mxu1 %vm19197_vm1, %v25492_v50  ;;  %v14455_v3 = vmul.f32 %v19185_v2, %v24844_v24  ;;  %v26254_v2 = vld [vmem:[#allocation3_spill] sm:$0xff] }
0x130a   :  { %v14478_v12 = vpack.c.bf16 %v14453_v56, %v14451_v57  ;;  %18102 = vmatprep.subr.bf16.mxu1 %v25492_v50 }
0x130b   :  { %v19187_v29 = vpop.eup %19186 }
0x130c   :  { %v14457_v5 = vmul.f32 %v19187_v29, %v24852_v13  ;;  %18087 = vmatmul.mubr.msk.bf16.vlgmr.msra.gmra.mxu0 %vm152_vm0, %v14478_v12  ;;  %v19189_v1 = vpop.eup %19188  ;;  %v14497_v13 = vsel %vm24366_vm11, %v19992_v60, 0  ;;  %v18166_v60 = vld [vmem:[%s25349_s2 + $0x40] sm:$0xff]  }
0x130d   :  { %18097 = vmatpush3.bf16.msra.mxu0 %v14496_v10  ;;  %18098 = vmatprep.mubr.msk.bf16.mxu0 %vm19197_vm1, %v25492_v50  ;;  %v14459_v0 = vmul.f32 %v19189_v1, %v24850_v19 }
0x130e   :  { %v14479_v8 = vpack.c.bf16 %v14457_v5, %v14455_v3  ;;  %18108 = vmatprep.subr.bf16.mxu0 %v18164_v51 }
0x130f   :  { %v19191_v21 = vpop.eup %19190 }
0x1310   :  { %v19193_v6 = vpop.eup %19192  ;;  %v14461_v24 = vmul.f32 %v19191_v21, %v24858_v28  ;;  %18093 = vmatmul.mubr.msk.bf16.vlgmr.msra.gmra.mxu1 %vm152_vm0, %v14479_v8  ;;  %v26256_v21 = vld [vmem:[#allocation40_spill] sm:$0xff] }
0x1311   :  { %18103 = vmatpush3.bf16.msra.mxu1 %v14497_v13  ;;  %18104 = vmatprep.mubr.msk.bf16.mxu1 %vm19197_vm1, %v25492_v50  ;;  %v14463_v19 = vmul.f32 %v19193_v6, %v24860_v62  ;;  %v18167_v50 = vld [vmem:[%s25349_s2 + $0x38] sm:$0xff]   ;;  %v18169_v62 = vld [vmem:[%s25349_s2 + $0x28] sm:$0xff]  }
0x1312   :  { %v14480_v23 = vpack.c.bf16 %v14461_v24, %v14459_v0  ;;  %v26257_v0 = vld [vmem:[#allocation89_spill] sm:$0xff] }
0x1313   :  { %v19195_v47 = vpop.eup %19194 }
0x1314   :  { %v14465_v28 = vmul.f32 %v19195_v47, %v24866_v63  ;;  %18099 = vmatmul.mubr.msk.bf16.vlgmr.msra.gmra.mxu0 %vm152_vm0, %v14480_v23  ;;  %v18170_v63 = vld [vmem:[%s25349_s2 + $0x20] sm:$0xff]  }
0x1315   :  { %18109 = vmatpush3.bf16.msra.mxu0 %v18164_v51  ;;  %v26255_v51 = vld [vmem:[#allocation88_spill] sm:$0xff] }
0x1316   :  { %v14481_v55 = vpack.c.bf16 %v14465_v28, %v14463_v19  ;;  %18110 = vmatprep.subr.bf16.mxu0 %v18165_v37  ;;  %v26258_v28 = vld [vmem:[#allocation37_spill] sm:$0xff] }
0x1318   :  { %18105 = vmatmul.mubr.msk.bf16.vlgmr.msra.gmra.mxu1 %vm152_vm0, %v14481_v55  ;;  %vm15527_vm0 = vcmask 261120  }
0x1319   :  { %18111 = vmatpush3.bf16.msra.mxu0 %v18165_v37 }
0x131a   :  { %18112 = vmatprep.subr.bf16.mxu0 %v18166_v60 }
0x131d   :  { %18113 = vmatpush3.bf16.msra.mxu0 %v18166_v60  ;;  %v26259_v60 = vld [vmem:[#allocation90_spill] sm:$0xff] }
0x131e   :  { %18114 = vmatprep.subr.bf16.mxu0 %v18167_v50 }
0x1321   :  { %18115 = vmatpush3.bf16.msra.mxu0 %v18167_v50 }
0x1322   :  { %18116 = vmatprep.subr.bf16.mxu0 %v18168_v25 }
0x1325   :  { %18117 = vmatpush3.bf16.msra.mxu0 %v18168_v25 }
0x1326   :  { %18118 = vmatprep.subr.bf16.mxu0 %v18169_v62 }
0x1329   :  { %18119 = vmatpush3.bf16.msra.mxu0 %v18169_v62 }
0x132a   :  { %18120 = vmatprep.subr.bf16.mxu0 %v18170_v63 }
0x132d   :  { %18121 = vmatpush3.bf16.msra.mxu0 %v18170_v63 }
0x132e   :  { %18122 = vmatprep.subr.bf16.mxu0 %v18171_v35 }
0x1331   :  { %18123 = vmatpush3.bf16.msra.mxu0 %v18171_v35 }
0x139b   :  { %v14535_v26 = vpop.f32.mrf.mxu0 }
0x139c   :  { %v25025_v11 = vadd.f32 %v14535_v26, %v24487_v34 }
0x139d   :  { %v18016_v15 = vpop.f32.mrf.mxu0 }
0x139e   :  { %v26260_v15 = vld [vmem:[#allocation4_spill] sm:$0xff] }
0x139f   :  { %v14538_v33 = vpop.f32.mrf.mxu0 }
0x13a0   :  { %v25028_v58 = vadd.f32 %v14538_v33, %v24490_v59  ;;  %v14579_v27 = vpop.f32.mrf.mxu1 }
0x13a1   :  { %v18017_v20 = vpop.f32.mrf.mxu0  ;;  %v25033_v9 = vadd.f32 %v14579_v27, %v26248_v16  ;;  %v26261_v27 = vld [vmem:[#allocation91_spill] sm:$0xff] }
0x13a2   :  { %v15234_v32 = vpack.c.bf16 %v25028_v58, %v25025_v11  ;;  %v18022_v61 = vpop.f32.mrf.mxu1 }
0x13a4   :  { %18124 = vmatprep.mubr.bf16.mxu0 %v15234_v32  ;;  %v14582_v22 = vpop.f32.mrf.mxu1  ;;  %v14623_v46 = vpop.f32.mrf.mxu0 }
0x13a5   :  { %v25036_v17 = vadd.f32 %v14582_v22, %v26249_v42  ;;  %v25041_v18 = vadd.f32 %v14623_v46, %v26250_v41  ;;  %v26262_v42 = vld [vmem:[#allocation5_spill] sm:$0xff] }
0x13a6   :  { %v18023_v34 = vpop.f32.mrf.mxu1  ;;  %v18028_v7 = vpop.f32.mrf.mxu0 }
0x13a7   :  { %v15235_v59 = vpack.c.bf16 %v25036_v17, %v25033_v9  ;;  %v26263_v7 = vld [vmem:[#allocation92_spill] sm:$0xff] }
0x13a8   :  { %v14626_v4 = vpop.f32.mrf.mxu0  ;;  %v14667_v52 = vpop.f32.mrf.mxu1 }
0x13a9   :  { %v25044_v30 = vadd.f32 %v14626_v4, %v26251_v43  ;;  %18125 = vmatmul.mubr.bf16.vlgmr.msra.gmra.mxu0 %v15235_v59  ;;  %v25049_v45 = vadd.f32 %v14667_v52, %v26252_v49 }
0x13aa   :  { %v18029_v44 = vpop.f32.mrf.mxu0  ;;  %v18034_v36 = vpop.f32.mrf.mxu1 }
0x13ab   :  { %v15236_v38 = vpack.c.bf16 %v25044_v30, %v25041_v18  ;;  %v26264_v36 = vld [vmem:[#allocation48_spill] sm:$0xff] }
0x13ac   :  { %v14670_v39 = vpop.f32.mrf.mxu1  ;;  %v14711_v40 = vpop.f32.mrf.mxu0 }
0x13ad   :  { %v25052_v31 = vadd.f32 %v14670_v39, %v26253_v14  ;;  %18128 = vmatprep.mubr.bf16.mxu0 %v15236_v38  ;;  %v25057_v12 = vadd.f32 %v14711_v40, %v26254_v2  ;;  %v26265_v39 = vld [vmem:[#allocation93_spill] sm:$0xff]  ;;  %v26267_v2 = vld [vmem:[#allocation94_spill] sm:$0xff] }
0x13ae   :  { %v18035_v48 = vpop.f32.mrf.mxu1  ;;  %v18040_v54 = vpop.f32.mrf.mxu0 }
0x13af   :  { %v15237_v57 = vpack.c.bf16 %v25052_v31, %v25049_v45 }
0x13b0   :  { %v14714_v56 = vpop.f32.mrf.mxu0  ;;  %v14755_v53 = vpop.f32.mrf.mxu1 }
0x13b1   :  { %v25060_v29 = vadd.f32 %v14714_v56, %v26255_v51  ;;  %18129 = vmatmul.mubr.bf16.gmra.mxu0 %v15237_v57  ;;  %v25065_v6 = vadd.f32 %v14755_v53, %v26256_v21  ;;  %v26266_v56 = vld [vmem:[#allocation46_spill] sm:$0xff] }
0x13b2   :  { %v18041_v3 = vpop.f32.mrf.mxu0  ;;  %v18046_v5 = vpop.f32.mrf.mxu1  ;;  %v26268_v21 = vld [vmem:[#allocation6_spill] sm:$0xff] }
0x13b3   :  { %v15238_v10 = vpack.c.bf16 %v25060_v29, %v25057_v12 }
0x13b4   :  { %v14758_v1 = vpop.f32.mrf.mxu1  ;;  %v14799_v8 = vpop.f32.mrf.mxu0 }
0x13b5   :  { %v25068_v24 = vadd.f32 %v14758_v1, %v26257_v0  ;;  %18132 = vmatprep.mubr.bf16.mxu0 %v15238_v10  ;;  %v25073_v55 = vadd.f32 %v14799_v8, %v26258_v28 }
0x13b6   :  { %v18047_v13 = vpop.f32.mrf.mxu1  ;;  %v18052_v47 = vpop.f32.mrf.mxu0 }
0x13b7   :  { %v15239_v23 = vpack.c.bf16 %v25068_v24, %v25065_v6  ;;  %v26269_v13 = vld [vmem:[#allocation95_spill] sm:$0xff] }
0x13b8   :  { %v14802_v37 = vpop.f32.mrf.mxu0  ;;  %v14843_v19 = vpop.f32.mrf.mxu1 }
0x13b9   :  { %v25076_v50 = vadd.f32 %v14802_v37, %v26259_v60  ;;  %18133 = vmatmul.mubr.bf16.gmra.mxu0 %v15239_v23  ;;  %v25081_v33 = vadd.f32 %v14843_v19, %v26260_v15 }
0x13ba   :  { %v18053_v25 = vpop.f32.mrf.mxu0  ;;  %v18058_v62 = vpop.f32.mrf.mxu1 }
0x13bb   :  { %v15240_v63 = vpack.c.bf16 %v25076_v50, %v25073_v55  ;;  %v26270_v25 = vld [vmem:[#allocation7_spill] sm:$0xff] }
0x13bc   :  { %v14846_v35 = vpop.f32.mrf.mxu1  ;;  %v14887_v26 = vpop.f32.mrf.mxu0 }
0x13bd   :  { %v25084_v20 = vadd.f32 %v14846_v35, %v26261_v27  ;;  %18136 = vmatprep.mubr.bf16.mxu0 %v15240_v63  ;;  %v25089_v34 = vadd.f32 %v14887_v26, %v26262_v42  ;;  %v26271_v63 = vld [vmem:[#allocation96_spill] sm:$0xff] }
0x13be   :  { %v18059_v32 = vpop.f32.mrf.mxu1  ;;  %v18064_v61 = vpop.f32.mrf.mxu0 }
0x13bf   :  { %v15241_v22 = vpack.c.bf16 %v25084_v20, %v25081_v33 }
0x13c0   :  { %v14890_v46 = vpop.f32.mrf.mxu0  ;;  %v14931_v16 = vpop.f32.mrf.mxu1 }
0x13c1   :  { %v25092_v59 = vadd.f32 %v14890_v46, %v26263_v7  ;;  %18137 = vmatmul.mubr.bf16.gmra.mxu0 %v15241_v22  ;;  %v25097_v38 = vadd.f32 %v14931_v16, %v26264_v36  ;;  %v26272_v22 = vld [vmem:[#allocation56_spill] sm:$0xff]  ;;  %v26273_v16 = vld [vmem:[#allocation97_spill] sm:$0xff] }
0x13c2   :  { %v18065_v4 = vpop.f32.mrf.mxu0  ;;  %v18070_v52 = vpop.f32.mrf.mxu1 }
0x13c3   :  { %v15242_v41 = vpack.c.bf16 %v25092_v59, %v25089_v34 }
0x13c4   :  { %v14934_v43 = vpop.f32.mrf.mxu1  ;;  %v14975_v44 = vpop.f32.mrf.mxu0 }
0x13c5   :  { %v25100_v40 = vadd.f32 %v14934_v43, %v26265_v39  ;;  %18140 = vmatprep.mubr.bf16.mxu0 %v15242_v41  ;;  %v25105_v53 = vadd.f32 %v14975_v44, %v26266_v56  ;;  %v26274_v44 = vld [vmem:[#allocation54_spill] sm:$0xff]  ;;  %v26276_v56 = vld [vmem:[#allocation8_spill] sm:$0xff] }
0x13c6   :  { %v18071_v49 = vpop.f32.mrf.mxu1  ;;  %v18076_v14 = vpop.f32.mrf.mxu0  ;;  %v26275_v39 = vld [vmem:[#allocation98_spill] sm:$0xff] }
0x13c7   :  { %v15243_v48 = vpack.c.bf16 %v25100_v40, %v25097_v38 }
0x13c8   :  { %v14978_v54 = vpop.f32.mrf.mxu0  ;;  %v15019_v57 = vpop.f32.mrf.mxu1 }
0x13c9   :  { %v25108_v51 = vadd.f32 %v14978_v54, %v26267_v2  ;;  %18141 = vmatmul.mubr.bf16.gmra.mxu0 %v15243_v48  ;;  %v25113_v0 = vadd.f32 %v15019_v57, %v26268_v21 }
0x13ca   :  { %v18077_v3 = vpop.f32.mrf.mxu0  ;;  %v18082_v5 = vpop.f32.mrf.mxu1 }
0x13cb   :  { %v15244_v10 = vpack.c.bf16 %v25108_v51, %v25105_v53  ;;  %v26277_v3 = vld [vmem:[#allocation99_spill] sm:$0xff] }
0x13cc   :  { %v15022_v1 = vpop.f32.mrf.mxu1  ;;  %v15063_v8 = vpop.f32.mrf.mxu0 }
0x13cd   :  { %v25116_v47 = vadd.f32 %v15022_v1, %v26269_v13  ;;  %18144 = vmatprep.mubr.bf16.mxu0 %v15244_v10  ;;  %v25121_v62 = vadd.f32 %v15063_v8, %v26270_v25  ;;  %v25155_v8 = vld [vmem:[%s25352_s3 + $0x3] ss:$0 sm:$0xff] }
0x13ce   :  { %v18083_v23 = vpop.f32.mrf.mxu1  ;;  %v18088_v37 = vpop.f32.mrf.mxu0 }
0x13cf   :  { %v15245_v19 = vpack.c.bf16 %v25116_v47, %v25113_v0 }
0x13d0   :  { %v15066_v28 = vpop.f32.mrf.mxu0  ;;  %v15107_v60 = vpop.f32.mrf.mxu1 }
0x13d1   :  { %v25124_v35 = vadd.f32 %v15066_v28, %v26271_v63  ;;  %18145 = vmatmul.mubr.bf16.gmra.mxu0 %v15245_v19  ;;  %v25129_v46 = vadd.f32 %v15107_v60, %v26272_v22 }
0x13d2   :  { %v18089_v26 = vpop.f32.mrf.mxu0  ;;  %v18094_v15 = vpop.f32.mrf.mxu1 }
0x13d3   :  { %v15246_v27 = vpack.c.bf16 %v25124_v35, %v25121_v62 }
0x13d4   :  { %v15110_v32 = vpop.f32.mrf.mxu1  ;;  %v15151_v61 = vpop.f32.mrf.mxu0 }
0x13d5   :  { %v25132_v42 = vadd.f32 %v15110_v32, %v26273_v16  ;;  %18148 = vmatprep.mubr.bf16.mxu0 %v15246_v27  ;;  %v25137_v36 = vadd.f32 %v15151_v61, %v26274_v44 }
0x13d6   :  { %v18095_v7 = vpop.f32.mrf.mxu1  ;;  %v18100_v4 = vpop.f32.mrf.mxu0 }
0x13d7   :  { %v15247_v52 = vpack.c.bf16 %v25132_v42, %v25129_v46 }
0x13d8   :  { %v15154_v41 = vpop.f32.mrf.mxu0  ;;  %v15195_v43 = vpop.f32.mrf.mxu1 }
0x13d9   :  { %v25140_v49 = vadd.f32 %v15154_v41, %v26275_v39  ;;  %18149 = vmatmul.mubr.bf16.gmra.mxu0 %v15247_v52  ;;  %v25145_v2 = vadd.f32 %v15195_v43, %v26276_v56 }
0x13da   :  { %v18101_v14 = vpop.f32.mrf.mxu0  ;;  %v18106_v48 = vpop.f32.mrf.mxu1 }
0x13db   :  { %v15248_v54 = vpack.c.bf16 %v25140_v49, %v25137_v36 }
0x13dc   :  { %v15198_v57 = vpop.f32.mrf.mxu1 }
0x13dd   :  { %v25148_v5 = vadd.f32 %v15198_v57, %v26277_v3  ;;  %18152 = vmatprep.mubr.bf16.mxu0 %v15248_v54 }
0x13de   :  { %v18107_v10 = vpop.f32.mrf.mxu1 }
0x13df   :  { %v15249_v1 = vpack.c.bf16 %v25148_v5, %v25145_v2 }
0x13e1   :  { %18153 = vmatmul.mubr.bf16.gmra.mxu0 %v15249_v1 }
0x1469   :  { %v18126_v21 = vpop.f32.mrf.mxu0 }
0x146a   :  { %v15345_v13 = vadd.f32 %v18126_v21, %v25155_v8 }
0x146b   :  { %v15336_v23 = vpop.f32.mrf.mxu0 }
0x146c   :  { %v15465_v37 = vmax.f32 %v15345_v13, 0.0  ;;  %v15337_v19 = vadd.f32 %v25155_v8, %v15336_v23 }
0x146d   :  { %v18127_v28 = vpop.f32.mrf.mxu0 }
0x146e   :  { %v15497_v60 = vadd.f32 %v15465_v37, %v25033_v9  ;;  %v15463_v25 = vmax.f32 %v15337_v19, 0.0  ;;  %v15348_v63 = vadd.f32 %v18127_v28, %v25155_v8 }
0x146f   :  { %v15339_v26 = vpop.f32.mrf.mxu0 }
0x1470   :  { %15530 = vst.msk [vmem:[%s25353_s4 + $0x10] sm:$0xff] %vm15527_vm0, %v15497_v60  ;;  %v15495_v15 = vadd.f32 %v15463_v25, %v25025_v11  ;;  %v15466_v27 = vmax.f32 %v15348_v63, 0.0  ;;  %v15340_v32 = vadd.f32 %v25155_v8, %v15339_v26 }
0x1471   :  { %v18130_v61 = vpop.f32.mrf.mxu0 }
0x1472   :  { %15528 = vst.msk [vmem:[%s25353_s4] sm:$0xff] %vm15527_vm0, %v15495_v15  ;;  %v15498_v9 = vadd.f32 %v15466_v27, %v25036_v17  ;;  %v15464_v22 = vmax.f32 %v15340_v32, 0.0  ;;  %v15361_v16 = vadd.f32 %v18130_v61, %v25155_v8 }
0x1473   :  { %v15352_v7 = vpop.f32.mrf.mxu0 }
0x1474   :  { %15531 = vst.msk [vmem:[%s25353_s4 + $0x18] sm:$0xff] %vm15527_vm0, %v15498_v9  ;;  %v15496_v11 = vadd.f32 %v15464_v22, %v25028_v58  ;;  %v15469_v4 = vmax.f32 %v15361_v16, 0.0  ;;  %v15353_v52 = vadd.f32 %v25155_v8, %v15352_v7 }
0x1475   :  { %v18131_v41 = vpop.f32.mrf.mxu0 }
0x1476   :  { %15529 = vst.msk [vmem:[%s25353_s4 + $0x8] sm:$0xff] %vm15527_vm0, %v15496_v11  ;;  %v15501_v17 = vadd.f32 %v15469_v4, %v25049_v45  ;;  %v15467_v43 = vmax.f32 %v15353_v52, 0.0  ;;  %v15364_v44 = vadd.f32 %v18131_v41, %v25155_v8 }
0x1477   :  { %v15355_v39 = vpop.f32.mrf.mxu0 }
0x1478   :  { %15534 = vst.msk [vmem:[%s25353_s4 + $0x30] sm:$0xff] %vm15527_vm0, %v15501_v17  ;;  %v15499_v58 = vadd.f32 %v15467_v43, %v25041_v18  ;;  %v15470_v14 = vmax.f32 %v15364_v44, 0.0  ;;  %v15356_v48 = vadd.f32 %v25155_v8, %v15355_v39 }
0x1479   :  { %v18134_v54 = vpop.f32.mrf.mxu0 }
0x147a   :  { %15532 = vst.msk [vmem:[%s25353_s4 + $0x20] sm:$0xff] %vm15527_vm0, %v15499_v58  ;;  %v15502_v45 = vadd.f32 %v15470_v14, %v25052_v31  ;;  %v15468_v57 = vmax.f32 %v15356_v48, 0.0  ;;  %v15377_v56 = vadd.f32 %v18134_v54, %v25155_v8 }
0x147b   :  { %v15368_v3 = vpop.f32.mrf.mxu0 }
0x147c   :  { %15535 = vst.msk [vmem:[%s25353_s4 + $0x38] sm:$0xff] %vm15527_vm0, %v15502_v45  ;;  %v15500_v18 = vadd.f32 %v15468_v57, %v25044_v30  ;;  %v15473_v10 = vmax.f32 %v15377_v56, 0.0  ;;  %v15369_v1 = vadd.f32 %v25155_v8, %v15368_v3 }
0x147d   :  { %v18135_v21 = vpop.f32.mrf.mxu0 }
0x147e   :  { %15533 = vst.msk [vmem:[%s25353_s4 + $0x28] sm:$0xff] %vm15527_vm0, %v15500_v18  ;;  %v15505_v31 = vadd.f32 %v15473_v10, %v25065_v6  ;;  %v15471_v13 = vmax.f32 %v15369_v1, 0.0  ;;  %v15380_v23 = vadd.f32 %v18135_v21, %v25155_v8 }
0x147f   :  { %v15371_v37 = vpop.f32.mrf.mxu0 }
0x1480   :  { %15538 = vst.msk [vmem:[%s25353_s4 + $0x50] sm:$0xff] %vm15527_vm0, %v15505_v31  ;;  %v15503_v30 = vadd.f32 %v15471_v13, %v25057_v12  ;;  %v15474_v19 = vmax.f32 %v15380_v23, 0.0  ;;  %v15372_v28 = vadd.f32 %v25155_v8, %v15371_v37 }
0x1481   :  { %v18138_v60 = vpop.f32.mrf.mxu0 }
0x1482   :  { %15536 = vst.msk [vmem:[%s25353_s4 + $0x40] sm:$0xff] %vm15527_vm0, %v15503_v30  ;;  %v15506_v6 = vadd.f32 %v15474_v19, %v25068_v24  ;;  %v15472_v25 = vmax.f32 %v15372_v28, 0.0  ;;  %v15393_v63 = vadd.f32 %v18138_v60, %v25155_v8 }
0x1483   :  { %v15384_v26 = vpop.f32.mrf.mxu0 }
0x1484   :  { %15539 = vst.msk [vmem:[%s25353_s4 + $0x58] sm:$0xff] %vm15527_vm0, %v15506_v6  ;;  %v15504_v12 = vadd.f32 %v15472_v25, %v25060_v29  ;;  %v15477_v15 = vmax.f32 %v15393_v63, 0.0  ;;  %v15385_v27 = vadd.f32 %v25155_v8, %v15384_v26 }
0x1485   :  { %v18139_v32 = vpop.f32.mrf.mxu0 }
0x1486   :  { %15537 = vst.msk [vmem:[%s25353_s4 + $0x48] sm:$0xff] %vm15527_vm0, %v15504_v12  ;;  %v15509_v24 = vadd.f32 %v15477_v15, %v25081_v33  ;;  %v15475_v61 = vmax.f32 %v15385_v27, 0.0  ;;  %v15396_v9 = vadd.f32 %v18139_v32, %v25155_v8 }
0x1487   :  { %v15387_v22 = vpop.f32.mrf.mxu0 }
0x1488   :  { %15542 = vst.msk [vmem:[%s25353_s4 + $0x70] sm:$0xff] %vm15527_vm0, %v15509_v24  ;;  %v15507_v29 = vadd.f32 %v15475_v61, %v25073_v55  ;;  %v15478_v16 = vmax.f32 %v15396_v9, 0.0  ;;  %v15388_v7 = vadd.f32 %v25155_v8, %v15387_v22 }
0x1489   :  { %v18142_v11 = vpop.f32.mrf.mxu0 }
0x148a   :  { %15540 = vst.msk [vmem:[%s25353_s4 + $0x60] sm:$0xff] %vm15527_vm0, %v15507_v29  ;;  %v15510_v33 = vadd.f32 %v15478_v16, %v25084_v20  ;;  %v15476_v4 = vmax.f32 %v15388_v7, 0.0  ;;  %v15409_v52 = vadd.f32 %v18142_v11, %v25155_v8 }
0x148b   :  { %v15400_v41 = vpop.f32.mrf.mxu0 }
0x148c   :  { %15543 = vst.msk [vmem:[%s25353_s4 + $0x78] sm:$0xff] %vm15527_vm0, %v15510_v33  ;;  %v15508_v55 = vadd.f32 %v15476_v4, %v25076_v50  ;;  %v15481_v17 = vmax.f32 %v15409_v52, 0.0  ;;  %v15401_v43 = vadd.f32 %v25155_v8, %v15400_v41 }
0x148d   :  { %v18143_v44 = vpop.f32.mrf.mxu0 }
0x148e   :  { %15541 = vst.msk [vmem:[%s25353_s4 + $0x68] sm:$0xff] %vm15527_vm0, %v15508_v55  ;;  %v15513_v20 = vadd.f32 %v15481_v17, %v25097_v38  ;;  %v15479_v39 = vmax.f32 %v15401_v43, 0.0  ;;  %v15412_v58 = vadd.f32 %v18143_v44, %v25155_v8 }
0x148f   :  { %v15403_v14 = vpop.f32.mrf.mxu0 }
0x1490   :  { %15546 = vst.msk [vmem:[%s25353_s4 + $0x90] sm:$0xff] %vm15527_vm0, %v15513_v20  ;;  %v15511_v50 = vadd.f32 %v15479_v39, %v25089_v34  ;;  %v15482_v48 = vmax.f32 %v15412_v58, 0.0  ;;  %v15404_v54 = vadd.f32 %v25155_v8, %v15403_v14 }
0x1491   :  { %v18146_v45 = vpop.f32.mrf.mxu0 }
0x1492   :  { %15544 = vst.msk [vmem:[%s25353_s4 + $0x80] sm:$0xff] %vm15527_vm0, %v15511_v50  ;;  %v15514_v38 = vadd.f32 %v15482_v48, %v25100_v40  ;;  %v15480_v57 = vmax.f32 %v15404_v54, 0.0  ;;  %v15425_v56 = vadd.f32 %v18146_v45, %v25155_v8 }
0x1493   :  { %v15416_v3 = vpop.f32.mrf.mxu0 }
0x1494   :  { %15547 = vst.msk [vmem:[%s25353_s4 + $0x98] sm:$0xff] %vm15527_vm0, %v15514_v38  ;;  %v15512_v34 = vadd.f32 %v15480_v57, %v25092_v59  ;;  %v15485_v18 = vmax.f32 %v15425_v56, 0.0  ;;  %v15417_v10 = vadd.f32 %v25155_v8, %v15416_v3 }
0x1495   :  { %v18147_v1 = vpop.f32.mrf.mxu0 }
0x1496   :  { %15545 = vst.msk [vmem:[%s25353_s4 + $0x88] sm:$0xff] %vm15527_vm0, %v15512_v34  ;;  %v15517_v40 = vadd.f32 %v15485_v18, %v25113_v0  ;;  %v15483_v21 = vmax.f32 %v15417_v10, 0.0  ;;  %v15428_v31 = vadd.f32 %v18147_v1, %v25155_v8 }
0x1497   :  { %v15419_v13 = vpop.f32.mrf.mxu0 }
0x1498   :  { %15550 = vst.msk [vmem:[%s25353_s4 + $0xb0] sm:$0xff] %vm15527_vm0, %v15517_v40  ;;  %v15515_v59 = vadd.f32 %v15483_v21, %v25105_v53  ;;  %v15486_v23 = vmax.f32 %v15428_v31, 0.0  ;;  %v15420_v37 = vadd.f32 %v25155_v8, %v15419_v13 }
0x1499   :  { %v18150_v30 = vpop.f32.mrf.mxu0 }
0x149a   :  { %15548 = vst.msk [vmem:[%s25353_s4 + $0xa0] sm:$0xff] %vm15527_vm0, %v15515_v59  ;;  %v15518_v0 = vadd.f32 %v15486_v23, %v25116_v47  ;;  %v15484_v19 = vmax.f32 %v15420_v37, 0.0  ;;  %v15441_v28 = vadd.f32 %v18150_v30, %v25155_v8 }
0x149b   :  { %v15432_v60 = vpop.f32.mrf.mxu0 }
0x149c   :  { %15551 = vst.msk [vmem:[%s25353_s4 + $0xb8] sm:$0xff] %vm15527_vm0, %v15518_v0  ;;  %v15516_v53 = vadd.f32 %v15484_v19, %v25108_v51  ;;  %v15489_v6 = vmax.f32 %v15441_v28, 0.0  ;;  %v15433_v25 = vadd.f32 %v25155_v8, %v15432_v60 }
0x149d   :  { %v18151_v63 = vpop.f32.mrf.mxu0 }
0x149e   :  { %15549 = vst.msk [vmem:[%s25353_s4 + $0xa8] sm:$0xff] %vm15527_vm0, %v15516_v53  ;;  %v15521_v47 = vadd.f32 %v15489_v6, %v25129_v46  ;;  %v15487_v26 = vmax.f32 %v15433_v25, 0.0  ;;  %v15444_v12 = vadd.f32 %v18151_v63, %v25155_v8 }
0x149f   :  { %v15435_v15 = vpop.f32.mrf.mxu0 }
0x14a0   :  { %15554 = vst.msk [vmem:[%s25353_s4 + $0xd0] sm:$0xff] %vm15527_vm0, %v15521_v47  ;;  %v15519_v51 = vadd.f32 %v15487_v26, %v25121_v62  ;;  %v15490_v27 = vmax.f32 %v15444_v12, 0.0  ;;  %v15436_v32 = vadd.f32 %v25155_v8, %v15435_v15 }
0x14a1   :  { %v18154_v24 = vpop.f32.mrf.mxu0 }
0x14a2   :  { %15552 = vst.msk [vmem:[%s25353_s4 + $0xc0] sm:$0xff] %vm15527_vm0, %v15519_v51  ;;  %v15522_v46 = vadd.f32 %v15490_v27, %v25132_v42  ;;  %v15488_v61 = vmax.f32 %v15436_v32, 0.0  ;;  %v15457_v9 = vadd.f32 %v18154_v24, %v25155_v8 }
0x14a3   :  { %v15448_v22 = vpop.f32.mrf.mxu0 }
0x14a4   :  { %15555 = vst.msk [vmem:[%s25353_s4 + $0xd8] sm:$0xff] %vm15527_vm0, %v15522_v46  ;;  %v15520_v62 = vadd.f32 %v15488_v61, %v25124_v35  ;;  %v15493_v29 = vmax.f32 %v15457_v9, 0.0  ;;  %v15449_v16 = vadd.f32 %v25155_v8, %v15448_v22 }
0x14a5   :  { %v18155_v7 = vpop.f32.mrf.mxu0 }
0x14a6   :  { %15553 = vst.msk [vmem:[%s25353_s4 + $0xc8] sm:$0xff] %vm15527_vm0, %v15520_v62  ;;  %v15525_v42 = vadd.f32 %v15493_v29, %v25145_v2  ;;  %v15491_v11 = vmax.f32 %v15449_v16, 0.0  ;;  %v15460_v33 = vadd.f32 %v18155_v7, %v25155_v8 }
0x14a7   :  { %v15451_v4 = vpop.f32.mrf.mxu0 }
0x14a8   :  { %15558 = vst.msk [vmem:[%s25353_s4 + $0xf0] sm:$0xff] %vm15527_vm0, %v15525_v42  ;;  %v15523_v35 = vadd.f32 %v15491_v11, %v25137_v36  ;;  %v15494_v52 = vmax.f32 %v15460_v33, 0.0  ;;  %v15452_v41 = vadd.f32 %v25155_v8, %v15451_v4 }
0x14aa   :  { %15556 = vst.msk [vmem:[%s25353_s4 + $0xe0] sm:$0xff] %vm15527_vm0, %v15523_v35  ;;  %v15526_v2 = vadd.f32 %v15494_v52, %v25148_v5  ;;  %v15492_v55 = vmax.f32 %v15452_v41, 0.0 }
0x14ac   :  { %15559 = vst.msk [vmem:[%s25353_s4 + $0xf8] sm:$0xff] %vm15527_vm0, %v15526_v2  ;;  %v15524_v17 = vadd.f32 %v15492_v55, %v25140_v49 }
0x14ae   :  { %15557 = vst.msk [vmem:[%s25353_s4 + $0xe8] sm:$0xff] %vm15527_vm0, %v15524_v17 }

</bundles_post_ra>
